<compile_context>
chip_gen: v5e
topology: v5e:2x2
jax: 0.10.0
libtpu: 0.0.40
codegen_flags: <defaults>
</compile_context>

<pallas_src>
import functools

import jax
import jax.numpy as jnp
from jax.experimental import pallas as pl
from jax.experimental.pallas import tpu as pltpu


def _round_up(x, m):
    return (x + m - 1) // m * m


# ---------------------------------------------------------------------------
# Pallas kernel 1: fused 3-layer MLP  relu(relu(relu(z@W1+b1)@W2+b2)@W3+b3)
# ---------------------------------------------------------------------------
def _fused_mlp_kernel(z_ref, w1_ref, b1_ref, w2_ref, b2_ref, w3_ref, b3_ref,
                      o_ref):
    h = jnp.dot(z_ref[...], w1_ref[...], preferred_element_type=jnp.float32)
    h = jnp.maximum(h + b1_ref[...], 0.0)
    h = jnp.dot(h, w2_ref[...], preferred_element_type=jnp.float32)
    h = jnp.maximum(h + b2_ref[...], 0.0)
    h = jnp.dot(h, w3_ref[...], preferred_element_type=jnp.float32)
    o_ref[...] = jnp.maximum(h + b3_ref[...], 0.0)


def fused_mlp(z, W1, B1, W2, B2, W3, B3):
    """z: (B, latent) -> (B, W3.shape[1]) f32, all three layers in one kernel."""
    B, L = z.shape
    Mp = _round_up(max(B, 8), 8)
    Kp = W1.shape[0]                        # latent dim padded to 128 in prep
    z_p = jnp.zeros((Mp, Kp), jnp.float32).at[:B, :L].set(z.astype(jnp.float32))

    def full(a):
        return pl.BlockSpec(a.shape, lambda i: (0,) * a.ndim)

    out = pl.pallas_call(
        _fused_mlp_kernel,
        out_shape=jax.ShapeDtypeStruct((Mp, W3.shape[1]), jnp.float32),
        grid_spec=pltpu.PrefetchScalarGridSpec(
            num_scalar_prefetch=0,
            grid=(1,),
            in_specs=[full(z_p), full(W1), full(B1), full(W2), full(B2),
                      full(W3), full(B3)],
            out_specs=pl.BlockSpec((Mp, W3.shape[1]), lambda i: (0, 0)),
        ),
        compiler_params=pltpu.CompilerParams(
            dimension_semantics=("arbitrary",)),
    )(z_p, W1, B1, W2, B2, W3, B3)
    return out[:B]


# ---------------------------------------------------------------------------
# Pallas kernel 2: fused  act(A @ W + b)  (used by every ConvTranspose layer)
# ---------------------------------------------------------------------------
def _matmul_bias_act_kernel(a_ref, w_ref, b_ref, o_ref, *, activation):
    acc = jnp.dot(a_ref[...], w_ref[...], preferred_element_type=jnp.float32)
    acc = acc + b_ref[...]
    if activation == "relu":
        acc = jnp.maximum(acc, 0.0)
    elif activation == "sigmoid":
        # exp on the EUP + approx reciprocal on the EUP; clamp to exact [0,1].
        acc = jnp.clip(pl.reciprocal(1.0 + jnp.exp(-acc), approx=True),
                       0.0, 1.0)
    o_ref[...] = acc.astype(o_ref.dtype)


def _choose_tm(M, cap=1024):
    """Largest power-of-two-ish tile <= cap with >=2 grid points when M > 128."""
    if M <= 128:
        return M
    tm = M
    while tm == M or tm > cap:
        tm //= 2
    return tm


# ---------------------------------------------------------------------------
# ConvTranspose2d (stride=2, padding=1, kernel 4x4) via parity decomposition
# ---------------------------------------------------------------------------
def conv_transpose2d_parity(x_nhwc, w_bd, b_tiled, activation, out_dtype):
    """x_nhwc: (B,H,W,Cin) bf16.  w_bd: (16*Cin, 4*Cout) bf16 block-diagonal
    parity weight (see _prep_convt_weight).  b_tiled: (1, 4*Cout) f32.
    Returns (B, 2H, 2W, Cout) in out_dtype.

    y[b, 2m+py, 2n+px, co] =
        sum_{dy,dx,ci} x_pad[b, m+py+dy, n+px+dx, ci]
                       * w_t[ci, co, (3-py)-2*dy, (3-px)-2*dx]
    """
    B, H, W, Cin = x_nhwc.shape
    K = 16 * Cin
    N = w_bd.shape[1]
    Cout = N // 4

    # Parity im2col (XLA glue, pure data movement).  Column layout:
    #   col = ((py*2+px)*4 + (dy*2+dx)) * Cin + ci   -- matches w_bd rows.
    xp = jnp.pad(x_nhwc, ((0, 0), (1, 1), (1, 1), (0, 0)))
    cols = [xp[:, py + dy:py + dy + H, px + dx:px + dx + W, :]
            for py in range(2) for px in range(2)
            for dy in range(2) for dx in range(2)]
    A = jnp.concatenate(cols, axis=-1).reshape(B * H * W, K)

    M = B * H * W
    tm = _choose_tm(M)
    assert M % tm == 0

    y = pl.pallas_call(
        functools.partial(_matmul_bias_act_kernel, activation=activation),
        out_shape=jax.ShapeDtypeStruct((M, N), out_dtype),
        grid_spec=pltpu.PrefetchScalarGridSpec(
            num_scalar_prefetch=0,
            grid=(M // tm,),
            in_specs=[
                pl.BlockSpec((tm, K), lambda i: (i, 0)),
                pl.BlockSpec((K, N), lambda i: (0, 0)),
                pl.BlockSpec((1, N), lambda i: (0, 0)),
            ],
            out_specs=pl.BlockSpec((tm, N), lambda i: (i, 0)),
        ),
        compiler_params=pltpu.CompilerParams(
            dimension_semantics=("parallel",)),
    )(A, w_bd, b_tiled)

    # Interleave the 4 parity classes back into the output spatial grid:
    # y[(b*H+m)*W+n, (py*2+px)*Cout+co] -> out[b, 2m+py, 2n+px, co]
    y = y.reshape(B, H, W, 2, 2, Cout)
    y = jnp.transpose(y, (0, 1, 3, 2, 4, 5)).reshape(B, 2 * H, 2 * W, Cout)
    return y


# ---------------------------------------------------------------------------
# Parameter init (torch layouts, deterministic) + one-time kernel-layout prep
# ---------------------------------------------------------------------------
def init_params(key, img_size=(1, 64, 64), latent_dim=10):
    hid, k, hidden = 32, 4, 256
    n_chan = img_size[0]
    keys = jax.random.split(key, 14)

    def lin(ki, kb, fan_in, fan_out):
        bound = 1.0 / (fan_in ** 0.5)
        w = jax.random.uniform(ki, (fan_out, fan_in), jnp.float32, -bound, bound)
        b = jax.random.uniform(kb, (fan_out,), jnp.float32, -bound, bound)
        return w, b

    def convT(ki, kb, cin, cout):
        bound = 1.0 / ((cin * k * k) ** 0.5)
        w = jax.random.uniform(ki, (cin, cout, k, k), jnp.float32, -bound, bound)
        b = jax.random.uniform(kb, (cout,), jnp.float32, -bound, bound)
        return w, b

    p = {
        "lin1": lin(keys[0], keys[1], latent_dim, hidden),
        "lin2": lin(keys[2], keys[3], hidden, hidden),
        "lin3": lin(keys[4], keys[5], hidden, hid * k * k),
        "convT1": convT(keys[8], keys[9], hid, hid),
        "convT2": convT(keys[10], keys[11], hid, hid),
        "convT3": convT(keys[12], keys[13], hid, n_chan),
    }
    if img_size[1] == img_size[2] == 64:
        p["convT_64"] = convT(keys[6], keys[7], hid, hid)
    return p


def _prep_convt_weight(w_t):
    """(Cin, Cout, 4, 4) torch ConvT weight -> (16*Cin, 4*Cout) bf16 block-diag.

    Block p = py*2+px holds the 2x2 sub-kernel of output parity (py, px):
      row  p*4*Cin + (dy*2+dx)*Cin + ci , col p*Cout + co
        =  w_t[ci, co, (3-py)-2*dy, (3-px)-2*dx]
    """
    Cin, Cout, kH, kW = w_t.shape
    assert kH == 4 and kW == 4
    K1 = 4 * Cin
    Wm = jnp.zeros((4 * K1, 4 * Cout), jnp.float32)
    for py in range(2):
        for px in range(2):
            p = py * 2 + px
            taps = [w_t[:, :, 3 - py - 2 * dy, 3 - px - 2 * dx]
                    for dy in range(2) for dx in range(2)]
            blk = jnp.concatenate(taps, axis=0)            # (4*Cin, Cout)
            Wm = Wm.at[p * K1:(p + 1) * K1, p * Cout:(p + 1) * Cout].set(blk)
    return Wm.astype(jnp.bfloat16)


def prep_params(raw, latent_dim=10):
    """One-time repack of torch-layout params into kernel-ready layouts."""
    Kp = _round_up(latent_dim, 128)
    w1, b1 = raw["lin1"]
    w2, b2 = raw["lin2"]
    w3, b3 = raw["lin3"]
    W1 = jnp.zeros((Kp, w1.shape[0]), jnp.float32).at[:latent_dim, :].set(w1.T)
    prepped = {
        "mlp": (W1, b1.reshape(1, -1),
                jnp.asarray(w2.T, jnp.float32), b2.reshape(1, -1),
                jnp.asarray(w3.T, jnp.float32), b3.reshape(1, -1)),
    }

    def conv(name):
        w, b = raw[name]
        cout = w.shape[1]
        return (_prep_convt_weight(w),
                jnp.tile(b.reshape(1, cout), (1, 4)).astype(jnp.float32))

    for name in ("convT_64", "convT1", "convT2", "convT3"):
        if name in raw:
            prepped[name] = conv(name)
    return prepped


# ---------------------------------------------------------------------------
# Forward pass (mirrors DecoderBurgess.forward)
# ---------------------------------------------------------------------------
def decoder_burgess_forward(params, z, img_size=(1, 64, 64)):
    B = z.shape[0]
    hid, k = 32, 4

    x = fused_mlp(z, *params["mlp"])                        # (B, 512) f32
    x = x.reshape(B, hid, k, k)                             # NCHW (torch .view)
    x = jnp.transpose(x, (0, 2, 3, 1)).astype(jnp.bfloat16)  # -> NHWC bf16

    if img_size[1] == img_size[2] == 64:
        w, b = params["convT_64"]
        x = conv_transpose2d_parity(x, w, b, "relu", jnp.bfloat16)
    w, b = params["convT1"]
    x = conv_transpose2d_parity(x, w, b, "relu", jnp.bfloat16)
    w, b = params["convT2"]
    x = conv_transpose2d_parity(x, w, b, "relu", jnp.bfloat16)
    w, b = params["convT3"]
    x = conv_transpose2d_parity(x, w, b, "sigmoid", jnp.float32)

    return jnp.transpose(x, (0, 3, 1, 2))                   # NCHW (B, C, H, W)


if __name__ == "__main__":
    img_size = (1, 64, 64)
    latent_dim = 10
    batch = 2

    key = jax.random.PRNGKey(0)
    kp, kz = jax.random.split(key)
    raw_params = init_params(kp, img_size=img_size, latent_dim=latent_dim)
    params = prep_params(raw_params, latent_dim=latent_dim)
    z = jax.random.normal(kz, (batch, latent_dim), jnp.float32)

    fwd = jax.jit(functools.partial(decoder_burgess_forward, img_size=img_size))
    out = jax.block_until_ready(fwd(params, z))

    assert out.shape == (batch, img_size[0], img_size[1], img_size[2]), out.shape
    assert bool(jnp.all(jnp.isfinite(out)))
    assert bool(jnp.all((out >= 0.0) & (out <= 1.0)))  # sigmoid output range
    print("KERNEL_OK")
</pallas_src>

<mosaic_0001>
module attributes {stable_mosaic.version = 11 : i64} {
  func.func @_fused_mlp_kernel(%arg0: i32, %arg1: memref<8x128xf32, #tpu.memory_space<vmem>>, %arg2: memref<128x256xf32, #tpu.memory_space<vmem>>, %arg3: memref<1x256xf32, #tpu.memory_space<vmem>>, %arg4: memref<256x256xf32, #tpu.memory_space<vmem>>, %arg5: memref<1x256xf32, #tpu.memory_space<vmem>>, %arg6: memref<256x512xf32, #tpu.memory_space<vmem>>, %arg7: memref<1x512xf32, #tpu.memory_space<vmem>>, %arg8: memref<8x512xf32, #tpu.memory_space<vmem>>) attributes {dimension_semantics = [#tpu.dimension_semantics<arbitrary>], iteration_bounds = array<i64: 1>, scalar_prefetch = 0 : i64, scratch_operands = 0 : i64, tpu.core_type = #tpu.core_type<tc>, window_params = [{pipeline_mode = #tpu.pipeline_mode<synchronous>, transform_indices = @transform_0, window_bounds = array<i64: 8, 128>}, {pipeline_mode = #tpu.pipeline_mode<synchronous>, transform_indices = @transform_1, window_bounds = array<i64: 128, 256>}, {pipeline_mode = #tpu.pipeline_mode<synchronous>, transform_indices = @transform_2, window_bounds = array<i64: 1, 256>}, {pipeline_mode = #tpu.pipeline_mode<synchronous>, transform_indices = @transform_3, window_bounds = array<i64: 256, 256>}, {pipeline_mode = #tpu.pipeline_mode<synchronous>, transform_indices = @transform_4, window_bounds = array<i64: 1, 256>}, {pipeline_mode = #tpu.pipeline_mode<synchronous>, transform_indices = @transform_5, window_bounds = array<i64: 256, 512>}, {pipeline_mode = #tpu.pipeline_mode<synchronous>, transform_indices = @transform_6, window_bounds = array<i64: 1, 512>}, {pipeline_mode = #tpu.pipeline_mode<synchronous>, transform_indices = @transform_7, window_bounds = array<i64: 8, 512>}]} {
    %c0 = arith.constant 0 : index
    %c0_0 = arith.constant 0 : index
    %0 = vector.load %arg1[%c0, %c0_0] : memref<8x128xf32, #tpu.memory_space<vmem>>, vector<8x128xf32>
    %c0_1 = arith.constant 0 : index
    %c0_2 = arith.constant 0 : index
    %1 = vector.load %arg2[%c0_1, %c0_2] : memref<128x256xf32, #tpu.memory_space<vmem>>, vector<128x256xf32>
    %cst = arith.constant dense<0.000000e+00> : vector<8x256xf32>
    %2 = tpu.matmul %0, %1, %cst {dimension_numbers = #tpu.dot_dimension_numbers<[1], [0], [0], [1], [0, 0, 1, 1], [], []>} : vector<8x128xf32>, vector<128x256xf32>, vector<8x256xf32> -> vector<8x256xf32>
    %c0_3 = arith.constant 0 : index
    %c0_4 = arith.constant 0 : index
    %3 = vector.load %arg3[%c0_3, %c0_4] : memref<1x256xf32, #tpu.memory_space<vmem>>, vector<1x256xf32>
    %4 = vector.broadcast %3 : vector<1x256xf32> to vector<8x256xf32>
    %5 = arith.addf %2, %4 : vector<8x256xf32>
    %cst_5 = arith.constant 0.000000e+00 : f32
    %6 = vector.broadcast %cst_5 : f32 to vector<8x256xf32>
    %7 = arith.maximumf %5, %6 : vector<8x256xf32>
    %c0_6 = arith.constant 0 : index
    %c0_7 = arith.constant 0 : index
    %8 = vector.load %arg4[%c0_6, %c0_7] : memref<256x256xf32, #tpu.memory_space<vmem>>, vector<256x256xf32>
    %cst_8 = arith.constant dense<0.000000e+00> : vector<8x256xf32>
    %9 = tpu.matmul %7, %8, %cst_8 {dimension_numbers = #tpu.dot_dimension_numbers<[1], [0], [0], [1], [0, 0, 1, 1], [], []>} : vector<8x256xf32>, vector<256x256xf32>, vector<8x256xf32> -> vector<8x256xf32>
    %c0_9 = arith.constant 0 : index
    %c0_10 = arith.constant 0 : index
    %10 = vector.load %arg5[%c0_9, %c0_10] : memref<1x256xf32, #tpu.memory_space<vmem>>, vector<1x256xf32>
    %11 = vector.broadcast %10 : vector<1x256xf32> to vector<8x256xf32>
    %12 = arith.addf %9, %11 : vector<8x256xf32>
    %cst_11 = arith.constant 0.000000e+00 : f32
    %13 = vector.broadcast %cst_11 : f32 to vector<8x256xf32>
    %14 = arith.maximumf %12, %13 : vector<8x256xf32>
    %c0_12 = arith.constant 0 : index
    %c0_13 = arith.constant 0 : index
    %15 = vector.load %arg6[%c0_12, %c0_13] : memref<256x512xf32, #tpu.memory_space<vmem>>, vector<256x512xf32>
    %cst_14 = arith.constant dense<0.000000e+00> : vector<8x512xf32>
    %16 = tpu.matmul %14, %15, %cst_14 {dimension_numbers = #tpu.dot_dimension_numbers<[1], [0], [0], [1], [0, 0, 1, 1], [], []>} : vector<8x256xf32>, vector<256x512xf32>, vector<8x512xf32> -> vector<8x512xf32>
    %c0_15 = arith.constant 0 : index
    %c0_16 = arith.constant 0 : index
    %17 = vector.load %arg7[%c0_15, %c0_16] : memref<1x512xf32, #tpu.memory_space<vmem>>, vector<1x512xf32>
    %18 = vector.broadcast %17 : vector<1x512xf32> to vector<8x512xf32>
    %19 = arith.addf %16, %18 : vector<8x512xf32>
    %cst_17 = arith.constant 0.000000e+00 : f32
    %20 = vector.broadcast %cst_17 : f32 to vector<8x512xf32>
    %21 = arith.maximumf %19, %20 : vector<8x512xf32>
    %c0_18 = arith.constant 0 : index
    %c0_19 = arith.constant 0 : index
    %22 = vector.load %arg8[%c0_18, %c0_19] : memref<8x512xf32, #tpu.memory_space<vmem>>, vector<8x512xf32>
    tpu.vector_store %arg8[%c0_18, %c0_19], %21 {strides = array<i32>} : memref<8x512xf32, #tpu.memory_space<vmem>>, vector<8x512xf32>,
    return
  }
  func.func @transform_0(%arg0: i32) -> (i32, i32) {
    %c0_i32 = arith.constant 0 : i32
    %c0_i32_0 = arith.constant 0 : i32
    %c0_i32_1 = arith.constant 0 : i32
    return %c0_i32, %c0_i32_0 : i32, i32
  }
  func.func @transform_1(%arg0: i32) -> (i32, i32) {
    %c0_i32 = arith.constant 0 : i32
    %c0_i32_0 = arith.constant 0 : i32
    %c0_i32_1 = arith.constant 0 : i32
    return %c0_i32, %c0_i32_0 : i32, i32
  }
  func.func @transform_2(%arg0: i32) -> (i32, i32) {
    %c0_i32 = arith.constant 0 : i32
    %c0_i32_0 = arith.constant 0 : i32
    %c0_i32_1 = arith.constant 0 : i32
    return %c0_i32, %c0_i32_0 : i32, i32
  }
  func.func @transform_3(%arg0: i32) -> (i32, i32) {
    %c0_i32 = arith.constant 0 : i32
    %c0_i32_0 = arith.constant 0 : i32
    %c0_i32_1 = arith.constant 0 : i32
    return %c0_i32, %c0_i32_0 : i32, i32
  }
  func.func @transform_4(%arg0: i32) -> (i32, i32) {
    %c0_i32 = arith.constant 0 : i32
    %c0_i32_0 = arith.constant 0 : i32
    %c0_i32_1 = arith.constant 0 : i32
    return %c0_i32, %c0_i32_0 : i32, i32
  }
  func.func @transform_5(%arg0: i32) -> (i32, i32) {
    %c0_i32 = arith.constant 0 : i32
    %c0_i32_0 = arith.constant 0 : i32
    %c0_i32_1 = arith.constant 0 : i32
    return %c0_i32, %c0_i32_0 : i32, i32
  }
  func.func @transform_6(%arg0: i32) -> (i32, i32) {
    %c0_i32 = arith.constant 0 : i32
    %c0_i32_0 = arith.constant 0 : i32
    %c0_i32_1 = arith.constant 0 : i32
    return %c0_i32, %c0_i32_0 : i32, i32
  }
  func.func @transform_7(%arg0: i32) -> (i32, i32) {
    %c0_i32 = arith.constant 0 : i32
    %c0_i32_0 = arith.constant 0 : i32
    %c0_i32_1 = arith.constant 0 : i32
    return %c0_i32, %c0_i32_0 : i32, i32
  }
}

module attributes {stable_mosaic.version = 11 : i64} {
  func.func @_matmul_bias_act_kernel(%arg0: i32, %arg1: memref<32x512xbf16, #tpu.memory_space<vmem>>, %arg2: memref<512x128xbf16, #tpu.memory_space<vmem>>, %arg3: memref<1x128xf32, #tpu.memory_space<vmem>>, %arg4: memref<32x128xbf16, #tpu.memory_space<vmem>>) attributes {dimension_semantics = [#tpu.dimension_semantics<parallel>], iteration_bounds = array<i64: 1>, scalar_prefetch = 0 : i64, scratch_operands = 0 : i64, tpu.core_type = #tpu.core_type<tc>, window_params = [{transform_indices = @transform_0, window_bounds = array<i64: 32, 512>}, {pipeline_mode = #tpu.pipeline_mode<synchronous>, transform_indices = @transform_1, window_bounds = array<i64: 512, 128>}, {pipeline_mode = #tpu.pipeline_mode<synchronous>, transform_indices = @transform_2, window_bounds = array<i64: 1, 128>}, {transform_indices = @transform_3, window_bounds = array<i64: 32, 128>}]} {
    %c0 = arith.constant 0 : index
    %c0_0 = arith.constant 0 : index
    %0 = vector.load %arg1[%c0, %c0_0] : memref<32x512xbf16, #tpu.memory_space<vmem>>, vector<32x512xbf16>
    %c0_1 = arith.constant 0 : index
    %c0_2 = arith.constant 0 : index
    %1 = vector.load %arg2[%c0_1, %c0_2] : memref<512x128xbf16, #tpu.memory_space<vmem>>, vector<512x128xbf16>
    %cst = arith.constant dense<0.000000e+00> : vector<32x128xf32>
    %2 = tpu.matmul %0, %1, %cst {dimension_numbers = #tpu.dot_dimension_numbers<[1], [0], [0], [1], [0, 0, 1, 1], [], []>} : vector<32x512xbf16>, vector<512x128xbf16>, vector<32x128xf32> -> vector<32x128xf32>
    %c0_3 = arith.constant 0 : index
    %c0_4 = arith.constant 0 : index
    %3 = vector.load %arg3[%c0_3, %c0_4] : memref<1x128xf32, #tpu.memory_space<vmem>>, vector<1x128xf32>
    %4 = vector.broadcast %3 : vector<1x128xf32> to vector<32x128xf32>
    %5 = arith.addf %2, %4 : vector<32x128xf32>
    %cst_5 = arith.constant 0.000000e+00 : f32
    %6 = vector.broadcast %cst_5 : f32 to vector<32x128xf32>
    %7 = arith.maximumf %5, %6 : vector<32x128xf32>
    %8 = arith.truncf %7 : vector<32x128xf32> to vector<32x128xbf16>
    %c0_6 = arith.constant 0 : index
    %c0_7 = arith.constant 0 : index
    %9 = vector.load %arg4[%c0_6, %c0_7] : memref<32x128xbf16, #tpu.memory_space<vmem>>, vector<32x128xbf16>
    tpu.vector_store %arg4[%c0_6, %c0_7], %8 {strides = array<i32>} : memref<32x128xbf16, #tpu.memory_space<vmem>>, vector<32x128xbf16>,
    return
  }
  func.func @transform_0(%arg0: i32) -> (i32, i32) {
    %c0_i32 = arith.constant 0 : i32
    %c0_i32_0 = arith.constant 0 : i32
    return %arg0, %c0_i32 : i32, i32
  }
  func.func @transform_1(%arg0: i32) -> (i32, i32) {
    %c0_i32 = arith.constant 0 : i32
    %c0_i32_0 = arith.constant 0 : i32
    %c0_i32_1 = arith.constant 0 : i32
    return %c0_i32, %c0_i32_0 : i32, i32
  }
  func.func @transform_2(%arg0: i32) -> (i32, i32) {
    %c0_i32 = arith.constant 0 : i32
    %c0_i32_0 = arith.constant 0 : i32
    %c0_i32_1 = arith.constant 0 : i32
    return %c0_i32, %c0_i32_0 : i32, i32
  }
  func.func @transform_3(%arg0: i32) -> (i32, i32) {
    %c0_i32 = arith.constant 0 : i32
    %c0_i32_0 = arith.constant 0 : i32
    return %arg0, %c0_i32 : i32, i32
  }
}

module attributes {stable_mosaic.version = 11 : i64} {
  func.func @_matmul_bias_act_kernel(%arg0: i32, %arg1: memref<128x512xbf16, #tpu.memory_space<vmem>>, %arg2: memref<512x128xbf16, #tpu.memory_space<vmem>>, %arg3: memref<1x128xf32, #tpu.memory_space<vmem>>, %arg4: memref<128x128xbf16, #tpu.memory_space<vmem>>) attributes {dimension_semantics = [#tpu.dimension_semantics<parallel>], iteration_bounds = array<i64: 1>, scalar_prefetch = 0 : i64, scratch_operands = 0 : i64, tpu.core_type = #tpu.core_type<tc>, window_params = [{transform_indices = @transform_0, window_bounds = array<i64: 128, 512>}, {pipeline_mode = #tpu.pipeline_mode<synchronous>, transform_indices = @transform_1, window_bounds = array<i64: 512, 128>}, {pipeline_mode = #tpu.pipeline_mode<synchronous>, transform_indices = @transform_2, window_bounds = array<i64: 1, 128>}, {transform_indices = @transform_3, window_bounds = array<i64: 128, 128>}]} {
    %c0 = arith.constant 0 : index
    %c0_0 = arith.constant 0 : index
    %0 = vector.load %arg1[%c0, %c0_0] : memref<128x512xbf16, #tpu.memory_space<vmem>>, vector<128x512xbf16>
    %c0_1 = arith.constant 0 : index
    %c0_2 = arith.constant 0 : index
    %1 = vector.load %arg2[%c0_1, %c0_2] : memref<512x128xbf16, #tpu.memory_space<vmem>>, vector<512x128xbf16>
    %cst = arith.constant dense<0.000000e+00> : vector<128x128xf32>
    %2 = tpu.matmul %0, %1, %cst {dimension_numbers = #tpu.dot_dimension_numbers<[1], [0], [0], [1], [0, 0, 1, 1], [], []>} : vector<128x512xbf16>, vector<512x128xbf16>, vector<128x128xf32> -> vector<128x128xf32>
    %c0_3 = arith.constant 0 : index
    %c0_4 = arith.constant 0 : index
    %3 = vector.load %arg3[%c0_3, %c0_4] : memref<1x128xf32, #tpu.memory_space<vmem>>, vector<1x128xf32>
    %4 = vector.broadcast %3 : vector<1x128xf32> to vector<128x128xf32>
    %5 = arith.addf %2, %4 : vector<128x128xf32>
    %cst_5 = arith.constant 0.000000e+00 : f32
    %6 = vector.broadcast %cst_5 : f32 to vector<128x128xf32>
    %7 = arith.maximumf %5, %6 : vector<128x128xf32>
    %8 = arith.truncf %7 : vector<128x128xf32> to vector<128x128xbf16>
    %c0_6 = arith.constant 0 : index
    %c0_7 = arith.constant 0 : index
    %9 = vector.load %arg4[%c0_6, %c0_7] : memref<128x128xbf16, #tpu.memory_space<vmem>>, vector<128x128xbf16>
    tpu.vector_store %arg4[%c0_6, %c0_7], %8 {strides = array<i32>} : memref<128x128xbf16, #tpu.memory_space<vmem>>, vector<128x128xbf16>,
    return
  }
  func.func @transform_0(%arg0: i32) -> (i32, i32) {
    %c0_i32 = arith.constant 0 : i32
    %c0_i32_0 = arith.constant 0 : i32
    return %arg0, %c0_i32 : i32, i32
  }
  func.func @transform_1(%arg0: i32) -> (i32, i32) {
    %c0_i32 = arith.constant 0 : i32
    %c0_i32_0 = arith.constant 0 : i32
    %c0_i32_1 = arith.constant 0 : i32
    return %c0_i32, %c0_i32_0 : i32, i32
  }
  func.func @transform_2(%arg0: i32) -> (i32, i32) {
    %c0_i32 = arith.constant 0 : i32
    %c0_i32_0 = arith.constant 0 : i32
    %c0_i32_1 = arith.constant 0 : i32
    return %c0_i32, %c0_i32_0 : i32, i32
  }
  func.func @transform_3(%arg0: i32) -> (i32, i32) {
    %c0_i32 = arith.constant 0 : i32
    %c0_i32_0 = arith.constant 0 : i32
    return %arg0, %c0_i32 : i32, i32
  }
}

module attributes {stable_mosaic.version = 11 : i64} {
  func.func @_matmul_bias_act_kernel(%arg0: i32, %arg1: memref<256x512xbf16, #tpu.memory_space<vmem>>, %arg2: memref<512x128xbf16, #tpu.memory_space<vmem>>, %arg3: memref<1x128xf32, #tpu.memory_space<vmem>>, %arg4: memref<256x128xbf16, #tpu.memory_space<vmem>>) attributes {dimension_semantics = [#tpu.dimension_semantics<parallel>], iteration_bounds = array<i64: 2>, scalar_prefetch = 0 : i64, scratch_operands = 0 : i64, tpu.core_type = #tpu.core_type<tc>, window_params = [{transform_indices = @transform_0, window_bounds = array<i64: 256, 512>}, {pipeline_mode = #tpu.pipeline_mode<synchronous>, transform_indices = @transform_1, window_bounds = array<i64: 512, 128>}, {pipeline_mode = #tpu.pipeline_mode<synchronous>, transform_indices = @transform_2, window_bounds = array<i64: 1, 128>}, {transform_indices = @transform_3, window_bounds = array<i64: 256, 128>}]} {
    %c0 = arith.constant 0 : index
    %c0_0 = arith.constant 0 : index
    %0 = vector.load %arg1[%c0, %c0_0] : memref<256x512xbf16, #tpu.memory_space<vmem>>, vector<256x512xbf16>
    %c0_1 = arith.constant 0 : index
    %c0_2 = arith.constant 0 : index
    %1 = vector.load %arg2[%c0_1, %c0_2] : memref<512x128xbf16, #tpu.memory_space<vmem>>, vector<512x128xbf16>
    %cst = arith.constant dense<0.000000e+00> : vector<256x128xf32>
    %2 = tpu.matmul %0, %1, %cst {dimension_numbers = #tpu.dot_dimension_numbers<[1], [0], [0], [1], [0, 0, 1, 1], [], []>} : vector<256x512xbf16>, vector<512x128xbf16>, vector<256x128xf32> -> vector<256x128xf32>
    %c0_3 = arith.constant 0 : index
    %c0_4 = arith.constant 0 : index
    %3 = vector.load %arg3[%c0_3, %c0_4] : memref<1x128xf32, #tpu.memory_space<vmem>>, vector<1x128xf32>
    %4 = vector.broadcast %3 : vector<1x128xf32> to vector<256x128xf32>
    %5 = arith.addf %2, %4 : vector<256x128xf32>
    %cst_5 = arith.constant 0.000000e+00 : f32
    %6 = vector.broadcast %cst_5 : f32 to vector<256x128xf32>
    %7 = arith.maximumf %5, %6 : vector<256x128xf32>
    %8 = arith.truncf %7 : vector<256x128xf32> to vector<256x128xbf16>
    %c0_6 = arith.constant 0 : index
    %c0_7 = arith.constant 0 : index
    %9 = vector.load %arg4[%c0_6, %c0_7] : memref<256x128xbf16, #tpu.memory_space<vmem>>, vector<256x128xbf16>
    tpu.vector_store %arg4[%c0_6, %c0_7], %8 {strides = array<i32>} : memref<256x128xbf16, #tpu.memory_space<vmem>>, vector<256x128xbf16>,
    return
  }
  func.func @transform_0(%arg0: i32) -> (i32, i32) {
    %c0_i32 = arith.constant 0 : i32
    %c0_i32_0 = arith.constant 0 : i32
    return %arg0, %c0_i32 : i32, i32
  }
  func.func @transform_1(%arg0: i32) -> (i32, i32) {
    %c0_i32 = arith.constant 0 : i32
    %c0_i32_0 = arith.constant 0 : i32
    %c0_i32_1 = arith.constant 0 : i32
    return %c0_i32, %c0_i32_0 : i32, i32
  }
  func.func @transform_2(%arg0: i32) -> (i32, i32) {
    %c0_i32 = arith.constant 0 : i32
    %c0_i32_0 = arith.constant 0 : i32
    %c0_i32_1 = arith.constant 0 : i32
    return %c0_i32, %c0_i32_0 : i32, i32
  }
  func.func @transform_3(%arg0: i32) -> (i32, i32) {
    %c0_i32 = arith.constant 0 : i32
    %c0_i32_0 = arith.constant 0 : i32
    return %arg0, %c0_i32 : i32, i32
  }
}

module attributes {stable_mosaic.version = 11 : i64} {
  func.func @_matmul_bias_act_kernel(%arg0: i32, %arg1: memref<1024x512xbf16, #tpu.memory_space<vmem>>, %arg2: memref<512x4xbf16, #tpu.memory_space<vmem>>, %arg3: memref<1x4xf32, #tpu.memory_space<vmem>>, %arg4: memref<1024x4xf32, #tpu.memory_space<vmem>>) attributes {dimension_semantics = [#tpu.dimension_semantics<parallel>], iteration_bounds = array<i64: 2>, scalar_prefetch = 0 : i64, scratch_operands = 0 : i64, tpu.core_type = #tpu.core_type<tc>, window_params = [{transform_indices = @transform_0, window_bounds = array<i64: 1024, 512>}, {pipeline_mode = #tpu.pipeline_mode<synchronous>, transform_indices = @transform_1, window_bounds = array<i64: 512, 4>}, {pipeline_mode = #tpu.pipeline_mode<synchronous>, transform_indices = @transform_2, window_bounds = array<i64: 1, 4>}, {transform_indices = @transform_3, window_bounds = array<i64: 1024, 4>}]} {
    %c0 = arith.constant 0 : index
    %c0_0 = arith.constant 0 : index
    %0 = vector.load %arg1[%c0, %c0_0] : memref<1024x512xbf16, #tpu.memory_space<vmem>>, vector<1024x512xbf16>
    %c0_1 = arith.constant 0 : index
    %c0_2 = arith.constant 0 : index
    %1 = vector.load %arg2[%c0_1, %c0_2] : memref<512x4xbf16, #tpu.memory_space<vmem>>, vector<512x4xbf16>
    %cst = arith.constant dense<0.000000e+00> : vector<1024x4xf32>
    %2 = tpu.matmul %0, %1, %cst {dimension_numbers = #tpu.dot_dimension_numbers<[1], [0], [0], [1], [0, 0, 1, 1], [], []>} : vector<1024x512xbf16>, vector<512x4xbf16>, vector<1024x4xf32> -> vector<1024x4xf32>
    %c0_3 = arith.constant 0 : index
    %c0_4 = arith.constant 0 : index
    %3 = vector.load %arg3[%c0_3, %c0_4] : memref<1x4xf32, #tpu.memory_space<vmem>>, vector<1x4xf32>
    %4 = vector.broadcast %3 : vector<1x4xf32> to vector<1024x4xf32>
    %5 = arith.addf %2, %4 : vector<1024x4xf32>
    %cst_5 = arith.constant 0.000000e+00 : f32
    %6 = vector.broadcast %cst_5 : f32 to vector<1024x4xf32>
    %7 = arith.subf %6, %5 : vector<1024x4xf32>
    %8 = math.exp %7 : vector<1024x4xf32>
    %cst_6 = arith.constant 1.000000e+00 : f32
    %9 = vector.broadcast %cst_6 : f32 to vector<1024x4xf32>
    %10 = arith.addf %9, %8 : vector<1024x4xf32>
    %11 = tpu.reciprocal %10 {approx = true} : vector<1024x4xf32> -> vector<1024x4xf32>
    %cst_7 = arith.constant 0.000000e+00 : f32
    %cst_8 = arith.constant 1.000000e+00 : f32
    %12 = vector.broadcast %cst_7 : f32 to vector<1024x4xf32>
    %13 = arith.maximumf %12, %11 : vector<1024x4xf32>
    %14 = vector.broadcast %cst_8 : f32 to vector<1024x4xf32>
    %15 = arith.minimumf %14, %13 : vector<1024x4xf32>
    %c0_9 = arith.constant 0 : index
    %c0_10 = arith.constant 0 : index
    %16 = vector.load %arg4[%c0_9, %c0_10] : memref<1024x4xf32, #tpu.memory_space<vmem>>, vector<1024x4xf32>
    tpu.vector_store %arg4[%c0_9, %c0_10], %15 {strides = array<i32>} : memref<1024x4xf32, #tpu.memory_space<vmem>>, vector<1024x4xf32>,
    return
  }
  func.func @transform_0(%arg0: i32) -> (i32, i32) {
    %c0_i32 = arith.constant 0 : i32
    %c0_i32_0 = arith.constant 0 : i32
    return %arg0, %c0_i32 : i32, i32
  }
  func.func @transform_1(%arg0: i32) -> (i32, i32) {
    %c0_i32 = arith.constant 0 : i32
    %c0_i32_0 = arith.constant 0 : i32
    %c0_i32_1 = arith.constant 0 : i32
    return %c0_i32, %c0_i32_0 : i32, i32
  }
  func.func @transform_2(%arg0: i32) -> (i32, i32) {
    %c0_i32 = arith.constant 0 : i32
    %c0_i32_0 = arith.constant 0 : i32
    %c0_i32_1 = arith.constant 0 : i32
    return %c0_i32, %c0_i32_0 : i32, i32
  }
  func.func @transform_3(%arg0: i32) -> (i32, i32) {
    %c0_i32 = arith.constant 0 : i32
    %c0_i32_0 = arith.constant 0 : i32
    return %arg0, %c0_i32 : i32, i32
  }
}

</mosaic_0001>

<bundles_post_ra>
// kernel: decoder_burgess_forward.5
= control target key start
LH: loop header
LB: loop body
LE: loop exit
PB: predicated region body
PF: predicated region fallthrough
CT: control target
= control target key end

     0   :  { %12 = vsyncpa [#allocation3], 0  ;;  %s906_s0 = inlined_call_operand.vmem [shape: f32[8,128], index: 0, kind: input, shape index: {}]   ;;  %s907_s1 = inlined_call_operand.hbm [shape: f32[128,256], index: 1, kind: input, shape index: {}]   ;;  %s908_s2 = inlined_call_operand.hbm [shape: f32[1,256], index: 2, kind: input, shape index: {}]   ;;  %s909_s3 = inlined_call_operand.hbm [shape: f32[256,256], index: 3, kind: input, shape index: {}]   ;;  %s910_s4 = inlined_call_operand.hbm [shape: f32[1,256], index: 4, kind: input, shape index: {}]   ;;  %s911_s5 = inlined_call_operand.hbm [shape: f32[256,512], index: 5, kind: input, shape index: {}]   ;;  %s912_s6 = inlined_call_operand.hbm [shape: f32[1,512], index: 6, kind: input, shape index: {}]   ;;  %s913_s7 = inlined_call_operand.vmem [shape: f32[8,512], index: 7, kind: output, shape index: {}]  }
   0x1   :  { %13 = vsyncpa [#allocation5], 0 }
   0x2   :  { %14 = vsyncpa [#allocation8], 0  ;;  %s36_s26 = sshll.u32 %s908_s2, 4  ;;  %s37_s26 = int_to_ptr.hbm [resolvable:$true] %s36_s26 }
   0x3   :  { %15 = vsyncpa [#allocation11], 0  ;;  %s823_s27 = smov [#allocation4]   ;;  %s60_s8 = sshll.u32 %s910_s4, 4  ;;  %s61_s8 = int_to_ptr.hbm [resolvable:$true] %s60_s8 }
   0x4   :  { %s38_s28 = sshll.u32 %s823_s27, 4  ;;  %s824_s9 = smov [#allocation7]   ;;  %s39_s28 = int_to_ptr.vmem [resolvable:$true] %s38_s28 }
   0x5   :  { %41 = dma.hbm_to_vmem [thread:$0]  %s37_s26, 32, %s39_s28, [#allocation5]  }
   0x6   :  { %s62_s10 = sshll.u32 %s824_s9, 4  ;;  %s22_s13 = sshll.u32 %s907_s1, 4  ;;  %s63_s10 = int_to_ptr.vmem [resolvable:$true] %s62_s10  ;;  %s23_s13 = int_to_ptr.hbm [resolvable:$true] %s22_s13 }
   0x7   :  { %65 = dma.hbm_to_vmem [thread:$0]  %s61_s8, 32, %s63_s10, [#allocation8]  }
   0x8   :  { %s825_s2 = smov [#allocation2]   ;;  %s46_s17 = sshll.u32 %s909_s3, 4  ;;  %s47_s17 = int_to_ptr.hbm [resolvable:$true] %s46_s17 }
   0x9   :  { %s24_s14 = sshll.u32 %s825_s2, 4  ;;  %s826_s18 = smov 256   ;;  %s25_s14 = int_to_ptr.vmem [resolvable:$true] %s24_s14 }
   0xa   :  { %s827_s4 = smov 16   ;;  %s828_s19 = smov [#allocation6]  }
   0xb   :  { %30 = dma.hbm_to_vmem [thread:$0]  %s23_s13, 4096, %s25_s14, [#allocation3], %s826_s18, %s826_s18, %s827_s4  }
   0xc   :  { %s48_s20 = sshll.u32 %s828_s19, 4  ;;  %s70_s1 = sshll.u32 %s911_s5, 4  ;;  %s49_s20 = int_to_ptr.vmem [resolvable:$true] %s48_s20  ;;  %s71_s1 = int_to_ptr.hbm [resolvable:$true] %s70_s1 }
   0xd   :  { %54 = dma.hbm_to_vmem [thread:$0]  %s47_s17, 8192, %s49_s20, [#allocation5], %s826_s18, %s826_s18, %s827_s4  }
   0xe   :  { %s829_s23 = smov [#allocation9]   ;;  %s84_s3 = sshll.u32 %s912_s6, 4  ;;  %s85_s3 = int_to_ptr.hbm [resolvable:$true] %s84_s3 }
   0xf   :  { %s72_s24 = sshll.u32 %s829_s23, 4  ;;  %s830_s27 = smov 512   ;;  %s73_s24 = int_to_ptr.vmem [resolvable:$true] %s72_s24 }
  0x10   :  { %s831_s28 = smov 32   ;;  %s832_s29 = smov [#allocation10]  }
  0x11   :  { %78 = dma.hbm_to_vmem [thread:$0]  %s71_s1, 16384, %s73_s24, [#allocation8], %s830_s27, %s830_s27, %s831_s28  }
  0x12   :  { %s86_s30 = sshll.u32 %s832_s29, 4  ;;  %s87_s30 = int_to_ptr.vmem [resolvable:$true] %s86_s30 }
  0x13   :  { %89 = dma.hbm_to_vmem [thread:$0]  %s85_s3, 64, %s87_s30, [#allocation11]  }
  0x14   :  { %815 = dma.done.wait [#allocation3], 4096  }
  0x15   :  { %816 = vsyncadd [#allocation3], 4294963200 }
  0x16   :  { %817 = dma.done.wait [#allocation5], 8224  }
  0x17   :  { %818 = vsyncadd [#allocation5], 4294959072 }
  0x18   :  { %819 = dma.done.wait [#allocation8], 16416  }
  0x19   :  { %820 = vsyncadd [#allocation8], 4294950880 }
  0x1a   :  { %821 = dma.done.wait [#allocation11], 64  }
  0x1b   :  { %822 = vsyncadd [#allocation11], 4294967232  ;;  %v145_v0 = vld [vmem:[#allocation2 + $0xf0] sm:$0xff]  ;;  %v143_v1 = vld [vmem:[#allocation2 + $0xe0] sm:$0xff] }
  0x1c   :  { %v146_v2 = vld [vmem:[#allocation2 + $0xf8] sm:$0xff]  ;;  %153 = vmatpush.msra.mxu0 %v145_v0  ;;  %v144_v3 = vld [vmem:[#allocation2 + $0xe8] sm:$0xff]  ;;  %v141_v4 = vld [vmem:[#allocation2 + $0xd0] sm:$0xff] }
  0x1d   :  { %173 = vmatpush.msra.mxu1 %v146_v2  ;;  %v142_v5 = vld [vmem:[#allocation2 + $0xd8] sm:$0xff]  ;;  %v139_v6 = vld [vmem:[#allocation2 + $0xc0] sm:$0xff]  ;;  %v140_v7 = vld [vmem:[#allocation2 + $0xc8] sm:$0xff] }
  0x1e   :  { %154 = vmatpush.msra.mxu0 %v143_v1  ;;  %v137_v8 = vld [vmem:[#allocation2 + $0xb0] sm:$0xff]  ;;  %v138_v9 = vld [vmem:[#allocation2 + $0xb8] sm:$0xff]  ;;  %v135_v10 = vld [vmem:[#allocation2 + $0xa0] sm:$0xff] }
  0x1f   :  { %174 = vmatpush.msra.mxu1 %v144_v3  ;;  %v136_v11 = vld [vmem:[#allocation2 + $0xa8] sm:$0xff]  ;;  %v133_v12 = vld [vmem:[#allocation2 + $0x90] sm:$0xff]  ;;  %v134_v13 = vld [vmem:[#allocation2 + $0x98] sm:$0xff] }
  0x20   :  { %155 = vmatpush.msra.mxu0 %v141_v4  ;;  %v225_v14 = vld [vmem:[#allocation6 + $0xf0] sm:$0xff]  ;;  %v223_v15 = vld [vmem:[#allocation6 + $0xe0] sm:$0xff]  ;;  %v226_v52 = vld [vmem:[#allocation6 + $0xf8] sm:$0xff] }
  0x21   :  { %175 = vmatpush.msra.mxu1 %v142_v5  ;;  %v131_v16 = vld [vmem:[#allocation2 + $0x80] sm:$0xff]  ;;  %v132_v17 = vld [vmem:[#allocation2 + $0x88] sm:$0xff]  ;;  %265 = vmatpush.msra.mxu2 %v225_v14  ;;  %v257_v18 = vld [vmem:[#allocation6 + $0x1f0] sm:$0xff] }
  0x22   :  { %156 = vmatpush.msra.mxu0 %v139_v6  ;;  %v221_v19 = vld [vmem:[#allocation6 + $0xd0] sm:$0xff]  ;;  %v255_v20 = vld [vmem:[#allocation6 + $0x1e0] sm:$0xff]  ;;  %285 = vmatpush.msra.mxu3 %v257_v18  ;;  %v258_v53 = vld [vmem:[#allocation6 + $0x1f8] sm:$0xff] }
  0x23   :  { %176 = vmatpush.msra.mxu1 %v140_v7  ;;  %v129_v21 = vld [vmem:[#allocation2 + $0x70] sm:$0xff]  ;;  %v130_v22 = vld [vmem:[#allocation2 + $0x78] sm:$0xff]  ;;  %266 = vmatpush.msra.mxu2 %v223_v15  ;;  %v219_v23 = vld [vmem:[#allocation6 + $0xc0] sm:$0xff] }
  0x24   :  { %157 = vmatpush.msra.mxu0 %v137_v8  ;;  %v253_v24 = vld [vmem:[#allocation6 + $0x1d0] sm:$0xff]  ;;  %v127_v25 = vld [vmem:[#allocation2 + $0x60] sm:$0xff]  ;;  %v128_v26 = vld [vmem:[#allocation2 + $0x68] sm:$0xff]  ;;  %286 = vmatpush.msra.mxu3 %v255_v20 }
  0x25   :  { %177 = vmatpush.msra.mxu1 %v138_v9  ;;  %267 = vmatpush.msra.mxu2 %v221_v19  ;;  %v217_v27 = vld [vmem:[#allocation6 + $0xb0] sm:$0xff]  ;;  %v251_v28 = vld [vmem:[#allocation6 + $0x1c0] sm:$0xff]  ;;  %v224_v56 = vld [vmem:[#allocation6 + $0xe8] sm:$0xff] }
  0x26   :  { %158 = vmatpush.msra.mxu0 %v135_v10  ;;  %v125_v29 = vld [vmem:[#allocation2 + $0x50] sm:$0xff]  ;;  %v126_v30 = vld [vmem:[#allocation2 + $0x58] sm:$0xff]  ;;  %287 = vmatpush.msra.mxu3 %v253_v24  ;;  %v215_v31 = vld [vmem:[#allocation6 + $0xa0] sm:$0xff] }
  0x27   :  { %178 = vmatpush.msra.mxu1 %v136_v11  ;;  %268 = vmatpush.msra.mxu2 %v219_v23  ;;  %v249_v32 = vld [vmem:[#allocation6 + $0x1b0] sm:$0xff]  ;;  %v123_v33 = vld [vmem:[#allocation2 + $0x40] sm:$0xff]  ;;  %v124_v34 = vld [vmem:[#allocation2 + $0x48] sm:$0xff] }
  0x28   :  { %159 = vmatpush.msra.mxu0 %v133_v12  ;;  %288 = vmatpush.msra.mxu3 %v251_v28  ;;  %v213_v35 = vld [vmem:[#allocation6 + $0x90] sm:$0xff]  ;;  %v247_v36 = vld [vmem:[#allocation6 + $0x1a0] sm:$0xff]  ;;  %v256_v57 = vld [vmem:[#allocation6 + $0x1e8] sm:$0xff] }
  0x29   :  { %179 = vmatpush.msra.mxu1 %v134_v13  ;;  %269 = vmatpush.msra.mxu2 %v217_v27  ;;  %v121_v37 = vld [vmem:[#allocation2 + $0x30] sm:$0xff]  ;;  %v122_v38 = vld [vmem:[#allocation2 + $0x38] sm:$0xff]  ;;  %v211_v39 = vld [vmem:[#allocation6 + $0x80] sm:$0xff] }
  0x2a   :  { %160 = vmatpush.msra.mxu0 %v131_v16  ;;  %289 = vmatpush.msra.mxu3 %v249_v32  ;;  %v245_v40 = vld [vmem:[#allocation6 + $0x190] sm:$0xff]  ;;  %v119_v41 = vld [vmem:[#allocation2 + $0x20] sm:$0xff]  ;;  %v120_v42 = vld [vmem:[#allocation2 + $0x28] sm:$0xff] }
  0x2b   :  { %180 = vmatpush.msra.mxu1 %v132_v17  ;;  %270 = vmatpush.msra.mxu2 %v215_v31  ;;  %v209_v43 = vld [vmem:[#allocation6 + $0x70] sm:$0xff]  ;;  %v243_v44 = vld [vmem:[#allocation6 + $0x180] sm:$0xff]  ;;  %v222_v60 = vld [vmem:[#allocation6 + $0xd8] sm:$0xff] }
  0x2c   :  { %161 = vmatpush.msra.mxu0 %v129_v21  ;;  %290 = vmatpush.msra.mxu3 %v247_v36  ;;  %v117_v45 = vld [vmem:[#allocation2 + $0x10] sm:$0xff]  ;;  %v118_v46 = vld [vmem:[#allocation2 + $0x18] sm:$0xff]  ;;  %v207_v47 = vld [vmem:[#allocation6 + $0x60] sm:$0xff] }
  0x2d   :  { %181 = vmatpush.msra.mxu1 %v130_v22  ;;  %271 = vmatpush.msra.mxu2 %v213_v35  ;;  %v241_v48 = vld [vmem:[#allocation6 + $0x170] sm:$0xff]  ;;  %v115_v49 = vld [vmem:[#allocation2] sm:$0xff]  ;;  %v116_v50 = vld [vmem:[#allocation2 + $0x8] sm:$0xff] }
  0x2e   :  { %162 = vmatpush.msra.mxu0 %v127_v25  ;;  %291 = vmatpush.msra.mxu3 %v245_v40  ;;  %v114_v51 = vld [vmem:[%s906_s0] sm:$0xff]  ;;  %v205_v54 = vld [vmem:[#allocation6 + $0x50] sm:$0xff]  ;;  %v220_v0 = vld [vmem:[#allocation6 + $0xc8] sm:$0xff] }
  0x2f   :  { %182 = vmatpush.msra.mxu1 %v128_v26  ;;  %272 = vmatpush.msra.mxu2 %v211_v39  ;;  %v239_v55 = vld [vmem:[#allocation6 + $0x160] sm:$0xff]  ;;  %v237_v59 = vld [vmem:[#allocation6 + $0x150] sm:$0xff]  ;;  %v254_v61 = vld [vmem:[#allocation6 + $0x1d8] sm:$0xff] }
  0x30   :  { %163 = vmatpush.msra.mxu0 %v125_v29  ;;  %292 = vmatpush.msra.mxu3 %v243_v44  ;;  %v203_v58 = vld [vmem:[#allocation6 + $0x40] sm:$0xff]  ;;  %v201_v62 = vld [vmem:[#allocation6 + $0x30] sm:$0xff]  ;;  %v252_v1 = vld [vmem:[#allocation6 + $0x1c8] sm:$0xff] }
  0x31   :  { %183 = vmatpush.msra.mxu1 %v126_v30  ;;  %273 = vmatpush.msra.mxu2 %v209_v43  ;;  %v235_v63 = vld [vmem:[#allocation6 + $0x140] sm:$0xff]  ;;  %v218_v2 = vld [vmem:[#allocation6 + $0xb8] sm:$0xff]  ;;  %v216_v4 = vld [vmem:[#allocation6 + $0xa8] sm:$0xff] }
  0x32   :  { %164 = vmatpush.msra.mxu0 %v123_v33  ;;  %293 = vmatpush.msra.mxu3 %v241_v48  ;;  %v250_v3 = vld [vmem:[#allocation6 + $0x1b8] sm:$0xff]  ;;  %v248_v5 = vld [vmem:[#allocation6 + $0x1a8] sm:$0xff]  ;;  %v199_v19 = vld [vmem:[#allocation6 + $0x20] sm:$0xff] }
  0x33   :  { %184 = vmatpush.msra.mxu1 %v124_v34  ;;  %274 = vmatpush.msra.mxu2 %v207_v47  ;;  %v214_v6 = vld [vmem:[#allocation6 + $0x98] sm:$0xff]  ;;  %v212_v8 = vld [vmem:[#allocation6 + $0x88] sm:$0xff]  ;;  %v233_v20 = vld [vmem:[#allocation6 + $0x130] sm:$0xff] }
  0x34   :  { %165 = vmatpush.msra.mxu0 %v121_v37  ;;  %294 = vmatpush.msra.mxu3 %v239_v55  ;;  %v246_v7 = vld [vmem:[#allocation6 + $0x198] sm:$0xff]  ;;  %v244_v9 = vld [vmem:[#allocation6 + $0x188] sm:$0xff]  ;;  %v197_v23 = vld [vmem:[#allocation6 + $0x10] sm:$0xff] }
  0x35   :  { %185 = vmatpush.msra.mxu1 %v122_v38  ;;  %275 = vmatpush.msra.mxu2 %v205_v54  ;;  %v210_v10 = vld [vmem:[#allocation6 + $0x78] sm:$0xff]  ;;  %v208_v12 = vld [vmem:[#allocation6 + $0x68] sm:$0xff]  ;;  %v231_v24 = vld [vmem:[#allocation6 + $0x120] sm:$0xff] }
  0x36   :  { %166 = vmatpush.msra.mxu0 %v119_v41  ;;  %295 = vmatpush.msra.mxu3 %v237_v59  ;;  %v242_v11 = vld [vmem:[#allocation6 + $0x178] sm:$0xff]  ;;  %v240_v13 = vld [vmem:[#allocation6 + $0x168] sm:$0xff]  ;;  %v195_v27 = vld [vmem:[#allocation6] sm:$0xff] }
  0x37   :  { %186 = vmatpush.msra.mxu1 %v120_v42  ;;  %276 = vmatpush.msra.mxu2 %v203_v58  ;;  %v206_v14 = vld [vmem:[#allocation6 + $0x58] sm:$0xff]  ;;  %v204_v16 = vld [vmem:[#allocation6 + $0x48] sm:$0xff]  ;;  %v229_v28 = vld [vmem:[#allocation6 + $0x110] sm:$0xff] }
  0x38   :  { %167 = vmatpush.msra.mxu0 %v117_v45  ;;  %296 = vmatpush.msra.mxu3 %v235_v63  ;;  %v238_v15 = vld [vmem:[#allocation6 + $0x158] sm:$0xff]  ;;  %v236_v17 = vld [vmem:[#allocation6 + $0x148] sm:$0xff]  ;;  %v227_v31 = vld [vmem:[#allocation6 + $0x100] sm:$0xff] }
  0x39   :  { %187 = vmatpush.msra.mxu1 %v118_v46  ;;  %277 = vmatpush.msra.mxu2 %v201_v62  ;;  %v202_v18 = vld [vmem:[#allocation6 + $0x38] sm:$0xff]  ;;  %v200_v21 = vld [vmem:[#allocation6 + $0x28] sm:$0xff] }
  0x3a   :  { %168 = vmatpush.msra.mxu0 %v115_v49  ;;  %297 = vmatpush.msra.mxu3 %v233_v20  ;;  %v234_v22 = vld [vmem:[#allocation6 + $0x138] sm:$0xff]  ;;  %v232_v26 = vld [vmem:[#allocation6 + $0x128] sm:$0xff] }
  0x3b   :  { %188 = vmatpush.msra.mxu1 %v116_v50  ;;  %169 = vmatmul.f32.vlgmr.msra.gmra.mxu0 %v114_v51  ;;  %v198_v25 = vld [vmem:[#allocation6 + $0x18] sm:$0xff]  ;;  %v196_v29 = vld [vmem:[#allocation6 + $0x8] sm:$0xff] }
  0x3c   :  { %189 = vmatmul.f32.vlgmr.msra.gmra.mxu1 %v114_v51  ;;  %305 = vmatpush.msrb.mxu0 %v226_v52  ;;  %v230_v30 = vld [vmem:[#allocation6 + $0x118] sm:$0xff]  ;;  %v228_v32 = vld [vmem:[#allocation6 + $0x108] sm:$0xff] }
  0x3d   :  { %325 = vmatpush.msrb.mxu1 %v258_v53  ;;  %278 = vmatpush.msra.mxu2 %v199_v19  ;;  %v471_v33 = vld [vmem:[#allocation9 + $0x3e0] sm:$0xff]  ;;  %v472_v34 = vld [vmem:[#allocation9 + $0x3e8] sm:$0xff] }
  0x3e   :  { %306 = vmatpush.msrb.mxu0 %v224_v56  ;;  %298 = vmatpush.msra.mxu3 %v231_v24  ;;  %v467_v35 = vld [vmem:[#allocation9 + $0x3c0] sm:$0xff]  ;;  %v468_v36 = vld [vmem:[#allocation9 + $0x3c8] sm:$0xff] }
  0x3f   :  { %326 = vmatpush.msrb.mxu1 %v256_v57  ;;  %279 = vmatpush.msra.mxu2 %v197_v23  ;;  %v463_v37 = vld [vmem:[#allocation9 + $0x3a0] sm:$0xff]  ;;  %v408_v39 = vld [vmem:[#allocation9 + $0x1e8] sm:$0xff] }
  0x40   :  { %307 = vmatpush.msrb.mxu0 %v222_v60  ;;  %299 = vmatpush.msra.mxu3 %v229_v28  ;;  %v407_v38 = vld [vmem:[#allocation9 + $0x1e0] sm:$0xff]  ;;  %v464_v40 = vld [vmem:[#allocation9 + $0x3a8] sm:$0xff] }
  0x41   :  { %327 = vmatpush.msrb.mxu1 %v254_v61  ;;  %280 = vmatpush.msra.mxu2 %v195_v27  ;;  %v403_v41 = vld [vmem:[#allocation9 + $0x1c0] sm:$0xff]  ;;  %v404_v43 = vld [vmem:[#allocation9 + $0x1c8] sm:$0xff] }
  0x42   :  { %308 = vmatpush.msrb.mxu0 %v220_v0  ;;  %300 = vmatpush.msra.mxu3 %v227_v31  ;;  %v459_v42 = vld [vmem:[#allocation9 + $0x380] sm:$0xff]  ;;  %v460_v45 = vld [vmem:[#allocation9 + $0x388] sm:$0xff] }
  0x43   :  { %328 = vmatpush.msrb.mxu1 %v252_v1  ;;  %485 = vmatpush.msrb.mxu2 %v407_v38  ;;  %v399_v44 = vld [vmem:[#allocation9 + $0x1a0] sm:$0xff]  ;;  %v400_v46 = vld [vmem:[#allocation9 + $0x1a8] sm:$0xff]  ;;  %v473_v38 = vld [vmem:[#allocation9 + $0x3f0] sm:$0xff] }
  0x44   :  { %309 = vmatpush.msrb.mxu0 %v218_v2  ;;  %505 = vmatpush.msrb.mxu3 %v471_v33  ;;  %v455_v47 = vld [vmem:[#allocation9 + $0x360] sm:$0xff]  ;;  %v456_v49 = vld [vmem:[#allocation9 + $0x368] sm:$0xff] }
  0x45   :  { %329 = vmatpush.msrb.mxu1 %v250_v3  ;;  %486 = vmatpush.msrb.mxu2 %v403_v41  ;;  %v395_v48 = vld [vmem:[#allocation9 + $0x180] sm:$0xff]  ;;  %v396_v50 = vld [vmem:[#allocation9 + $0x188] sm:$0xff] }
  0x46   :  { %310 = vmatpush.msrb.mxu0 %v216_v4  ;;  %506 = vmatpush.msrb.mxu3 %v467_v35  ;;  %v451_v51 = vld [vmem:[#allocation9 + $0x340] sm:$0xff]  ;;  %v452_v53 = vld [vmem:[#allocation9 + $0x348] sm:$0xff] }
  0x47   :  { %330 = vmatpush.msrb.mxu1 %v248_v5  ;;  %487 = vmatpush.msrb.mxu2 %v399_v44  ;;  %v391_v52 = vld [vmem:[#allocation9 + $0x160] sm:$0xff]  ;;  %v392_v54 = vld [vmem:[#allocation9 + $0x168] sm:$0xff] }
  0x48   :  { %311 = vmatpush.msrb.mxu0 %v214_v6  ;;  %507 = vmatpush.msrb.mxu3 %v463_v37  ;;  %v447_v55 = vld [vmem:[#allocation9 + $0x320] sm:$0xff]  ;;  %v448_v57 = vld [vmem:[#allocation9 + $0x328] sm:$0xff] }
  0x49   :  { %331 = vmatpush.msrb.mxu1 %v246_v7  ;;  %488 = vmatpush.msrb.mxu2 %v395_v48  ;;  %v387_v56 = vld [vmem:[#allocation9 + $0x140] sm:$0xff]  ;;  %v388_v58 = vld [vmem:[#allocation9 + $0x148] sm:$0xff]  ;;  %v409_v48 = vld [vmem:[#allocation9 + $0x1f0] sm:$0xff] }
  0x4a   :  { %312 = vmatpush.msrb.mxu0 %v212_v8  ;;  %508 = vmatpush.msrb.mxu3 %v459_v42  ;;  %v443_v59 = vld [vmem:[#allocation9 + $0x300] sm:$0xff]  ;;  %v444_v61 = vld [vmem:[#allocation9 + $0x308] sm:$0xff]  ;;  %v469_v42 = vld [vmem:[#allocation9 + $0x3d0] sm:$0xff] }
  0x4b   :  { %332 = vmatpush.msrb.mxu1 %v244_v9  ;;  %489 = vmatpush.msrb.mxu2 %v391_v52  ;;  %v383_v60 = vld [vmem:[#allocation9 + $0x120] sm:$0xff]  ;;  %v384_v62 = vld [vmem:[#allocation9 + $0x128] sm:$0xff]  ;;  %v405_v52 = vld [vmem:[#allocation9 + $0x1d0] sm:$0xff] }
  0x4c   :  { %313 = vmatpush.msrb.mxu0 %v210_v10  ;;  %509 = vmatpush.msrb.mxu3 %v455_v47  ;;  %v439_v63 = vld [vmem:[#allocation9 + $0x2e0] sm:$0xff]  ;;  %v440_v1 = vld [vmem:[#allocation9 + $0x2e8] sm:$0xff]  ;;  %v466_v47 = vld [vmem:[#allocation9 + $0x3b8] sm:$0xff] }
  0x4d   :  { %333 = vmatpush.msrb.mxu1 %v242_v11  ;;  %490 = vmatpush.msrb.mxu2 %v387_v56  ;;  %v379_v0 = vld [vmem:[#allocation9 + $0x100] sm:$0xff]  ;;  %v380_v2 = vld [vmem:[#allocation9 + $0x108] sm:$0xff]  ;;  %v147_v11 = vld [vmem:[#allocation4] sm:$0x3] }
  0x4e   :  { %314 = vmatpush.msrb.mxu0 %v208_v12  ;;  %510 = vmatpush.msrb.mxu3 %v451_v51  ;;  %v435_v3 = vld [vmem:[#allocation9 + $0x2c0] sm:$0xff]  ;;  %v436_v5 = vld [vmem:[#allocation9 + $0x2c8] sm:$0xff]  ;;  %v150_v19 = vperm.slane %v147_v11, 1  ;;  %v462_v51 = vld [vmem:[#allocation9 + $0x398] sm:$0xff] }
  0x4f   :  { %334 = vmatpush.msrb.mxu1 %v240_v13  ;;  %491 = vmatpush.msrb.mxu2 %v383_v60  ;;  %v375_v4 = vld [vmem:[#allocation9 + $0xe0] sm:$0xff]  ;;  %v376_v6 = vld [vmem:[#allocation9 + $0xe8] sm:$0xff]  ;;  %v401_v56 = vld [vmem:[#allocation9 + $0x1b0] sm:$0xff] }
  0x50   :  { %315 = vmatpush.msrb.mxu0 %v206_v14  ;;  %511 = vmatpush.msrb.mxu3 %v447_v55  ;;  %v431_v7 = vld [vmem:[#allocation9 + $0x2a0] sm:$0xff]  ;;  %v432_v9 = vld [vmem:[#allocation9 + $0x2a8] sm:$0xff]  ;;  %v458_v55 = vld [vmem:[#allocation9 + $0x378] sm:$0xff] }
  0x51   :  { %335 = vmatpush.msrb.mxu1 %v238_v15  ;;  %492 = vmatpush.msrb.mxu2 %v379_v0  ;;  %v371_v8 = vld [vmem:[#allocation9 + $0xc0] sm:$0xff]  ;;  %v372_v10 = vld [vmem:[#allocation9 + $0xc8] sm:$0xff]  ;;  %v397_v60 = vld [vmem:[#allocation9 + $0x190] sm:$0xff] }
  0x52   :  { %316 = vmatpush.msrb.mxu0 %v204_v16  ;;  %512 = vmatpush.msrb.mxu3 %v443_v59  ;;  %v427_v12 = vld [vmem:[#allocation9 + $0x280] sm:$0xff]  ;;  %v428_v14 = vld [vmem:[#allocation9 + $0x288] sm:$0xff]  ;;  %v454_v59 = vld [vmem:[#allocation9 + $0x358] sm:$0xff] }
  0x53   :  { %336 = vmatpush.msrb.mxu1 %v236_v17  ;;  %493 = vmatpush.msrb.mxu2 %v375_v4  ;;  %v367_v13 = vld [vmem:[#allocation9 + $0xa0] sm:$0xff]  ;;  %v368_v15 = vld [vmem:[#allocation9 + $0xa8] sm:$0xff]  ;;  %v393_v0 = vld [vmem:[#allocation9 + $0x170] sm:$0xff] }
  0x54   :  { %317 = vmatpush.msrb.mxu0 %v202_v18  ;;  %513 = vmatpush.msrb.mxu3 %v439_v63  ;;  %v423_v16 = vld [vmem:[#allocation9 + $0x260] sm:$0xff]  ;;  %v149_v18 = vperm.slane %v147_v11, 0  ;;  %v424_v20 = vld [vmem:[#allocation9 + $0x268] sm:$0xff]  ;;  %v450_v63 = vld [vmem:[#allocation9 + $0x338] sm:$0xff] }
  0x55   :  { %337 = vmatpush.msrb.mxu1 %v234_v22  ;;  %494 = vmatpush.msrb.mxu2 %v371_v8  ;;  %v363_v17 = vld [vmem:[#allocation9 + $0x80] sm:$0xff]  ;;  %v420_v24 = vld [vmem:[#allocation9 + $0x248] sm:$0xff]  ;;  %v389_v4 = vld [vmem:[#allocation9 + $0x150] sm:$0xff] }
  0x56   :  { %318 = vmatpush.msrb.mxu0 %v200_v21  ;;  %514 = vmatpush.msrb.mxu3 %v435_v3  ;;  %v364_v21 = vld [vmem:[#allocation9 + $0x88] sm:$0xff]  ;;  %v419_v22 = vld [vmem:[#allocation9 + $0x240] sm:$0xff]  ;;  %v446_v3 = vld [vmem:[#allocation9 + $0x318] sm:$0xff] }
  0x57   :  { %338 = vmatpush.msrb.mxu1 %v232_v26  ;;  %495 = vmatpush.msrb.mxu2 %v367_v13  ;;  %v359_v23 = vld [vmem:[#allocation9 + $0x60] sm:$0xff]  ;;  %v356_v33 = vld [vmem:[#allocation9 + $0x48] sm:$0xff]  ;;  %v385_v8 = vld [vmem:[#allocation9 + $0x130] sm:$0xff] }
  0x58   :  { %319 = vmatpush.msrb.mxu0 %v198_v25  ;;  %515 = vmatpush.msrb.mxu3 %v431_v7  ;;  %v360_v25 = vld [vmem:[#allocation9 + $0x68] sm:$0xff]  ;;  %v415_v28 = vld [vmem:[#allocation9 + $0x220] sm:$0xff]  ;;  %v442_v7 = vld [vmem:[#allocation9 + $0x2f8] sm:$0xff] }
  0x59   :  { %339 = vmatpush.msrb.mxu1 %v230_v30  ;;  %496 = vmatpush.msrb.mxu2 %v363_v17  ;;  %v412_v37 = vld [vmem:[#allocation9 + $0x208] sm:$0xff]  ;;  %v347_v44 = vld [vmem:[#allocation9] sm:$0xff]  ;;  %v438_v11 = vld [vmem:[#allocation9 + $0x2d8] sm:$0xff] }
  0x5a   :  { %320 = vmatpush.msrb.mxu0 %v196_v29  ;;  %516 = vmatpush.msrb.mxu3 %v427_v12  ;;  %v355_v29 = vld [vmem:[#allocation9 + $0x40] sm:$0xff]  ;;  %v352_v41 = vld [vmem:[#allocation9 + $0x28] sm:$0xff]  ;;  %v381_v12 = vld [vmem:[#allocation9 + $0x110] sm:$0xff] }
  0x5b   :  { %340 = vmatpush.msrb.mxu1 %v228_v32  ;;  %v416_v32 = vld [vmem:[#allocation9 + $0x228] sm:$0xff]  ;;  %497 = vmatpush.msrb.mxu2 %v359_v23  ;;  %v433_v13 = vld [vmem:[#allocation9 + $0x2b0] sm:$0xff]  ;;  %v426_v23 = vld [vmem:[#allocation9 + $0x278] sm:$0xff] }
  0x5c   :  { %525 = vmatpush.msra.mxu0 %v408_v39  ;;  %517 = vmatpush.msrb.mxu3 %v423_v16  ;;  %v474_v39 = vld [vmem:[#allocation9 + $0x3f8] sm:$0xff]  ;;  %v377_v16 = vld [vmem:[#allocation9 + $0xf0] sm:$0xff] }
  0x5d   :  { %545 = vmatpush.msra.mxu1 %v472_v34  ;;  %498 = vmatpush.msrb.mxu2 %v355_v29  ;;  %v429_v17 = vld [vmem:[#allocation9 + $0x290] sm:$0xff] }
  0x5e   :  { %526 = vmatpush.msra.mxu0 %v404_v43  ;;  %518 = vmatpush.msrb.mxu3 %v419_v22  ;;  %v470_v43 = vld [vmem:[#allocation9 + $0x3d8] sm:$0xff]  ;;  %v417_v29 = vld [vmem:[#allocation9 + $0x230] sm:$0xff] }
  0x5f   :  { %546 = vmatpush.msra.mxu1 %v468_v36  ;;  %v411_v36 = vld [vmem:[#allocation9 + $0x200] sm:$0xff]  ;;  %v374_v22 = vld [vmem:[#allocation9 + $0xd8] sm:$0xff] }
  0x60   :  { %527 = vmatpush.msra.mxu0 %v400_v46  ;;  %519 = vmatpush.msrb.mxu3 %v415_v28  ;;  %v465_v46 = vld [vmem:[#allocation9 + $0x3b0] sm:$0xff] }
  0x61   :  { %547 = vmatpush.msra.mxu1 %v464_v40  ;;  %v351_v40 = vld [vmem:[#allocation9 + $0x20] sm:$0xff]  ;;  %v365_v28 = vld [vmem:[#allocation9 + $0x90] sm:$0xff] }
  0x62   :  { %528 = vmatpush.msra.mxu0 %v396_v50  ;;  %520 = vmatpush.msrb.mxu3 %v411_v36  ;;  %v461_v50 = vld [vmem:[#allocation9 + $0x390] sm:$0xff] }
  0x63   :  { %548 = vmatpush.msra.mxu1 %v460_v45  ;;  %v348_v45 = vld [vmem:[#allocation9 + $0x8] sm:$0xff]  ;;  %499 = vmatpush.msrb.mxu2 %v351_v40  ;;  %v357_v36 = vld [vmem:[#allocation9 + $0x50] sm:$0xff] }
  0x64   :  { %529 = vmatpush.msra.mxu0 %v392_v54  ;;  %v457_v54 = vld [vmem:[#allocation9 + $0x370] sm:$0xff] }
  0x65   :  { %549 = vmatpush.msra.mxu1 %v456_v49  ;;  %v410_v49 = vld [vmem:[#allocation9 + $0x1f8] sm:$0xff]  ;;  %500 = vmatpush.msrb.mxu2 %v347_v44  ;;  %v349_v40 = vld [vmem:[#allocation9 + $0x10] sm:$0xff] }
  0x66   :  { %530 = vmatpush.msra.mxu0 %v388_v58  ;;  %v453_v58 = vld [vmem:[#allocation9 + $0x350] sm:$0xff] }
  0x67   :  { %550 = vmatpush.msra.mxu1 %v452_v53  ;;  %v406_v53 = vld [vmem:[#allocation9 + $0x1d8] sm:$0xff] }
  0x68   :  { %531 = vmatpush.msra.mxu0 %v384_v62  ;;  %v449_v62 = vld [vmem:[#allocation9 + $0x330] sm:$0xff] }
  0x69   :  { %551 = vmatpush.msra.mxu1 %v448_v57  ;;  %v402_v57 = vld [vmem:[#allocation9 + $0x1b8] sm:$0xff] }
  0x6a   :  { %532 = vmatpush.msra.mxu0 %v380_v2  ;;  %v445_v2 = vld [vmem:[#allocation9 + $0x310] sm:$0xff] }
  0x6b   :  { %552 = vmatpush.msra.mxu1 %v444_v61  ;;  %v398_v61 = vld [vmem:[#allocation9 + $0x198] sm:$0xff] }
  0x6c   :  { %533 = vmatpush.msra.mxu0 %v376_v6  ;;  %v390_v6 = vld [vmem:[#allocation9 + $0x158] sm:$0xff] }
  0x6d   :  { %553 = vmatpush.msra.mxu1 %v440_v1  ;;  %v394_v1 = vld [vmem:[#allocation9 + $0x178] sm:$0xff] }
  0x6e   :  { %534 = vmatpush.msra.mxu0 %v372_v10  ;;  %v386_v10 = vld [vmem:[#allocation9 + $0x138] sm:$0xff] }
  0x6f   :  { %554 = vmatpush.msra.mxu1 %v436_v5  ;;  %v441_v5 = vld [vmem:[#allocation9 + $0x2f0] sm:$0xff] }
  0x70   :  { %535 = vmatpush.msra.mxu0 %v368_v15  ;;  %v434_v15 = vld [vmem:[#allocation9 + $0x2b8] sm:$0xff] }
  0x71   :  { %555 = vmatpush.msra.mxu1 %v432_v9  ;;  %v437_v9 = vld [vmem:[#allocation9 + $0x2d0] sm:$0xff] }
  0x72   :  { %536 = vmatpush.msra.mxu0 %v364_v21  ;;  %v425_v21 = vld [vmem:[#allocation9 + $0x270] sm:$0xff] }
  0x73   :  { %556 = vmatpush.msra.mxu1 %v428_v14  ;;  %v382_v14 = vld [vmem:[#allocation9 + $0x118] sm:$0xff] }
  0x74   :  { %537 = vmatpush.msra.mxu0 %v360_v25  ;;  %v421_v25 = vld [vmem:[#allocation9 + $0x250] sm:$0xff] }
  0x75   :  { %557 = vmatpush.msra.mxu1 %v424_v20  ;;  %v373_v20 = vld [vmem:[#allocation9 + $0xd0] sm:$0xff] }
  0x76   :  { %538 = vmatpush.msra.mxu0 %v356_v33  ;;  %v413_v33 = vld [vmem:[#allocation9 + $0x210] sm:$0xff] }
  0x77   :  { %558 = vmatpush.msra.mxu1 %v420_v24  ;;  %v369_v24 = vld [vmem:[#allocation9 + $0xb0] sm:$0xff] }
  0x78   :  { %539 = vmatpush.msra.mxu0 %v352_v41  ;;  %v350_v41 = vld [vmem:[#allocation9 + $0x18] sm:$0xff] }
  0x79   :  { %559 = vmatpush.msra.mxu1 %v416_v32  ;;  %v361_v32 = vld [vmem:[#allocation9 + $0x70] sm:$0xff] }
  0x7a   :  { %540 = vmatpush.msra.mxu0 %v348_v45 }
  0x7b   :  { %560 = vmatpush.msra.mxu1 %v412_v37  ;;  %v358_v37 = vld [vmem:[#allocation9 + $0x58] sm:$0xff] }
  0xb8   :  { %v170_v26 = vpop.f32.mrf.mxu0 }
  0xb9   :  { %v190_v27 = vpop.f32.mrf.mxu1  ;;  %v171_v30 = vadd.f32 %v170_v26, %v149_v18  ;;  %v378_v18 = vld [vmem:[#allocation9 + $0xf8] sm:$0xff] }
  0xba   :  { %v191_v31 = vadd.f32 %v190_v27, %v150_v19  ;;  %v430_v19 = vld [vmem:[#allocation9 + $0x298] sm:$0xff] }
  0xbb   :  { %v193_v34 = vmax.f32 %v171_v30, 0.0  ;;  %v370_v26 = vld [vmem:[#allocation9 + $0xb8] sm:$0xff] }
  0xbc   :  { %v194_v35 = vmax.f32 %v191_v31, 0.0  ;;  %v422_v27 = vld [vmem:[#allocation9 + $0x258] sm:$0xff] }
  0xbd   :  { %281 = vmatmul.f32.vlgmr.msra.gmra.mxu2 %v193_v34  ;;  %321 = vmatmul.f32.vlgmr.msrb.gmra.mxu0 %v193_v34  ;;  %v366_v30 = vld [vmem:[#allocation9 + $0x98] sm:$0xff] }
  0xbe   :  { %301 = vmatmul.f32.vlgmr.msra.gmra.mxu3 %v194_v35  ;;  %341 = vmatmul.f32.vlgmr.msrb.gmra.mxu1 %v194_v35  ;;  %v418_v31 = vld [vmem:[#allocation9 + $0x238] sm:$0xff] }
  0xbf   :  { %585 = vmatpush.msra.mxu3 %v473_v38  ;;  %625 = vmatpush.msrb.mxu1 %v474_v39  ;;  %v362_v34 = vld [vmem:[#allocation9 + $0x78] sm:$0xff]  ;;  %v353_v38 = vld [vmem:[#allocation9 + $0x30] sm:$0xff] }
  0xc0   :  { %565 = vmatpush.msra.mxu2 %v409_v48  ;;  %605 = vmatpush.msrb.mxu0 %v410_v49  ;;  %v414_v35 = vld [vmem:[#allocation9 + $0x218] sm:$0xff] }
  0xc1   :  { %586 = vmatpush.msra.mxu3 %v469_v42  ;;  %626 = vmatpush.msrb.mxu1 %v470_v43  ;;  %v354_v39 = vld [vmem:[#allocation9 + $0x38] sm:$0xff] }
  0xc2   :  { %566 = vmatpush.msra.mxu2 %v405_v52  ;;  %606 = vmatpush.msrb.mxu0 %v406_v53  ;;  %v259_v42 = vld [vmem:[#allocation7] sm:$0x3] }
  0xc3   :  { %587 = vmatpush.msra.mxu3 %v465_v46  ;;  %627 = vmatpush.msrb.mxu1 %v466_v47  ;;  %v262_v43 = vperm.slane %v259_v42, 1  ;;  %v261_v48 = vperm.slane %v259_v42, 0 }
  0xc4   :  { %567 = vmatpush.msra.mxu2 %v401_v56  ;;  %607 = vmatpush.msrb.mxu0 %v402_v57 }
  0xc5   :  { %588 = vmatpush.msra.mxu3 %v461_v50  ;;  %628 = vmatpush.msrb.mxu1 %v462_v51 }
  0xc6   :  { %568 = vmatpush.msra.mxu2 %v397_v60  ;;  %608 = vmatpush.msrb.mxu0 %v398_v61 }
  0xc7   :  { %589 = vmatpush.msra.mxu3 %v457_v54  ;;  %629 = vmatpush.msrb.mxu1 %v458_v55  ;;  %v475_v55 = vld [vmem:[#allocation10] sm:$0xf] }
  0xc8   :  { %569 = vmatpush.msra.mxu2 %v393_v0  ;;  %609 = vmatpush.msrb.mxu0 %v394_v1  ;;  %v478_v56 = vperm.slane %v475_v55, 1  ;;  %v477_v61 = vperm.slane %v475_v55, 0 }
  0xc9   :  { %590 = vmatpush.msra.mxu3 %v453_v58  ;;  %630 = vmatpush.msrb.mxu1 %v454_v59 }
  0xca   :  { %570 = vmatpush.msra.mxu2 %v389_v4  ;;  %610 = vmatpush.msrb.mxu0 %v390_v6 }
  0xcb   :  { %591 = vmatpush.msra.mxu3 %v449_v62  ;;  %631 = vmatpush.msrb.mxu1 %v450_v63  ;;  %v480_v63 = vperm.slane %v475_v55, 3 }
  0xcc   :  { %571 = vmatpush.msra.mxu2 %v385_v8  ;;  %611 = vmatpush.msrb.mxu0 %v386_v10 }
  0xcd   :  { %592 = vmatpush.msra.mxu3 %v445_v2  ;;  %632 = vmatpush.msrb.mxu1 %v446_v3 }
  0xce   :  { %572 = vmatpush.msra.mxu2 %v381_v12  ;;  %612 = vmatpush.msrb.mxu0 %v382_v14 }
  0xcf   :  { %593 = vmatpush.msra.mxu3 %v441_v5  ;;  %633 = vmatpush.msrb.mxu1 %v442_v7 }
  0xd0   :  { %573 = vmatpush.msra.mxu2 %v377_v16  ;;  %613 = vmatpush.msrb.mxu0 %v378_v18 }
  0xd1   :  { %594 = vmatpush.msra.mxu3 %v437_v9  ;;  %634 = vmatpush.msrb.mxu1 %v438_v11  ;;  %v479_v9 = vperm.slane %v475_v55, 2 }
  0xd2   :  { %574 = vmatpush.msra.mxu2 %v373_v20  ;;  %614 = vmatpush.msrb.mxu0 %v374_v22 }
  0xd3   :  { %595 = vmatpush.msra.mxu3 %v433_v13  ;;  %635 = vmatpush.msrb.mxu1 %v434_v15 }
  0xd4   :  { %575 = vmatpush.msra.mxu2 %v369_v24  ;;  %615 = vmatpush.msrb.mxu0 %v370_v26 }
  0xd5   :  { %596 = vmatpush.msra.mxu3 %v429_v17  ;;  %636 = vmatpush.msrb.mxu1 %v430_v19 }
  0xd6   :  { %576 = vmatpush.msra.mxu2 %v365_v28  ;;  %616 = vmatpush.msrb.mxu0 %v366_v30 }
  0xd7   :  { %597 = vmatpush.msra.mxu3 %v425_v21  ;;  %637 = vmatpush.msrb.mxu1 %v426_v23 }
  0xd8   :  { %577 = vmatpush.msra.mxu2 %v361_v32  ;;  %617 = vmatpush.msrb.mxu0 %v362_v34 }
  0xd9   :  { %598 = vmatpush.msra.mxu3 %v421_v25  ;;  %638 = vmatpush.msrb.mxu1 %v422_v27 }
  0xda   :  { %578 = vmatpush.msra.mxu2 %v357_v36  ;;  %618 = vmatpush.msrb.mxu0 %v358_v37 }
  0xdb   :  { %599 = vmatpush.msra.mxu3 %v417_v29  ;;  %639 = vmatpush.msrb.mxu1 %v418_v31 }
  0xdc   :  { %579 = vmatpush.msra.mxu2 %v353_v38  ;;  %619 = vmatpush.msrb.mxu0 %v354_v39 }
  0xdd   :  { %600 = vmatpush.msra.mxu3 %v413_v33  ;;  %640 = vmatpush.msrb.mxu1 %v414_v35 }
  0xde   :  { %580 = vmatpush.msra.mxu2 %v349_v40  ;;  %620 = vmatpush.msrb.mxu0 %v350_v41 }
 0x13a   :  { %v322_v44 = vpop.f32.mrf.mxu0 }
 0x13b   :  { %v323_v45 = vadd.f32 %v322_v44, %v262_v43  ;;  %v342_v46 = vpop.f32.mrf.mxu1 }
 0x13d   :  { %v343_v47 = vadd.f32 %v342_v46, %v323_v45 }
 0x13f   :  { %v346_v49 = vmax.f32 %v343_v47, 0.0 }
 0x140   :  { %v282_v50 = vpop.f32.mrf.mxu2 }
 0x141   :  { %v283_v51 = vadd.f32 %v282_v50, %v261_v48  ;;  %521 = vmatmul.f32.vlgmr.msrb.gmra.mxu3 %v346_v49  ;;  %561 = vmatmul.f32.vlgmr.msra.gmra.mxu1 %v346_v49  ;;  %v302_v52 = vpop.f32.mrf.mxu3 }
 0x143   :  { %v303_v53 = vadd.f32 %v302_v52, %v283_v51 }
 0x145   :  { %v345_v54 = vmax.f32 %v303_v53, 0.0 }
 0x147   :  { %501 = vmatmul.f32.vlgmr.msrb.gmra.mxu2 %v345_v54  ;;  %541 = vmatmul.f32.vlgmr.msra.gmra.mxu0 %v345_v54 }
 0x149   :  { %601 = vmatmul.f32.vlgmr.msra.gmra.mxu3 %v346_v49  ;;  %641 = vmatmul.f32.vlgmr.msrb.gmra.mxu1 %v346_v49 }
 0x14f   :  { %581 = vmatmul.f32.vlgmr.msra.gmra.mxu2 %v345_v54  ;;  %621 = vmatmul.f32.vlgmr.msrb.gmra.mxu0 %v345_v54 }
 0x1be   :  { %v562_v57 = vpop.f32.mrf.mxu1 }
 0x1c4   :  { %v542_v58 = vpop.f32.mrf.mxu0  ;;  %v522_v0 = vpop.f32.mrf.mxu3 }
 0x1c5   :  { %v543_v59 = vadd.f32 %v542_v58, %v478_v56 }
 0x1c6   :  { %v642_v6 = vpop.f32.mrf.mxu1 }
 0x1c7   :  { %v563_v60 = vadd.f32 %v562_v57, %v543_v59 }
 0x1c9   :  { %v646_v62 = vmax.f32 %v563_v60, 0.0 }
 0x1ca   :  { %v502_v1 = vpop.f32.mrf.mxu2 }
 0x1cb   :  { %650 = vst [vmem:[%s913_s7 + $0x8] sm:$0xff] %v646_v62  ;;  %v503_v2 = vadd.f32 %v502_v1, %v477_v61 }
 0x1cc   :  { %v622_v3 = vpop.f32.mrf.mxu0  ;;  %v602_v13 = vpop.f32.mrf.mxu3 }
 0x1cd   :  { %v523_v4 = vadd.f32 %v522_v0, %v503_v2  ;;  %v623_v5 = vadd.f32 %v622_v3, %v480_v63 }
 0x1cf   :  { %v645_v7 = vmax.f32 %v523_v4, 0.0  ;;  %v643_v8 = vadd.f32 %v642_v6, %v623_v5 }
 0x1d1   :  { %649 = vst [vmem:[%s913_s7] sm:$0xff] %v645_v7  ;;  %v648_v10 = vmax.f32 %v643_v8, 0.0 }
 0x1d2   :  { %v582_v11 = vpop.f32.mrf.mxu2 }
 0x1d3   :  { %652 = vst [vmem:[%s913_s7 + $0x18] sm:$0xff] %v648_v10  ;;  %v583_v12 = vadd.f32 %v582_v11, %v479_v9 }
 0x1d5   :  { %v603_v14 = vadd.f32 %v602_v13, %v583_v12 }
 0x1d7   :  { %v647_v15 = vmax.f32 %v603_v14, 0.0 }
 0x1d9   :  { %651 = vst [vmem:[%s913_s7 + $0x10] sm:$0xff] %v647_v15 }
 0x1da   :  { %657 = vsyncpa [#allocation3], 1 }
 0x1db   :  { %658 = vsyncpa [#allocation5], 1 }
 0x1dc   :  { %659 = vsyncpa [#allocation8], 1 }
 0x1dd   :  { %660 = vsyncpa [#allocation11], 1 }

// kernel: decoder_burgess_forward.6
= control target key start
LH: loop header
LB: loop body
LE: loop exit
PB: predicated region body
PF: predicated region fallthrough
CT: control target
= control target key end

     0   :  { %8 = vsyncpa [#allocation3], 0  ;;  %s798_s0 = inlined_call_operand.vmem [shape: bf16[32,512], index: 0, kind: input, shape index: {}]   ;;  %s799_s1 = inlined_call_operand.hbm [shape: bf16[512,128], index: 1, kind: input, shape index: {}]   ;;  %s800_s2 = inlined_call_operand.hbm [shape: f32[1,128], index: 2, kind: input, shape index: {}]   ;;  %s801_s3 = inlined_call_operand.vmem [shape: bf16[32,128], index: 3, kind: output, shape index: {}]  }
   0x1   :  { %s16_s14 = sshll.u32 %s799_s1, 4  ;;  %s17_s14 = int_to_ptr.hbm [resolvable:$true] %s16_s14 }
   0x2   :  { %9 = vsyncpa [#allocation5], 0  ;;  %s714_s15 = smov [#allocation2]   ;;  %s30_s19 = sshll.u32 %s800_s2, 4  ;;  %s31_s19 = int_to_ptr.hbm [resolvable:$true] %s30_s19 }
   0x3   :  { %s18_s16 = sshll.u32 %s714_s15, 4  ;;  %s715_s20 = smov 64   ;;  %s19_s16 = int_to_ptr.vmem [resolvable:$true] %s18_s16 }
   0x4   :  { %s716_s21 = smov 4   ;;  %s717_s22 = smov [#allocation4]  }
   0x5   :  { %24 = dma.hbm_to_vmem [thread:$0]  %s17_s14, 4096, %s19_s16, [#allocation3], %s715_s20, %s715_s20, %s716_s21  }
   0x6   :  { %s32_s23 = sshll.u32 %s717_s22, 4  ;;  %s33_s23 = int_to_ptr.vmem [resolvable:$true] %s32_s23 }
   0x7   :  { %35 = dma.hbm_to_vmem [thread:$0]  %s31_s19, 16, %s33_s23, [#allocation5]  }
   0x8   :  { %710 = dma.done.wait [#allocation3], 4096  }
   0x9   :  { %711 = vsyncadd [#allocation3], 4294963200 }
   0xa   :  { %712 = dma.done.wait [#allocation5], 16  }
   0xb   :  { %713 = vsyncadd [#allocation5], 4294967280  ;;  %v621_v0 = vld [vmem:[#allocation2 + $0x38] sm:$0xff]  ;;  %v620_v4 = vld [vmem:[#allocation2 + $0x30] sm:$0xff] }
   0xc   :  { %v629_v1 = vld [vmem:[#allocation2 + $0x78] sm:$0xff]  ;;  %352 = vmatpush.bf16.msra.mxu0 %v621_v0  ;;  %v628_v5 = vld [vmem:[#allocation2 + $0x70] sm:$0xff]  ;;  %v619_v8 = vld [vmem:[#allocation2 + $0x28] sm:$0xff] }
   0xd   :  { %v637_v2 = vld [vmem:[#allocation2 + $0xb8] sm:$0xff]  ;;  %371 = vmatpush.bf16.msra.mxu1 %v629_v1  ;;  %v636_v6 = vld [vmem:[#allocation2 + $0xb0] sm:$0xff]  ;;  %v627_v9 = vld [vmem:[#allocation2 + $0x68] sm:$0xff] }
   0xe   :  { %v645_v3 = vld [vmem:[#allocation2 + $0xf8] sm:$0xff]  ;;  %390 = vmatpush.bf16.msra.mxu2 %v637_v2  ;;  %v644_v7 = vld [vmem:[#allocation2 + $0xf0] sm:$0xff]  ;;  %v635_v10 = vld [vmem:[#allocation2 + $0xa8] sm:$0xff] }
   0xf   :  { %409 = vmatpush.bf16.msra.mxu3 %v645_v3  ;;  %v643_v11 = vld [vmem:[#allocation2 + $0xe8] sm:$0xff]  ;;  %v618_v12 = vld [vmem:[#allocation2 + $0x20] sm:$0xff]  ;;  %v617_v16 = vld [vmem:[#allocation2 + $0x18] sm:$0xff] }
  0x10   :  { %353 = vmatpush.bf16.msra.mxu0 %v620_v4  ;;  %v626_v13 = vld [vmem:[#allocation2 + $0x60] sm:$0xff]  ;;  %v625_v17 = vld [vmem:[#allocation2 + $0x58] sm:$0xff]  ;;  %v616_v20 = vld [vmem:[#allocation2 + $0x10] sm:$0xff] }
  0x11   :  { %372 = vmatpush.bf16.msra.mxu1 %v628_v5  ;;  %v634_v14 = vld [vmem:[#allocation2 + $0xa0] sm:$0xff]  ;;  %v633_v18 = vld [vmem:[#allocation2 + $0x98] sm:$0xff]  ;;  %v624_v21 = vld [vmem:[#allocation2 + $0x50] sm:$0xff] }
  0x12   :  { %391 = vmatpush.bf16.msra.mxu2 %v636_v6  ;;  %v642_v15 = vld [vmem:[#allocation2 + $0xe0] sm:$0xff]  ;;  %v641_v19 = vld [vmem:[#allocation2 + $0xd8] sm:$0xff]  ;;  %v632_v22 = vld [vmem:[#allocation2 + $0x90] sm:$0xff] }
  0x13   :  { %410 = vmatpush.bf16.msra.mxu3 %v644_v7  ;;  %v640_v23 = vld [vmem:[#allocation2 + $0xd0] sm:$0xff]  ;;  %v615_v24 = vld [vmem:[#allocation2 + $0x8] sm:$0xff]  ;;  %v614_v28 = vld [vmem:[#allocation2] sm:$0xff] }
  0x14   :  { %354 = vmatpush.bf16.msra.mxu0 %v619_v8  ;;  %v623_v25 = vld [vmem:[#allocation2 + $0x48] sm:$0xff]  ;;  %v622_v29 = vld [vmem:[#allocation2 + $0x40] sm:$0xff]  ;;  %v608_v33 = vld [vmem:[%s798_s0 + $0xc] sm:$0xf0] }
  0x15   :  { %373 = vmatpush.bf16.msra.mxu1 %v627_v9  ;;  %v631_v26 = vld [vmem:[#allocation2 + $0x88] sm:$0xff]  ;;  %v630_v30 = vld [vmem:[#allocation2 + $0x80] sm:$0xff]  ;;  %v450_v35 = vld [vmem:[%s798_s0 + $0x10] sm:$0xf0] }
  0x16   :  { %392 = vmatpush.bf16.msra.mxu2 %v635_v10  ;;  %v639_v27 = vld [vmem:[#allocation2 + $0xc8] sm:$0xff]  ;;  %v638_v31 = vld [vmem:[#allocation2 + $0xc0] sm:$0xff]  ;;  %v609_v37 = vld [vmem:[%s798_s0 + $0x14] sm:$0xf0] }
  0x17   :  { %411 = vmatpush.bf16.msra.mxu3 %v643_v11  ;;  %v448_v32 = vld [vmem:[%s798_s0] sm:$0xf]  ;;  %v606_v34 = vld [vmem:[%s798_s0 + $0x4] sm:$0xf]  ;;  %v456_v36 = vld [vmem:[%s798_s0 + $0x8] sm:$0xf] }
  0x18   :  { %355 = vmatpush.bf16.msra.mxu0 %v618_v12  ;;  %v607_v38 = vld [vmem:[%s798_s0 + $0xc] sm:$0xf]  ;;  %v458_v39 = vld [vmem:[%s798_s0 + $0x18] sm:$0xf0]  ;;  %v449_v40 = vor.u32 %v608_v33, %v448_v32  ;;  %v453_v41 = vor.u32 %v606_v34, %v450_v35  ;;  %v457_v42 = vor.u32 %v609_v37, %v456_v36  ;;  %v464_v44 = vld [vmem:[%s798_s0 + $0x20] sm:$0xf] }
  0x19   :  { %374 = vmatpush.bf16.msra.mxu1 %v626_v13  ;;  %v461_v43 = vor.u32 %v607_v38, %v458_v39  ;;  %v612_v45 = vld [vmem:[%s798_s0 + $0x2c] sm:$0xf0]  ;;  %v610_v46 = vld [vmem:[%s798_s0 + $0x24] sm:$0xf]  ;;  %v466_v47 = vld [vmem:[%s798_s0 + $0x30] sm:$0xf0] }
  0x1a   :  { %393 = vmatpush.bf16.msra.mxu2 %v634_v14  ;;  %v472_v48 = vld [vmem:[%s798_s0 + $0x28] sm:$0xf]  ;;  %v613_v49 = vld [vmem:[%s798_s0 + $0x34] sm:$0xf0]  ;;  %v611_v50 = vld [vmem:[%s798_s0 + $0x2c] sm:$0xf]  ;;  %v465_v52 = vor.u32 %v612_v45, %v464_v44  ;;  %v469_v53 = vor.u32 %v610_v46, %v466_v47 }
  0x1b   :  { %412 = vmatpush.bf16.msra.mxu3 %v642_v15  ;;  %v474_v51 = vld [vmem:[%s798_s0 + $0x38] sm:$0xf0]  ;;  %v473_v54 = vor.u32 %v613_v49, %v472_v48  ;;  %v661_v56 = vld [vmem:[#allocation4] ss:$0 sm:$0xff] }
  0x1c   :  { %356 = vmatpush.bf16.msra.mxu0 %v617_v16  ;;  %v477_v55 = vor.u32 %v611_v50, %v474_v51 }
  0x1d   :  { %375 = vmatpush.bf16.msra.mxu1 %v625_v17 }
  0x1e   :  { %394 = vmatpush.bf16.msra.mxu2 %v633_v18 }
  0x1f   :  { %413 = vmatpush.bf16.msra.mxu3 %v641_v19 }
  0x20   :  { %357 = vmatpush.bf16.msra.mxu0 %v616_v20 }
  0x21   :  { %376 = vmatpush.bf16.msra.mxu1 %v624_v21 }
  0x22   :  { %395 = vmatpush.bf16.msra.mxu2 %v632_v22 }
  0x23   :  { %414 = vmatpush.bf16.msra.mxu3 %v640_v23 }
  0x24   :  { %358 = vmatpush.bf16.msra.mxu0 %v615_v24 }
  0x25   :  { %377 = vmatpush.bf16.msra.mxu1 %v623_v25 }
  0x26   :  { %396 = vmatpush.bf16.msra.mxu2 %v631_v26 }
  0x27   :  { %415 = vmatpush.bf16.msra.mxu3 %v639_v27 }
  0x28   :  { %359 = vmatpush.bf16.msra.mxu0 %v614_v28 }
  0x29   :  { %378 = vmatpush.bf16.msra.mxu1 %v622_v29 }
  0x2a   :  { %397 = vmatpush.bf16.msra.mxu2 %v630_v30 }
  0x2b   :  { %416 = vmatpush.bf16.msra.mxu3 %v638_v31  ;;  %360 = vmatmul.bf16.vlgmr.msra.gmra.mxu0 %v449_v40 }
  0x2c   :  { %379 = vmatmul.bf16.vlgmr.msra.gmra.mxu1 %v453_v41 }
  0x2d   :  { %398 = vmatmul.bf16.vlgmr.msra.gmra.mxu2 %v457_v42 }
  0x2e   :  { %417 = vmatmul.bf16.vlgmr.msra.gmra.mxu3 %v461_v43 }
  0x3b   :  { %365 = vmatmul.bf16.gmra.mxu0 %v465_v52 }
  0x3c   :  { %384 = vmatmul.bf16.gmra.mxu1 %v469_v53 }
  0x3d   :  { %403 = vmatmul.bf16.gmra.mxu2 %v473_v54 }
  0x3e   :  { %422 = vmatmul.bf16.gmra.mxu3 %v477_v55 }
  0xa8   :  { %v361_v57 = vpop.f32.mrf.mxu0 }
  0xa9   :  { %v380_v58 = vpop.f32.mrf.mxu1  ;;  %v362_v59 = vadd.f32 %v661_v56, %v361_v57 }
  0xab   :  { %v381_v62 = vadd.f32 %v380_v58, %v362_v59 }
  0xb0   :  { %v399_v60 = vpop.f32.mrf.mxu2  ;;  %v363_v63 = vpop.f32.mrf.mxu0 }
  0xb1   :  { %v418_v61 = vpop.f32.mrf.mxu3  ;;  %v382_v0 = vpop.f32.mrf.mxu1  ;;  %v364_v1 = vadd.f32 %v661_v56, %v363_v63  ;;  %v400_v2 = vadd.f32 %v399_v60, %v381_v62 }
  0xb3   :  { %v383_v3 = vadd.f32 %v382_v0, %v364_v1  ;;  %v419_v6 = vadd.f32 %v418_v61, %v400_v2 }
  0xb5   :  { %v428_v11 = vmax.f32 %v419_v6, 0.0 }
  0xb8   :  { %v401_v4 = vpop.f32.mrf.mxu2  ;;  %v366_v8 = vpop.f32.mrf.mxu0 }
  0xb9   :  { %v420_v5 = vpop.f32.mrf.mxu3  ;;  %v402_v7 = vadd.f32 %v401_v4, %v383_v3  ;;  %v385_v10 = vpop.f32.mrf.mxu1  ;;  %v367_v13 = vadd.f32 %v661_v56, %v366_v8 }
  0xbb   :  { %v421_v9 = vadd.f32 %v420_v5, %v402_v7  ;;  %v386_v17 = vadd.f32 %v385_v10, %v367_v13 }
  0xbd   :  { %v429_v12 = vmax.f32 %v421_v9, 0.0 }
  0xbf   :  { %v649_v14 = vpack.c.bf16 %v429_v12, %v428_v11 }
  0xc0   :  { %v404_v15 = vpop.f32.mrf.mxu2  ;;  %v368_v18 = vpop.f32.mrf.mxu0 }
  0xc1   :  { %v423_v16 = vpop.f32.mrf.mxu3  ;;  %650 = vst [vmem:[%s801_s3] sm:$0xff] %v649_v14   ;;  %v369_v19 = vadd.f32 %v661_v56, %v368_v18  ;;  %v405_v20 = vadd.f32 %v404_v15, %v386_v17  ;;  %v387_v21 = vpop.f32.mrf.mxu1 }
  0xc3   :  { %v388_v22 = vadd.f32 %v387_v21, %v369_v19  ;;  %v424_v24 = vadd.f32 %v423_v16, %v405_v20 }
  0xc5   :  { %v430_v28 = vmax.f32 %v424_v24, 0.0 }
  0xc8   :  { %v406_v23 = vpop.f32.mrf.mxu2 }
  0xc9   :  { %v407_v25 = vadd.f32 %v406_v23, %v388_v22  ;;  %v425_v26 = vpop.f32.mrf.mxu3 }
  0xcb   :  { %v426_v27 = vadd.f32 %v425_v26, %v407_v25 }
  0xcd   :  { %v431_v29 = vmax.f32 %v426_v27, 0.0 }
  0xcf   :  { %v654_v30 = vpack.c.bf16 %v431_v29, %v430_v28 }
  0xd1   :  { %656 = vst [vmem:[%s801_s3 + $0x8] sm:$0xff] %v654_v30  }
  0xd2   :  { %444 = vsyncpa [#allocation3], 1 }
  0xd3   :  { %445 = vsyncpa [#allocation5], 1 }

// kernel: decoder_burgess_forward.7
= control target key start
LH: loop header
LB: loop body
LE: loop exit
PB: predicated region body
PF: predicated region fallthrough
CT: control target
= control target key end

     0   :  { %s1435_s1 = inlined_call_operand.vmem [shape: bf16[512,128], index: 1, kind: input, shape index: {}]   ;;  %s1436_s2 = inlined_call_operand.vmem [shape: f32[1,128], index: 2, kind: input, shape index: {}]   ;;  %s1437_s0 = inlined_call_operand.vmem [shape: bf16[128,512], index: 0, kind: input, shape index: {}]   ;;  %s1438_s3 = inlined_call_operand.vmem [shape: bf16[128,128], index: 3, kind: output, shape index: {}]  }
   0x1   :  { %v1009_v0 = vld [vmem:[%s1435_s1 + $0x38] sm:$0xff]  ;;  %v1008_v4 = vld [vmem:[%s1435_s1 + $0x30] sm:$0xff]  ;;  %v1007_v8 = vld [vmem:[%s1435_s1 + $0x28] sm:$0xff] }
   0x2   :  { %v1017_v1 = vld [vmem:[%s1435_s1 + $0x78] sm:$0xff]  ;;  %466 = vmatpush.bf16.msra.mxu0 %v1009_v0  ;;  %v1016_v5 = vld [vmem:[%s1435_s1 + $0x70] sm:$0xff]  ;;  %v1015_v9 = vld [vmem:[%s1435_s1 + $0x68] sm:$0xff] }
   0x3   :  { %v1025_v2 = vld [vmem:[%s1435_s1 + $0xb8] sm:$0xff]  ;;  %515 = vmatpush.bf16.msra.mxu1 %v1017_v1  ;;  %v1024_v6 = vld [vmem:[%s1435_s1 + $0xb0] sm:$0xff]  ;;  %v1023_v10 = vld [vmem:[%s1435_s1 + $0xa8] sm:$0xff] }
   0x4   :  { %v1033_v3 = vld [vmem:[%s1435_s1 + $0xf8] sm:$0xff]  ;;  %564 = vmatpush.bf16.msra.mxu2 %v1025_v2  ;;  %v1032_v7 = vld [vmem:[%s1435_s1 + $0xf0] sm:$0xff]  ;;  %v1031_v11 = vld [vmem:[%s1435_s1 + $0xe8] sm:$0xff] }
   0x5   :  { %613 = vmatpush.bf16.msra.mxu3 %v1033_v3  ;;  %v1006_v12 = vld [vmem:[%s1435_s1 + $0x20] sm:$0xff]  ;;  %v1005_v16 = vld [vmem:[%s1435_s1 + $0x18] sm:$0xff]  ;;  %v1004_v20 = vld [vmem:[%s1435_s1 + $0x10] sm:$0xff] }
   0x6   :  { %467 = vmatpush.bf16.msra.mxu0 %v1008_v4  ;;  %v1014_v13 = vld [vmem:[%s1435_s1 + $0x60] sm:$0xff]  ;;  %v1013_v17 = vld [vmem:[%s1435_s1 + $0x58] sm:$0xff]  ;;  %v1012_v21 = vld [vmem:[%s1435_s1 + $0x50] sm:$0xff] }
   0x7   :  { %516 = vmatpush.bf16.msra.mxu1 %v1016_v5  ;;  %v1022_v14 = vld [vmem:[%s1435_s1 + $0xa0] sm:$0xff]  ;;  %v1021_v18 = vld [vmem:[%s1435_s1 + $0x98] sm:$0xff]  ;;  %v1020_v22 = vld [vmem:[%s1435_s1 + $0x90] sm:$0xff] }
   0x8   :  { %565 = vmatpush.bf16.msra.mxu2 %v1024_v6  ;;  %v1030_v15 = vld [vmem:[%s1435_s1 + $0xe0] sm:$0xff]  ;;  %v1029_v19 = vld [vmem:[%s1435_s1 + $0xd8] sm:$0xff]  ;;  %v1028_v23 = vld [vmem:[%s1435_s1 + $0xd0] sm:$0xff] }
   0x9   :  { %614 = vmatpush.bf16.msra.mxu3 %v1032_v7  ;;  %v1003_v24 = vld [vmem:[%s1435_s1 + $0x8] sm:$0xff]  ;;  %v1002_v28 = vld [vmem:[%s1435_s1] sm:$0xff]  ;;  %v972_v33 = vld [vmem:[%s1437_s0 + $0xc] sm:$0xf0] }
   0xa   :  { %468 = vmatpush.bf16.msra.mxu0 %v1007_v8  ;;  %v1011_v25 = vld [vmem:[%s1435_s1 + $0x48] sm:$0xff]  ;;  %v1010_v29 = vld [vmem:[%s1435_s1 + $0x40] sm:$0xff]  ;;  %v718_v35 = vld [vmem:[%s1437_s0 + $0x10] sm:$0xf0] }
   0xb   :  { %517 = vmatpush.bf16.msra.mxu1 %v1015_v9  ;;  %v1019_v26 = vld [vmem:[%s1435_s1 + $0x88] sm:$0xff]  ;;  %v1018_v30 = vld [vmem:[%s1435_s1 + $0x80] sm:$0xff]  ;;  %v973_v37 = vld [vmem:[%s1437_s0 + $0x14] sm:$0xf0] }
   0xc   :  { %566 = vmatpush.bf16.msra.mxu2 %v1023_v10  ;;  %v1027_v27 = vld [vmem:[%s1435_s1 + $0xc8] sm:$0xff]  ;;  %v1026_v31 = vld [vmem:[%s1435_s1 + $0xc0] sm:$0xff]  ;;  %v726_v39 = vld [vmem:[%s1437_s0 + $0x18] sm:$0xf0] }
   0xd   :  { %615 = vmatpush.bf16.msra.mxu3 %v1031_v11  ;;  %v716_v32 = vld [vmem:[%s1437_s0] sm:$0xf]  ;;  %v970_v34 = vld [vmem:[%s1437_s0 + $0x4] sm:$0xf]  ;;  %v724_v36 = vld [vmem:[%s1437_s0 + $0x8] sm:$0xf] }
   0xe   :  { %469 = vmatpush.bf16.msra.mxu0 %v1006_v12  ;;  %v971_v38 = vld [vmem:[%s1437_s0 + $0xc] sm:$0xf]  ;;  %v717_v40 = vor.u32 %v972_v33, %v716_v32  ;;  %v721_v41 = vor.u32 %v970_v34, %v718_v35  ;;  %v725_v42 = vor.u32 %v973_v37, %v724_v36  ;;  %v732_v44 = vld [vmem:[%s1437_s0 + $0x20] sm:$0xf]  ;;  %v976_v45 = vld [vmem:[%s1437_s0 + $0x2c] sm:$0xf0] }
   0xf   :  { %518 = vmatpush.bf16.msra.mxu1 %v1014_v13  ;;  %v729_v43 = vor.u32 %v971_v38, %v726_v39  ;;  %v974_v46 = vld [vmem:[%s1437_s0 + $0x24] sm:$0xf]  ;;  %v734_v47 = vld [vmem:[%s1437_s0 + $0x30] sm:$0xf0]  ;;  %v740_v48 = vld [vmem:[%s1437_s0 + $0x28] sm:$0xf]  ;;  %v733_v52 = vor.u32 %v976_v45, %v732_v44 }
  0x10   :  { %567 = vmatpush.bf16.msra.mxu2 %v1022_v14  ;;  %v977_v49 = vld [vmem:[%s1437_s0 + $0x34] sm:$0xf0]  ;;  %v975_v50 = vld [vmem:[%s1437_s0 + $0x2c] sm:$0xf]  ;;  %v742_v51 = vld [vmem:[%s1437_s0 + $0x38] sm:$0xf0]  ;;  %v737_v53 = vor.u32 %v974_v46, %v734_v47 }
  0x11   :  { %616 = vmatpush.bf16.msra.mxu3 %v1030_v15  ;;  %v741_v54 = vor.u32 %v977_v49, %v740_v48  ;;  %v745_v55 = vor.u32 %v975_v50, %v742_v51  ;;  %v748_v56 = vld [vmem:[%s1437_s0 + $0x40] sm:$0xf]  ;;  %v980_v57 = vld [vmem:[%s1437_s0 + $0x4c] sm:$0xf0]  ;;  %v978_v58 = vld [vmem:[%s1437_s0 + $0x44] sm:$0xf] }
  0x12   :  { %470 = vmatpush.bf16.msra.mxu0 %v1005_v16  ;;  %v750_v59 = vld [vmem:[%s1437_s0 + $0x50] sm:$0xf0]  ;;  %v756_v60 = vld [vmem:[%s1437_s0 + $0x48] sm:$0xf]  ;;  %v981_v61 = vld [vmem:[%s1437_s0 + $0x54] sm:$0xf0]  ;;  %v749_v0 = vor.u32 %v980_v57, %v748_v56 }
  0x13   :  { %519 = vmatpush.bf16.msra.mxu1 %v1013_v17  ;;  %v979_v62 = vld [vmem:[%s1437_s0 + $0x4c] sm:$0xf]  ;;  %v758_v63 = vld [vmem:[%s1437_s0 + $0x58] sm:$0xf0]  ;;  %v753_v1 = vor.u32 %v978_v58, %v750_v59  ;;  %v757_v2 = vor.u32 %v981_v61, %v756_v60  ;;  %v764_v4 = vld [vmem:[%s1437_s0 + $0x60] sm:$0xf] }
  0x14   :  { %568 = vmatpush.bf16.msra.mxu2 %v1021_v18  ;;  %v761_v3 = vor.u32 %v979_v62, %v758_v63  ;;  %v984_v5 = vld [vmem:[%s1437_s0 + $0x6c] sm:$0xf0]  ;;  %v982_v6 = vld [vmem:[%s1437_s0 + $0x64] sm:$0xf]  ;;  %v766_v7 = vld [vmem:[%s1437_s0 + $0x70] sm:$0xf0] }
  0x15   :  { %617 = vmatpush.bf16.msra.mxu3 %v1029_v19  ;;  %v772_v8 = vld [vmem:[%s1437_s0 + $0x68] sm:$0xf]  ;;  %v985_v9 = vld [vmem:[%s1437_s0 + $0x74] sm:$0xf0]  ;;  %v983_v10 = vld [vmem:[%s1437_s0 + $0x6c] sm:$0xf]  ;;  %v765_v12 = vor.u32 %v984_v5, %v764_v4  ;;  %v769_v13 = vor.u32 %v982_v6, %v766_v7 }
  0x16   :  { %471 = vmatpush.bf16.msra.mxu0 %v1004_v20  ;;  %v774_v11 = vld [vmem:[%s1437_s0 + $0x78] sm:$0xf0]  ;;  %v773_v14 = vor.u32 %v985_v9, %v772_v8  ;;  %v780_v16 = vld [vmem:[%s1437_s0 + $0x80] sm:$0xf]  ;;  %v988_v17 = vld [vmem:[%s1437_s0 + $0x8c] sm:$0xf0] }
  0x17   :  { %520 = vmatpush.bf16.msra.mxu1 %v1012_v21  ;;  %v777_v15 = vor.u32 %v983_v10, %v774_v11  ;;  %v986_v18 = vld [vmem:[%s1437_s0 + $0x84] sm:$0xf]  ;;  %v782_v19 = vld [vmem:[%s1437_s0 + $0x90] sm:$0xf0]  ;;  %v788_v20 = vld [vmem:[%s1437_s0 + $0x88] sm:$0xf] }
  0x18   :  { %569 = vmatpush.bf16.msra.mxu2 %v1020_v22  ;;  %v989_v21 = vld [vmem:[%s1437_s0 + $0x94] sm:$0xf0]  ;;  %v987_v22 = vld [vmem:[%s1437_s0 + $0x8c] sm:$0xf]  ;;  %v804_v32 = vld [vmem:[%s1437_s0 + $0xa8] sm:$0xf] }
  0x19   :  { %618 = vmatpush.bf16.msra.mxu3 %v1028_v23  ;;  %v790_v23 = vld [vmem:[%s1437_s0 + $0x98] sm:$0xf0]  ;;  %v993_v33 = vld [vmem:[%s1437_s0 + $0xb4] sm:$0xf0]  ;;  %v991_v34 = vld [vmem:[%s1437_s0 + $0xac] sm:$0xf] }
  0x1a   :  { %472 = vmatpush.bf16.msra.mxu0 %v1003_v24  ;;  %v781_v24 = vor.u32 %v988_v17, %v780_v16  ;;  %v806_v35 = vld [vmem:[%s1437_s0 + $0xb8] sm:$0xf0]  ;;  %v805_v38 = vor.u32 %v993_v33, %v804_v32  ;;  %v820_v44 = vld [vmem:[%s1437_s0 + $0xc8] sm:$0xf]  ;;  %v997_v45 = vld [vmem:[%s1437_s0 + $0xd4] sm:$0xf0] }
  0x1b   :  { %521 = vmatpush.bf16.msra.mxu1 %v1011_v25  ;;  %v785_v25 = vor.u32 %v986_v18, %v782_v19  ;;  %v809_v39 = vor.u32 %v991_v34, %v806_v35  ;;  %v995_v46 = vld [vmem:[%s1437_s0 + $0xcc] sm:$0xf]  ;;  %v822_v47 = vld [vmem:[%s1437_s0 + $0xd8] sm:$0xf0]  ;;  %v821_v50 = vor.u32 %v997_v45, %v820_v44  ;;  %v836_v56 = vld [vmem:[%s1437_s0 + $0xe8] sm:$0xf] }
  0x1c   :  { %570 = vmatpush.bf16.msra.mxu2 %v1019_v26  ;;  %v789_v26 = vor.u32 %v989_v21, %v788_v20  ;;  %v825_v51 = vor.u32 %v995_v46, %v822_v47  ;;  %v1001_v57 = vld [vmem:[%s1437_s0 + $0xf4] sm:$0xf0]  ;;  %v999_v58 = vld [vmem:[%s1437_s0 + $0xec] sm:$0xf]  ;;  %v838_v59 = vld [vmem:[%s1437_s0 + $0xf8] sm:$0xf0] }
  0x1d   :  { %619 = vmatpush.bf16.msra.mxu3 %v1027_v27  ;;  %v793_v27 = vor.u32 %v987_v22, %v790_v23  ;;  %v837_v62 = vor.u32 %v1001_v57, %v836_v56  ;;  %v841_v63 = vor.u32 %v999_v58, %v838_v59 }
  0x1e   :  { %473 = vmatpush.bf16.msra.mxu0 %v1002_v28  ;;  %v796_v28 = vld [vmem:[%s1437_s0 + $0xa0] sm:$0xf] }
  0x1f   :  { %522 = vmatpush.bf16.msra.mxu1 %v1010_v29  ;;  %v992_v29 = vld [vmem:[%s1437_s0 + $0xac] sm:$0xf0] }
  0x20   :  { %571 = vmatpush.bf16.msra.mxu2 %v1018_v30  ;;  %v990_v30 = vld [vmem:[%s1437_s0 + $0xa4] sm:$0xf]  ;;  %v797_v36 = vor.u32 %v992_v29, %v796_v28 }
  0x21   :  { %620 = vmatpush.bf16.msra.mxu3 %v1026_v31  ;;  %474 = vmatmul.bf16.vlgmr.msra.gmra.mxu0 %v717_v40  ;;  %v798_v31 = vld [vmem:[%s1437_s0 + $0xb0] sm:$0xf0]  ;;  %v812_v40 = vld [vmem:[%s1437_s0 + $0xc0] sm:$0xf] }
  0x22   :  { %523 = vmatmul.bf16.vlgmr.msra.gmra.mxu1 %v721_v41  ;;  %v801_v37 = vor.u32 %v990_v30, %v798_v31  ;;  %v996_v41 = vld [vmem:[%s1437_s0 + $0xcc] sm:$0xf0] }
  0x23   :  { %572 = vmatmul.bf16.vlgmr.msra.gmra.mxu2 %v725_v42  ;;  %v994_v42 = vld [vmem:[%s1437_s0 + $0xc4] sm:$0xf]  ;;  %v813_v48 = vor.u32 %v996_v41, %v812_v40 }
  0x24   :  { %621 = vmatmul.bf16.vlgmr.msra.gmra.mxu3 %v729_v43  ;;  %v814_v43 = vld [vmem:[%s1437_s0 + $0xd0] sm:$0xf0] }
  0x25   :  { %v817_v49 = vor.u32 %v994_v42, %v814_v43 }
  0x31   :  { %479 = vmatmul.bf16.gmra.mxu0 %v733_v52  ;;  %v828_v52 = vld [vmem:[%s1437_s0 + $0xe0] sm:$0xf] }
  0x32   :  { %528 = vmatmul.bf16.gmra.mxu1 %v737_v53  ;;  %v1000_v53 = vld [vmem:[%s1437_s0 + $0xec] sm:$0xf0] }
  0x33   :  { %577 = vmatmul.bf16.gmra.mxu2 %v741_v54  ;;  %v998_v54 = vld [vmem:[%s1437_s0 + $0xe4] sm:$0xf]  ;;  %v829_v60 = vor.u32 %v1000_v53, %v828_v52 }
  0x34   :  { %626 = vmatmul.bf16.gmra.mxu3 %v745_v55  ;;  %v830_v55 = vld [vmem:[%s1437_s0 + $0xf0] sm:$0xf0] }
  0x35   :  { %v833_v61 = vor.u32 %v998_v54, %v830_v55 }
  0x41   :  { %484 = vmatmul.bf16.gmra.mxu0 %v749_v0  ;;  %v1393_v0 = vld [vmem:[%s1436_s2] ss:$0 sm:$0xff] }
  0x42   :  { %533 = vmatmul.bf16.gmra.mxu1 %v753_v1 }
  0x43   :  { %582 = vmatmul.bf16.gmra.mxu2 %v757_v2 }
  0x44   :  { %631 = vmatmul.bf16.gmra.mxu3 %v761_v3 }
  0x51   :  { %489 = vmatmul.bf16.gmra.mxu0 %v765_v12 }
  0x52   :  { %538 = vmatmul.bf16.gmra.mxu1 %v769_v13 }
  0x53   :  { %587 = vmatmul.bf16.gmra.mxu2 %v773_v14 }
  0x54   :  { %636 = vmatmul.bf16.gmra.mxu3 %v777_v15 }
  0x61   :  { %494 = vmatmul.bf16.gmra.mxu0 %v781_v24 }
  0x62   :  { %543 = vmatmul.bf16.gmra.mxu1 %v785_v25 }
  0x63   :  { %592 = vmatmul.bf16.gmra.mxu2 %v789_v26 }
  0x64   :  { %641 = vmatmul.bf16.gmra.mxu3 %v793_v27 }
  0x71   :  { %499 = vmatmul.bf16.gmra.mxu0 %v797_v36 }
  0x72   :  { %548 = vmatmul.bf16.gmra.mxu1 %v801_v37 }
  0x73   :  { %597 = vmatmul.bf16.gmra.mxu2 %v805_v38 }
  0x74   :  { %646 = vmatmul.bf16.gmra.mxu3 %v809_v39 }
  0x81   :  { %504 = vmatmul.bf16.gmra.mxu0 %v813_v48 }
  0x82   :  { %553 = vmatmul.bf16.gmra.mxu1 %v817_v49 }
  0x83   :  { %602 = vmatmul.bf16.gmra.mxu2 %v821_v50 }
  0x84   :  { %651 = vmatmul.bf16.gmra.mxu3 %v825_v51 }
  0x91   :  { %509 = vmatmul.bf16.gmra.mxu0 %v829_v60 }
  0x92   :  { %558 = vmatmul.bf16.gmra.mxu1 %v833_v61 }
  0x93   :  { %607 = vmatmul.bf16.gmra.mxu2 %v837_v62 }
  0x94   :  { %656 = vmatmul.bf16.gmra.mxu3 %v841_v63 }
  0x9e   :  { %v475_v1 = vpop.f32.mrf.mxu0 }
  0x9f   :  { %v524_v2 = vpop.f32.mrf.mxu1  ;;  %v476_v3 = vadd.f32 %v1393_v0, %v475_v1 }
  0xa1   :  { %v525_v6 = vadd.f32 %v524_v2, %v476_v3 }
  0xa6   :  { %v573_v4 = vpop.f32.mrf.mxu2  ;;  %v477_v7 = vpop.f32.mrf.mxu0 }
  0xa7   :  { %v622_v5 = vpop.f32.mrf.mxu3  ;;  %v526_v8 = vpop.f32.mrf.mxu1  ;;  %v478_v9 = vadd.f32 %v1393_v0, %v477_v7  ;;  %v574_v10 = vadd.f32 %v573_v4, %v525_v6 }
  0xa9   :  { %v527_v11 = vadd.f32 %v526_v8, %v478_v9  ;;  %v623_v14 = vadd.f32 %v622_v5, %v574_v10 }
  0xab   :  { %v662_v19 = vmax.f32 %v623_v14, 0.0 }
  0xae   :  { %v575_v12 = vpop.f32.mrf.mxu2  ;;  %v480_v16 = vpop.f32.mrf.mxu0 }
  0xaf   :  { %v624_v13 = vpop.f32.mrf.mxu3  ;;  %v576_v15 = vadd.f32 %v575_v12, %v527_v11  ;;  %v529_v17 = vpop.f32.mrf.mxu1  ;;  %v481_v21 = vadd.f32 %v1393_v0, %v480_v16 }
  0xb1   :  { %v625_v18 = vadd.f32 %v624_v13, %v576_v15  ;;  %v530_v25 = vadd.f32 %v529_v17, %v481_v21 }
  0xb3   :  { %v663_v20 = vmax.f32 %v625_v18, 0.0 }
  0xb5   :  { %v1037_v22 = vpack.c.bf16 %v663_v20, %v662_v19 }
  0xb6   :  { %v578_v23 = vpop.f32.mrf.mxu2  ;;  %v482_v26 = vpop.f32.mrf.mxu0 }
  0xb7   :  { %v627_v24 = vpop.f32.mrf.mxu3  ;;  %1038 = vst [vmem:[%s1438_s3] sm:$0xff] %v1037_v22   ;;  %v531_v27 = vpop.f32.mrf.mxu1  ;;  %v483_v28 = vadd.f32 %v1393_v0, %v482_v26  ;;  %v579_v29 = vadd.f32 %v578_v23, %v530_v25 }
  0xb9   :  { %v532_v30 = vadd.f32 %v531_v27, %v483_v28  ;;  %v628_v33 = vadd.f32 %v627_v24, %v579_v29 }
  0xbb   :  { %v664_v38 = vmax.f32 %v628_v33, 0.0 }
  0xbe   :  { %v580_v31 = vpop.f32.mrf.mxu2  ;;  %v485_v35 = vpop.f32.mrf.mxu0 }
  0xbf   :  { %v629_v32 = vpop.f32.mrf.mxu3  ;;  %v581_v34 = vadd.f32 %v580_v31, %v532_v30  ;;  %v534_v36 = vpop.f32.mrf.mxu1  ;;  %v486_v40 = vadd.f32 %v1393_v0, %v485_v35 }
  0xc1   :  { %v630_v37 = vadd.f32 %v629_v32, %v581_v34  ;;  %v535_v44 = vadd.f32 %v534_v36, %v486_v40 }
  0xc3   :  { %v665_v39 = vmax.f32 %v630_v37, 0.0 }
  0xc5   :  { %v1042_v41 = vpack.c.bf16 %v665_v39, %v664_v38 }
  0xc6   :  { %v583_v42 = vpop.f32.mrf.mxu2  ;;  %v487_v45 = vpop.f32.mrf.mxu0 }
  0xc7   :  { %v632_v43 = vpop.f32.mrf.mxu3  ;;  %1074 = vst [vmem:[%s1438_s3 + $0x8] sm:$0xff] %v1042_v41   ;;  %v536_v46 = vpop.f32.mrf.mxu1  ;;  %v488_v47 = vadd.f32 %v1393_v0, %v487_v45  ;;  %v584_v48 = vadd.f32 %v583_v42, %v535_v44 }
  0xc9   :  { %v537_v49 = vadd.f32 %v536_v46, %v488_v47  ;;  %v633_v52 = vadd.f32 %v632_v43, %v584_v48 }
  0xcb   :  { %v666_v57 = vmax.f32 %v633_v52, 0.0 }
  0xce   :  { %v585_v50 = vpop.f32.mrf.mxu2  ;;  %v490_v54 = vpop.f32.mrf.mxu0 }
  0xcf   :  { %v634_v51 = vpop.f32.mrf.mxu3  ;;  %v586_v53 = vadd.f32 %v585_v50, %v537_v49  ;;  %v539_v55 = vpop.f32.mrf.mxu1  ;;  %v491_v59 = vadd.f32 %v1393_v0, %v490_v54 }
  0xd1   :  { %v635_v56 = vadd.f32 %v634_v51, %v586_v53  ;;  %v540_v63 = vadd.f32 %v539_v55, %v491_v59 }
  0xd3   :  { %v667_v58 = vmax.f32 %v635_v56, 0.0 }
  0xd5   :  { %v1047_v60 = vpack.c.bf16 %v667_v58, %v666_v57 }
  0xd6   :  { %v588_v61 = vpop.f32.mrf.mxu2  ;;  %v492_v1 = vpop.f32.mrf.mxu0 }
  0xd7   :  { %v637_v62 = vpop.f32.mrf.mxu3  ;;  %1075 = vst [vmem:[%s1438_s3 + $0x10] sm:$0xff] %v1047_v60   ;;  %v541_v2 = vpop.f32.mrf.mxu1  ;;  %v493_v3 = vadd.f32 %v1393_v0, %v492_v1  ;;  %v589_v4 = vadd.f32 %v588_v61, %v540_v63 }
  0xd9   :  { %v542_v5 = vadd.f32 %v541_v2, %v493_v3  ;;  %v638_v8 = vadd.f32 %v637_v62, %v589_v4 }
  0xdb   :  { %v668_v13 = vmax.f32 %v638_v8, 0.0 }
  0xde   :  { %v590_v6 = vpop.f32.mrf.mxu2  ;;  %v495_v10 = vpop.f32.mrf.mxu0 }
  0xdf   :  { %v639_v7 = vpop.f32.mrf.mxu3  ;;  %v591_v9 = vadd.f32 %v590_v6, %v542_v5  ;;  %v544_v11 = vpop.f32.mrf.mxu1  ;;  %v496_v15 = vadd.f32 %v1393_v0, %v495_v10 }
  0xe1   :  { %v640_v12 = vadd.f32 %v639_v7, %v591_v9  ;;  %v545_v19 = vadd.f32 %v544_v11, %v496_v15 }
  0xe3   :  { %v669_v14 = vmax.f32 %v640_v12, 0.0 }
  0xe5   :  { %v1052_v16 = vpack.c.bf16 %v669_v14, %v668_v13 }
  0xe6   :  { %v593_v17 = vpop.f32.mrf.mxu2  ;;  %v497_v20 = vpop.f32.mrf.mxu0 }
  0xe7   :  { %v642_v18 = vpop.f32.mrf.mxu3  ;;  %1076 = vst [vmem:[%s1438_s3 + $0x18] sm:$0xff] %v1052_v16   ;;  %v546_v21 = vpop.f32.mrf.mxu1  ;;  %v498_v22 = vadd.f32 %v1393_v0, %v497_v20  ;;  %v594_v23 = vadd.f32 %v593_v17, %v545_v19 }
  0xe9   :  { %v547_v24 = vadd.f32 %v546_v21, %v498_v22  ;;  %v643_v27 = vadd.f32 %v642_v18, %v594_v23 }
  0xeb   :  { %v670_v32 = vmax.f32 %v643_v27, 0.0 }
  0xee   :  { %v595_v25 = vpop.f32.mrf.mxu2  ;;  %v500_v29 = vpop.f32.mrf.mxu0 }
  0xef   :  { %v644_v26 = vpop.f32.mrf.mxu3  ;;  %v596_v28 = vadd.f32 %v595_v25, %v547_v24  ;;  %v549_v30 = vpop.f32.mrf.mxu1  ;;  %v501_v34 = vadd.f32 %v1393_v0, %v500_v29 }
  0xf1   :  { %v645_v31 = vadd.f32 %v644_v26, %v596_v28  ;;  %v550_v38 = vadd.f32 %v549_v30, %v501_v34 }
  0xf3   :  { %v671_v33 = vmax.f32 %v645_v31, 0.0 }
  0xf5   :  { %v1057_v35 = vpack.c.bf16 %v671_v33, %v670_v32 }
  0xf6   :  { %v598_v36 = vpop.f32.mrf.mxu2  ;;  %v502_v39 = vpop.f32.mrf.mxu0 }
  0xf7   :  { %v647_v37 = vpop.f32.mrf.mxu3  ;;  %1077 = vst [vmem:[%s1438_s3 + $0x20] sm:$0xff] %v1057_v35   ;;  %v551_v40 = vpop.f32.mrf.mxu1  ;;  %v503_v41 = vadd.f32 %v1393_v0, %v502_v39  ;;  %v599_v42 = vadd.f32 %v598_v36, %v550_v38 }
  0xf9   :  { %v552_v43 = vadd.f32 %v551_v40, %v503_v41  ;;  %v648_v46 = vadd.f32 %v647_v37, %v599_v42 }
  0xfb   :  { %v672_v51 = vmax.f32 %v648_v46, 0.0 }
  0xfe   :  { %v600_v44 = vpop.f32.mrf.mxu2  ;;  %v505_v48 = vpop.f32.mrf.mxu0 }
  0xff   :  { %v649_v45 = vpop.f32.mrf.mxu3  ;;  %v601_v47 = vadd.f32 %v600_v44, %v552_v43  ;;  %v554_v49 = vpop.f32.mrf.mxu1  ;;  %v506_v53 = vadd.f32 %v1393_v0, %v505_v48 }
 0x101   :  { %v650_v50 = vadd.f32 %v649_v45, %v601_v47  ;;  %v555_v57 = vadd.f32 %v554_v49, %v506_v53 }
 0x103   :  { %v673_v52 = vmax.f32 %v650_v50, 0.0 }
 0x105   :  { %v1062_v54 = vpack.c.bf16 %v673_v52, %v672_v51 }
 0x106   :  { %v603_v55 = vpop.f32.mrf.mxu2  ;;  %v507_v58 = vpop.f32.mrf.mxu0 }
 0x107   :  { %v652_v56 = vpop.f32.mrf.mxu3  ;;  %1078 = vst [vmem:[%s1438_s3 + $0x28] sm:$0xff] %v1062_v54   ;;  %v556_v59 = vpop.f32.mrf.mxu1  ;;  %v508_v60 = vadd.f32 %v1393_v0, %v507_v58  ;;  %v604_v61 = vadd.f32 %v603_v55, %v555_v57 }
 0x109   :  { %v557_v62 = vadd.f32 %v556_v59, %v508_v60  ;;  %v653_v2 = vadd.f32 %v652_v56, %v604_v61 }
 0x10b   :  { %v674_v7 = vmax.f32 %v653_v2, 0.0 }
 0x10e   :  { %v605_v63 = vpop.f32.mrf.mxu2  ;;  %v510_v4 = vpop.f32.mrf.mxu0 }
 0x10f   :  { %v654_v1 = vpop.f32.mrf.mxu3  ;;  %v606_v3 = vadd.f32 %v605_v63, %v557_v62  ;;  %v559_v6 = vpop.f32.mrf.mxu1  ;;  %v511_v9 = vadd.f32 %v1393_v0, %v510_v4 }
 0x111   :  { %v655_v5 = vadd.f32 %v654_v1, %v606_v3  ;;  %v560_v13 = vadd.f32 %v559_v6, %v511_v9 }
 0x113   :  { %v675_v8 = vmax.f32 %v655_v5, 0.0 }
 0x115   :  { %v1067_v10 = vpack.c.bf16 %v675_v8, %v674_v7 }
 0x116   :  { %v608_v11 = vpop.f32.mrf.mxu2  ;;  %v512_v14 = vpop.f32.mrf.mxu0 }
 0x117   :  { %v657_v12 = vpop.f32.mrf.mxu3  ;;  %1079 = vst [vmem:[%s1438_s3 + $0x30] sm:$0xff] %v1067_v10   ;;  %v513_v15 = vadd.f32 %v1393_v0, %v512_v14  ;;  %v609_v16 = vadd.f32 %v608_v11, %v560_v13  ;;  %v561_v17 = vpop.f32.mrf.mxu1 }
 0x119   :  { %v562_v18 = vadd.f32 %v561_v17, %v513_v15  ;;  %v658_v20 = vadd.f32 %v657_v12, %v609_v16 }
 0x11b   :  { %v676_v24 = vmax.f32 %v658_v20, 0.0 }
 0x11e   :  { %v610_v19 = vpop.f32.mrf.mxu2 }
 0x11f   :  { %v611_v21 = vadd.f32 %v610_v19, %v562_v18  ;;  %v659_v22 = vpop.f32.mrf.mxu3 }
 0x121   :  { %v660_v23 = vadd.f32 %v659_v22, %v611_v21 }
 0x123   :  { %v677_v25 = vmax.f32 %v660_v23, 0.0 }
 0x125   :  { %v1072_v26 = vpack.c.bf16 %v677_v25, %v676_v24 }
 0x127   :  { %1080 = vst [vmem:[%s1438_s3 + $0x38] sm:$0xff] %v1072_v26  }

// kernel: decoder_burgess_forward.8
= control target key start
LH: loop header
LB: loop body
LE: loop exit
PB: predicated region body
PF: predicated region fallthrough
CT: control target
= control target key end

     0   :  { %s1954_s12 = smov 0   ;;  %s2256_s0 = inlined_call_operand.vmem [shape: bf16[512,512], index: 0, kind: input, shape index: {}]   ;;  %s2257_s1 = inlined_call_operand.vmem [shape: bf16[512,128], index: 1, kind: input, shape index: {}]   ;;  %s2258_s2 = inlined_call_operand.vmem [shape: f32[1,128], index: 2, kind: input, shape index: {}]   ;;  %s2259_s3 = inlined_call_operand.vmem [shape: bf16[512,128], index: 3, kind: output, shape index: {}]  }
   0x1 LB: > { %s1329_s13 = sadd.s32 4294967295, %s1932_s12   ;;  %p1333_p0 = scmp.ge.s32.totalorder %s1932_s12, 1  ;;  %s1932_s12 = sphi %s1954_s12, %s13_s12  }
   0x2   : > { %p139_p1 = scmp.lt.s32.totalorder %s1932_s12, 3 }
   0x4   : > { %p140_p2 = pnand %p1333_p0, %p139_p1 }
   0x5   : > { %s1334_s11 = sshll.u32 (!%p140_p2), %s1329_s13, 5 }
   0x6   : > { %143 = sbr.rel (%p140_p2) target bundleno = 434 (0x1b2), region = 32  ;;  %p165_p3 = scmp.lt.s32.totalorder (!%p140_p2), %s1334_s11, 63 }
   0xb   : > { %v1797_v0 = vld [vmem:[%s2257_s1 + $0x38] sm:$0xff]  ;;  %v1796_v4 = vld [vmem:[%s2257_s1 + $0x30] sm:$0xff]  ;;  %v1795_v8 = vld [vmem:[%s2257_s1 + $0x28] sm:$0xff]  ;;  %s2261_s11 = smov (!%p165_p3, %s1334_s11), 63 }
   0xc   : > { %v1805_v1 = vld [vmem:[%s2257_s1 + $0x78] sm:$0xff]  ;;  %821 = vmatpush.bf16.msra.mxu0 %v1797_v0  ;;  %v1804_v5 = vld [vmem:[%s2257_s1 + $0x70] sm:$0xff]  ;;  %v1803_v9 = vld [vmem:[%s2257_s1 + $0x68] sm:$0xff]  ;;  %s1725_s10 = sshll.u32 %s2261_s11, 4  ;;  %s1338_s7 = sshll.u32 %s2261_s11, 2 }
   0xd   : > { %v1813_v2 = vld [vmem:[%s2257_s1 + $0xb8] sm:$0xff]  ;;  %910 = vmatpush.bf16.msra.mxu1 %v1805_v1  ;;  %v1812_v6 = vld [vmem:[%s2257_s1 + $0xb0] sm:$0xff]  ;;  %v1811_v10 = vld [vmem:[%s2257_s1 + $0xa8] sm:$0xff]  ;;  %s2046_s20 = scalar_lea.vmem %s2256_s0, %s1725_s10  ;;  %s2158_s10 = scalar_lea.vmem %s2259_s3, %s1338_s7 }
   0xe   : > { %v1821_v3 = vld [vmem:[%s2257_s1 + $0xf8] sm:$0xff]  ;;  %999 = vmatpush.bf16.msra.mxu2 %v1813_v2  ;;  %v1820_v7 = vld [vmem:[%s2257_s1 + $0xf0] sm:$0xff]  ;;  %v1819_v11 = vld [vmem:[%s2257_s1 + $0xe8] sm:$0xff] }
   0xf   : > { %1088 = vmatpush.bf16.msra.mxu3 %v1821_v3  ;;  %v1794_v12 = vld [vmem:[%s2257_s1 + $0x20] sm:$0xff]  ;;  %v1793_v16 = vld [vmem:[%s2257_s1 + $0x18] sm:$0xff]  ;;  %v1792_v20 = vld [vmem:[%s2257_s1 + $0x10] sm:$0xff] }
  0x10   : > { %822 = vmatpush.bf16.msra.mxu0 %v1796_v4  ;;  %v1802_v13 = vld [vmem:[%s2257_s1 + $0x60] sm:$0xff]  ;;  %v1801_v17 = vld [vmem:[%s2257_s1 + $0x58] sm:$0xff]  ;;  %v1800_v21 = vld [vmem:[%s2257_s1 + $0x50] sm:$0xff] }
  0x11   : > { %911 = vmatpush.bf16.msra.mxu1 %v1804_v5  ;;  %v1810_v14 = vld [vmem:[%s2257_s1 + $0xa0] sm:$0xff]  ;;  %v1809_v18 = vld [vmem:[%s2257_s1 + $0x98] sm:$0xff]  ;;  %v1808_v22 = vld [vmem:[%s2257_s1 + $0x90] sm:$0xff] }
  0x12   : > { %1000 = vmatpush.bf16.msra.mxu2 %v1812_v6  ;;  %v1818_v15 = vld [vmem:[%s2257_s1 + $0xe0] sm:$0xff]  ;;  %v1817_v19 = vld [vmem:[%s2257_s1 + $0xd8] sm:$0xff]  ;;  %v1816_v23 = vld [vmem:[%s2257_s1 + $0xd0] sm:$0xff] }
  0x13   : > { %1089 = vmatpush.bf16.msra.mxu3 %v1820_v7  ;;  %v1791_v24 = vld [vmem:[%s2257_s1 + $0x8] sm:$0xff]  ;;  %v1790_v28 = vld [vmem:[%s2257_s1] sm:$0xff]  ;;  %v1728_v33 = vld [vmem:[%s2046_s20 + $0xc] sm:$0xf0] }
  0x14   : > { %823 = vmatpush.bf16.msra.mxu0 %v1795_v8  ;;  %v1799_v25 = vld [vmem:[%s2257_s1 + $0x48] sm:$0xff]  ;;  %v1798_v29 = vld [vmem:[%s2257_s1 + $0x40] sm:$0xff]  ;;  %v1343_v35 = vld [vmem:[%s2046_s20 + $0x10] sm:$0xf0] }
  0x15   : > { %912 = vmatpush.bf16.msra.mxu1 %v1803_v9  ;;  %v1807_v26 = vld [vmem:[%s2257_s1 + $0x88] sm:$0xff]  ;;  %v1806_v30 = vld [vmem:[%s2257_s1 + $0x80] sm:$0xff]  ;;  %v1729_v37 = vld [vmem:[%s2046_s20 + $0x14] sm:$0xf0] }
  0x16   : > { %1001 = vmatpush.bf16.msra.mxu2 %v1811_v10  ;;  %v1815_v27 = vld [vmem:[%s2257_s1 + $0xc8] sm:$0xff]  ;;  %v1814_v31 = vld [vmem:[%s2257_s1 + $0xc0] sm:$0xff]  ;;  %v1351_v39 = vld [vmem:[%s2046_s20 + $0x18] sm:$0xf0] }
  0x17   : > { %1090 = vmatpush.bf16.msra.mxu3 %v1819_v11  ;;  %v1341_v32 = vld [vmem:[%s2046_s20] sm:$0xf]  ;;  %v1726_v34 = vld [vmem:[%s2046_s20 + $0x4] sm:$0xf]  ;;  %v1349_v36 = vld [vmem:[%s2046_s20 + $0x8] sm:$0xf] }
  0x18   : > { %824 = vmatpush.bf16.msra.mxu0 %v1794_v12  ;;  %v1727_v38 = vld [vmem:[%s2046_s20 + $0xc] sm:$0xf]  ;;  %v1342_v40 = vor.u32 %v1728_v33, %v1341_v32  ;;  %v1346_v41 = vor.u32 %v1726_v34, %v1343_v35  ;;  %v1350_v42 = vor.u32 %v1729_v37, %v1349_v36  ;;  %v1357_v44 = vld [vmem:[%s2046_s20 + $0x20] sm:$0xf]  ;;  %v1732_v45 = vld [vmem:[%s2046_s20 + $0x2c] sm:$0xf0] }
  0x19   : > { %913 = vmatpush.bf16.msra.mxu1 %v1802_v13  ;;  %v1354_v43 = vor.u32 %v1727_v38, %v1351_v39  ;;  %v1730_v46 = vld [vmem:[%s2046_s20 + $0x24] sm:$0xf]  ;;  %v1359_v47 = vld [vmem:[%s2046_s20 + $0x30] sm:$0xf0]  ;;  %v1365_v48 = vld [vmem:[%s2046_s20 + $0x28] sm:$0xf]  ;;  %v1358_v52 = vor.u32 %v1732_v45, %v1357_v44 }
  0x1a   : > { %1002 = vmatpush.bf16.msra.mxu2 %v1810_v14  ;;  %v1733_v49 = vld [vmem:[%s2046_s20 + $0x34] sm:$0xf0]  ;;  %v1731_v50 = vld [vmem:[%s2046_s20 + $0x2c] sm:$0xf]  ;;  %v1367_v51 = vld [vmem:[%s2046_s20 + $0x38] sm:$0xf0]  ;;  %v1362_v53 = vor.u32 %v1730_v46, %v1359_v47 }
  0x1b   : > { %1091 = vmatpush.bf16.msra.mxu3 %v1818_v15  ;;  %v1366_v54 = vor.u32 %v1733_v49, %v1365_v48  ;;  %v1370_v55 = vor.u32 %v1731_v50, %v1367_v51  ;;  %v1373_v56 = vld [vmem:[%s2046_s20 + $0x40] sm:$0xf]  ;;  %v1736_v57 = vld [vmem:[%s2046_s20 + $0x4c] sm:$0xf0]  ;;  %v1734_v58 = vld [vmem:[%s2046_s20 + $0x44] sm:$0xf] }
  0x1c   : > { %825 = vmatpush.bf16.msra.mxu0 %v1793_v16  ;;  %v1375_v59 = vld [vmem:[%s2046_s20 + $0x50] sm:$0xf0]  ;;  %v1381_v60 = vld [vmem:[%s2046_s20 + $0x48] sm:$0xf]  ;;  %v1737_v61 = vld [vmem:[%s2046_s20 + $0x54] sm:$0xf0]  ;;  %v1374_v0 = vor.u32 %v1736_v57, %v1373_v56 }
  0x1d   : > { %914 = vmatpush.bf16.msra.mxu1 %v1801_v17  ;;  %v1735_v62 = vld [vmem:[%s2046_s20 + $0x4c] sm:$0xf]  ;;  %v1383_v63 = vld [vmem:[%s2046_s20 + $0x58] sm:$0xf0]  ;;  %v1378_v1 = vor.u32 %v1734_v58, %v1375_v59  ;;  %v1382_v2 = vor.u32 %v1737_v61, %v1381_v60  ;;  %v1389_v4 = vld [vmem:[%s2046_s20 + $0x60] sm:$0xf] }
  0x1e   : > { %1003 = vmatpush.bf16.msra.mxu2 %v1809_v18  ;;  %v1386_v3 = vor.u32 %v1735_v62, %v1383_v63  ;;  %v1740_v5 = vld [vmem:[%s2046_s20 + $0x6c] sm:$0xf0]  ;;  %v1738_v6 = vld [vmem:[%s2046_s20 + $0x64] sm:$0xf]  ;;  %v1391_v7 = vld [vmem:[%s2046_s20 + $0x70] sm:$0xf0] }
  0x1f   : > { %1092 = vmatpush.bf16.msra.mxu3 %v1817_v19  ;;  %v1397_v8 = vld [vmem:[%s2046_s20 + $0x68] sm:$0xf]  ;;  %v1741_v9 = vld [vmem:[%s2046_s20 + $0x74] sm:$0xf0]  ;;  %v1739_v10 = vld [vmem:[%s2046_s20 + $0x6c] sm:$0xf]  ;;  %v1390_v12 = vor.u32 %v1740_v5, %v1389_v4  ;;  %v1394_v13 = vor.u32 %v1738_v6, %v1391_v7 }
  0x20   : > { %826 = vmatpush.bf16.msra.mxu0 %v1792_v20  ;;  %v1399_v11 = vld [vmem:[%s2046_s20 + $0x78] sm:$0xf0]  ;;  %v1398_v14 = vor.u32 %v1741_v9, %v1397_v8  ;;  %v1405_v16 = vld [vmem:[%s2046_s20 + $0x80] sm:$0xf]  ;;  %v1744_v17 = vld [vmem:[%s2046_s20 + $0x8c] sm:$0xf0] }
  0x21   : > { %915 = vmatpush.bf16.msra.mxu1 %v1800_v21  ;;  %v1402_v15 = vor.u32 %v1739_v10, %v1399_v11  ;;  %v1742_v18 = vld [vmem:[%s2046_s20 + $0x84] sm:$0xf]  ;;  %v1407_v19 = vld [vmem:[%s2046_s20 + $0x90] sm:$0xf0]  ;;  %v1413_v20 = vld [vmem:[%s2046_s20 + $0x88] sm:$0xf] }
  0x22   : > { %1004 = vmatpush.bf16.msra.mxu2 %v1808_v22  ;;  %v1745_v21 = vld [vmem:[%s2046_s20 + $0x94] sm:$0xf0]  ;;  %v1743_v22 = vld [vmem:[%s2046_s20 + $0x8c] sm:$0xf]  ;;  %v1429_v32 = vld [vmem:[%s2046_s20 + $0xa8] sm:$0xf] }
  0x23   : > { %1093 = vmatpush.bf16.msra.mxu3 %v1816_v23  ;;  %v1415_v23 = vld [vmem:[%s2046_s20 + $0x98] sm:$0xf0]  ;;  %v1749_v33 = vld [vmem:[%s2046_s20 + $0xb4] sm:$0xf0]  ;;  %v1747_v34 = vld [vmem:[%s2046_s20 + $0xac] sm:$0xf] }
  0x24   : > { %827 = vmatpush.bf16.msra.mxu0 %v1791_v24  ;;  %v1406_v24 = vor.u32 %v1744_v17, %v1405_v16  ;;  %v1431_v35 = vld [vmem:[%s2046_s20 + $0xb8] sm:$0xf0]  ;;  %v1430_v38 = vor.u32 %v1749_v33, %v1429_v32  ;;  %v1445_v44 = vld [vmem:[%s2046_s20 + $0xc8] sm:$0xf]  ;;  %v1753_v45 = vld [vmem:[%s2046_s20 + $0xd4] sm:$0xf0] }
  0x25   : > { %916 = vmatpush.bf16.msra.mxu1 %v1799_v25  ;;  %v1410_v25 = vor.u32 %v1742_v18, %v1407_v19  ;;  %v1434_v39 = vor.u32 %v1747_v34, %v1431_v35  ;;  %v1751_v46 = vld [vmem:[%s2046_s20 + $0xcc] sm:$0xf]  ;;  %v1447_v47 = vld [vmem:[%s2046_s20 + $0xd8] sm:$0xf0]  ;;  %v1446_v50 = vor.u32 %v1753_v45, %v1445_v44  ;;  %v1461_v56 = vld [vmem:[%s2046_s20 + $0xe8] sm:$0xf] }
  0x26   : > { %1005 = vmatpush.bf16.msra.mxu2 %v1807_v26  ;;  %v1414_v26 = vor.u32 %v1745_v21, %v1413_v20  ;;  %v1450_v51 = vor.u32 %v1751_v46, %v1447_v47  ;;  %v1757_v57 = vld [vmem:[%s2046_s20 + $0xf4] sm:$0xf0]  ;;  %v1755_v58 = vld [vmem:[%s2046_s20 + $0xec] sm:$0xf]  ;;  %v1463_v59 = vld [vmem:[%s2046_s20 + $0xf8] sm:$0xf0] }
  0x27   : > { %1094 = vmatpush.bf16.msra.mxu3 %v1815_v27  ;;  %v1418_v27 = vor.u32 %v1743_v22, %v1415_v23  ;;  %v1462_v62 = vor.u32 %v1757_v57, %v1461_v56  ;;  %v1466_v63 = vor.u32 %v1755_v58, %v1463_v59  ;;  %v1477_v4 = vld [vmem:[%s2046_s20 + $0x108] sm:$0xf]  ;;  %v1761_v5 = vld [vmem:[%s2046_s20 + $0x114] sm:$0xf0]  ;;  %v1759_v6 = vld [vmem:[%s2046_s20 + $0x10c] sm:$0xf] }
  0x28   : > { %828 = vmatpush.bf16.msra.mxu0 %v1790_v28  ;;  %v1421_v28 = vld [vmem:[%s2046_s20 + $0xa0] sm:$0xf]  ;;  %v1479_v7 = vld [vmem:[%s2046_s20 + $0x118] sm:$0xf0]  ;;  %v1764_v23 = vld [vmem:[%s2046_s20 + $0x12c] sm:$0xf0] }
  0x29   : > { %917 = vmatpush.bf16.msra.mxu1 %v1798_v29  ;;  %v1748_v29 = vld [vmem:[%s2046_s20 + $0xac] sm:$0xf0]  ;;  %v2141_v10 = vld [vmem:[%s2258_s2] ss:$0 sm:$0xff]  ;;  %v1766_v56 = vld [vmem:[%s2046_s20 + $0x144] sm:$0xf] }
  0x2a   : > { %1006 = vmatpush.bf16.msra.mxu2 %v1806_v30  ;;  %v1746_v30 = vld [vmem:[%s2046_s20 + $0xa4] sm:$0xf]  ;;  %v1422_v36 = vor.u32 %v1748_v29, %v1421_v28  ;;  %v1485_v22 = vld [vmem:[%s2046_s20 + $0x120] sm:$0xf]  ;;  %v1765_v28 = vld [vmem:[%s2046_s20 + $0x134] sm:$0xf0] }
  0x2b   : > { %1095 = vmatpush.bf16.msra.mxu3 %v1814_v31  ;;  %829 = vmatmul.bf16.vlgmr.msra.gmra.mxu0 %v1342_v40  ;;  %v1423_v31 = vld [vmem:[%s2046_s20 + $0xb0] sm:$0xf0]  ;;  %v1437_v40 = vld [vmem:[%s2046_s20 + $0xc0] sm:$0xf]  ;;  %v1763_v29 = vld [vmem:[%s2046_s20 + $0x12c] sm:$0xf]  ;;  %v1486_v34 = vor.u32 %v1764_v23, %v1485_v22 }
  0x2c   : > { %918 = vmatmul.bf16.vlgmr.msra.gmra.mxu1 %v1346_v41  ;;  %v1426_v37 = vor.u32 %v1746_v30, %v1423_v31  ;;  %v1752_v41 = vld [vmem:[%s2046_s20 + $0xcc] sm:$0xf0]  ;;  %v1495_v30 = vld [vmem:[%s2046_s20 + $0x138] sm:$0xf0]  ;;  %v1503_v57 = vld [vmem:[%s2046_s20 + $0x150] sm:$0xf0] }
  0x2d   : > { %1007 = vmatmul.bf16.vlgmr.msra.gmra.mxu2 %v1350_v42  ;;  %v1750_v42 = vld [vmem:[%s2046_s20 + $0xc4] sm:$0xf]  ;;  %v1438_v48 = vor.u32 %v1752_v41, %v1437_v40  ;;  %v1498_v41 = vor.u32 %v1763_v29, %v1495_v30  ;;  %v1509_v58 = vld [vmem:[%s2046_s20 + $0x148] sm:$0xf]  ;;  %v1769_v59 = vld [vmem:[%s2046_s20 + $0x154] sm:$0xf0] }
  0x2e   : > { %1096 = vmatmul.bf16.vlgmr.msra.gmra.mxu3 %v1354_v43  ;;  %v1439_v43 = vld [vmem:[%s2046_s20 + $0xd0] sm:$0xf0]  ;;  %v1772_v22 = vld [vmem:[%s2046_s20 + $0x16c] sm:$0xf0]  ;;  %v1527_v29 = vld [vmem:[%s2046_s20 + $0x178] sm:$0xf0] }
  0x2f   : > { %v1442_v49 = vor.u32 %v1750_v42, %v1439_v43 }
  0x3b   : > { %834 = vmatmul.bf16.gmra.mxu0 %v1358_v52  ;;  %v1453_v52 = vld [vmem:[%s2046_s20 + $0xe0] sm:$0xf] }
  0x3c   : > { %923 = vmatmul.bf16.gmra.mxu1 %v1362_v53  ;;  %v1756_v53 = vld [vmem:[%s2046_s20 + $0xec] sm:$0xf0] }
  0x3d   : > { %1012 = vmatmul.bf16.gmra.mxu2 %v1366_v54  ;;  %v1754_v54 = vld [vmem:[%s2046_s20 + $0xe4] sm:$0xf]  ;;  %v1454_v60 = vor.u32 %v1756_v53, %v1453_v52  ;;  %v1501_v53 = vld [vmem:[%s2046_s20 + $0x140] sm:$0xf] }
  0x3e   : > { %1101 = vmatmul.bf16.gmra.mxu3 %v1370_v55  ;;  %v1455_v55 = vld [vmem:[%s2046_s20 + $0xf0] sm:$0xf0] }
  0x3f   : > { %v1458_v61 = vor.u32 %v1754_v54, %v1455_v55  ;;  %v1768_v54 = vld [vmem:[%s2046_s20 + $0x14c] sm:$0xf0] }
  0x4b   : > { %839 = vmatmul.bf16.gmra.mxu0 %v1374_v0  ;;  %v1469_v0 = vld [vmem:[%s2046_s20 + $0x100] sm:$0xf] }
  0x4c   : > { %928 = vmatmul.bf16.gmra.mxu1 %v1378_v1  ;;  %v1760_v1 = vld [vmem:[%s2046_s20 + $0x10c] sm:$0xf0] }
  0x4d   : > { %1017 = vmatmul.bf16.gmra.mxu2 %v1382_v2  ;;  %v1758_v2 = vld [vmem:[%s2046_s20 + $0x104] sm:$0xf]  ;;  %v1470_v8 = vor.u32 %v1760_v1, %v1469_v0  ;;  %v1502_v1 = vor.u32 %v1768_v54, %v1501_v53  ;;  %v1776_v53 = vld [vmem:[%s2046_s20 + $0x18c] sm:$0xf0] }
  0x4e   : > { %1106 = vmatmul.bf16.gmra.mxu3 %v1386_v3  ;;  %v1471_v3 = vld [vmem:[%s2046_s20 + $0x110] sm:$0xf0] }
  0x4f   : > { %v1474_v9 = vor.u32 %v1758_v2, %v1471_v3  ;;  %v1506_v2 = vor.u32 %v1766_v56, %v1503_v57  ;;  %v1535_v56 = vld [vmem:[%s2046_s20 + $0x190] sm:$0xf0]  ;;  %v1541_v57 = vld [vmem:[%s2046_s20 + $0x188] sm:$0xf] }
  0x5b   : > { %844 = vmatmul.bf16.gmra.mxu0 %v1390_v12 }
  0x5c   : > { %933 = vmatmul.bf16.gmra.mxu1 %v1394_v13  ;;  %v1478_v13 = vor.u32 %v1761_v5, %v1477_v4 }
  0x5d   : > { %1022 = vmatmul.bf16.gmra.mxu2 %v1398_v14  ;;  %v1482_v14 = vor.u32 %v1759_v6, %v1479_v7  ;;  %v1510_v7 = vor.u32 %v1769_v59, %v1509_v58  ;;  %v1777_v58 = vld [vmem:[%s2046_s20 + $0x194] sm:$0xf0]  ;;  %v1775_v59 = vld [vmem:[%s2046_s20 + $0x18c] sm:$0xf] }
  0x5e   : > { %1111 = vmatmul.bf16.gmra.mxu3 %v1402_v15 }
  0x6b   : > { %849 = vmatmul.bf16.gmra.mxu0 %v1406_v24 }
  0x6c   : > { %938 = vmatmul.bf16.gmra.mxu1 %v1410_v25  ;;  %v1762_v25 = vld [vmem:[%s2046_s20 + $0x124] sm:$0xf] }
  0x6d   : > { %1027 = vmatmul.bf16.gmra.mxu2 %v1414_v26  ;;  %v1487_v26 = vld [vmem:[%s2046_s20 + $0x130] sm:$0xf0] }
  0x6e   : > { %1116 = vmatmul.bf16.gmra.mxu3 %v1418_v27  ;;  %v1493_v27 = vld [vmem:[%s2046_s20 + $0x128] sm:$0xf]  ;;  %v1490_v35 = vor.u32 %v1762_v25, %v1487_v26  ;;  %v1519_v25 = vld [vmem:[%s2046_s20 + $0x170] sm:$0xf0] }
  0x6f   : > { %v1494_v40 = vor.u32 %v1765_v28, %v1493_v27  ;;  %v1525_v26 = vld [vmem:[%s2046_s20 + $0x168] sm:$0xf]  ;;  %v1773_v27 = vld [vmem:[%s2046_s20 + $0x174] sm:$0xf0]  ;;  %v1771_v28 = vld [vmem:[%s2046_s20 + $0x16c] sm:$0xf] }
  0x7b   : > { %854 = vmatmul.bf16.gmra.mxu0 %v1422_v36 }
  0x7c   : > { %943 = vmatmul.bf16.gmra.mxu1 %v1426_v37 }
  0x7d   : > { %1032 = vmatmul.bf16.gmra.mxu2 %v1430_v38 }
  0x7e   : > { %1121 = vmatmul.bf16.gmra.mxu3 %v1434_v39 }
  0x8b   : > { %859 = vmatmul.bf16.gmra.mxu0 %v1438_v48 }
  0x8c   : > { %948 = vmatmul.bf16.gmra.mxu1 %v1442_v49 }
  0x8d   : > { %1037 = vmatmul.bf16.gmra.mxu2 %v1446_v50 }
  0x8e   : > { %1126 = vmatmul.bf16.gmra.mxu3 %v1450_v51 }
  0x9b   : > { %864 = vmatmul.bf16.gmra.mxu0 %v1454_v60  ;;  %v1767_v60 = vld [vmem:[%s2046_s20 + $0x14c] sm:$0xf] }
  0x9c   : > { %953 = vmatmul.bf16.gmra.mxu1 %v1458_v61  ;;  %v1511_v61 = vld [vmem:[%s2046_s20 + $0x158] sm:$0xf0] }
  0x9d   : > { %1042 = vmatmul.bf16.gmra.mxu2 %v1462_v62 }
  0x9e   : > { %1131 = vmatmul.bf16.gmra.mxu3 %v1466_v63 }
  0xa8   : > { %v830_v11 = vpop.f32.mrf.mxu0 }
  0xa9   : > { %v919_v12 = vpop.f32.mrf.mxu1  ;;  %v831_v15 = vadd.f32 %v2141_v10, %v830_v11 }
  0xab   : > { %869 = vmatmul.bf16.gmra.mxu0 %v1470_v8  ;;  %v920_v18 = vadd.f32 %v919_v12, %v831_v15  ;;  %v1514_v8 = vor.u32 %v1767_v60, %v1511_v61  ;;  %v1543_v60 = vld [vmem:[%s2046_s20 + $0x198] sm:$0xf0] }
  0xac   : > { %958 = vmatmul.bf16.gmra.mxu1 %v1474_v9 }
  0xad   : > { %1047 = vmatmul.bf16.gmra.mxu2 %v1478_v13 }
  0xae   : > { %1136 = vmatmul.bf16.gmra.mxu3 %v1482_v14 }
  0xb0   : > { %v1008_v16 = vpop.f32.mrf.mxu2  ;;  %v832_v19 = vpop.f32.mrf.mxu0 }
  0xb1   : > { %v1097_v17 = vpop.f32.mrf.mxu3  ;;  %v921_v20 = vpop.f32.mrf.mxu1  ;;  %v833_v21 = vadd.f32 %v2141_v10, %v832_v19  ;;  %v1009_v24 = vadd.f32 %v1008_v16, %v920_v18 }
  0xb3   : > { %v922_v31 = vadd.f32 %v921_v20, %v833_v21  ;;  %v1098_v36 = vadd.f32 %v1097_v17, %v1009_v24  ;;  %v1517_v21 = vld [vmem:[%s2046_s20 + $0x160] sm:$0xf]  ;;  %v1770_v24 = vld [vmem:[%s2046_s20 + $0x164] sm:$0xf] }
  0xb5   : > { %v1177_v43 = vmax.f32 %v1098_v36, 0.0 }
  0xb8   : > { %v1010_v32 = vpop.f32.mrf.mxu2  ;;  %v835_v38 = vpop.f32.mrf.mxu0 }
  0xb9   : > { %v1099_v33 = vpop.f32.mrf.mxu3  ;;  %v1011_v37 = vadd.f32 %v1010_v32, %v922_v31  ;;  %v924_v39 = vpop.f32.mrf.mxu1  ;;  %v836_v45 = vadd.f32 %v2141_v10, %v835_v38 }
  0xbb   : > { %v1100_v42 = vadd.f32 %v1099_v33, %v1011_v37  ;;  %874 = vmatmul.bf16.gmra.mxu0 %v1486_v34  ;;  %v925_v49 = vadd.f32 %v924_v39, %v836_v45  ;;  %v1518_v33 = vor.u32 %v1772_v22, %v1517_v21  ;;  %v1522_v34 = vor.u32 %v1770_v24, %v1519_v25  ;;  %v1780_v21 = vld [vmem:[%s2046_s20 + $0x1ac] sm:$0xf0]  ;;  %v1551_v24 = vld [vmem:[%s2046_s20 + $0x1b0] sm:$0xf0]  ;;  %v1557_v25 = vld [vmem:[%s2046_s20 + $0x1a8] sm:$0xf] }
  0xbc   : > { %963 = vmatmul.bf16.gmra.mxu1 %v1490_v35  ;;  %v1526_v39 = vor.u32 %v1773_v27, %v1525_v26  ;;  %v1781_v26 = vld [vmem:[%s2046_s20 + $0x1b4] sm:$0xf0]  ;;  %v1779_v27 = vld [vmem:[%s2046_s20 + $0x1ac] sm:$0xf] }
  0xbd   : > { %v1178_v44 = vmax.f32 %v1100_v42, 0.0  ;;  %1052 = vmatmul.bf16.gmra.mxu2 %v1494_v40  ;;  %v1530_v40 = vor.u32 %v1771_v28, %v1527_v29  ;;  %v1559_v28 = vld [vmem:[%s2046_s20 + $0x1b8] sm:$0xf0] }
  0xbe   : > { %1141 = vmatmul.bf16.gmra.mxu3 %v1498_v41 }
  0xbf   : > { %v1825_v46 = vpack.c.bf16 %v1178_v44, %v1177_v43 }
  0xc0   : > { %v1013_v47 = vpop.f32.mrf.mxu2  ;;  %v837_v50 = vpop.f32.mrf.mxu0 }
  0xc1   : > { %v1102_v48 = vpop.f32.mrf.mxu3  ;;  %1826 = vst [vmem:[%s2158_s10] sm:$0xff] %v1825_v46   ;;  %v926_v51 = vpop.f32.mrf.mxu1  ;;  %v838_v52 = vadd.f32 %v2141_v10, %v837_v50  ;;  %v1014_v55 = vadd.f32 %v1013_v47, %v925_v49 }
  0xc3   : > { %v927_v62 = vadd.f32 %v926_v51, %v838_v52  ;;  %v1103_v3 = vadd.f32 %v1102_v48, %v1014_v55  ;;  %v1533_v52 = vld [vmem:[%s2046_s20 + $0x180] sm:$0xf]  ;;  %v1774_v55 = vld [vmem:[%s2046_s20 + $0x184] sm:$0xf] }
  0xc5   : > { %v1179_v11 = vmax.f32 %v1103_v3, 0.0 }
  0xc8   : > { %v1015_v63 = vpop.f32.mrf.mxu2  ;;  %v840_v5 = vpop.f32.mrf.mxu0 }
  0xc9   : > { %v1104_v0 = vpop.f32.mrf.mxu3  ;;  %v1016_v4 = vadd.f32 %v1015_v63, %v927_v62  ;;  %v929_v6 = vpop.f32.mrf.mxu1  ;;  %v841_v13 = vadd.f32 %v2141_v10, %v840_v5 }
  0xcb   : > { %v1105_v9 = vadd.f32 %v1104_v0, %v1016_v4  ;;  %879 = vmatmul.bf16.gmra.mxu0 %v1502_v1  ;;  %v930_v17 = vadd.f32 %v929_v6, %v841_v13  ;;  %v1534_v0 = vor.u32 %v1776_v53, %v1533_v52  ;;  %v1538_v1 = vor.u32 %v1774_v55, %v1535_v56  ;;  %v1784_v52 = vld [vmem:[%s2046_s20 + $0x1cc] sm:$0xf0]  ;;  %v1567_v55 = vld [vmem:[%s2046_s20 + $0x1d0] sm:$0xf0]  ;;  %v1573_v56 = vld [vmem:[%s2046_s20 + $0x1c8] sm:$0xf] }
  0xcc   : > { %968 = vmatmul.bf16.gmra.mxu1 %v1506_v2  ;;  %v1542_v6 = vor.u32 %v1777_v58, %v1541_v57  ;;  %v1785_v57 = vld [vmem:[%s2046_s20 + $0x1d4] sm:$0xf0]  ;;  %v1783_v58 = vld [vmem:[%s2046_s20 + $0x1cc] sm:$0xf] }
  0xcd   : > { %v1180_v12 = vmax.f32 %v1105_v9, 0.0  ;;  %1057 = vmatmul.bf16.gmra.mxu2 %v1510_v7  ;;  %v1546_v7 = vor.u32 %v1775_v59, %v1543_v60  ;;  %v1575_v59 = vld [vmem:[%s2046_s20 + $0x1d8] sm:$0xf0] }
  0xce   : > { %1146 = vmatmul.bf16.gmra.mxu3 %v1514_v8 }
  0xcf   : > { %v1830_v14 = vpack.c.bf16 %v1180_v12, %v1179_v11 }
  0xd0   : > { %v1018_v15 = vpop.f32.mrf.mxu2  ;;  %v842_v18 = vpop.f32.mrf.mxu0 }
  0xd1   : > { %v1107_v16 = vpop.f32.mrf.mxu3  ;;  %1902 = vst [vmem:[%s2158_s10 + $0x8] sm:$0xff] %v1830_v14   ;;  %v931_v19 = vpop.f32.mrf.mxu1  ;;  %v843_v20 = vadd.f32 %v2141_v10, %v842_v18  ;;  %v1019_v23 = vadd.f32 %v1018_v15, %v930_v17 }
  0xd3   : > { %v932_v30 = vadd.f32 %v931_v19, %v843_v20  ;;  %v1108_v35 = vadd.f32 %v1107_v16, %v1019_v23  ;;  %v1549_v20 = vld [vmem:[%s2046_s20 + $0x1a0] sm:$0xf]  ;;  %v1778_v23 = vld [vmem:[%s2046_s20 + $0x1a4] sm:$0xf] }
  0xd5   : > { %v1181_v42 = vmax.f32 %v1108_v35, 0.0 }
  0xd8   : > { %v1020_v31 = vpop.f32.mrf.mxu2  ;;  %v845_v37 = vpop.f32.mrf.mxu0 }
  0xd9   : > { %v1109_v32 = vpop.f32.mrf.mxu3  ;;  %v1021_v36 = vadd.f32 %v1020_v31, %v932_v30  ;;  %v934_v38 = vpop.f32.mrf.mxu1  ;;  %v846_v44 = vadd.f32 %v2141_v10, %v845_v37 }
  0xdb   : > { %v1110_v41 = vadd.f32 %v1109_v32, %v1021_v36  ;;  %884 = vmatmul.bf16.gmra.mxu0 %v1518_v33  ;;  %v935_v48 = vadd.f32 %v934_v38, %v846_v44  ;;  %v1550_v32 = vor.u32 %v1780_v21, %v1549_v20  ;;  %v1554_v33 = vor.u32 %v1778_v23, %v1551_v24  ;;  %v1788_v20 = vld [vmem:[%s2046_s20 + $0x1ec] sm:$0xf0]  ;;  %v1583_v23 = vld [vmem:[%s2046_s20 + $0x1f0] sm:$0xf0]  ;;  %v1589_v24 = vld [vmem:[%s2046_s20 + $0x1e8] sm:$0xf] }
  0xdc   : > { %973 = vmatmul.bf16.gmra.mxu1 %v1522_v34  ;;  %v1558_v38 = vor.u32 %v1781_v26, %v1557_v25  ;;  %v1789_v25 = vld [vmem:[%s2046_s20 + $0x1f4] sm:$0xf0]  ;;  %v1787_v26 = vld [vmem:[%s2046_s20 + $0x1ec] sm:$0xf] }
  0xdd   : > { %v1182_v43 = vmax.f32 %v1110_v41, 0.0  ;;  %1062 = vmatmul.bf16.gmra.mxu2 %v1526_v39  ;;  %v1562_v39 = vor.u32 %v1779_v27, %v1559_v28  ;;  %v1591_v27 = vld [vmem:[%s2046_s20 + $0x1f8] sm:$0xf0] }
  0xde   : > { %1151 = vmatmul.bf16.gmra.mxu3 %v1530_v40 }
  0xdf   : > { %v1835_v45 = vpack.c.bf16 %v1182_v43, %v1181_v42 }
  0xe0   : > { %v1023_v46 = vpop.f32.mrf.mxu2  ;;  %v847_v49 = vpop.f32.mrf.mxu0 }
  0xe1   : > { %v1112_v47 = vpop.f32.mrf.mxu3  ;;  %1903 = vst [vmem:[%s2158_s10 + $0x10] sm:$0xff] %v1835_v45   ;;  %v936_v50 = vpop.f32.mrf.mxu1  ;;  %v848_v51 = vadd.f32 %v2141_v10, %v847_v49  ;;  %v1024_v54 = vadd.f32 %v1023_v46, %v935_v48 }
  0xe3   : > { %v937_v61 = vadd.f32 %v936_v50, %v848_v51  ;;  %v1113_v2 = vadd.f32 %v1112_v47, %v1024_v54  ;;  %v1565_v51 = vld [vmem:[%s2046_s20 + $0x1c0] sm:$0xf]  ;;  %v1782_v54 = vld [vmem:[%s2046_s20 + $0x1c4] sm:$0xf] }
  0xe5   : > { %v1183_v9 = vmax.f32 %v1113_v2, 0.0 }
  0xe8   : > { %v1025_v62 = vpop.f32.mrf.mxu2  ;;  %v850_v4 = vpop.f32.mrf.mxu0 }
  0xe9   : > { %v1114_v63 = vpop.f32.mrf.mxu3  ;;  %v1026_v3 = vadd.f32 %v1025_v62, %v937_v61  ;;  %v939_v5 = vpop.f32.mrf.mxu1  ;;  %v851_v12 = vadd.f32 %v2141_v10, %v850_v4 }
  0xeb   : > { %v1115_v8 = vadd.f32 %v1114_v63, %v1026_v3  ;;  %889 = vmatmul.bf16.gmra.mxu0 %v1534_v0  ;;  %v940_v16 = vadd.f32 %v939_v5, %v851_v12  ;;  %v1566_v63 = vor.u32 %v1784_v52, %v1565_v51  ;;  %v1570_v0 = vor.u32 %v1782_v54, %v1567_v55 }
  0xec   : > { %978 = vmatmul.bf16.gmra.mxu1 %v1538_v1  ;;  %v1574_v5 = vor.u32 %v1785_v57, %v1573_v56 }
  0xed   : > { %v1184_v11 = vmax.f32 %v1115_v8, 0.0  ;;  %1067 = vmatmul.bf16.gmra.mxu2 %v1542_v6  ;;  %v1578_v6 = vor.u32 %v1783_v58, %v1575_v59 }
  0xee   : > { %1156 = vmatmul.bf16.gmra.mxu3 %v1546_v7 }
  0xef   : > { %v1840_v13 = vpack.c.bf16 %v1184_v11, %v1183_v9 }
  0xf0   : > { %v1028_v14 = vpop.f32.mrf.mxu2  ;;  %v852_v17 = vpop.f32.mrf.mxu0 }
  0xf1   : > { %v1117_v15 = vpop.f32.mrf.mxu3  ;;  %1904 = vst [vmem:[%s2158_s10 + $0x18] sm:$0xff] %v1840_v13   ;;  %v941_v18 = vpop.f32.mrf.mxu1  ;;  %v853_v19 = vadd.f32 %v2141_v10, %v852_v17  ;;  %v1029_v22 = vadd.f32 %v1028_v14, %v940_v16 }
  0xf3   : > { %v942_v29 = vadd.f32 %v941_v18, %v853_v19  ;;  %v1118_v34 = vadd.f32 %v1117_v15, %v1029_v22  ;;  %v1581_v19 = vld [vmem:[%s2046_s20 + $0x1e0] sm:$0xf]  ;;  %v1786_v22 = vld [vmem:[%s2046_s20 + $0x1e4] sm:$0xf] }
  0xf5   : > { %v1185_v41 = vmax.f32 %v1118_v34, 0.0 }
  0xf8   : > { %v1030_v30 = vpop.f32.mrf.mxu2  ;;  %v855_v36 = vpop.f32.mrf.mxu0 }
  0xf9   : > { %v1119_v31 = vpop.f32.mrf.mxu3  ;;  %v1031_v35 = vadd.f32 %v1030_v30, %v942_v29  ;;  %v944_v37 = vpop.f32.mrf.mxu1  ;;  %v856_v43 = vadd.f32 %v2141_v10, %v855_v36 }
  0xfb   : > { %v1120_v40 = vadd.f32 %v1119_v31, %v1031_v35  ;;  %894 = vmatmul.bf16.gmra.mxu0 %v1550_v32  ;;  %v945_v47 = vadd.f32 %v944_v37, %v856_v43  ;;  %v1582_v31 = vor.u32 %v1788_v20, %v1581_v19  ;;  %v1586_v32 = vor.u32 %v1786_v22, %v1583_v23 }
  0xfc   : > { %983 = vmatmul.bf16.gmra.mxu1 %v1554_v33  ;;  %v1590_v37 = vor.u32 %v1789_v25, %v1589_v24 }
  0xfd   : > { %v1186_v42 = vmax.f32 %v1120_v40, 0.0  ;;  %1072 = vmatmul.bf16.gmra.mxu2 %v1558_v38  ;;  %v1594_v38 = vor.u32 %v1787_v26, %v1591_v27 }
  0xfe   : > { %1161 = vmatmul.bf16.gmra.mxu3 %v1562_v39 }
  0xff   : > { %v1845_v44 = vpack.c.bf16 %v1186_v42, %v1185_v41 }
 0x100   : > { %v1033_v45 = vpop.f32.mrf.mxu2  ;;  %v857_v48 = vpop.f32.mrf.mxu0 }
 0x101   : > { %v1122_v46 = vpop.f32.mrf.mxu3  ;;  %1905 = vst [vmem:[%s2158_s10 + $0x20] sm:$0xff] %v1845_v44   ;;  %v946_v49 = vpop.f32.mrf.mxu1  ;;  %v858_v50 = vadd.f32 %v2141_v10, %v857_v48  ;;  %v1034_v53 = vadd.f32 %v1033_v45, %v945_v47 }
 0x103   : > { %v947_v60 = vadd.f32 %v946_v49, %v858_v50  ;;  %v1123_v1 = vadd.f32 %v1122_v46, %v1034_v53 }
 0x105   : > { %v1187_v8 = vmax.f32 %v1123_v1, 0.0 }
 0x108   : > { %v1035_v61 = vpop.f32.mrf.mxu2  ;;  %v860_v3 = vpop.f32.mrf.mxu0 }
 0x109   : > { %v1124_v62 = vpop.f32.mrf.mxu3  ;;  %v1036_v2 = vadd.f32 %v1035_v61, %v947_v60  ;;  %v949_v4 = vpop.f32.mrf.mxu1  ;;  %v861_v11 = vadd.f32 %v2141_v10, %v860_v3 }
 0x10b   : > { %v1125_v7 = vadd.f32 %v1124_v62, %v1036_v2  ;;  %899 = vmatmul.bf16.gmra.mxu0 %v1566_v63  ;;  %v950_v15 = vadd.f32 %v949_v4, %v861_v11 }
 0x10c   : > { %988 = vmatmul.bf16.gmra.mxu1 %v1570_v0 }
 0x10d   : > { %v1188_v9 = vmax.f32 %v1125_v7, 0.0  ;;  %1077 = vmatmul.bf16.gmra.mxu2 %v1574_v5 }
 0x10e   : > { %1166 = vmatmul.bf16.gmra.mxu3 %v1578_v6 }
 0x10f   : > { %v1850_v12 = vpack.c.bf16 %v1188_v9, %v1187_v8 }
 0x110   : > { %v1038_v13 = vpop.f32.mrf.mxu2  ;;  %v862_v16 = vpop.f32.mrf.mxu0 }
 0x111   : > { %v1127_v14 = vpop.f32.mrf.mxu3  ;;  %1906 = vst [vmem:[%s2158_s10 + $0x28] sm:$0xff] %v1850_v12   ;;  %v951_v17 = vpop.f32.mrf.mxu1  ;;  %v863_v18 = vadd.f32 %v2141_v10, %v862_v16  ;;  %v1039_v21 = vadd.f32 %v1038_v13, %v950_v15 }
 0x113   : > { %v952_v28 = vadd.f32 %v951_v17, %v863_v18  ;;  %v1128_v33 = vadd.f32 %v1127_v14, %v1039_v21 }
 0x115   : > { %v1189_v40 = vmax.f32 %v1128_v33, 0.0 }
 0x118   : > { %v1040_v29 = vpop.f32.mrf.mxu2  ;;  %v865_v35 = vpop.f32.mrf.mxu0 }
 0x119   : > { %v1129_v30 = vpop.f32.mrf.mxu3  ;;  %v1041_v34 = vadd.f32 %v1040_v29, %v952_v28  ;;  %v954_v36 = vpop.f32.mrf.mxu1  ;;  %v866_v42 = vadd.f32 %v2141_v10, %v865_v35 }
 0x11b   : > { %v1130_v39 = vadd.f32 %v1129_v30, %v1041_v34  ;;  %904 = vmatmul.bf16.gmra.mxu0 %v1582_v31  ;;  %v955_v46 = vadd.f32 %v954_v36, %v866_v42 }
 0x11c   : > { %993 = vmatmul.bf16.gmra.mxu1 %v1586_v32 }
 0x11d   : > { %v1190_v41 = vmax.f32 %v1130_v39, 0.0  ;;  %1082 = vmatmul.bf16.gmra.mxu2 %v1590_v37 }
 0x11e   : > { %1171 = vmatmul.bf16.gmra.mxu3 %v1594_v38 }
 0x11f   : > { %v1855_v43 = vpack.c.bf16 %v1190_v41, %v1189_v40 }
 0x120   : > { %v1043_v44 = vpop.f32.mrf.mxu2  ;;  %v867_v47 = vpop.f32.mrf.mxu0 }
 0x121   : > { %v1132_v45 = vpop.f32.mrf.mxu3  ;;  %1907 = vst [vmem:[%s2158_s10 + $0x30] sm:$0xff] %v1855_v43   ;;  %v956_v48 = vpop.f32.mrf.mxu1  ;;  %v868_v49 = vadd.f32 %v2141_v10, %v867_v47  ;;  %v1044_v50 = vadd.f32 %v1043_v44, %v955_v46 }
 0x123   : > { %v957_v51 = vadd.f32 %v956_v48, %v868_v49  ;;  %v1133_v54 = vadd.f32 %v1132_v45, %v1044_v50 }
 0x125   : > { %v1191_v59 = vmax.f32 %v1133_v54, 0.0 }
 0x128   : > { %v1045_v52 = vpop.f32.mrf.mxu2  ;;  %v870_v56 = vpop.f32.mrf.mxu0 }
 0x129   : > { %v1134_v53 = vpop.f32.mrf.mxu3  ;;  %v1046_v55 = vadd.f32 %v1045_v52, %v957_v51  ;;  %v959_v57 = vpop.f32.mrf.mxu1  ;;  %v871_v61 = vadd.f32 %v2141_v10, %v870_v56 }
 0x12b   : > { %v1135_v58 = vadd.f32 %v1134_v53, %v1046_v55  ;;  %v960_v1 = vadd.f32 %v959_v57, %v871_v61 }
 0x12d   : > { %v1192_v60 = vmax.f32 %v1135_v58, 0.0 }
 0x12f   : > { %v1860_v62 = vpack.c.bf16 %v1192_v60, %v1191_v59 }
 0x130   : > { %v1048_v63 = vpop.f32.mrf.mxu2  ;;  %v872_v2 = vpop.f32.mrf.mxu0 }
 0x131   : > { %v1137_v0 = vpop.f32.mrf.mxu3  ;;  %1908 = vst [vmem:[%s2158_s10 + $0x38] sm:$0xff] %v1860_v62   ;;  %v961_v3 = vpop.f32.mrf.mxu1  ;;  %v873_v4 = vadd.f32 %v2141_v10, %v872_v2  ;;  %v1049_v5 = vadd.f32 %v1048_v63, %v960_v1 }
 0x133   : > { %v962_v6 = vadd.f32 %v961_v3, %v873_v4  ;;  %v1138_v9 = vadd.f32 %v1137_v0, %v1049_v5 }
 0x135   : > { %v1193_v15 = vmax.f32 %v1138_v9, 0.0 }
 0x138   : > { %v1050_v7 = vpop.f32.mrf.mxu2  ;;  %v875_v12 = vpop.f32.mrf.mxu0 }
 0x139   : > { %v1139_v8 = vpop.f32.mrf.mxu3  ;;  %v1051_v11 = vadd.f32 %v1050_v7, %v962_v6  ;;  %v964_v13 = vpop.f32.mrf.mxu1  ;;  %v876_v17 = vadd.f32 %v2141_v10, %v875_v12 }
 0x13b   : > { %v1140_v14 = vadd.f32 %v1139_v8, %v1051_v11  ;;  %v965_v21 = vadd.f32 %v964_v13, %v876_v17 }
 0x13d   : > { %v1194_v16 = vmax.f32 %v1140_v14, 0.0 }
 0x13f   : > { %v1865_v18 = vpack.c.bf16 %v1194_v16, %v1193_v15 }
 0x140   : > { %v1053_v19 = vpop.f32.mrf.mxu2  ;;  %v877_v22 = vpop.f32.mrf.mxu0 }
 0x141   : > { %v1142_v20 = vpop.f32.mrf.mxu3  ;;  %1909 = vst [vmem:[%s2158_s10 + $0x40] sm:$0xff] %v1865_v18   ;;  %v966_v23 = vpop.f32.mrf.mxu1  ;;  %v878_v24 = vadd.f32 %v2141_v10, %v877_v22  ;;  %v1054_v25 = vadd.f32 %v1053_v19, %v965_v21 }
 0x143   : > { %v967_v26 = vadd.f32 %v966_v23, %v878_v24  ;;  %v1143_v29 = vadd.f32 %v1142_v20, %v1054_v25 }
 0x145   : > { %v1195_v34 = vmax.f32 %v1143_v29, 0.0 }
 0x148   : > { %v1055_v27 = vpop.f32.mrf.mxu2  ;;  %v880_v31 = vpop.f32.mrf.mxu0 }
 0x149   : > { %v1144_v28 = vpop.f32.mrf.mxu3  ;;  %v1056_v30 = vadd.f32 %v1055_v27, %v967_v26  ;;  %v969_v32 = vpop.f32.mrf.mxu1  ;;  %v881_v36 = vadd.f32 %v2141_v10, %v880_v31 }
 0x14b   : > { %v1145_v33 = vadd.f32 %v1144_v28, %v1056_v30  ;;  %v970_v40 = vadd.f32 %v969_v32, %v881_v36 }
 0x14d   : > { %v1196_v35 = vmax.f32 %v1145_v33, 0.0 }
 0x14f   : > { %v1870_v37 = vpack.c.bf16 %v1196_v35, %v1195_v34 }
 0x150   : > { %v1058_v38 = vpop.f32.mrf.mxu2  ;;  %v882_v41 = vpop.f32.mrf.mxu0 }
 0x151   : > { %v1147_v39 = vpop.f32.mrf.mxu3  ;;  %1910 = vst [vmem:[%s2158_s10 + $0x48] sm:$0xff] %v1870_v37   ;;  %v971_v42 = vpop.f32.mrf.mxu1  ;;  %v883_v43 = vadd.f32 %v2141_v10, %v882_v41  ;;  %v1059_v44 = vadd.f32 %v1058_v38, %v970_v40 }
 0x153   : > { %v972_v45 = vadd.f32 %v971_v42, %v883_v43  ;;  %v1148_v48 = vadd.f32 %v1147_v39, %v1059_v44 }
 0x155   : > { %v1197_v53 = vmax.f32 %v1148_v48, 0.0 }
 0x158   : > { %v1060_v46 = vpop.f32.mrf.mxu2  ;;  %v885_v50 = vpop.f32.mrf.mxu0 }
 0x159   : > { %v1149_v47 = vpop.f32.mrf.mxu3  ;;  %v1061_v49 = vadd.f32 %v1060_v46, %v972_v45  ;;  %v974_v51 = vpop.f32.mrf.mxu1  ;;  %v886_v55 = vadd.f32 %v2141_v10, %v885_v50 }
 0x15b   : > { %v1150_v52 = vadd.f32 %v1149_v47, %v1061_v49  ;;  %v975_v59 = vadd.f32 %v974_v51, %v886_v55 }
 0x15d   : > { %v1198_v54 = vmax.f32 %v1150_v52, 0.0 }
 0x15f   : > { %v1875_v56 = vpack.c.bf16 %v1198_v54, %v1197_v53 }
 0x160   : > { %v1063_v57 = vpop.f32.mrf.mxu2  ;;  %v887_v60 = vpop.f32.mrf.mxu0 }
 0x161   : > { %v1152_v58 = vpop.f32.mrf.mxu3  ;;  %1911 = vst [vmem:[%s2158_s10 + $0x50] sm:$0xff] %v1875_v56   ;;  %v976_v61 = vpop.f32.mrf.mxu1  ;;  %v888_v62 = vadd.f32 %v2141_v10, %v887_v60  ;;  %v1064_v63 = vadd.f32 %v1063_v57, %v975_v59 }
 0x163   : > { %v977_v0 = vadd.f32 %v976_v61, %v888_v62  ;;  %v1153_v3 = vadd.f32 %v1152_v58, %v1064_v63 }
 0x165   : > { %v1199_v8 = vmax.f32 %v1153_v3, 0.0 }
 0x168   : > { %v1065_v1 = vpop.f32.mrf.mxu2  ;;  %v890_v5 = vpop.f32.mrf.mxu0 }
 0x169   : > { %v1154_v2 = vpop.f32.mrf.mxu3  ;;  %v1066_v4 = vadd.f32 %v1065_v1, %v977_v0  ;;  %v979_v6 = vpop.f32.mrf.mxu1  ;;  %v891_v11 = vadd.f32 %v2141_v10, %v890_v5 }
 0x16b   : > { %v1155_v7 = vadd.f32 %v1154_v2, %v1066_v4  ;;  %v980_v15 = vadd.f32 %v979_v6, %v891_v11 }
 0x16d   : > { %v1200_v9 = vmax.f32 %v1155_v7, 0.0 }
 0x16f   : > { %v1880_v12 = vpack.c.bf16 %v1200_v9, %v1199_v8 }
 0x170   : > { %v1068_v13 = vpop.f32.mrf.mxu2  ;;  %v892_v16 = vpop.f32.mrf.mxu0 }
 0x171   : > { %v1157_v14 = vpop.f32.mrf.mxu3  ;;  %1912 = vst [vmem:[%s2158_s10 + $0x58] sm:$0xff] %v1880_v12   ;;  %v981_v17 = vpop.f32.mrf.mxu1  ;;  %v893_v18 = vadd.f32 %v2141_v10, %v892_v16  ;;  %v1069_v19 = vadd.f32 %v1068_v13, %v980_v15 }
 0x173   : > { %v982_v20 = vadd.f32 %v981_v17, %v893_v18  ;;  %v1158_v23 = vadd.f32 %v1157_v14, %v1069_v19 }
 0x175   : > { %v1201_v28 = vmax.f32 %v1158_v23, 0.0 }
 0x178   : > { %v1070_v21 = vpop.f32.mrf.mxu2  ;;  %v895_v25 = vpop.f32.mrf.mxu0 }
 0x179   : > { %v1159_v22 = vpop.f32.mrf.mxu3  ;;  %v1071_v24 = vadd.f32 %v1070_v21, %v982_v20  ;;  %v984_v26 = vpop.f32.mrf.mxu1  ;;  %v896_v30 = vadd.f32 %v2141_v10, %v895_v25 }
 0x17b   : > { %v1160_v27 = vadd.f32 %v1159_v22, %v1071_v24  ;;  %v985_v34 = vadd.f32 %v984_v26, %v896_v30 }
 0x17d   : > { %v1202_v29 = vmax.f32 %v1160_v27, 0.0 }
 0x17f   : > { %v1885_v31 = vpack.c.bf16 %v1202_v29, %v1201_v28 }
 0x180   : > { %v1073_v32 = vpop.f32.mrf.mxu2  ;;  %v897_v35 = vpop.f32.mrf.mxu0 }
 0x181   : > { %v1162_v33 = vpop.f32.mrf.mxu3  ;;  %1913 = vst [vmem:[%s2158_s10 + $0x60] sm:$0xff] %v1885_v31   ;;  %v986_v36 = vpop.f32.mrf.mxu1  ;;  %v898_v37 = vadd.f32 %v2141_v10, %v897_v35  ;;  %v1074_v38 = vadd.f32 %v1073_v32, %v985_v34 }
 0x183   : > { %v987_v39 = vadd.f32 %v986_v36, %v898_v37  ;;  %v1163_v42 = vadd.f32 %v1162_v33, %v1074_v38 }
 0x185   : > { %v1203_v47 = vmax.f32 %v1163_v42, 0.0 }
 0x188   : > { %v1075_v40 = vpop.f32.mrf.mxu2  ;;  %v900_v44 = vpop.f32.mrf.mxu0 }
 0x189   : > { %v1164_v41 = vpop.f32.mrf.mxu3  ;;  %v1076_v43 = vadd.f32 %v1075_v40, %v987_v39  ;;  %v989_v45 = vpop.f32.mrf.mxu1  ;;  %v901_v49 = vadd.f32 %v2141_v10, %v900_v44 }
 0x18b   : > { %v1165_v46 = vadd.f32 %v1164_v41, %v1076_v43  ;;  %v990_v53 = vadd.f32 %v989_v45, %v901_v49 }
 0x18d   : > { %v1204_v48 = vmax.f32 %v1165_v46, 0.0 }
 0x18f   : > { %v1890_v50 = vpack.c.bf16 %v1204_v48, %v1203_v47 }
 0x190   : > { %v1078_v51 = vpop.f32.mrf.mxu2  ;;  %v902_v54 = vpop.f32.mrf.mxu0 }
 0x191   : > { %v1167_v52 = vpop.f32.mrf.mxu3  ;;  %1914 = vst [vmem:[%s2158_s10 + $0x68] sm:$0xff] %v1890_v50   ;;  %v991_v55 = vpop.f32.mrf.mxu1  ;;  %v903_v56 = vadd.f32 %v2141_v10, %v902_v54  ;;  %v1079_v57 = vadd.f32 %v1078_v51, %v990_v53 }
 0x193   : > { %v992_v58 = vadd.f32 %v991_v55, %v903_v56  ;;  %v1168_v61 = vadd.f32 %v1167_v52, %v1079_v57 }
 0x195   : > { %v1205_v2 = vmax.f32 %v1168_v61, 0.0 }
 0x198   : > { %v1080_v59 = vpop.f32.mrf.mxu2  ;;  %v905_v63 = vpop.f32.mrf.mxu0 }
 0x199   : > { %v1169_v60 = vpop.f32.mrf.mxu3  ;;  %v1081_v62 = vadd.f32 %v1080_v59, %v992_v58  ;;  %v994_v1 = vpop.f32.mrf.mxu1  ;;  %v906_v4 = vadd.f32 %v2141_v10, %v905_v63 }
 0x19b   : > { %v1170_v0 = vadd.f32 %v1169_v60, %v1081_v62  ;;  %v995_v8 = vadd.f32 %v994_v1, %v906_v4 }
 0x19d   : > { %v1206_v3 = vmax.f32 %v1170_v0, 0.0 }
 0x19f   : > { %v1895_v5 = vpack.c.bf16 %v1206_v3, %v1205_v2 }
 0x1a0   : > { %v1083_v6 = vpop.f32.mrf.mxu2  ;;  %v907_v9 = vpop.f32.mrf.mxu0 }
 0x1a1   : > { %v1172_v7 = vpop.f32.mrf.mxu3  ;;  %1915 = vst [vmem:[%s2158_s10 + $0x70] sm:$0xff] %v1895_v5   ;;  %v908_v11 = vadd.f32 %v2141_v10, %v907_v9  ;;  %v1084_v12 = vadd.f32 %v1083_v6, %v995_v8  ;;  %v996_v13 = vpop.f32.mrf.mxu1 }
 0x1a3   : > { %v997_v14 = vadd.f32 %v996_v13, %v908_v11  ;;  %v1173_v16 = vadd.f32 %v1172_v7, %v1084_v12 }
 0x1a5   : > { %v1207_v20 = vmax.f32 %v1173_v16, 0.0 }
 0x1a8   : > { %v1085_v15 = vpop.f32.mrf.mxu2 }
 0x1a9   : > { %v1086_v17 = vadd.f32 %v1085_v15, %v997_v14  ;;  %v1174_v18 = vpop.f32.mrf.mxu3 }
 0x1ab   : > { %v1175_v19 = vadd.f32 %v1174_v18, %v1086_v17 }
 0x1ad   : > { %v1208_v21 = vmax.f32 %v1175_v19, 0.0 }
 0x1af   : > { %v1900_v22 = vpack.c.bf16 %v1208_v21, %v1207_v20 }
 0x1b1   : > { %1916 = vst [vmem:[%s2158_s10 + $0x78] sm:$0xff] %v1900_v22  }
 0x1b2 PF: > { %s13_s12 = sadd.s32 1, %s1932_s12  }
 0x1b3   : > { %p10_p4 = scmp.ge.s32.totalorder %s13_s12, 4  }
 0x1b5   :  { %12 = sbr.rel (!%p10_p4) target bundleno = 1 (0x1), region = 62 }

// kernel: decoder_burgess_forward.9
= control target key start
LH: loop header
LB: loop body
LE: loop exit
PB: predicated region body
PF: predicated region fallthrough
CT: control target
= control target key end

     0   :  { %s6378_s12 = smov 0   ;;  %s7424_s0 = inlined_call_operand.vmem [shape: bf16[2048,512], index: 0, kind: input, shape index: {}]   ;;  %s7425_s1 = inlined_call_operand.vmem [shape: bf16[512,4], index: 1, kind: input, shape index: {}]   ;;  %s7426_s2 = inlined_call_operand.vmem [shape: f32[1,4], index: 2, kind: input, shape index: {}]   ;;  %s7427_s3 = inlined_call_operand.vmem [shape: f32[2048,4], index: 3, kind: output, shape index: {}]  }
   0x1 LB: > { %s4370_s13 = sadd.s32 4294967295, %s6356_s12   ;;  %p4374_p0 = scmp.ge.s32.totalorder %s6356_s12, 1  ;;  %s6356_s12 = sphi %s6378_s12, %s13_s12  }
   0x2   : > { %p139_p1 = scmp.lt.s32.totalorder %s6356_s12, 3 }
   0x4   : > { %p140_p2 = pnand %p4374_p0, %p139_p1 }
   0x5   : > { %s4375_s11 = sshll.u32 (!%p140_p2), %s4370_s13, 7 }
   0x6   : > { %143 = sbr.rel (%p140_p2) target bundleno = 1222 (0x4c6), region = 32  ;;  %p165_p3 = scmp.lt.s32.totalorder (!%p140_p2), %s4375_s11, 255 }
   0xb   : > { %v5798_v0 = vld [vmem:[%s7425_s1 + $0x38] sm:$0xff]  ;;  %v5797_v4 = vld [vmem:[%s7425_s1 + $0x30] sm:$0xff]  ;;  %v5796_v8 = vld [vmem:[%s7425_s1 + $0x28] sm:$0xff]  ;;  %s7429_s11 = smov (!%p165_p3, %s4375_s11), 255  ;;  %vm4185_vm0 = vcmask 31744  }
   0xc   : > { %v5806_v1 = vld [vmem:[%s7425_s1 + $0x78] sm:$0xff]  ;;  %1973 = vmatpush.bf16.msra.mxu0 %v5798_v0  ;;  %v5805_v5 = vld [vmem:[%s7425_s1 + $0x70] sm:$0xff]  ;;  %v5804_v9 = vld [vmem:[%s7425_s1 + $0x68] sm:$0xff]  ;;  %s5534_s10 = sshll.u32 %s7429_s11, 4  ;;  %s4379_s7 = sshll.u32 %s7429_s11, 3 }
   0xd   : > { %v5814_v2 = vld [vmem:[%s7425_s1 + $0xb8] sm:$0xff]  ;;  %2302 = vmatpush.bf16.msra.mxu1 %v5806_v1  ;;  %v5813_v6 = vld [vmem:[%s7425_s1 + $0xb0] sm:$0xff]  ;;  %v5812_v10 = vld [vmem:[%s7425_s1 + $0xa8] sm:$0xff]  ;;  %s6470_s20 = scalar_lea.vmem %s7424_s0, %s5534_s10  ;;  %s6591_s10 = scalar_lea.vmem %s7427_s3, %s4379_s7 }
   0xe   : > { %v5822_v3 = vld [vmem:[%s7425_s1 + $0xf8] sm:$0xff]  ;;  %2631 = vmatpush.bf16.msra.mxu2 %v5814_v2  ;;  %v5821_v7 = vld [vmem:[%s7425_s1 + $0xf0] sm:$0xff]  ;;  %v5820_v11 = vld [vmem:[%s7425_s1 + $0xe8] sm:$0xff] }
   0xf   : > { %2960 = vmatpush.bf16.msra.mxu3 %v5822_v3  ;;  %v5795_v12 = vld [vmem:[%s7425_s1 + $0x20] sm:$0xff]  ;;  %v5794_v16 = vld [vmem:[%s7425_s1 + $0x18] sm:$0xff]  ;;  %v5793_v20 = vld [vmem:[%s7425_s1 + $0x10] sm:$0xff] }
  0x10   : > { %1974 = vmatpush.bf16.msra.mxu0 %v5797_v4  ;;  %v5803_v13 = vld [vmem:[%s7425_s1 + $0x60] sm:$0xff]  ;;  %v5802_v17 = vld [vmem:[%s7425_s1 + $0x58] sm:$0xff]  ;;  %v5801_v21 = vld [vmem:[%s7425_s1 + $0x50] sm:$0xff] }
  0x11   : > { %2303 = vmatpush.bf16.msra.mxu1 %v5805_v5  ;;  %v5811_v14 = vld [vmem:[%s7425_s1 + $0xa0] sm:$0xff]  ;;  %v5810_v18 = vld [vmem:[%s7425_s1 + $0x98] sm:$0xff]  ;;  %v5809_v22 = vld [vmem:[%s7425_s1 + $0x90] sm:$0xff] }
  0x12   : > { %2632 = vmatpush.bf16.msra.mxu2 %v5813_v6  ;;  %v5819_v15 = vld [vmem:[%s7425_s1 + $0xe0] sm:$0xff]  ;;  %v5818_v19 = vld [vmem:[%s7425_s1 + $0xd8] sm:$0xff]  ;;  %v5817_v23 = vld [vmem:[%s7425_s1 + $0xd0] sm:$0xff] }
  0x13   : > { %2961 = vmatpush.bf16.msra.mxu3 %v5821_v7  ;;  %v5792_v24 = vld [vmem:[%s7425_s1 + $0x8] sm:$0xff]  ;;  %v5791_v28 = vld [vmem:[%s7425_s1] sm:$0xff]  ;;  %v5537_v33 = vld [vmem:[%s6470_s20 + $0xc] sm:$0xf0] }
  0x14   : > { %1975 = vmatpush.bf16.msra.mxu0 %v5796_v8  ;;  %v5800_v25 = vld [vmem:[%s7425_s1 + $0x48] sm:$0xff]  ;;  %v5799_v29 = vld [vmem:[%s7425_s1 + $0x40] sm:$0xff]  ;;  %v4384_v35 = vld [vmem:[%s6470_s20 + $0x10] sm:$0xf0] }
  0x15   : > { %2304 = vmatpush.bf16.msra.mxu1 %v5804_v9  ;;  %v5808_v26 = vld [vmem:[%s7425_s1 + $0x88] sm:$0xff]  ;;  %v5807_v30 = vld [vmem:[%s7425_s1 + $0x80] sm:$0xff]  ;;  %v5538_v37 = vld [vmem:[%s6470_s20 + $0x14] sm:$0xf0] }
  0x16   : > { %2633 = vmatpush.bf16.msra.mxu2 %v5812_v10  ;;  %v5816_v27 = vld [vmem:[%s7425_s1 + $0xc8] sm:$0xff]  ;;  %v5815_v31 = vld [vmem:[%s7425_s1 + $0xc0] sm:$0xff]  ;;  %v4392_v39 = vld [vmem:[%s6470_s20 + $0x18] sm:$0xf0] }
  0x17   : > { %2962 = vmatpush.bf16.msra.mxu3 %v5820_v11  ;;  %v4382_v32 = vld [vmem:[%s6470_s20] sm:$0xf]  ;;  %v5535_v34 = vld [vmem:[%s6470_s20 + $0x4] sm:$0xf]  ;;  %v4390_v36 = vld [vmem:[%s6470_s20 + $0x8] sm:$0xf] }
  0x18   : > { %1976 = vmatpush.bf16.msra.mxu0 %v5795_v12  ;;  %v5536_v38 = vld [vmem:[%s6470_s20 + $0xc] sm:$0xf]  ;;  %v4383_v40 = vor.u32 %v5537_v33, %v4382_v32  ;;  %v4387_v41 = vor.u32 %v5535_v34, %v4384_v35  ;;  %v4391_v42 = vor.u32 %v5538_v37, %v4390_v36  ;;  %v4398_v44 = vld [vmem:[%s6470_s20 + $0x20] sm:$0xf]  ;;  %v5541_v45 = vld [vmem:[%s6470_s20 + $0x2c] sm:$0xf0] }
  0x19   : > { %2305 = vmatpush.bf16.msra.mxu1 %v5803_v13  ;;  %v4395_v43 = vor.u32 %v5536_v38, %v4392_v39  ;;  %v5539_v46 = vld [vmem:[%s6470_s20 + $0x24] sm:$0xf]  ;;  %v4400_v47 = vld [vmem:[%s6470_s20 + $0x30] sm:$0xf0]  ;;  %v4406_v48 = vld [vmem:[%s6470_s20 + $0x28] sm:$0xf]  ;;  %v4399_v52 = vor.u32 %v5541_v45, %v4398_v44 }
  0x1a   : > { %2634 = vmatpush.bf16.msra.mxu2 %v5811_v14  ;;  %v5542_v49 = vld [vmem:[%s6470_s20 + $0x34] sm:$0xf0]  ;;  %v5540_v50 = vld [vmem:[%s6470_s20 + $0x2c] sm:$0xf]  ;;  %v4408_v51 = vld [vmem:[%s6470_s20 + $0x38] sm:$0xf0]  ;;  %v4403_v53 = vor.u32 %v5539_v46, %v4400_v47 }
  0x1b   : > { %2963 = vmatpush.bf16.msra.mxu3 %v5819_v15  ;;  %v4407_v54 = vor.u32 %v5542_v49, %v4406_v48  ;;  %v4411_v55 = vor.u32 %v5540_v50, %v4408_v51  ;;  %v4414_v56 = vld [vmem:[%s6470_s20 + $0x40] sm:$0xf]  ;;  %v5545_v57 = vld [vmem:[%s6470_s20 + $0x4c] sm:$0xf0]  ;;  %v5543_v58 = vld [vmem:[%s6470_s20 + $0x44] sm:$0xf] }
  0x1c   : > { %1977 = vmatpush.bf16.msra.mxu0 %v5794_v16  ;;  %v4416_v59 = vld [vmem:[%s6470_s20 + $0x50] sm:$0xf0]  ;;  %v4422_v60 = vld [vmem:[%s6470_s20 + $0x48] sm:$0xf]  ;;  %v5546_v61 = vld [vmem:[%s6470_s20 + $0x54] sm:$0xf0]  ;;  %v4415_v0 = vor.u32 %v5545_v57, %v4414_v56 }
  0x1d   : > { %2306 = vmatpush.bf16.msra.mxu1 %v5802_v17  ;;  %v5544_v62 = vld [vmem:[%s6470_s20 + $0x4c] sm:$0xf]  ;;  %v4424_v63 = vld [vmem:[%s6470_s20 + $0x58] sm:$0xf0]  ;;  %v4419_v1 = vor.u32 %v5543_v58, %v4416_v59  ;;  %v4423_v2 = vor.u32 %v5546_v61, %v4422_v60  ;;  %v4430_v4 = vld [vmem:[%s6470_s20 + $0x60] sm:$0xf] }
  0x1e   : > { %2635 = vmatpush.bf16.msra.mxu2 %v5810_v18  ;;  %v4427_v3 = vor.u32 %v5544_v62, %v4424_v63  ;;  %v5549_v5 = vld [vmem:[%s6470_s20 + $0x6c] sm:$0xf0]  ;;  %v5547_v6 = vld [vmem:[%s6470_s20 + $0x64] sm:$0xf]  ;;  %v4432_v7 = vld [vmem:[%s6470_s20 + $0x70] sm:$0xf0] }
  0x1f   : > { %2964 = vmatpush.bf16.msra.mxu3 %v5818_v19  ;;  %v4438_v8 = vld [vmem:[%s6470_s20 + $0x68] sm:$0xf]  ;;  %v5550_v9 = vld [vmem:[%s6470_s20 + $0x74] sm:$0xf0]  ;;  %v5548_v10 = vld [vmem:[%s6470_s20 + $0x6c] sm:$0xf]  ;;  %v4431_v12 = vor.u32 %v5549_v5, %v4430_v4  ;;  %v4435_v13 = vor.u32 %v5547_v6, %v4432_v7 }
  0x20   : > { %1978 = vmatpush.bf16.msra.mxu0 %v5793_v20  ;;  %v4440_v11 = vld [vmem:[%s6470_s20 + $0x78] sm:$0xf0]  ;;  %v4439_v14 = vor.u32 %v5550_v9, %v4438_v8  ;;  %v4446_v16 = vld [vmem:[%s6470_s20 + $0x80] sm:$0xf]  ;;  %v5553_v17 = vld [vmem:[%s6470_s20 + $0x8c] sm:$0xf0] }
  0x21   : > { %2307 = vmatpush.bf16.msra.mxu1 %v5801_v21  ;;  %v4443_v15 = vor.u32 %v5548_v10, %v4440_v11  ;;  %v5551_v18 = vld [vmem:[%s6470_s20 + $0x84] sm:$0xf]  ;;  %v4448_v19 = vld [vmem:[%s6470_s20 + $0x90] sm:$0xf0]  ;;  %v4454_v20 = vld [vmem:[%s6470_s20 + $0x88] sm:$0xf] }
  0x22   : > { %2636 = vmatpush.bf16.msra.mxu2 %v5809_v22  ;;  %v5554_v21 = vld [vmem:[%s6470_s20 + $0x94] sm:$0xf0]  ;;  %v5552_v22 = vld [vmem:[%s6470_s20 + $0x8c] sm:$0xf]  ;;  %v4470_v32 = vld [vmem:[%s6470_s20 + $0xa8] sm:$0xf] }
  0x23   : > { %2965 = vmatpush.bf16.msra.mxu3 %v5817_v23  ;;  %v4456_v23 = vld [vmem:[%s6470_s20 + $0x98] sm:$0xf0]  ;;  %v5558_v33 = vld [vmem:[%s6470_s20 + $0xb4] sm:$0xf0]  ;;  %v5556_v34 = vld [vmem:[%s6470_s20 + $0xac] sm:$0xf] }
  0x24   : > { %1979 = vmatpush.bf16.msra.mxu0 %v5792_v24  ;;  %v4447_v24 = vor.u32 %v5553_v17, %v4446_v16  ;;  %v4472_v35 = vld [vmem:[%s6470_s20 + $0xb8] sm:$0xf0]  ;;  %v4471_v38 = vor.u32 %v5558_v33, %v4470_v32  ;;  %v4486_v44 = vld [vmem:[%s6470_s20 + $0xc8] sm:$0xf]  ;;  %v5562_v45 = vld [vmem:[%s6470_s20 + $0xd4] sm:$0xf0] }
  0x25   : > { %2308 = vmatpush.bf16.msra.mxu1 %v5800_v25  ;;  %v4451_v25 = vor.u32 %v5551_v18, %v4448_v19  ;;  %v4475_v39 = vor.u32 %v5556_v34, %v4472_v35  ;;  %v5560_v46 = vld [vmem:[%s6470_s20 + $0xcc] sm:$0xf]  ;;  %v4488_v47 = vld [vmem:[%s6470_s20 + $0xd8] sm:$0xf0]  ;;  %v4487_v50 = vor.u32 %v5562_v45, %v4486_v44  ;;  %v4502_v56 = vld [vmem:[%s6470_s20 + $0xe8] sm:$0xf] }
  0x26   : > { %2637 = vmatpush.bf16.msra.mxu2 %v5808_v26  ;;  %v4455_v26 = vor.u32 %v5554_v21, %v4454_v20  ;;  %v4491_v51 = vor.u32 %v5560_v46, %v4488_v47  ;;  %v5566_v57 = vld [vmem:[%s6470_s20 + $0xf4] sm:$0xf0]  ;;  %v5564_v58 = vld [vmem:[%s6470_s20 + $0xec] sm:$0xf]  ;;  %v4504_v59 = vld [vmem:[%s6470_s20 + $0xf8] sm:$0xf0] }
  0x27   : > { %2966 = vmatpush.bf16.msra.mxu3 %v5816_v27  ;;  %v4459_v27 = vor.u32 %v5552_v22, %v4456_v23  ;;  %v4503_v62 = vor.u32 %v5566_v57, %v4502_v56  ;;  %v4507_v63 = vor.u32 %v5564_v58, %v4504_v59  ;;  %v4512_v4 = vld [vmem:[%s6470_s20 + $0x110] sm:$0xf0]  ;;  %v4518_v5 = vld [vmem:[%s6470_s20 + $0x108] sm:$0xf]  ;;  %v5570_v6 = vld [vmem:[%s6470_s20 + $0x114] sm:$0xf0] }
  0x28   : > { %1980 = vmatpush.bf16.msra.mxu0 %v5791_v28  ;;  %v4462_v28 = vld [vmem:[%s6470_s20 + $0xa0] sm:$0xf]  ;;  %v5568_v7 = vld [vmem:[%s6470_s20 + $0x10c] sm:$0xf]  ;;  %v4520_v8 = vld [vmem:[%s6470_s20 + $0x118] sm:$0xf0] }
  0x29   : > { %2309 = vmatpush.bf16.msra.mxu1 %v5799_v29  ;;  %v5557_v29 = vld [vmem:[%s6470_s20 + $0xac] sm:$0xf0]  ;;  %v4536_v32 = vld [vmem:[%s6470_s20 + $0x138] sm:$0xf0]  ;;  %v4542_v58 = vld [vmem:[%s6470_s20 + $0x140] sm:$0xf] }
  0x2a   : > { %2638 = vmatpush.bf16.msra.mxu2 %v5807_v30  ;;  %v5555_v30 = vld [vmem:[%s6470_s20 + $0xa4] sm:$0xf]  ;;  %v4463_v36 = vor.u32 %v5557_v29, %v4462_v28  ;;  %v4528_v28 = vld [vmem:[%s6470_s20 + $0x130] sm:$0xf0]  ;;  %v4534_v29 = vld [vmem:[%s6470_s20 + $0x128] sm:$0xf] }
  0x2b   : > { %2967 = vmatpush.bf16.msra.mxu3 %v5815_v31  ;;  %1981 = vmatmul.bf16.vlgmr.msra.gmra.mxu0 %v4383_v40  ;;  %v4464_v31 = vld [vmem:[%s6470_s20 + $0xb0] sm:$0xf0]  ;;  %v4478_v40 = vld [vmem:[%s6470_s20 + $0xc0] sm:$0xf]  ;;  %v5577_v59 = vld [vmem:[%s6470_s20 + $0x14c] sm:$0xf0] }
  0x2c   : > { %2310 = vmatmul.bf16.vlgmr.msra.gmra.mxu1 %v4387_v41  ;;  %v4467_v37 = vor.u32 %v5555_v30, %v4464_v31  ;;  %v5561_v41 = vld [vmem:[%s6470_s20 + $0xcc] sm:$0xf0]  ;;  %v5574_v30 = vld [vmem:[%s6470_s20 + $0x134] sm:$0xf0]  ;;  %v5572_v31 = vld [vmem:[%s6470_s20 + $0x12c] sm:$0xf] }
  0x2d   : > { %2639 = vmatmul.bf16.vlgmr.msra.gmra.mxu2 %v4391_v42  ;;  %v5559_v42 = vld [vmem:[%s6470_s20 + $0xc4] sm:$0xf]  ;;  %v4479_v48 = vor.u32 %v5561_v41, %v4478_v40 }
  0x2e   : > { %2968 = vmatmul.bf16.vlgmr.msra.gmra.mxu3 %v4395_v43  ;;  %v4480_v43 = vld [vmem:[%s6470_s20 + $0xd0] sm:$0xf0] }
  0x2f   : > { %v4483_v49 = vor.u32 %v5559_v42, %v4480_v43  ;;  %v4535_v42 = vor.u32 %v5574_v30, %v4534_v29  ;;  %v4539_v43 = vor.u32 %v5572_v31, %v4536_v32 }
  0x3b   : > { %1986 = vmatmul.bf16.gmra.mxu0 %v4399_v52  ;;  %v4494_v52 = vld [vmem:[%s6470_s20 + $0xe0] sm:$0xf] }
  0x3c   : > { %2315 = vmatmul.bf16.gmra.mxu1 %v4403_v53  ;;  %v5565_v53 = vld [vmem:[%s6470_s20 + $0xec] sm:$0xf0] }
  0x3d   : > { %2644 = vmatmul.bf16.gmra.mxu2 %v4407_v54  ;;  %v5563_v54 = vld [vmem:[%s6470_s20 + $0xe4] sm:$0xf]  ;;  %v4495_v60 = vor.u32 %v5565_v53, %v4494_v52 }
  0x3e   : > { %2973 = vmatmul.bf16.gmra.mxu3 %v4411_v55  ;;  %v4496_v55 = vld [vmem:[%s6470_s20 + $0xf0] sm:$0xf0] }
  0x3f   : > { %v4499_v61 = vor.u32 %v5563_v54, %v4496_v55 }
  0x4b   : > { %1991 = vmatmul.bf16.gmra.mxu0 %v4415_v0  ;;  %v6557_v0 = vld [vmem:[%s7426_s2] ss:$0 sm:$0xff] }
  0x4c   : > { %2320 = vmatmul.bf16.gmra.mxu1 %v4419_v1  ;;  %v4510_v1 = vld [vmem:[%s6470_s20 + $0x100] sm:$0xf] }
  0x4d   : > { %2649 = vmatmul.bf16.gmra.mxu2 %v4423_v2  ;;  %v5569_v2 = vld [vmem:[%s6470_s20 + $0x10c] sm:$0xf0] }
  0x4e   : > { %2978 = vmatmul.bf16.gmra.mxu3 %v4427_v3  ;;  %v5567_v3 = vld [vmem:[%s6470_s20 + $0x104] sm:$0xf]  ;;  %v4511_v9 = vor.u32 %v5569_v2, %v4510_v1  ;;  %v5578_v1 = vld [vmem:[%s6470_s20 + $0x154] sm:$0xf0]  ;;  %v5576_v2 = vld [vmem:[%s6470_s20 + $0x14c] sm:$0xf] }
  0x4f   : > { %v4515_v10 = vor.u32 %v5567_v3, %v4512_v4  ;;  %v4552_v3 = vld [vmem:[%s6470_s20 + $0x158] sm:$0xf0] }
  0x5b   : > { %1996 = vmatmul.bf16.gmra.mxu0 %v4431_v12 }
  0x5c   : > { %2325 = vmatmul.bf16.gmra.mxu1 %v4435_v13  ;;  %v4519_v13 = vor.u32 %v5570_v6, %v4518_v5 }
  0x5d   : > { %2654 = vmatmul.bf16.gmra.mxu2 %v4439_v14  ;;  %v4523_v14 = vor.u32 %v5568_v7, %v4520_v8 }
  0x5e   : > { %2983 = vmatmul.bf16.gmra.mxu3 %v4443_v15 }
  0x6b   : > { %2001 = vmatmul.bf16.gmra.mxu0 %v4447_v24  ;;  %v4526_v24 = vld [vmem:[%s6470_s20 + $0x120] sm:$0xf] }
  0x6c   : > { %2330 = vmatmul.bf16.gmra.mxu1 %v4451_v25  ;;  %v5573_v25 = vld [vmem:[%s6470_s20 + $0x12c] sm:$0xf0] }
  0x6d   : > { %2659 = vmatmul.bf16.gmra.mxu2 %v4455_v26  ;;  %v5571_v26 = vld [vmem:[%s6470_s20 + $0x124] sm:$0xf] }
  0x6e   : > { %2988 = vmatmul.bf16.gmra.mxu3 %v4459_v27 }
  0x7b   : > { %2006 = vmatmul.bf16.gmra.mxu0 %v4463_v36 }
  0x7c   : > { %2335 = vmatmul.bf16.gmra.mxu1 %v4467_v37  ;;  %v4527_v37 = vor.u32 %v5573_v25, %v4526_v24 }
  0x7d   : > { %2664 = vmatmul.bf16.gmra.mxu2 %v4471_v38  ;;  %v4531_v38 = vor.u32 %v5571_v26, %v4528_v28 }
  0x7e   : > { %2993 = vmatmul.bf16.gmra.mxu3 %v4475_v39 }
  0x8b   : > { %2011 = vmatmul.bf16.gmra.mxu0 %v4479_v48 }
  0x8c   : > { %2340 = vmatmul.bf16.gmra.mxu1 %v4483_v49 }
  0x8d   : > { %2669 = vmatmul.bf16.gmra.mxu2 %v4487_v50 }
  0x8e   : > { %2998 = vmatmul.bf16.gmra.mxu3 %v4491_v51 }
  0x9b   : > { %2016 = vmatmul.bf16.gmra.mxu0 %v4495_v60  ;;  %v5575_v60 = vld [vmem:[%s6470_s20 + $0x144] sm:$0xf] }
  0x9c   : > { %2345 = vmatmul.bf16.gmra.mxu1 %v4499_v61  ;;  %v4544_v61 = vld [vmem:[%s6470_s20 + $0x150] sm:$0xf0] }
  0x9d   : > { %2674 = vmatmul.bf16.gmra.mxu2 %v4503_v62 }
  0x9e   : > { %3003 = vmatmul.bf16.gmra.mxu3 %v4507_v63  ;;  %v4550_v63 = vld [vmem:[%s6470_s20 + $0x148] sm:$0xf] }
  0xa8   : > { %v1982_v11 = vpop.f32.mrf.mxu0 }
  0xa9   : > { %v2311_v12 = vpop.f32.mrf.mxu1  ;;  %v1983_v15 = vadd.f32 %v6557_v0, %v1982_v11  ;;  %v4543_v11 = vor.u32 %v5577_v59, %v4542_v58 }
  0xab   : > { %2021 = vmatmul.bf16.gmra.mxu0 %v4511_v9  ;;  %v2312_v16 = vadd.f32 %v2311_v12, %v1983_v15  ;;  %v4547_v12 = vor.u32 %v5575_v60, %v4544_v61 }
  0xac   : > { %2350 = vmatmul.bf16.gmra.mxu1 %v4515_v10 }
  0xad   : > { %2679 = vmatmul.bf16.gmra.mxu2 %v4519_v13  ;;  %v4551_v13 = vor.u32 %v5578_v1, %v4550_v63 }
  0xae   : > { %3008 = vmatmul.bf16.gmra.mxu3 %v4523_v14 }
  0xb0   : > { %v2640_v17 = vpop.f32.mrf.mxu2  ;;  %v1984_v20 = vpop.f32.mrf.mxu0 }
  0xb1   : > { %v2969_v18 = vpop.f32.mrf.mxu3  ;;  %v2641_v19 = vadd.f32 %v2640_v17, %v2312_v16  ;;  %v2313_v21 = vpop.f32.mrf.mxu1  ;;  %v1985_v23 = vadd.f32 %v6557_v0, %v1984_v20 }
  0xb3   : > { %v2970_v22 = vadd.f32 %v2969_v18, %v2641_v19  ;;  %v2314_v34 = vadd.f32 %v2313_v21, %v1985_v23  ;;  %v4555_v18 = vor.u32 %v5576_v2, %v4552_v3 }
  0xb5   : > { %v3289_v27 = vsub.f32 0.0, %v2970_v22 }
  0xb7   : > { %v3417_v33 = vmul.f32 1.442695, %v3289_v27 }
  0xb8   : > { %v2642_v35 = vpop.f32.mrf.mxu2  ;;  %v1987_v40 = vpop.f32.mrf.mxu0 }
  0xb9   : > { %v2971_v36 = vpop.f32.mrf.mxu3  ;;  %5832 = vpow2.f32 %v3417_v33  ;;  %v2643_v39 = vadd.f32 %v2642_v35, %v2314_v34  ;;  %v2316_v41 = vpop.f32.mrf.mxu1  ;;  %v1988_v44 = vadd.f32 %v6557_v0, %v1987_v40  ;;  %v4560_v40 = vld [vmem:[%s6470_s20 + $0x170] sm:$0xf0] }
  0xbb   : > { %v2972_v45 = vadd.f32 %v2971_v36, %v2643_v39  ;;  %2026 = vmatmul.bf16.gmra.mxu0 %v4527_v37  ;;  %v2317_v47 = vadd.f32 %v2316_v41, %v1988_v44  ;;  %v4558_v37 = vld [vmem:[%s6470_s20 + $0x160] sm:$0xf]  ;;  %v5579_v39 = vld [vmem:[%s6470_s20 + $0x164] sm:$0xf]  ;;  %v5580_v44 = vld [vmem:[%s6470_s20 + $0x16c] sm:$0xf] }
  0xbc   : > { %2355 = vmatmul.bf16.gmra.mxu1 %v4531_v38  ;;  %v5581_v38 = vld [vmem:[%s6470_s20 + $0x16c] sm:$0xf0] }
  0xbd   : > { %v3290_v46 = vsub.f32 0.0, %v2972_v45  ;;  %2684 = vmatmul.bf16.gmra.mxu2 %v4535_v42  ;;  %v4566_v42 = vld [vmem:[%s6470_s20 + $0x168] sm:$0xf]  ;;  %v4568_v45 = vld [vmem:[%s6470_s20 + $0x178] sm:$0xf0] }
  0xbe   : > { %3013 = vmatmul.bf16.gmra.mxu3 %v4539_v43  ;;  %v5582_v43 = vld [vmem:[%s6470_s20 + $0x174] sm:$0xf0]  ;;  %v4571_v60 = vor.u32 %v5580_v44, %v4568_v45 }
  0xbf   : > { %v5833_v48 = vpop.eup %5832  ;;  %v3419_v49 = vmul.f32 1.442695, %v3290_v46 }
  0xc0   : > { %v3673_v50 = vadd.f32 1.0, %v5833_v48  ;;  %v2645_v51 = vpop.f32.mrf.mxu2  ;;  %v1989_v54 = vpop.f32.mrf.mxu0 }
  0xc1   : > { %v2974_v52 = vpop.f32.mrf.mxu3  ;;  %5834 = vpow2.f32 %v3419_v49  ;;  %v2646_v53 = vadd.f32 %v2645_v51, %v2317_v47  ;;  %v2318_v55 = vpop.f32.mrf.mxu1  ;;  %v1990_v57 = vadd.f32 %v6557_v0, %v1989_v54  ;;  %v4563_v54 = vor.u32 %v5579_v39, %v4560_v40 }
  0xc2   : > { %5836 = vrcp.f32 %v3673_v50 }
  0xc3   : > { %v2975_v56 = vadd.f32 %v2974_v52, %v2646_v53  ;;  %v2319_v6 = vadd.f32 %v2318_v55, %v1990_v57  ;;  %v4559_v53 = vor.u32 %v5581_v38, %v4558_v37  ;;  %v4567_v55 = vor.u32 %v5582_v43, %v4566_v42 }
  0xc5   : > { %v3291_v62 = vsub.f32 0.0, %v2975_v56 }
  0xc7   : > { %v5835_v4 = vpop.eup %5834  ;;  %v3421_v5 = vmul.f32 1.442695, %v3291_v62 }
  0xc8   : > { %v5837_v7 = vpop.eup %5836  ;;  %v3674_v8 = vadd.f32 1.0, %v5835_v4  ;;  %v2647_v9 = vpop.f32.mrf.mxu2 }
  0xc9   : > { %v2976_v10 = vpop.f32.mrf.mxu3  ;;  %v3929_v14 = vmax.f32 %v5837_v7, 0.0  ;;  %5838 = vpow2.f32 %v3421_v5  ;;  %v2648_v15 = vadd.f32 %v2647_v9, %v2319_v6  ;;  %v1992_v16 = vpop.f32.mrf.mxu0 }
  0xca   : > { %v2321_v17 = vpop.f32.mrf.mxu1  ;;  %5840 = vrcp.f32 %v3674_v8  ;;  %v1993_v19 = vadd.f32 %v6557_v0, %v1992_v16  ;;  %v4574_v16 = vld [vmem:[%s6470_s20 + $0x180] sm:$0xf] }
  0xcb   : > { %v4057_v20 = vmin.f32 %v3929_v14, 1.0  ;;  %v2977_v21 = vadd.f32 %v2976_v10, %v2648_v15  ;;  %2031 = vmatmul.bf16.gmra.mxu0 %v4543_v11 }
  0xcc   : > { %2360 = vmatmul.bf16.gmra.mxu1 %v4547_v12  ;;  %v2322_v23 = vadd.f32 %v2321_v17, %v1993_v19  ;;  %v5585_v17 = vld [vmem:[%s6470_s20 + $0x18c] sm:$0xf0]  ;;  %v4576_v19 = vld [vmem:[%s6470_s20 + $0x190] sm:$0xf0] }
  0xcd   : > { %4186 = vst.msk [vmem:[%s6591_s10] sm:$0xff] %vm4185_vm0, %v4057_v20  ;;  %v3292_v22 = vsub.f32 0.0, %v2977_v21  ;;  %2689 = vmatmul.bf16.gmra.mxu2 %v4551_v13  ;;  %v4582_v21 = vld [vmem:[%s6470_s20 + $0x188] sm:$0xf] }
  0xce   : > { %3018 = vmatmul.bf16.gmra.mxu3 %v4555_v18  ;;  %v5583_v18 = vld [vmem:[%s6470_s20 + $0x184] sm:$0xf] }
  0xcf   : > { %v5839_v24 = vpop.eup %5838  ;;  %v3423_v25 = vmul.f32 1.442695, %v3292_v22  ;;  %v5586_v22 = vld [vmem:[%s6470_s20 + $0x194] sm:$0xf0] }
  0xd0   : > { %v5841_v26 = vpop.eup %5840  ;;  %v3675_v27 = vadd.f32 1.0, %v5839_v24  ;;  %v2650_v28 = vpop.f32.mrf.mxu2  ;;  %v4584_v24 = vld [vmem:[%s6470_s20 + $0x198] sm:$0xf0] }
  0xd1   : > { %v2979_v29 = vpop.f32.mrf.mxu3  ;;  %v3930_v30 = vmax.f32 %v5841_v26, 0.0  ;;  %5842 = vpow2.f32 %v3423_v25  ;;  %v2651_v31 = vadd.f32 %v2650_v28, %v2322_v23  ;;  %v1994_v32 = vpop.f32.mrf.mxu0  ;;  %v5584_v23 = vld [vmem:[%s6470_s20 + $0x18c] sm:$0xf] }
  0xd2   : > { %v2323_v33 = vpop.f32.mrf.mxu1  ;;  %5844 = vrcp.f32 %v3675_v27  ;;  %v1995_v36 = vadd.f32 %v6557_v0, %v1994_v32  ;;  %v4575_v32 = vor.u32 %v5585_v17, %v4574_v16  ;;  %v4587_v39 = vor.u32 %v5584_v23, %v4584_v24 }
  0xd3   : > { %v4058_v34 = vmin.f32 %v3930_v30, 1.0  ;;  %v2980_v35 = vadd.f32 %v2979_v29, %v2651_v31 }
  0xd4   : > { %v2324_v48 = vadd.f32 %v2323_v33, %v1995_v36  ;;  %v4579_v33 = vor.u32 %v5583_v18, %v4576_v19 }
  0xd5   : > { %4187 = vst.msk [vmem:[%s6591_s10 + $0x8] sm:$0xff] %vm4185_vm0, %v4058_v34  ;;  %v3293_v41 = vsub.f32 0.0, %v2980_v35  ;;  %v4583_v34 = vor.u32 %v5586_v22, %v4582_v21 }
  0xd7   : > { %v5843_v46 = vpop.eup %5842  ;;  %v3425_v47 = vmul.f32 1.442695, %v3293_v41 }
  0xd8   : > { %v5845_v49 = vpop.eup %5844  ;;  %v3676_v50 = vadd.f32 1.0, %v5843_v46  ;;  %v2652_v51 = vpop.f32.mrf.mxu2 }
  0xd9   : > { %v2981_v52 = vpop.f32.mrf.mxu3  ;;  %v3931_v56 = vmax.f32 %v5845_v49, 0.0  ;;  %5846 = vpow2.f32 %v3425_v47  ;;  %v2653_v57 = vadd.f32 %v2652_v51, %v2324_v48  ;;  %v1997_v58 = vpop.f32.mrf.mxu0 }
  0xda   : > { %v2326_v59 = vpop.f32.mrf.mxu1  ;;  %5848 = vrcp.f32 %v3676_v50  ;;  %v1998_v61 = vadd.f32 %v6557_v0, %v1997_v58  ;;  %v4590_v58 = vld [vmem:[%s6470_s20 + $0x1a0] sm:$0xf] }
  0xdb   : > { %v4059_v62 = vmin.f32 %v3931_v56, 1.0  ;;  %v2982_v63 = vadd.f32 %v2981_v52, %v2653_v57  ;;  %2036 = vmatmul.bf16.gmra.mxu0 %v4559_v53 }
  0xdc   : > { %2365 = vmatmul.bf16.gmra.mxu1 %v4563_v54  ;;  %v2327_v2 = vadd.f32 %v2326_v59, %v1998_v61  ;;  %v5589_v59 = vld [vmem:[%s6470_s20 + $0x1ac] sm:$0xf0]  ;;  %v4592_v61 = vld [vmem:[%s6470_s20 + $0x1b0] sm:$0xf0] }
  0xdd   : > { %4188 = vst.msk [vmem:[%s6591_s10 + $0x10] sm:$0xff] %vm4185_vm0, %v4059_v62  ;;  %v3294_v1 = vsub.f32 0.0, %v2982_v63  ;;  %2694 = vmatmul.bf16.gmra.mxu2 %v4567_v55  ;;  %v4598_v63 = vld [vmem:[%s6470_s20 + $0x1a8] sm:$0xf] }
  0xde   : > { %3023 = vmatmul.bf16.gmra.mxu3 %v4571_v60  ;;  %v5587_v60 = vld [vmem:[%s6470_s20 + $0x1a4] sm:$0xf] }
  0xdf   : > { %v5847_v3 = vpop.eup %5846  ;;  %v3427_v4 = vmul.f32 1.442695, %v3294_v1  ;;  %v5590_v1 = vld [vmem:[%s6470_s20 + $0x1b4] sm:$0xf0] }
  0xe0   : > { %v5849_v5 = vpop.eup %5848  ;;  %v3677_v6 = vadd.f32 1.0, %v5847_v3  ;;  %v2655_v7 = vpop.f32.mrf.mxu2  ;;  %v4600_v3 = vld [vmem:[%s6470_s20 + $0x1b8] sm:$0xf0] }
  0xe1   : > { %v2984_v8 = vpop.f32.mrf.mxu3  ;;  %v3932_v9 = vmax.f32 %v5849_v5, 0.0  ;;  %5850 = vpow2.f32 %v3427_v4  ;;  %v2656_v10 = vadd.f32 %v2655_v7, %v2327_v2  ;;  %v1999_v11 = vpop.f32.mrf.mxu0  ;;  %v5588_v2 = vld [vmem:[%s6470_s20 + $0x1ac] sm:$0xf] }
  0xe2   : > { %v2328_v12 = vpop.f32.mrf.mxu1  ;;  %5852 = vrcp.f32 %v3677_v6  ;;  %v2000_v15 = vadd.f32 %v6557_v0, %v1999_v11  ;;  %v4591_v11 = vor.u32 %v5589_v59, %v4590_v58  ;;  %v4603_v18 = vor.u32 %v5588_v2, %v4600_v3 }
  0xe3   : > { %v4060_v13 = vmin.f32 %v3932_v9, 1.0  ;;  %v2985_v14 = vadd.f32 %v2984_v8, %v2656_v10 }
  0xe4   : > { %v2329_v27 = vadd.f32 %v2328_v12, %v2000_v15  ;;  %v4595_v12 = vor.u32 %v5587_v60, %v4592_v61 }
  0xe5   : > { %4189 = vst.msk [vmem:[%s6591_s10 + $0x18] sm:$0xff] %vm4185_vm0, %v4060_v13  ;;  %v3295_v20 = vsub.f32 0.0, %v2985_v14  ;;  %v4599_v13 = vor.u32 %v5590_v1, %v4598_v63 }
  0xe7   : > { %v5851_v25 = vpop.eup %5850  ;;  %v3429_v26 = vmul.f32 1.442695, %v3295_v20 }
  0xe8   : > { %v5853_v28 = vpop.eup %5852  ;;  %v3678_v29 = vadd.f32 1.0, %v5851_v25  ;;  %v2657_v30 = vpop.f32.mrf.mxu2 }
  0xe9   : > { %v2986_v31 = vpop.f32.mrf.mxu3  ;;  %v3933_v35 = vmax.f32 %v5853_v28, 0.0  ;;  %5854 = vpow2.f32 %v3429_v26  ;;  %v2658_v36 = vadd.f32 %v2657_v30, %v2329_v27  ;;  %v2002_v37 = vpop.f32.mrf.mxu0 }
  0xea   : > { %v2331_v38 = vpop.f32.mrf.mxu1  ;;  %5856 = vrcp.f32 %v3678_v29  ;;  %v2003_v40 = vadd.f32 %v6557_v0, %v2002_v37  ;;  %v4606_v37 = vld [vmem:[%s6470_s20 + $0x1c0] sm:$0xf] }
  0xeb   : > { %v4061_v41 = vmin.f32 %v3933_v35, 1.0  ;;  %v2987_v42 = vadd.f32 %v2986_v31, %v2658_v36  ;;  %2041 = vmatmul.bf16.gmra.mxu0 %v4575_v32 }
  0xec   : > { %2370 = vmatmul.bf16.gmra.mxu1 %v4579_v33  ;;  %v2332_v44 = vadd.f32 %v2331_v38, %v2003_v40  ;;  %v5593_v38 = vld [vmem:[%s6470_s20 + $0x1cc] sm:$0xf0]  ;;  %v4608_v40 = vld [vmem:[%s6470_s20 + $0x1d0] sm:$0xf0] }
  0xed   : > { %4190 = vst.msk [vmem:[%s6591_s10 + $0x20] sm:$0xff] %vm4185_vm0, %v4061_v41  ;;  %v3296_v43 = vsub.f32 0.0, %v2987_v42  ;;  %2699 = vmatmul.bf16.gmra.mxu2 %v4583_v34  ;;  %v4614_v42 = vld [vmem:[%s6470_s20 + $0x1c8] sm:$0xf] }
  0xee   : > { %3028 = vmatmul.bf16.gmra.mxu3 %v4587_v39  ;;  %v5591_v39 = vld [vmem:[%s6470_s20 + $0x1c4] sm:$0xf] }
  0xef   : > { %v5855_v45 = vpop.eup %5854  ;;  %v3431_v46 = vmul.f32 1.442695, %v3296_v43  ;;  %v5594_v43 = vld [vmem:[%s6470_s20 + $0x1d4] sm:$0xf0] }
  0xf0   : > { %v5857_v47 = vpop.eup %5856  ;;  %v3679_v48 = vadd.f32 1.0, %v5855_v45  ;;  %v2660_v49 = vpop.f32.mrf.mxu2  ;;  %v4616_v45 = vld [vmem:[%s6470_s20 + $0x1d8] sm:$0xf0] }
  0xf1   : > { %v2989_v50 = vpop.f32.mrf.mxu3  ;;  %v3934_v51 = vmax.f32 %v5857_v47, 0.0  ;;  %5858 = vpow2.f32 %v3431_v46  ;;  %v2661_v52 = vadd.f32 %v2660_v49, %v2332_v44  ;;  %v2004_v53 = vpop.f32.mrf.mxu0  ;;  %v5592_v44 = vld [vmem:[%s6470_s20 + $0x1cc] sm:$0xf] }
  0xf2   : > { %v2333_v54 = vpop.f32.mrf.mxu1  ;;  %5860 = vrcp.f32 %v3679_v48  ;;  %v2005_v57 = vadd.f32 %v6557_v0, %v2004_v53  ;;  %v4607_v53 = vor.u32 %v5593_v38, %v4606_v37  ;;  %v4619_v60 = vor.u32 %v5592_v44, %v4616_v45 }
  0xf3   : > { %v4062_v55 = vmin.f32 %v3934_v51, 1.0  ;;  %v2990_v56 = vadd.f32 %v2989_v50, %v2661_v52 }
  0xf4   : > { %v2334_v6 = vadd.f32 %v2333_v54, %v2005_v57  ;;  %v4611_v54 = vor.u32 %v5591_v39, %v4608_v40 }
  0xf5   : > { %4191 = vst.msk [vmem:[%s6591_s10 + $0x28] sm:$0xff] %vm4185_vm0, %v4062_v55  ;;  %v3297_v62 = vsub.f32 0.0, %v2990_v56  ;;  %v4615_v55 = vor.u32 %v5594_v43, %v4614_v42 }
  0xf7   : > { %v5859_v4 = vpop.eup %5858  ;;  %v3433_v5 = vmul.f32 1.442695, %v3297_v62 }
  0xf8   : > { %v5861_v7 = vpop.eup %5860  ;;  %v3680_v8 = vadd.f32 1.0, %v5859_v4  ;;  %v2662_v9 = vpop.f32.mrf.mxu2 }
  0xf9   : > { %v2991_v10 = vpop.f32.mrf.mxu3  ;;  %v3935_v14 = vmax.f32 %v5861_v7, 0.0  ;;  %5862 = vpow2.f32 %v3433_v5  ;;  %v2663_v15 = vadd.f32 %v2662_v9, %v2334_v6  ;;  %v2007_v16 = vpop.f32.mrf.mxu0 }
  0xfa   : > { %v2336_v17 = vpop.f32.mrf.mxu1  ;;  %5864 = vrcp.f32 %v3680_v8  ;;  %v2008_v19 = vadd.f32 %v6557_v0, %v2007_v16  ;;  %v4622_v16 = vld [vmem:[%s6470_s20 + $0x1e0] sm:$0xf] }
  0xfb   : > { %v4063_v20 = vmin.f32 %v3935_v14, 1.0  ;;  %v2992_v21 = vadd.f32 %v2991_v10, %v2663_v15  ;;  %2046 = vmatmul.bf16.gmra.mxu0 %v4591_v11 }
  0xfc   : > { %2375 = vmatmul.bf16.gmra.mxu1 %v4595_v12  ;;  %v2337_v23 = vadd.f32 %v2336_v17, %v2008_v19  ;;  %v5597_v17 = vld [vmem:[%s6470_s20 + $0x1ec] sm:$0xf0]  ;;  %v4624_v19 = vld [vmem:[%s6470_s20 + $0x1f0] sm:$0xf0] }
  0xfd   : > { %4192 = vst.msk [vmem:[%s6591_s10 + $0x30] sm:$0xff] %vm4185_vm0, %v4063_v20  ;;  %v3298_v22 = vsub.f32 0.0, %v2992_v21  ;;  %2704 = vmatmul.bf16.gmra.mxu2 %v4599_v13  ;;  %v4630_v21 = vld [vmem:[%s6470_s20 + $0x1e8] sm:$0xf] }
  0xfe   : > { %3033 = vmatmul.bf16.gmra.mxu3 %v4603_v18  ;;  %v5595_v18 = vld [vmem:[%s6470_s20 + $0x1e4] sm:$0xf] }
  0xff   : > { %v5863_v24 = vpop.eup %5862  ;;  %v3435_v25 = vmul.f32 1.442695, %v3298_v22  ;;  %v5598_v22 = vld [vmem:[%s6470_s20 + $0x1f4] sm:$0xf0] }
 0x100   : > { %v5865_v26 = vpop.eup %5864  ;;  %v3681_v27 = vadd.f32 1.0, %v5863_v24  ;;  %v2665_v28 = vpop.f32.mrf.mxu2  ;;  %v4632_v24 = vld [vmem:[%s6470_s20 + $0x1f8] sm:$0xf0] }
 0x101   : > { %v2994_v29 = vpop.f32.mrf.mxu3  ;;  %v3936_v30 = vmax.f32 %v5865_v26, 0.0  ;;  %5866 = vpow2.f32 %v3435_v25  ;;  %v2666_v31 = vadd.f32 %v2665_v28, %v2337_v23  ;;  %v2009_v32 = vpop.f32.mrf.mxu0  ;;  %v5596_v23 = vld [vmem:[%s6470_s20 + $0x1ec] sm:$0xf] }
 0x102   : > { %v2338_v33 = vpop.f32.mrf.mxu1  ;;  %5868 = vrcp.f32 %v3681_v27  ;;  %v2010_v36 = vadd.f32 %v6557_v0, %v2009_v32  ;;  %v4623_v32 = vor.u32 %v5597_v17, %v4622_v16  ;;  %v4635_v39 = vor.u32 %v5596_v23, %v4632_v24 }
 0x103   : > { %v4064_v34 = vmin.f32 %v3936_v30, 1.0  ;;  %v2995_v35 = vadd.f32 %v2994_v29, %v2666_v31 }
 0x104   : > { %v2339_v48 = vadd.f32 %v2338_v33, %v2010_v36  ;;  %v4627_v33 = vor.u32 %v5595_v18, %v4624_v19 }
 0x105   : > { %4193 = vst.msk [vmem:[%s6591_s10 + $0x38] sm:$0xff] %vm4185_vm0, %v4064_v34  ;;  %v3299_v41 = vsub.f32 0.0, %v2995_v35  ;;  %v4631_v34 = vor.u32 %v5598_v22, %v4630_v21 }
 0x107   : > { %v5867_v46 = vpop.eup %5866  ;;  %v3437_v47 = vmul.f32 1.442695, %v3299_v41 }
 0x108   : > { %v5869_v49 = vpop.eup %5868  ;;  %v3682_v50 = vadd.f32 1.0, %v5867_v46  ;;  %v2667_v51 = vpop.f32.mrf.mxu2 }
 0x109   : > { %v2996_v52 = vpop.f32.mrf.mxu3  ;;  %v3937_v56 = vmax.f32 %v5869_v49, 0.0  ;;  %5870 = vpow2.f32 %v3437_v47  ;;  %v2668_v57 = vadd.f32 %v2667_v51, %v2339_v48  ;;  %v2012_v58 = vpop.f32.mrf.mxu0 }
 0x10a   : > { %v2341_v59 = vpop.f32.mrf.mxu1  ;;  %5872 = vrcp.f32 %v3682_v50  ;;  %v2013_v61 = vadd.f32 %v6557_v0, %v2012_v58  ;;  %v4638_v58 = vld [vmem:[%s6470_s20 + $0x200] sm:$0xf] }
 0x10b   : > { %v4065_v62 = vmin.f32 %v3937_v56, 1.0  ;;  %v2997_v63 = vadd.f32 %v2996_v52, %v2668_v57  ;;  %2051 = vmatmul.bf16.gmra.mxu0 %v4607_v53 }
 0x10c   : > { %2380 = vmatmul.bf16.gmra.mxu1 %v4611_v54  ;;  %v2342_v2 = vadd.f32 %v2341_v59, %v2013_v61  ;;  %v5601_v59 = vld [vmem:[%s6470_s20 + $0x20c] sm:$0xf0]  ;;  %v4640_v61 = vld [vmem:[%s6470_s20 + $0x210] sm:$0xf0] }
 0x10d   : > { %4194 = vst.msk [vmem:[%s6591_s10 + $0x40] sm:$0xff] %vm4185_vm0, %v4065_v62  ;;  %v3300_v1 = vsub.f32 0.0, %v2997_v63  ;;  %2709 = vmatmul.bf16.gmra.mxu2 %v4615_v55  ;;  %v4646_v63 = vld [vmem:[%s6470_s20 + $0x208] sm:$0xf] }
 0x10e   : > { %3038 = vmatmul.bf16.gmra.mxu3 %v4619_v60  ;;  %v5599_v60 = vld [vmem:[%s6470_s20 + $0x204] sm:$0xf] }
 0x10f   : > { %v5871_v3 = vpop.eup %5870  ;;  %v3439_v4 = vmul.f32 1.442695, %v3300_v1  ;;  %v5602_v1 = vld [vmem:[%s6470_s20 + $0x214] sm:$0xf0] }
 0x110   : > { %v5873_v5 = vpop.eup %5872  ;;  %v3683_v6 = vadd.f32 1.0, %v5871_v3  ;;  %v2670_v7 = vpop.f32.mrf.mxu2  ;;  %v4648_v3 = vld [vmem:[%s6470_s20 + $0x218] sm:$0xf0] }
 0x111   : > { %v2999_v8 = vpop.f32.mrf.mxu3  ;;  %v3938_v9 = vmax.f32 %v5873_v5, 0.0  ;;  %5874 = vpow2.f32 %v3439_v4  ;;  %v2671_v10 = vadd.f32 %v2670_v7, %v2342_v2  ;;  %v2014_v11 = vpop.f32.mrf.mxu0  ;;  %v5600_v2 = vld [vmem:[%s6470_s20 + $0x20c] sm:$0xf] }
 0x112   : > { %v2343_v12 = vpop.f32.mrf.mxu1  ;;  %5876 = vrcp.f32 %v3683_v6  ;;  %v2015_v15 = vadd.f32 %v6557_v0, %v2014_v11  ;;  %v4639_v11 = vor.u32 %v5601_v59, %v4638_v58  ;;  %v4651_v18 = vor.u32 %v5600_v2, %v4648_v3 }
 0x113   : > { %v4066_v13 = vmin.f32 %v3938_v9, 1.0  ;;  %v3000_v14 = vadd.f32 %v2999_v8, %v2671_v10 }
 0x114   : > { %v2344_v27 = vadd.f32 %v2343_v12, %v2015_v15  ;;  %v4643_v12 = vor.u32 %v5599_v60, %v4640_v61 }
 0x115   : > { %4195 = vst.msk [vmem:[%s6591_s10 + $0x48] sm:$0xff] %vm4185_vm0, %v4066_v13  ;;  %v3301_v20 = vsub.f32 0.0, %v3000_v14  ;;  %v4647_v13 = vor.u32 %v5602_v1, %v4646_v63 }
 0x117   : > { %v5875_v25 = vpop.eup %5874  ;;  %v3441_v26 = vmul.f32 1.442695, %v3301_v20 }
 0x118   : > { %v5877_v28 = vpop.eup %5876  ;;  %v3684_v29 = vadd.f32 1.0, %v5875_v25  ;;  %v2672_v30 = vpop.f32.mrf.mxu2 }
 0x119   : > { %v3001_v31 = vpop.f32.mrf.mxu3  ;;  %v3939_v35 = vmax.f32 %v5877_v28, 0.0  ;;  %5878 = vpow2.f32 %v3441_v26  ;;  %v2673_v36 = vadd.f32 %v2672_v30, %v2344_v27  ;;  %v2017_v37 = vpop.f32.mrf.mxu0 }
 0x11a   : > { %v2346_v38 = vpop.f32.mrf.mxu1  ;;  %5880 = vrcp.f32 %v3684_v29  ;;  %v2018_v40 = vadd.f32 %v6557_v0, %v2017_v37  ;;  %v4654_v37 = vld [vmem:[%s6470_s20 + $0x220] sm:$0xf] }
 0x11b   : > { %v4067_v41 = vmin.f32 %v3939_v35, 1.0  ;;  %v3002_v42 = vadd.f32 %v3001_v31, %v2673_v36  ;;  %2056 = vmatmul.bf16.gmra.mxu0 %v4623_v32 }
 0x11c   : > { %2385 = vmatmul.bf16.gmra.mxu1 %v4627_v33  ;;  %v2347_v44 = vadd.f32 %v2346_v38, %v2018_v40  ;;  %v5605_v38 = vld [vmem:[%s6470_s20 + $0x22c] sm:$0xf0]  ;;  %v4656_v40 = vld [vmem:[%s6470_s20 + $0x230] sm:$0xf0] }
 0x11d   : > { %4196 = vst.msk [vmem:[%s6591_s10 + $0x50] sm:$0xff] %vm4185_vm0, %v4067_v41  ;;  %v3302_v43 = vsub.f32 0.0, %v3002_v42  ;;  %2714 = vmatmul.bf16.gmra.mxu2 %v4631_v34  ;;  %v4662_v42 = vld [vmem:[%s6470_s20 + $0x228] sm:$0xf] }
 0x11e   : > { %3043 = vmatmul.bf16.gmra.mxu3 %v4635_v39  ;;  %v5603_v39 = vld [vmem:[%s6470_s20 + $0x224] sm:$0xf] }
 0x11f   : > { %v5879_v45 = vpop.eup %5878  ;;  %v3443_v46 = vmul.f32 1.442695, %v3302_v43  ;;  %v5606_v43 = vld [vmem:[%s6470_s20 + $0x234] sm:$0xf0] }
 0x120   : > { %v5881_v47 = vpop.eup %5880  ;;  %v3685_v48 = vadd.f32 1.0, %v5879_v45  ;;  %v2675_v49 = vpop.f32.mrf.mxu2  ;;  %v4664_v45 = vld [vmem:[%s6470_s20 + $0x238] sm:$0xf0] }
 0x121   : > { %v3004_v50 = vpop.f32.mrf.mxu3  ;;  %v3940_v51 = vmax.f32 %v5881_v47, 0.0  ;;  %5882 = vpow2.f32 %v3443_v46  ;;  %v2676_v52 = vadd.f32 %v2675_v49, %v2347_v44  ;;  %v2019_v53 = vpop.f32.mrf.mxu0  ;;  %v5604_v44 = vld [vmem:[%s6470_s20 + $0x22c] sm:$0xf] }
 0x122   : > { %v2348_v54 = vpop.f32.mrf.mxu1  ;;  %5884 = vrcp.f32 %v3685_v48  ;;  %v2020_v57 = vadd.f32 %v6557_v0, %v2019_v53  ;;  %v4655_v53 = vor.u32 %v5605_v38, %v4654_v37  ;;  %v4667_v60 = vor.u32 %v5604_v44, %v4664_v45 }
 0x123   : > { %v4068_v55 = vmin.f32 %v3940_v51, 1.0  ;;  %v3005_v56 = vadd.f32 %v3004_v50, %v2676_v52 }
 0x124   : > { %v2349_v6 = vadd.f32 %v2348_v54, %v2020_v57  ;;  %v4659_v54 = vor.u32 %v5603_v39, %v4656_v40  ;;  %v6708_v39 = vld [vmem:[%s7426_s2] ss:$0 sm:$0xff] }
 0x125   : > { %4197 = vst.msk [vmem:[%s6591_s10 + $0x58] sm:$0xff] %vm4185_vm0, %v4068_v55  ;;  %v3303_v62 = vsub.f32 0.0, %v3005_v56  ;;  %v4663_v55 = vor.u32 %v5606_v43, %v4662_v42 }
 0x127   : > { %v5883_v4 = vpop.eup %5882  ;;  %v3445_v5 = vmul.f32 1.442695, %v3303_v62 }
 0x128   : > { %v5885_v7 = vpop.eup %5884  ;;  %v3686_v8 = vadd.f32 1.0, %v5883_v4  ;;  %v2677_v9 = vpop.f32.mrf.mxu2 }
 0x129   : > { %v3006_v10 = vpop.f32.mrf.mxu3  ;;  %v3941_v14 = vmax.f32 %v5885_v7, 0.0  ;;  %5886 = vpow2.f32 %v3445_v5  ;;  %v2678_v15 = vadd.f32 %v2677_v9, %v2349_v6  ;;  %v2022_v16 = vpop.f32.mrf.mxu0 }
 0x12a   : > { %v2351_v17 = vpop.f32.mrf.mxu1  ;;  %5888 = vrcp.f32 %v3686_v8  ;;  %v2023_v19 = vadd.f32 %v6557_v0, %v2022_v16  ;;  %v4670_v16 = vld [vmem:[%s6470_s20 + $0x240] sm:$0xf] }
 0x12b   : > { %v4069_v20 = vmin.f32 %v3941_v14, 1.0  ;;  %v3007_v21 = vadd.f32 %v3006_v10, %v2678_v15  ;;  %2061 = vmatmul.bf16.gmra.mxu0 %v4639_v11 }
 0x12c   : > { %2390 = vmatmul.bf16.gmra.mxu1 %v4643_v12  ;;  %v2352_v23 = vadd.f32 %v2351_v17, %v2023_v19  ;;  %v5609_v17 = vld [vmem:[%s6470_s20 + $0x24c] sm:$0xf0]  ;;  %v4672_v19 = vld [vmem:[%s6470_s20 + $0x250] sm:$0xf0] }
 0x12d   : > { %4198 = vst.msk [vmem:[%s6591_s10 + $0x60] sm:$0xff] %vm4185_vm0, %v4069_v20  ;;  %v3304_v22 = vsub.f32 0.0, %v3007_v21  ;;  %2719 = vmatmul.bf16.gmra.mxu2 %v4647_v13  ;;  %v4678_v21 = vld [vmem:[%s6470_s20 + $0x248] sm:$0xf] }
 0x12e   : > { %3048 = vmatmul.bf16.gmra.mxu3 %v4651_v18  ;;  %v5607_v18 = vld [vmem:[%s6470_s20 + $0x244] sm:$0xf] }
 0x12f   : > { %v5887_v24 = vpop.eup %5886  ;;  %v3447_v25 = vmul.f32 1.442695, %v3304_v22  ;;  %v5610_v22 = vld [vmem:[%s6470_s20 + $0x254] sm:$0xf0] }
 0x130   : > { %v5889_v26 = vpop.eup %5888  ;;  %v3687_v27 = vadd.f32 1.0, %v5887_v24  ;;  %v2680_v28 = vpop.f32.mrf.mxu2  ;;  %v4680_v24 = vld [vmem:[%s6470_s20 + $0x258] sm:$0xf0] }
 0x131   : > { %v3009_v29 = vpop.f32.mrf.mxu3  ;;  %v3942_v30 = vmax.f32 %v5889_v26, 0.0  ;;  %5890 = vpow2.f32 %v3447_v25  ;;  %v2681_v31 = vadd.f32 %v2680_v28, %v2352_v23  ;;  %v2024_v32 = vpop.f32.mrf.mxu0  ;;  %v5608_v23 = vld [vmem:[%s6470_s20 + $0x24c] sm:$0xf] }
 0x132   : > { %v2353_v33 = vpop.f32.mrf.mxu1  ;;  %5892 = vrcp.f32 %v3687_v27  ;;  %v2025_v36 = vadd.f32 %v6557_v0, %v2024_v32  ;;  %v4671_v32 = vor.u32 %v5609_v17, %v4670_v16  ;;  %v4683_v38 = vor.u32 %v5608_v23, %v4680_v24 }
 0x133   : > { %v4070_v34 = vmin.f32 %v3942_v30, 1.0  ;;  %v3010_v35 = vadd.f32 %v3009_v29, %v2681_v31 }
 0x134   : > { %v2354_v48 = vadd.f32 %v2353_v33, %v2025_v36  ;;  %v4679_v33 = vor.u32 %v5610_v22, %v4678_v21 }
 0x135   : > { %4199 = vst.msk [vmem:[%s6591_s10 + $0x68] sm:$0xff] %vm4185_vm0, %v4070_v34  ;;  %v3305_v41 = vsub.f32 0.0, %v3010_v35 }
 0x137   : > { %v5891_v46 = vpop.eup %5890  ;;  %v3449_v47 = vmul.f32 1.442695, %v3305_v41 }
 0x138   : > { %v5893_v49 = vpop.eup %5892  ;;  %v3688_v50 = vadd.f32 1.0, %v5891_v46  ;;  %v2682_v51 = vpop.f32.mrf.mxu2 }
 0x139   : > { %v3011_v52 = vpop.f32.mrf.mxu3  ;;  %v3943_v56 = vmax.f32 %v5893_v49, 0.0  ;;  %5894 = vpow2.f32 %v3449_v47  ;;  %v2683_v57 = vadd.f32 %v2682_v51, %v2354_v48  ;;  %v2027_v58 = vpop.f32.mrf.mxu0 }
 0x13a   : > { %v2356_v59 = vpop.f32.mrf.mxu1  ;;  %5896 = vrcp.f32 %v3688_v50  ;;  %v2028_v61 = vadd.f32 %v6557_v0, %v2027_v58  ;;  %v4686_v58 = vld [vmem:[%s6470_s20 + $0x260] sm:$0xf] }
 0x13b   : > { %v4071_v62 = vmin.f32 %v3943_v56, 1.0  ;;  %v3012_v63 = vadd.f32 %v3011_v52, %v2683_v57  ;;  %2066 = vmatmul.bf16.gmra.mxu0 %v4655_v53 }
 0x13c   : > { %2395 = vmatmul.bf16.gmra.mxu1 %v4659_v54  ;;  %v2357_v2 = vadd.f32 %v2356_v59, %v2028_v61  ;;  %v5613_v59 = vld [vmem:[%s6470_s20 + $0x26c] sm:$0xf0]  ;;  %v4688_v61 = vld [vmem:[%s6470_s20 + $0x270] sm:$0xf0] }
 0x13d   : > { %4200 = vst.msk [vmem:[%s6591_s10 + $0x70] sm:$0xff] %vm4185_vm0, %v4071_v62  ;;  %v3306_v1 = vsub.f32 0.0, %v3012_v63  ;;  %2724 = vmatmul.bf16.gmra.mxu2 %v4663_v55  ;;  %v4694_v63 = vld [vmem:[%s6470_s20 + $0x268] sm:$0xf] }
 0x13e   : > { %3053 = vmatmul.bf16.gmra.mxu3 %v4667_v60  ;;  %v5611_v60 = vld [vmem:[%s6470_s20 + $0x264] sm:$0xf] }
 0x13f   : > { %v5895_v3 = vpop.eup %5894  ;;  %v3451_v4 = vmul.f32 1.442695, %v3306_v1  ;;  %v5614_v1 = vld [vmem:[%s6470_s20 + $0x274] sm:$0xf0] }
 0x140   : > { %v5897_v5 = vpop.eup %5896  ;;  %v3689_v6 = vadd.f32 1.0, %v5895_v3  ;;  %v2685_v7 = vpop.f32.mrf.mxu2  ;;  %v4696_v3 = vld [vmem:[%s6470_s20 + $0x278] sm:$0xf0] }
 0x141   : > { %v3014_v8 = vpop.f32.mrf.mxu3  ;;  %v3944_v9 = vmax.f32 %v5897_v5, 0.0  ;;  %5898 = vpow2.f32 %v3451_v4  ;;  %v2686_v10 = vadd.f32 %v2685_v7, %v2357_v2  ;;  %v2029_v11 = vpop.f32.mrf.mxu0  ;;  %v5612_v2 = vld [vmem:[%s6470_s20 + $0x26c] sm:$0xf] }
 0x142   : > { %v2358_v12 = vpop.f32.mrf.mxu1  ;;  %5900 = vrcp.f32 %v3689_v6  ;;  %v2030_v15 = vadd.f32 %v6557_v0, %v2029_v11  ;;  %v4675_v0 = vor.u32 %v5607_v18, %v4672_v19  ;;  %v4687_v11 = vor.u32 %v5613_v59, %v4686_v58 }
 0x143   : > { %v4072_v13 = vmin.f32 %v3944_v9, 1.0  ;;  %v3015_v14 = vadd.f32 %v3014_v8, %v2686_v10  ;;  %v4699_v18 = vor.u32 %v5612_v2, %v4696_v3 }
 0x144   : > { %v2359_v27 = vadd.f32 %v2358_v12, %v2030_v15  ;;  %v4691_v12 = vor.u32 %v5611_v60, %v4688_v61 }
 0x145   : > { %4201 = vst.msk [vmem:[%s6591_s10 + $0x78] sm:$0xff] %vm4185_vm0, %v4072_v13  ;;  %v3307_v20 = vsub.f32 0.0, %v3015_v14  ;;  %v4695_v13 = vor.u32 %v5614_v1, %v4694_v63 }
 0x147   : > { %v5899_v25 = vpop.eup %5898  ;;  %v3453_v26 = vmul.f32 1.442695, %v3307_v20 }
 0x148   : > { %v5901_v28 = vpop.eup %5900  ;;  %v3690_v29 = vadd.f32 1.0, %v5899_v25  ;;  %v2687_v30 = vpop.f32.mrf.mxu2 }
 0x149   : > { %v3016_v31 = vpop.f32.mrf.mxu3  ;;  %v3945_v34 = vmax.f32 %v5901_v28, 0.0  ;;  %5902 = vpow2.f32 %v3453_v26  ;;  %v2688_v35 = vadd.f32 %v2687_v30, %v2359_v27  ;;  %v2032_v36 = vpop.f32.mrf.mxu0 }
 0x14a   : > { %v2361_v37 = vpop.f32.mrf.mxu1  ;;  %5904 = vrcp.f32 %v3690_v29  ;;  %v2033_v40 = vadd.f32 %v6708_v39, %v2032_v36  ;;  %v4702_v36 = vld [vmem:[%s6470_s20 + $0x280] sm:$0xf] }
 0x14b   : > { %v4073_v41 = vmin.f32 %v3945_v34, 1.0  ;;  %v3017_v42 = vadd.f32 %v3016_v31, %v2688_v35  ;;  %2071 = vmatmul.bf16.gmra.mxu0 %v4671_v32 }
 0x14c   : > { %2400 = vmatmul.bf16.gmra.mxu1 %v4675_v0  ;;  %v2362_v44 = vadd.f32 %v2361_v37, %v2033_v40  ;;  %v5617_v37 = vld [vmem:[%s6470_s20 + $0x28c] sm:$0xf0]  ;;  %v4704_v40 = vld [vmem:[%s6470_s20 + $0x290] sm:$0xf0] }
 0x14d   : > { %4202 = vst.msk [vmem:[%s6591_s10 + $0x80] sm:$0xff] %vm4185_vm0, %v4073_v41  ;;  %v3308_v43 = vsub.f32 0.0, %v3017_v42  ;;  %2729 = vmatmul.bf16.gmra.mxu2 %v4679_v33  ;;  %v4710_v42 = vld [vmem:[%s6470_s20 + $0x288] sm:$0xf] }
 0x14e   : > { %3058 = vmatmul.bf16.gmra.mxu3 %v4683_v38  ;;  %v5615_v38 = vld [vmem:[%s6470_s20 + $0x284] sm:$0xf] }
 0x14f   : > { %v5903_v45 = vpop.eup %5902  ;;  %v3455_v46 = vmul.f32 1.442695, %v3308_v43  ;;  %v5618_v43 = vld [vmem:[%s6470_s20 + $0x294] sm:$0xf0] }
 0x150   : > { %v5905_v47 = vpop.eup %5904  ;;  %v3691_v48 = vadd.f32 1.0, %v5903_v45  ;;  %v2690_v49 = vpop.f32.mrf.mxu2  ;;  %v4712_v45 = vld [vmem:[%s6470_s20 + $0x298] sm:$0xf0] }
 0x151   : > { %v3019_v50 = vpop.f32.mrf.mxu3  ;;  %v3946_v51 = vmax.f32 %v5905_v47, 0.0  ;;  %5906 = vpow2.f32 %v3455_v46  ;;  %v2691_v52 = vadd.f32 %v2690_v49, %v2362_v44  ;;  %v2034_v53 = vpop.f32.mrf.mxu0  ;;  %v5616_v44 = vld [vmem:[%s6470_s20 + $0x28c] sm:$0xf] }
 0x152   : > { %v2363_v54 = vpop.f32.mrf.mxu1  ;;  %5908 = vrcp.f32 %v3691_v48  ;;  %v2035_v57 = vadd.f32 %v6708_v39, %v2034_v53  ;;  %v4703_v53 = vor.u32 %v5617_v37, %v4702_v36  ;;  %v4715_v60 = vor.u32 %v5616_v44, %v4712_v45 }
 0x153   : > { %v4074_v55 = vmin.f32 %v3946_v51, 1.0  ;;  %v3020_v56 = vadd.f32 %v3019_v50, %v2691_v52 }
 0x154   : > { %v2364_v6 = vadd.f32 %v2363_v54, %v2035_v57  ;;  %v4707_v54 = vor.u32 %v5615_v38, %v4704_v40 }
 0x155   : > { %4203 = vst.msk [vmem:[%s6591_s10 + $0x88] sm:$0xff] %vm4185_vm0, %v4074_v55  ;;  %v3309_v62 = vsub.f32 0.0, %v3020_v56  ;;  %v4711_v55 = vor.u32 %v5618_v43, %v4710_v42 }
 0x157   : > { %v5907_v4 = vpop.eup %5906  ;;  %v3457_v5 = vmul.f32 1.442695, %v3309_v62 }
 0x158   : > { %v5909_v7 = vpop.eup %5908  ;;  %v3692_v8 = vadd.f32 1.0, %v5907_v4  ;;  %v2692_v9 = vpop.f32.mrf.mxu2 }
 0x159   : > { %v3021_v10 = vpop.f32.mrf.mxu3  ;;  %v3947_v14 = vmax.f32 %v5909_v7, 0.0  ;;  %5910 = vpow2.f32 %v3457_v5  ;;  %v2693_v15 = vadd.f32 %v2692_v9, %v2364_v6  ;;  %v2037_v16 = vpop.f32.mrf.mxu0 }
 0x15a   : > { %v2366_v17 = vpop.f32.mrf.mxu1  ;;  %5912 = vrcp.f32 %v3692_v8  ;;  %v2038_v19 = vadd.f32 %v6708_v39, %v2037_v16  ;;  %v4718_v16 = vld [vmem:[%s6470_s20 + $0x2a0] sm:$0xf] }
 0x15b   : > { %v4075_v20 = vmin.f32 %v3947_v14, 1.0  ;;  %v3022_v21 = vadd.f32 %v3021_v10, %v2693_v15  ;;  %2076 = vmatmul.bf16.gmra.mxu0 %v4687_v11 }
 0x15c   : > { %2405 = vmatmul.bf16.gmra.mxu1 %v4691_v12  ;;  %v2367_v23 = vadd.f32 %v2366_v17, %v2038_v19  ;;  %v5621_v17 = vld [vmem:[%s6470_s20 + $0x2ac] sm:$0xf0]  ;;  %v4720_v19 = vld [vmem:[%s6470_s20 + $0x2b0] sm:$0xf0] }
 0x15d   : > { %4204 = vst.msk [vmem:[%s6591_s10 + $0x90] sm:$0xff] %vm4185_vm0, %v4075_v20  ;;  %v3310_v22 = vsub.f32 0.0, %v3022_v21  ;;  %2734 = vmatmul.bf16.gmra.mxu2 %v4695_v13  ;;  %v4726_v21 = vld [vmem:[%s6470_s20 + $0x2a8] sm:$0xf] }
 0x15e   : > { %3063 = vmatmul.bf16.gmra.mxu3 %v4699_v18  ;;  %v5619_v18 = vld [vmem:[%s6470_s20 + $0x2a4] sm:$0xf] }
 0x15f   : > { %v5911_v24 = vpop.eup %5910  ;;  %v3459_v25 = vmul.f32 1.442695, %v3310_v22  ;;  %v5622_v22 = vld [vmem:[%s6470_s20 + $0x2b4] sm:$0xf0] }
 0x160   : > { %v5913_v26 = vpop.eup %5912  ;;  %v3693_v27 = vadd.f32 1.0, %v5911_v24  ;;  %v2695_v28 = vpop.f32.mrf.mxu2  ;;  %v4728_v24 = vld [vmem:[%s6470_s20 + $0x2b8] sm:$0xf0] }
 0x161   : > { %v3024_v29 = vpop.f32.mrf.mxu3  ;;  %v3948_v30 = vmax.f32 %v5913_v26, 0.0  ;;  %5914 = vpow2.f32 %v3459_v25  ;;  %v2696_v31 = vadd.f32 %v2695_v28, %v2367_v23  ;;  %v2039_v32 = vpop.f32.mrf.mxu0  ;;  %v5620_v23 = vld [vmem:[%s6470_s20 + $0x2ac] sm:$0xf] }
 0x162   : > { %v2368_v0 = vpop.f32.mrf.mxu1  ;;  %5916 = vrcp.f32 %v3693_v27  ;;  %v2040_v35 = vadd.f32 %v6708_v39, %v2039_v32  ;;  %v4719_v32 = vor.u32 %v5621_v17, %v4718_v16  ;;  %v4731_v38 = vor.u32 %v5620_v23, %v4728_v24 }
 0x163   : > { %v4076_v33 = vmin.f32 %v3948_v30, 1.0  ;;  %v3025_v34 = vadd.f32 %v3024_v29, %v2696_v31 }
 0x164   : > { %v2369_v48 = vadd.f32 %v2368_v0, %v2040_v35  ;;  %v4723_v0 = vor.u32 %v5619_v18, %v4720_v19 }
 0x165   : > { %4205 = vst.msk [vmem:[%s6591_s10 + $0x98] sm:$0xff] %vm4185_vm0, %v4076_v33  ;;  %v3311_v41 = vsub.f32 0.0, %v3025_v34  ;;  %v4727_v33 = vor.u32 %v5622_v22, %v4726_v21 }
 0x167   : > { %v5915_v46 = vpop.eup %5914  ;;  %v3461_v47 = vmul.f32 1.442695, %v3311_v41 }
 0x168   : > { %v5917_v49 = vpop.eup %5916  ;;  %v3694_v50 = vadd.f32 1.0, %v5915_v46  ;;  %v2697_v51 = vpop.f32.mrf.mxu2 }
 0x169   : > { %v3026_v52 = vpop.f32.mrf.mxu3  ;;  %v3949_v56 = vmax.f32 %v5917_v49, 0.0  ;;  %5918 = vpow2.f32 %v3461_v47  ;;  %v2698_v57 = vadd.f32 %v2697_v51, %v2369_v48  ;;  %v2042_v58 = vpop.f32.mrf.mxu0 }
 0x16a   : > { %v2371_v59 = vpop.f32.mrf.mxu1  ;;  %5920 = vrcp.f32 %v3694_v50  ;;  %v2043_v61 = vadd.f32 %v6708_v39, %v2042_v58  ;;  %v4734_v58 = vld [vmem:[%s6470_s20 + $0x2c0] sm:$0xf] }
 0x16b   : > { %v4077_v62 = vmin.f32 %v3949_v56, 1.0  ;;  %v3027_v63 = vadd.f32 %v3026_v52, %v2698_v57  ;;  %2081 = vmatmul.bf16.gmra.mxu0 %v4703_v53 }
 0x16c   : > { %2410 = vmatmul.bf16.gmra.mxu1 %v4707_v54  ;;  %v2372_v2 = vadd.f32 %v2371_v59, %v2043_v61  ;;  %v5625_v59 = vld [vmem:[%s6470_s20 + $0x2cc] sm:$0xf0]  ;;  %v4736_v61 = vld [vmem:[%s6470_s20 + $0x2d0] sm:$0xf0] }
 0x16d   : > { %4206 = vst.msk [vmem:[%s6591_s10 + $0xa0] sm:$0xff] %vm4185_vm0, %v4077_v62  ;;  %v3312_v1 = vsub.f32 0.0, %v3027_v63  ;;  %2739 = vmatmul.bf16.gmra.mxu2 %v4711_v55  ;;  %v4742_v63 = vld [vmem:[%s6470_s20 + $0x2c8] sm:$0xf] }
 0x16e   : > { %3068 = vmatmul.bf16.gmra.mxu3 %v4715_v60  ;;  %v5623_v60 = vld [vmem:[%s6470_s20 + $0x2c4] sm:$0xf] }
 0x16f   : > { %v5919_v3 = vpop.eup %5918  ;;  %v3463_v4 = vmul.f32 1.442695, %v3312_v1  ;;  %v5626_v1 = vld [vmem:[%s6470_s20 + $0x2d4] sm:$0xf0] }
 0x170   : > { %v5921_v5 = vpop.eup %5920  ;;  %v3695_v6 = vadd.f32 1.0, %v5919_v3  ;;  %v2700_v7 = vpop.f32.mrf.mxu2  ;;  %v4744_v3 = vld [vmem:[%s6470_s20 + $0x2d8] sm:$0xf0] }
 0x171   : > { %v3029_v8 = vpop.f32.mrf.mxu3  ;;  %v3950_v9 = vmax.f32 %v5921_v5, 0.0  ;;  %5922 = vpow2.f32 %v3463_v4  ;;  %v2701_v10 = vadd.f32 %v2700_v7, %v2372_v2  ;;  %v2044_v11 = vpop.f32.mrf.mxu0  ;;  %v5624_v2 = vld [vmem:[%s6470_s20 + $0x2cc] sm:$0xf] }
 0x172   : > { %v2373_v12 = vpop.f32.mrf.mxu1  ;;  %5924 = vrcp.f32 %v3695_v6  ;;  %v2045_v15 = vadd.f32 %v6708_v39, %v2044_v11  ;;  %v4735_v11 = vor.u32 %v5625_v59, %v4734_v58  ;;  %v4747_v18 = vor.u32 %v5624_v2, %v4744_v3 }
 0x173   : > { %v4078_v13 = vmin.f32 %v3950_v9, 1.0  ;;  %v3030_v14 = vadd.f32 %v3029_v8, %v2701_v10 }
 0x174   : > { %v2374_v27 = vadd.f32 %v2373_v12, %v2045_v15  ;;  %v4739_v12 = vor.u32 %v5623_v60, %v4736_v61 }
 0x175   : > { %4207 = vst.msk [vmem:[%s6591_s10 + $0xa8] sm:$0xff] %vm4185_vm0, %v4078_v13  ;;  %v3313_v20 = vsub.f32 0.0, %v3030_v14  ;;  %v4743_v13 = vor.u32 %v5626_v1, %v4742_v63 }
 0x177   : > { %v5923_v25 = vpop.eup %5922  ;;  %v3465_v26 = vmul.f32 1.442695, %v3313_v20 }
 0x178   : > { %v5925_v28 = vpop.eup %5924  ;;  %v3696_v29 = vadd.f32 1.0, %v5923_v25  ;;  %v2702_v30 = vpop.f32.mrf.mxu2 }
 0x179   : > { %v3031_v31 = vpop.f32.mrf.mxu3  ;;  %v3951_v34 = vmax.f32 %v5925_v28, 0.0  ;;  %5926 = vpow2.f32 %v3465_v26  ;;  %v2703_v35 = vadd.f32 %v2702_v30, %v2374_v27  ;;  %v2047_v36 = vpop.f32.mrf.mxu0 }
 0x17a   : > { %v2376_v37 = vpop.f32.mrf.mxu1  ;;  %5928 = vrcp.f32 %v3696_v29  ;;  %v2048_v40 = vadd.f32 %v6708_v39, %v2047_v36  ;;  %v4750_v36 = vld [vmem:[%s6470_s20 + $0x2e0] sm:$0xf] }
 0x17b   : > { %v4079_v41 = vmin.f32 %v3951_v34, 1.0  ;;  %v3032_v42 = vadd.f32 %v3031_v31, %v2703_v35  ;;  %2086 = vmatmul.bf16.gmra.mxu0 %v4719_v32 }
 0x17c   : > { %2415 = vmatmul.bf16.gmra.mxu1 %v4723_v0  ;;  %v2377_v44 = vadd.f32 %v2376_v37, %v2048_v40  ;;  %v5629_v37 = vld [vmem:[%s6470_s20 + $0x2ec] sm:$0xf0]  ;;  %v4752_v40 = vld [vmem:[%s6470_s20 + $0x2f0] sm:$0xf0] }
 0x17d   : > { %4208 = vst.msk [vmem:[%s6591_s10 + $0xb0] sm:$0xff] %vm4185_vm0, %v4079_v41  ;;  %v3314_v43 = vsub.f32 0.0, %v3032_v42  ;;  %2744 = vmatmul.bf16.gmra.mxu2 %v4727_v33  ;;  %v4758_v42 = vld [vmem:[%s6470_s20 + $0x2e8] sm:$0xf] }
 0x17e   : > { %3073 = vmatmul.bf16.gmra.mxu3 %v4731_v38  ;;  %v5627_v38 = vld [vmem:[%s6470_s20 + $0x2e4] sm:$0xf] }
 0x17f   : > { %v5927_v45 = vpop.eup %5926  ;;  %v3467_v46 = vmul.f32 1.442695, %v3314_v43  ;;  %v5630_v43 = vld [vmem:[%s6470_s20 + $0x2f4] sm:$0xf0] }
 0x180   : > { %v5929_v47 = vpop.eup %5928  ;;  %v3697_v48 = vadd.f32 1.0, %v5927_v45  ;;  %v2705_v49 = vpop.f32.mrf.mxu2  ;;  %v4760_v45 = vld [vmem:[%s6470_s20 + $0x2f8] sm:$0xf0] }
 0x181   : > { %v3034_v50 = vpop.f32.mrf.mxu3  ;;  %v3952_v51 = vmax.f32 %v5929_v47, 0.0  ;;  %5930 = vpow2.f32 %v3467_v46  ;;  %v2706_v52 = vadd.f32 %v2705_v49, %v2377_v44  ;;  %v2049_v53 = vpop.f32.mrf.mxu0  ;;  %v5628_v44 = vld [vmem:[%s6470_s20 + $0x2ec] sm:$0xf] }
 0x182   : > { %v2378_v54 = vpop.f32.mrf.mxu1  ;;  %5932 = vrcp.f32 %v3697_v48  ;;  %v2050_v57 = vadd.f32 %v6708_v39, %v2049_v53  ;;  %v4751_v53 = vor.u32 %v5629_v37, %v4750_v36  ;;  %v4763_v60 = vor.u32 %v5628_v44, %v4760_v45 }
 0x183   : > { %v4080_v55 = vmin.f32 %v3952_v51, 1.0  ;;  %v3035_v56 = vadd.f32 %v3034_v50, %v2706_v52 }
 0x184   : > { %v2379_v6 = vadd.f32 %v2378_v54, %v2050_v57  ;;  %v4755_v54 = vor.u32 %v5627_v38, %v4752_v40 }
 0x185   : > { %4209 = vst.msk [vmem:[%s6591_s10 + $0xb8] sm:$0xff] %vm4185_vm0, %v4080_v55  ;;  %v3315_v62 = vsub.f32 0.0, %v3035_v56  ;;  %v4759_v55 = vor.u32 %v5630_v43, %v4758_v42 }
 0x187   : > { %v5931_v4 = vpop.eup %5930  ;;  %v3469_v5 = vmul.f32 1.442695, %v3315_v62 }
 0x188   : > { %v5933_v7 = vpop.eup %5932  ;;  %v3698_v8 = vadd.f32 1.0, %v5931_v4  ;;  %v2707_v9 = vpop.f32.mrf.mxu2 }
 0x189   : > { %v3036_v10 = vpop.f32.mrf.mxu3  ;;  %v3953_v14 = vmax.f32 %v5933_v7, 0.0  ;;  %5934 = vpow2.f32 %v3469_v5  ;;  %v2708_v15 = vadd.f32 %v2707_v9, %v2379_v6  ;;  %v2052_v16 = vpop.f32.mrf.mxu0 }
 0x18a   : > { %v2381_v17 = vpop.f32.mrf.mxu1  ;;  %5936 = vrcp.f32 %v3698_v8  ;;  %v2053_v19 = vadd.f32 %v6708_v39, %v2052_v16  ;;  %v4766_v16 = vld [vmem:[%s6470_s20 + $0x300] sm:$0xf] }
 0x18b   : > { %v4081_v20 = vmin.f32 %v3953_v14, 1.0  ;;  %v3037_v21 = vadd.f32 %v3036_v10, %v2708_v15  ;;  %2091 = vmatmul.bf16.gmra.mxu0 %v4735_v11 }
 0x18c   : > { %2420 = vmatmul.bf16.gmra.mxu1 %v4739_v12  ;;  %v2382_v23 = vadd.f32 %v2381_v17, %v2053_v19  ;;  %v5633_v17 = vld [vmem:[%s6470_s20 + $0x30c] sm:$0xf0]  ;;  %v4768_v19 = vld [vmem:[%s6470_s20 + $0x310] sm:$0xf0] }
 0x18d   : > { %4210 = vst.msk [vmem:[%s6591_s10 + $0xc0] sm:$0xff] %vm4185_vm0, %v4081_v20  ;;  %v3316_v22 = vsub.f32 0.0, %v3037_v21  ;;  %2749 = vmatmul.bf16.gmra.mxu2 %v4743_v13  ;;  %v4774_v21 = vld [vmem:[%s6470_s20 + $0x308] sm:$0xf] }
 0x18e   : > { %3078 = vmatmul.bf16.gmra.mxu3 %v4747_v18  ;;  %v5631_v18 = vld [vmem:[%s6470_s20 + $0x304] sm:$0xf] }
 0x18f   : > { %v5935_v24 = vpop.eup %5934  ;;  %v3471_v25 = vmul.f32 1.442695, %v3316_v22  ;;  %v5634_v22 = vld [vmem:[%s6470_s20 + $0x314] sm:$0xf0] }
 0x190   : > { %v5937_v26 = vpop.eup %5936  ;;  %v3699_v27 = vadd.f32 1.0, %v5935_v24  ;;  %v2710_v28 = vpop.f32.mrf.mxu2  ;;  %v4776_v24 = vld [vmem:[%s6470_s20 + $0x318] sm:$0xf0] }
 0x191   : > { %v3039_v29 = vpop.f32.mrf.mxu3  ;;  %v3954_v30 = vmax.f32 %v5937_v26, 0.0  ;;  %5938 = vpow2.f32 %v3471_v25  ;;  %v2711_v31 = vadd.f32 %v2710_v28, %v2382_v23  ;;  %v2054_v32 = vpop.f32.mrf.mxu0  ;;  %v5632_v23 = vld [vmem:[%s6470_s20 + $0x30c] sm:$0xf] }
 0x192   : > { %v2383_v0 = vpop.f32.mrf.mxu1  ;;  %5940 = vrcp.f32 %v3699_v27  ;;  %v2055_v35 = vadd.f32 %v6708_v39, %v2054_v32  ;;  %v4767_v32 = vor.u32 %v5633_v17, %v4766_v16  ;;  %v4779_v38 = vor.u32 %v5632_v23, %v4776_v24 }
 0x193   : > { %v4082_v33 = vmin.f32 %v3954_v30, 1.0  ;;  %v3040_v34 = vadd.f32 %v3039_v29, %v2711_v31 }
 0x194   : > { %v2384_v48 = vadd.f32 %v2383_v0, %v2055_v35  ;;  %v4771_v0 = vor.u32 %v5631_v18, %v4768_v19 }
 0x195   : > { %4211 = vst.msk [vmem:[%s6591_s10 + $0xc8] sm:$0xff] %vm4185_vm0, %v4082_v33  ;;  %v3317_v41 = vsub.f32 0.0, %v3040_v34  ;;  %v4775_v33 = vor.u32 %v5634_v22, %v4774_v21 }
 0x197   : > { %v5939_v46 = vpop.eup %5938  ;;  %v3473_v47 = vmul.f32 1.442695, %v3317_v41 }
 0x198   : > { %v5941_v49 = vpop.eup %5940  ;;  %v3700_v50 = vadd.f32 1.0, %v5939_v46  ;;  %v2712_v51 = vpop.f32.mrf.mxu2 }
 0x199   : > { %v3041_v52 = vpop.f32.mrf.mxu3  ;;  %v3955_v56 = vmax.f32 %v5941_v49, 0.0  ;;  %5942 = vpow2.f32 %v3473_v47  ;;  %v2713_v57 = vadd.f32 %v2712_v51, %v2384_v48  ;;  %v2057_v58 = vpop.f32.mrf.mxu0 }
 0x19a   : > { %v2386_v59 = vpop.f32.mrf.mxu1  ;;  %5944 = vrcp.f32 %v3700_v50  ;;  %v2058_v61 = vadd.f32 %v6708_v39, %v2057_v58  ;;  %v4782_v58 = vld [vmem:[%s6470_s20 + $0x320] sm:$0xf] }
 0x19b   : > { %v4083_v62 = vmin.f32 %v3955_v56, 1.0  ;;  %v3042_v63 = vadd.f32 %v3041_v52, %v2713_v57  ;;  %2096 = vmatmul.bf16.gmra.mxu0 %v4751_v53 }
 0x19c   : > { %2425 = vmatmul.bf16.gmra.mxu1 %v4755_v54  ;;  %v2387_v2 = vadd.f32 %v2386_v59, %v2058_v61  ;;  %v5637_v59 = vld [vmem:[%s6470_s20 + $0x32c] sm:$0xf0]  ;;  %v4784_v61 = vld [vmem:[%s6470_s20 + $0x330] sm:$0xf0] }
 0x19d   : > { %4212 = vst.msk [vmem:[%s6591_s10 + $0xd0] sm:$0xff] %vm4185_vm0, %v4083_v62  ;;  %v3318_v1 = vsub.f32 0.0, %v3042_v63  ;;  %2754 = vmatmul.bf16.gmra.mxu2 %v4759_v55  ;;  %v4790_v63 = vld [vmem:[%s6470_s20 + $0x328] sm:$0xf] }
 0x19e   : > { %3083 = vmatmul.bf16.gmra.mxu3 %v4763_v60  ;;  %v5635_v60 = vld [vmem:[%s6470_s20 + $0x324] sm:$0xf] }
 0x19f   : > { %v5943_v3 = vpop.eup %5942  ;;  %v3475_v4 = vmul.f32 1.442695, %v3318_v1  ;;  %v5638_v1 = vld [vmem:[%s6470_s20 + $0x334] sm:$0xf0] }
 0x1a0   : > { %v5945_v5 = vpop.eup %5944  ;;  %v3701_v6 = vadd.f32 1.0, %v5943_v3  ;;  %v2715_v7 = vpop.f32.mrf.mxu2  ;;  %v4792_v3 = vld [vmem:[%s6470_s20 + $0x338] sm:$0xf0] }
 0x1a1   : > { %v3044_v8 = vpop.f32.mrf.mxu3  ;;  %v3956_v9 = vmax.f32 %v5945_v5, 0.0  ;;  %5946 = vpow2.f32 %v3475_v4  ;;  %v2716_v10 = vadd.f32 %v2715_v7, %v2387_v2  ;;  %v2059_v11 = vpop.f32.mrf.mxu0  ;;  %v5636_v2 = vld [vmem:[%s6470_s20 + $0x32c] sm:$0xf] }
 0x1a2   : > { %v2388_v12 = vpop.f32.mrf.mxu1  ;;  %5948 = vrcp.f32 %v3701_v6  ;;  %v2060_v15 = vadd.f32 %v6708_v39, %v2059_v11  ;;  %v4783_v11 = vor.u32 %v5637_v59, %v4782_v58  ;;  %v4795_v18 = vor.u32 %v5636_v2, %v4792_v3 }
 0x1a3   : > { %v4084_v13 = vmin.f32 %v3956_v9, 1.0  ;;  %v3045_v14 = vadd.f32 %v3044_v8, %v2716_v10 }
 0x1a4   : > { %v2389_v27 = vadd.f32 %v2388_v12, %v2060_v15  ;;  %v4787_v12 = vor.u32 %v5635_v60, %v4784_v61 }
 0x1a5   : > { %4213 = vst.msk [vmem:[%s6591_s10 + $0xd8] sm:$0xff] %vm4185_vm0, %v4084_v13  ;;  %v3319_v20 = vsub.f32 0.0, %v3045_v14  ;;  %v4791_v13 = vor.u32 %v5638_v1, %v4790_v63 }
 0x1a7   : > { %v5947_v25 = vpop.eup %5946  ;;  %v3477_v26 = vmul.f32 1.442695, %v3319_v20 }
 0x1a8   : > { %v5949_v28 = vpop.eup %5948  ;;  %v3702_v29 = vadd.f32 1.0, %v5947_v25  ;;  %v2717_v30 = vpop.f32.mrf.mxu2 }
 0x1a9   : > { %v3046_v31 = vpop.f32.mrf.mxu3  ;;  %v3957_v34 = vmax.f32 %v5949_v28, 0.0  ;;  %5950 = vpow2.f32 %v3477_v26  ;;  %v2718_v35 = vadd.f32 %v2717_v30, %v2389_v27  ;;  %v2062_v36 = vpop.f32.mrf.mxu0 }
 0x1aa   : > { %v2391_v37 = vpop.f32.mrf.mxu1  ;;  %5952 = vrcp.f32 %v3702_v29  ;;  %v2063_v40 = vadd.f32 %v6708_v39, %v2062_v36  ;;  %v4798_v36 = vld [vmem:[%s6470_s20 + $0x340] sm:$0xf] }
 0x1ab   : > { %v4085_v41 = vmin.f32 %v3957_v34, 1.0  ;;  %v3047_v42 = vadd.f32 %v3046_v31, %v2718_v35  ;;  %2101 = vmatmul.bf16.gmra.mxu0 %v4767_v32 }
 0x1ac   : > { %2430 = vmatmul.bf16.gmra.mxu1 %v4771_v0  ;;  %v2392_v44 = vadd.f32 %v2391_v37, %v2063_v40  ;;  %v5641_v37 = vld [vmem:[%s6470_s20 + $0x34c] sm:$0xf0]  ;;  %v4800_v40 = vld [vmem:[%s6470_s20 + $0x350] sm:$0xf0] }
 0x1ad   : > { %4214 = vst.msk [vmem:[%s6591_s10 + $0xe0] sm:$0xff] %vm4185_vm0, %v4085_v41  ;;  %v3320_v43 = vsub.f32 0.0, %v3047_v42  ;;  %2759 = vmatmul.bf16.gmra.mxu2 %v4775_v33  ;;  %v4806_v42 = vld [vmem:[%s6470_s20 + $0x348] sm:$0xf] }
 0x1ae   : > { %3088 = vmatmul.bf16.gmra.mxu3 %v4779_v38  ;;  %v5639_v38 = vld [vmem:[%s6470_s20 + $0x344] sm:$0xf] }
 0x1af   : > { %v5951_v45 = vpop.eup %5950  ;;  %v3479_v46 = vmul.f32 1.442695, %v3320_v43  ;;  %v5642_v43 = vld [vmem:[%s6470_s20 + $0x354] sm:$0xf0] }
 0x1b0   : > { %v5953_v47 = vpop.eup %5952  ;;  %v3703_v48 = vadd.f32 1.0, %v5951_v45  ;;  %v2720_v49 = vpop.f32.mrf.mxu2  ;;  %v4808_v45 = vld [vmem:[%s6470_s20 + $0x358] sm:$0xf0] }
 0x1b1   : > { %v3049_v50 = vpop.f32.mrf.mxu3  ;;  %v3958_v51 = vmax.f32 %v5953_v47, 0.0  ;;  %5954 = vpow2.f32 %v3479_v46  ;;  %v2721_v52 = vadd.f32 %v2720_v49, %v2392_v44  ;;  %v2064_v53 = vpop.f32.mrf.mxu0  ;;  %v5640_v44 = vld [vmem:[%s6470_s20 + $0x34c] sm:$0xf] }
 0x1b2   : > { %v2393_v54 = vpop.f32.mrf.mxu1  ;;  %5956 = vrcp.f32 %v3703_v48  ;;  %v2065_v57 = vadd.f32 %v6708_v39, %v2064_v53  ;;  %v4799_v53 = vor.u32 %v5641_v37, %v4798_v36  ;;  %v4811_v60 = vor.u32 %v5640_v44, %v4808_v45 }
 0x1b3   : > { %v4086_v55 = vmin.f32 %v3958_v51, 1.0  ;;  %v3050_v56 = vadd.f32 %v3049_v50, %v2721_v52 }
 0x1b4   : > { %v2394_v6 = vadd.f32 %v2393_v54, %v2065_v57  ;;  %v4803_v54 = vor.u32 %v5639_v38, %v4800_v40 }
 0x1b5   : > { %4215 = vst.msk [vmem:[%s6591_s10 + $0xe8] sm:$0xff] %vm4185_vm0, %v4086_v55  ;;  %v3321_v62 = vsub.f32 0.0, %v3050_v56  ;;  %v4807_v55 = vor.u32 %v5642_v43, %v4806_v42 }
 0x1b7   : > { %v5955_v4 = vpop.eup %5954  ;;  %v3481_v5 = vmul.f32 1.442695, %v3321_v62 }
 0x1b8   : > { %v5957_v7 = vpop.eup %5956  ;;  %v3704_v8 = vadd.f32 1.0, %v5955_v4  ;;  %v2722_v9 = vpop.f32.mrf.mxu2 }
 0x1b9   : > { %v3051_v10 = vpop.f32.mrf.mxu3  ;;  %v3959_v14 = vmax.f32 %v5957_v7, 0.0  ;;  %5958 = vpow2.f32 %v3481_v5  ;;  %v2723_v15 = vadd.f32 %v2722_v9, %v2394_v6  ;;  %v2067_v16 = vpop.f32.mrf.mxu0 }
 0x1ba   : > { %v2396_v17 = vpop.f32.mrf.mxu1  ;;  %5960 = vrcp.f32 %v3704_v8  ;;  %v2068_v19 = vadd.f32 %v6708_v39, %v2067_v16  ;;  %v4814_v16 = vld [vmem:[%s6470_s20 + $0x360] sm:$0xf] }
 0x1bb   : > { %v4087_v20 = vmin.f32 %v3959_v14, 1.0  ;;  %v3052_v21 = vadd.f32 %v3051_v10, %v2723_v15  ;;  %2106 = vmatmul.bf16.gmra.mxu0 %v4783_v11 }
 0x1bc   : > { %2435 = vmatmul.bf16.gmra.mxu1 %v4787_v12  ;;  %v2397_v23 = vadd.f32 %v2396_v17, %v2068_v19  ;;  %v5645_v17 = vld [vmem:[%s6470_s20 + $0x36c] sm:$0xf0]  ;;  %v4816_v19 = vld [vmem:[%s6470_s20 + $0x370] sm:$0xf0] }
 0x1bd   : > { %4216 = vst.msk [vmem:[%s6591_s10 + $0xf0] sm:$0xff] %vm4185_vm0, %v4087_v20  ;;  %v3322_v22 = vsub.f32 0.0, %v3052_v21  ;;  %2764 = vmatmul.bf16.gmra.mxu2 %v4791_v13  ;;  %v4822_v21 = vld [vmem:[%s6470_s20 + $0x368] sm:$0xf] }
 0x1be   : > { %3093 = vmatmul.bf16.gmra.mxu3 %v4795_v18  ;;  %v5643_v18 = vld [vmem:[%s6470_s20 + $0x364] sm:$0xf] }
 0x1bf   : > { %v5959_v24 = vpop.eup %5958  ;;  %v3483_v25 = vmul.f32 1.442695, %v3322_v22  ;;  %v5646_v22 = vld [vmem:[%s6470_s20 + $0x374] sm:$0xf0] }
 0x1c0   : > { %v5961_v26 = vpop.eup %5960  ;;  %v3705_v27 = vadd.f32 1.0, %v5959_v24  ;;  %v2725_v28 = vpop.f32.mrf.mxu2  ;;  %v4824_v24 = vld [vmem:[%s6470_s20 + $0x378] sm:$0xf0] }
 0x1c1   : > { %v3054_v29 = vpop.f32.mrf.mxu3  ;;  %v3960_v30 = vmax.f32 %v5961_v26, 0.0  ;;  %5962 = vpow2.f32 %v3483_v25  ;;  %v2726_v31 = vadd.f32 %v2725_v28, %v2397_v23  ;;  %v2069_v32 = vpop.f32.mrf.mxu0  ;;  %v5644_v23 = vld [vmem:[%s6470_s20 + $0x36c] sm:$0xf] }
 0x1c2   : > { %v2398_v0 = vpop.f32.mrf.mxu1  ;;  %5964 = vrcp.f32 %v3705_v27  ;;  %v2070_v35 = vadd.f32 %v6708_v39, %v2069_v32  ;;  %v4815_v32 = vor.u32 %v5645_v17, %v4814_v16  ;;  %v4827_v38 = vor.u32 %v5644_v23, %v4824_v24 }
 0x1c3   : > { %v4088_v33 = vmin.f32 %v3960_v30, 1.0  ;;  %v3055_v34 = vadd.f32 %v3054_v29, %v2726_v31 }
 0x1c4   : > { %v2399_v48 = vadd.f32 %v2398_v0, %v2070_v35  ;;  %v4819_v0 = vor.u32 %v5643_v18, %v4816_v19  ;;  %v6853_v18 = vld [vmem:[%s7426_s2] ss:$0 sm:$0xff] }
 0x1c5   : > { %4217 = vst.msk [vmem:[%s6591_s10 + $0xf8] sm:$0xff] %vm4185_vm0, %v4088_v33  ;;  %v3323_v41 = vsub.f32 0.0, %v3055_v34  ;;  %v4823_v33 = vor.u32 %v5646_v22, %v4822_v21 }
 0x1c7   : > { %v5963_v46 = vpop.eup %5962  ;;  %v3485_v47 = vmul.f32 1.442695, %v3323_v41 }
 0x1c8   : > { %v5965_v49 = vpop.eup %5964  ;;  %v3706_v50 = vadd.f32 1.0, %v5963_v46  ;;  %v2727_v51 = vpop.f32.mrf.mxu2 }
 0x1c9   : > { %v3056_v52 = vpop.f32.mrf.mxu3  ;;  %v3961_v56 = vmax.f32 %v5965_v49, 0.0  ;;  %5966 = vpow2.f32 %v3485_v47  ;;  %v2728_v57 = vadd.f32 %v2727_v51, %v2399_v48  ;;  %v2072_v58 = vpop.f32.mrf.mxu0 }
 0x1ca   : > { %v2401_v59 = vpop.f32.mrf.mxu1  ;;  %5968 = vrcp.f32 %v3706_v50  ;;  %v2073_v61 = vadd.f32 %v6708_v39, %v2072_v58  ;;  %v4830_v58 = vld [vmem:[%s6470_s20 + $0x380] sm:$0xf] }
 0x1cb   : > { %v4089_v62 = vmin.f32 %v3961_v56, 1.0  ;;  %v3057_v63 = vadd.f32 %v3056_v52, %v2728_v57  ;;  %2111 = vmatmul.bf16.gmra.mxu0 %v4799_v53 }
 0x1cc   : > { %2440 = vmatmul.bf16.gmra.mxu1 %v4803_v54  ;;  %v2402_v2 = vadd.f32 %v2401_v59, %v2073_v61  ;;  %v5649_v59 = vld [vmem:[%s6470_s20 + $0x38c] sm:$0xf0]  ;;  %v4832_v61 = vld [vmem:[%s6470_s20 + $0x390] sm:$0xf0] }
 0x1cd   : > { %4218 = vst.msk [vmem:[%s6591_s10 + $0x100] sm:$0xff] %vm4185_vm0, %v4089_v62  ;;  %v3324_v1 = vsub.f32 0.0, %v3057_v63  ;;  %2769 = vmatmul.bf16.gmra.mxu2 %v4807_v55  ;;  %v4838_v63 = vld [vmem:[%s6470_s20 + $0x388] sm:$0xf] }
 0x1ce   : > { %3098 = vmatmul.bf16.gmra.mxu3 %v4811_v60  ;;  %v5647_v60 = vld [vmem:[%s6470_s20 + $0x384] sm:$0xf] }
 0x1cf   : > { %v5967_v3 = vpop.eup %5966  ;;  %v3487_v4 = vmul.f32 1.442695, %v3324_v1  ;;  %v5650_v1 = vld [vmem:[%s6470_s20 + $0x394] sm:$0xf0] }
 0x1d0   : > { %v5969_v5 = vpop.eup %5968  ;;  %v3707_v6 = vadd.f32 1.0, %v5967_v3  ;;  %v2730_v7 = vpop.f32.mrf.mxu2  ;;  %v4840_v3 = vld [vmem:[%s6470_s20 + $0x398] sm:$0xf0] }
 0x1d1   : > { %v3059_v8 = vpop.f32.mrf.mxu3  ;;  %v3962_v9 = vmax.f32 %v5969_v5, 0.0  ;;  %5970 = vpow2.f32 %v3487_v4  ;;  %v2731_v10 = vadd.f32 %v2730_v7, %v2402_v2  ;;  %v2074_v11 = vpop.f32.mrf.mxu0  ;;  %v5648_v2 = vld [vmem:[%s6470_s20 + $0x38c] sm:$0xf] }
 0x1d2   : > { %v2403_v12 = vpop.f32.mrf.mxu1  ;;  %5972 = vrcp.f32 %v3707_v6  ;;  %v2075_v15 = vadd.f32 %v6708_v39, %v2074_v11  ;;  %v4831_v11 = vor.u32 %v5649_v59, %v4830_v58  ;;  %v4843_v17 = vor.u32 %v5648_v2, %v4840_v3 }
 0x1d3   : > { %v4090_v13 = vmin.f32 %v3962_v9, 1.0  ;;  %v3060_v14 = vadd.f32 %v3059_v8, %v2731_v10 }
 0x1d4   : > { %v2404_v27 = vadd.f32 %v2403_v12, %v2075_v15  ;;  %v4839_v12 = vor.u32 %v5650_v1, %v4838_v63 }
 0x1d5   : > { %4219 = vst.msk [vmem:[%s6591_s10 + $0x108] sm:$0xff] %vm4185_vm0, %v4090_v13  ;;  %v3325_v20 = vsub.f32 0.0, %v3060_v14 }
 0x1d7   : > { %v5971_v25 = vpop.eup %5970  ;;  %v3489_v26 = vmul.f32 1.442695, %v3325_v20 }
 0x1d8   : > { %v5973_v28 = vpop.eup %5972  ;;  %v3708_v29 = vadd.f32 1.0, %v5971_v25  ;;  %v2732_v30 = vpop.f32.mrf.mxu2 }
 0x1d9   : > { %v3061_v31 = vpop.f32.mrf.mxu3  ;;  %v3963_v34 = vmax.f32 %v5973_v28, 0.0  ;;  %5974 = vpow2.f32 %v3489_v26  ;;  %v2733_v35 = vadd.f32 %v2732_v30, %v2404_v27  ;;  %v2077_v36 = vpop.f32.mrf.mxu0 }
 0x1da   : > { %v2406_v37 = vpop.f32.mrf.mxu1  ;;  %5976 = vrcp.f32 %v3708_v29  ;;  %v2078_v40 = vadd.f32 %v6708_v39, %v2077_v36  ;;  %v4846_v36 = vld [vmem:[%s6470_s20 + $0x3a0] sm:$0xf] }
 0x1db   : > { %v4091_v41 = vmin.f32 %v3963_v34, 1.0  ;;  %v3062_v42 = vadd.f32 %v3061_v31, %v2733_v35  ;;  %2116 = vmatmul.bf16.gmra.mxu0 %v4815_v32 }
 0x1dc   : > { %2445 = vmatmul.bf16.gmra.mxu1 %v4819_v0  ;;  %v2407_v44 = vadd.f32 %v2406_v37, %v2078_v40  ;;  %v5653_v37 = vld [vmem:[%s6470_s20 + $0x3ac] sm:$0xf0]  ;;  %v4848_v40 = vld [vmem:[%s6470_s20 + $0x3b0] sm:$0xf0] }
 0x1dd   : > { %4220 = vst.msk [vmem:[%s6591_s10 + $0x110] sm:$0xff] %vm4185_vm0, %v4091_v41  ;;  %v3326_v43 = vsub.f32 0.0, %v3062_v42  ;;  %2774 = vmatmul.bf16.gmra.mxu2 %v4823_v33  ;;  %v4854_v42 = vld [vmem:[%s6470_s20 + $0x3a8] sm:$0xf] }
 0x1de   : > { %3103 = vmatmul.bf16.gmra.mxu3 %v4827_v38  ;;  %v5651_v38 = vld [vmem:[%s6470_s20 + $0x3a4] sm:$0xf] }
 0x1df   : > { %v5975_v45 = vpop.eup %5974  ;;  %v3491_v46 = vmul.f32 1.442695, %v3326_v43  ;;  %v5654_v43 = vld [vmem:[%s6470_s20 + $0x3b4] sm:$0xf0] }
 0x1e0   : > { %v5977_v47 = vpop.eup %5976  ;;  %v3709_v48 = vadd.f32 1.0, %v5975_v45  ;;  %v2735_v49 = vpop.f32.mrf.mxu2  ;;  %v4856_v45 = vld [vmem:[%s6470_s20 + $0x3b8] sm:$0xf0] }
 0x1e1   : > { %v3064_v50 = vpop.f32.mrf.mxu3  ;;  %v3964_v51 = vmax.f32 %v5977_v47, 0.0  ;;  %5978 = vpow2.f32 %v3491_v46  ;;  %v2736_v52 = vadd.f32 %v2735_v49, %v2407_v44  ;;  %v2079_v53 = vpop.f32.mrf.mxu0  ;;  %v5652_v44 = vld [vmem:[%s6470_s20 + $0x3ac] sm:$0xf] }
 0x1e2   : > { %v2408_v54 = vpop.f32.mrf.mxu1  ;;  %5980 = vrcp.f32 %v3709_v48  ;;  %v2080_v57 = vadd.f32 %v6708_v39, %v2079_v53  ;;  %v4835_v39 = vor.u32 %v5647_v60, %v4832_v61  ;;  %v4847_v53 = vor.u32 %v5653_v37, %v4846_v36 }
 0x1e3   : > { %v4092_v55 = vmin.f32 %v3964_v51, 1.0  ;;  %v3065_v56 = vadd.f32 %v3064_v50, %v2736_v52  ;;  %v4859_v60 = vor.u32 %v5652_v44, %v4856_v45 }
 0x1e4   : > { %v2409_v6 = vadd.f32 %v2408_v54, %v2080_v57  ;;  %v4851_v54 = vor.u32 %v5651_v38, %v4848_v40 }
 0x1e5   : > { %4221 = vst.msk [vmem:[%s6591_s10 + $0x118] sm:$0xff] %vm4185_vm0, %v4092_v55  ;;  %v3327_v62 = vsub.f32 0.0, %v3065_v56  ;;  %v4855_v55 = vor.u32 %v5654_v43, %v4854_v42 }
 0x1e7   : > { %v5979_v4 = vpop.eup %5978  ;;  %v3493_v5 = vmul.f32 1.442695, %v3327_v62 }
 0x1e8   : > { %v5981_v7 = vpop.eup %5980  ;;  %v3710_v8 = vadd.f32 1.0, %v5979_v4  ;;  %v2737_v9 = vpop.f32.mrf.mxu2 }
 0x1e9   : > { %v3066_v10 = vpop.f32.mrf.mxu3  ;;  %v3965_v13 = vmax.f32 %v5981_v7, 0.0  ;;  %5982 = vpow2.f32 %v3493_v5  ;;  %v2738_v14 = vadd.f32 %v2737_v9, %v2409_v6  ;;  %v2082_v15 = vpop.f32.mrf.mxu0 }
 0x1ea   : > { %v2411_v16 = vpop.f32.mrf.mxu1  ;;  %5984 = vrcp.f32 %v3710_v8  ;;  %v2083_v19 = vadd.f32 %v6853_v18, %v2082_v15  ;;  %v4862_v15 = vld [vmem:[%s6470_s20 + $0x3c0] sm:$0xf] }
 0x1eb   : > { %v4093_v20 = vmin.f32 %v3965_v13, 1.0  ;;  %v3067_v21 = vadd.f32 %v3066_v10, %v2738_v14  ;;  %2121 = vmatmul.bf16.gmra.mxu0 %v4831_v11 }
 0x1ec   : > { %2450 = vmatmul.bf16.gmra.mxu1 %v4835_v39  ;;  %v2412_v23 = vadd.f32 %v2411_v16, %v2083_v19  ;;  %v5657_v16 = vld [vmem:[%s6470_s20 + $0x3cc] sm:$0xf0]  ;;  %v4864_v19 = vld [vmem:[%s6470_s20 + $0x3d0] sm:$0xf0] }
 0x1ed   : > { %4222 = vst.msk [vmem:[%s6591_s10 + $0x120] sm:$0xff] %vm4185_vm0, %v4093_v20  ;;  %v3328_v22 = vsub.f32 0.0, %v3067_v21  ;;  %2779 = vmatmul.bf16.gmra.mxu2 %v4839_v12  ;;  %v4870_v21 = vld [vmem:[%s6470_s20 + $0x3c8] sm:$0xf] }
 0x1ee   : > { %3108 = vmatmul.bf16.gmra.mxu3 %v4843_v17  ;;  %v5655_v17 = vld [vmem:[%s6470_s20 + $0x3c4] sm:$0xf] }
 0x1ef   : > { %v5983_v24 = vpop.eup %5982  ;;  %v3495_v25 = vmul.f32 1.442695, %v3328_v22  ;;  %v5658_v22 = vld [vmem:[%s6470_s20 + $0x3d4] sm:$0xf0] }
 0x1f0   : > { %v5985_v26 = vpop.eup %5984  ;;  %v3711_v27 = vadd.f32 1.0, %v5983_v24  ;;  %v2740_v28 = vpop.f32.mrf.mxu2  ;;  %v4872_v24 = vld [vmem:[%s6470_s20 + $0x3d8] sm:$0xf0] }
 0x1f1   : > { %v3069_v29 = vpop.f32.mrf.mxu3  ;;  %v3966_v30 = vmax.f32 %v5985_v26, 0.0  ;;  %5986 = vpow2.f32 %v3495_v25  ;;  %v2741_v31 = vadd.f32 %v2740_v28, %v2412_v23  ;;  %v2084_v32 = vpop.f32.mrf.mxu0  ;;  %v5656_v23 = vld [vmem:[%s6470_s20 + $0x3cc] sm:$0xf] }
 0x1f2   : > { %v2413_v0 = vpop.f32.mrf.mxu1  ;;  %5988 = vrcp.f32 %v3711_v27  ;;  %v2085_v35 = vadd.f32 %v6853_v18, %v2084_v32  ;;  %v4863_v32 = vor.u32 %v5657_v16, %v4862_v15  ;;  %v4875_v38 = vor.u32 %v5656_v23, %v4872_v24 }
 0x1f3   : > { %v4094_v33 = vmin.f32 %v3966_v30, 1.0  ;;  %v3070_v34 = vadd.f32 %v3069_v29, %v2741_v31 }
 0x1f4   : > { %v2414_v48 = vadd.f32 %v2413_v0, %v2085_v35  ;;  %v4867_v0 = vor.u32 %v5655_v17, %v4864_v19 }
 0x1f5   : > { %4223 = vst.msk [vmem:[%s6591_s10 + $0x128] sm:$0xff] %vm4185_vm0, %v4094_v33  ;;  %v3329_v41 = vsub.f32 0.0, %v3070_v34  ;;  %v4871_v33 = vor.u32 %v5658_v22, %v4870_v21 }
 0x1f7   : > { %v5987_v46 = vpop.eup %5986  ;;  %v3497_v47 = vmul.f32 1.442695, %v3329_v41 }
 0x1f8   : > { %v5989_v49 = vpop.eup %5988  ;;  %v3712_v50 = vadd.f32 1.0, %v5987_v46  ;;  %v2742_v51 = vpop.f32.mrf.mxu2 }
 0x1f9   : > { %v3071_v52 = vpop.f32.mrf.mxu3  ;;  %v3967_v56 = vmax.f32 %v5989_v49, 0.0  ;;  %5990 = vpow2.f32 %v3497_v47  ;;  %v2743_v57 = vadd.f32 %v2742_v51, %v2414_v48  ;;  %v2087_v58 = vpop.f32.mrf.mxu0 }
 0x1fa   : > { %v2416_v59 = vpop.f32.mrf.mxu1  ;;  %5992 = vrcp.f32 %v3712_v50  ;;  %v2088_v61 = vadd.f32 %v6853_v18, %v2087_v58  ;;  %v4878_v58 = vld [vmem:[%s6470_s20 + $0x3e0] sm:$0xf] }
 0x1fb   : > { %v4095_v62 = vmin.f32 %v3967_v56, 1.0  ;;  %v3072_v63 = vadd.f32 %v3071_v52, %v2743_v57  ;;  %2126 = vmatmul.bf16.gmra.mxu0 %v4847_v53 }
 0x1fc   : > { %2455 = vmatmul.bf16.gmra.mxu1 %v4851_v54  ;;  %v2417_v2 = vadd.f32 %v2416_v59, %v2088_v61  ;;  %v5661_v59 = vld [vmem:[%s6470_s20 + $0x3ec] sm:$0xf0]  ;;  %v4880_v61 = vld [vmem:[%s6470_s20 + $0x3f0] sm:$0xf0] }
 0x1fd   : > { %4224 = vst.msk [vmem:[%s6591_s10 + $0x130] sm:$0xff] %vm4185_vm0, %v4095_v62  ;;  %v3330_v1 = vsub.f32 0.0, %v3072_v63  ;;  %2784 = vmatmul.bf16.gmra.mxu2 %v4855_v55  ;;  %v4886_v63 = vld [vmem:[%s6470_s20 + $0x3e8] sm:$0xf] }
 0x1fe   : > { %3113 = vmatmul.bf16.gmra.mxu3 %v4859_v60  ;;  %v5659_v60 = vld [vmem:[%s6470_s20 + $0x3e4] sm:$0xf] }
 0x1ff   : > { %v5991_v3 = vpop.eup %5990  ;;  %v3499_v4 = vmul.f32 1.442695, %v3330_v1  ;;  %v5662_v1 = vld [vmem:[%s6470_s20 + $0x3f4] sm:$0xf0] }
 0x200   : > { %v5993_v5 = vpop.eup %5992  ;;  %v3713_v6 = vadd.f32 1.0, %v5991_v3  ;;  %v2745_v7 = vpop.f32.mrf.mxu2  ;;  %v4888_v3 = vld [vmem:[%s6470_s20 + $0x3f8] sm:$0xf0] }
 0x201   : > { %v3074_v8 = vpop.f32.mrf.mxu3  ;;  %v3968_v9 = vmax.f32 %v5993_v5, 0.0  ;;  %5994 = vpow2.f32 %v3499_v4  ;;  %v2746_v10 = vadd.f32 %v2745_v7, %v2417_v2  ;;  %v2089_v11 = vpop.f32.mrf.mxu0  ;;  %v5660_v2 = vld [vmem:[%s6470_s20 + $0x3ec] sm:$0xf] }
 0x202   : > { %v2418_v39 = vpop.f32.mrf.mxu1  ;;  %5996 = vrcp.f32 %v3713_v6  ;;  %v2090_v14 = vadd.f32 %v6853_v18, %v2089_v11  ;;  %v4879_v11 = vor.u32 %v5661_v59, %v4878_v58  ;;  %v4891_v17 = vor.u32 %v5660_v2, %v4888_v3 }
 0x203   : > { %v4096_v12 = vmin.f32 %v3968_v9, 1.0  ;;  %v3075_v13 = vadd.f32 %v3074_v8, %v2746_v10 }
 0x204   : > { %v2419_v27 = vadd.f32 %v2418_v39, %v2090_v14  ;;  %v4883_v39 = vor.u32 %v5659_v60, %v4880_v61 }
 0x205   : > { %4225 = vst.msk [vmem:[%s6591_s10 + $0x138] sm:$0xff] %vm4185_vm0, %v4096_v12  ;;  %v3331_v20 = vsub.f32 0.0, %v3075_v13  ;;  %v4887_v12 = vor.u32 %v5662_v1, %v4886_v63 }
 0x207   : > { %v5995_v25 = vpop.eup %5994  ;;  %v3501_v26 = vmul.f32 1.442695, %v3331_v20 }
 0x208   : > { %v5997_v28 = vpop.eup %5996  ;;  %v3714_v29 = vadd.f32 1.0, %v5995_v25  ;;  %v2747_v30 = vpop.f32.mrf.mxu2 }
 0x209   : > { %v3076_v31 = vpop.f32.mrf.mxu3  ;;  %v3969_v34 = vmax.f32 %v5997_v28, 0.0  ;;  %5998 = vpow2.f32 %v3501_v26  ;;  %v2748_v35 = vadd.f32 %v2747_v30, %v2419_v27  ;;  %v2092_v36 = vpop.f32.mrf.mxu0 }
 0x20a   : > { %v2421_v37 = vpop.f32.mrf.mxu1  ;;  %6000 = vrcp.f32 %v3714_v29  ;;  %v2093_v40 = vadd.f32 %v6853_v18, %v2092_v36  ;;  %v4894_v36 = vld [vmem:[%s6470_s20 + $0x400] sm:$0xf] }
 0x20b   : > { %v4097_v41 = vmin.f32 %v3969_v34, 1.0  ;;  %v3077_v42 = vadd.f32 %v3076_v31, %v2748_v35  ;;  %2131 = vmatmul.bf16.gmra.mxu0 %v4863_v32 }
 0x20c   : > { %2460 = vmatmul.bf16.gmra.mxu1 %v4867_v0  ;;  %v2422_v44 = vadd.f32 %v2421_v37, %v2093_v40  ;;  %v5665_v37 = vld [vmem:[%s6470_s20 + $0x40c] sm:$0xf0]  ;;  %v4896_v40 = vld [vmem:[%s6470_s20 + $0x410] sm:$0xf0] }
 0x20d   : > { %4226 = vst.msk [vmem:[%s6591_s10 + $0x140] sm:$0xff] %vm4185_vm0, %v4097_v41  ;;  %v3332_v43 = vsub.f32 0.0, %v3077_v42  ;;  %2789 = vmatmul.bf16.gmra.mxu2 %v4871_v33  ;;  %v4902_v42 = vld [vmem:[%s6470_s20 + $0x408] sm:$0xf] }
 0x20e   : > { %3118 = vmatmul.bf16.gmra.mxu3 %v4875_v38  ;;  %v5663_v38 = vld [vmem:[%s6470_s20 + $0x404] sm:$0xf] }
 0x20f   : > { %v5999_v45 = vpop.eup %5998  ;;  %v3503_v46 = vmul.f32 1.442695, %v3332_v43  ;;  %v5666_v43 = vld [vmem:[%s6470_s20 + $0x414] sm:$0xf0] }
 0x210   : > { %v6001_v47 = vpop.eup %6000  ;;  %v3715_v48 = vadd.f32 1.0, %v5999_v45  ;;  %v2750_v49 = vpop.f32.mrf.mxu2  ;;  %v4904_v45 = vld [vmem:[%s6470_s20 + $0x418] sm:$0xf0] }
 0x211   : > { %v3079_v50 = vpop.f32.mrf.mxu3  ;;  %v3970_v51 = vmax.f32 %v6001_v47, 0.0  ;;  %6002 = vpow2.f32 %v3503_v46  ;;  %v2751_v52 = vadd.f32 %v2750_v49, %v2422_v44  ;;  %v2094_v53 = vpop.f32.mrf.mxu0  ;;  %v5664_v44 = vld [vmem:[%s6470_s20 + $0x40c] sm:$0xf] }
 0x212   : > { %v2423_v54 = vpop.f32.mrf.mxu1  ;;  %6004 = vrcp.f32 %v3715_v48  ;;  %v2095_v57 = vadd.f32 %v6853_v18, %v2094_v53  ;;  %v4895_v53 = vor.u32 %v5665_v37, %v4894_v36  ;;  %v4907_v60 = vor.u32 %v5664_v44, %v4904_v45 }
 0x213   : > { %v4098_v55 = vmin.f32 %v3970_v51, 1.0  ;;  %v3080_v56 = vadd.f32 %v3079_v50, %v2751_v52 }
 0x214   : > { %v2424_v6 = vadd.f32 %v2423_v54, %v2095_v57  ;;  %v4899_v54 = vor.u32 %v5663_v38, %v4896_v40 }
 0x215   : > { %4227 = vst.msk [vmem:[%s6591_s10 + $0x148] sm:$0xff] %vm4185_vm0, %v4098_v55  ;;  %v3333_v62 = vsub.f32 0.0, %v3080_v56  ;;  %v4903_v55 = vor.u32 %v5666_v43, %v4902_v42 }
 0x217   : > { %v6003_v4 = vpop.eup %6002  ;;  %v3505_v5 = vmul.f32 1.442695, %v3333_v62 }
 0x218   : > { %v6005_v7 = vpop.eup %6004  ;;  %v3716_v8 = vadd.f32 1.0, %v6003_v4  ;;  %v2752_v9 = vpop.f32.mrf.mxu2 }
 0x219   : > { %v3081_v10 = vpop.f32.mrf.mxu3  ;;  %v3971_v13 = vmax.f32 %v6005_v7, 0.0  ;;  %6006 = vpow2.f32 %v3505_v5  ;;  %v2753_v14 = vadd.f32 %v2752_v9, %v2424_v6  ;;  %v2097_v15 = vpop.f32.mrf.mxu0 }
 0x21a   : > { %v2426_v16 = vpop.f32.mrf.mxu1  ;;  %6008 = vrcp.f32 %v3716_v8  ;;  %v2098_v19 = vadd.f32 %v6853_v18, %v2097_v15  ;;  %v4910_v15 = vld [vmem:[%s6470_s20 + $0x420] sm:$0xf] }
 0x21b   : > { %v4099_v20 = vmin.f32 %v3971_v13, 1.0  ;;  %v3082_v21 = vadd.f32 %v3081_v10, %v2753_v14  ;;  %2136 = vmatmul.bf16.gmra.mxu0 %v4879_v11 }
 0x21c   : > { %2465 = vmatmul.bf16.gmra.mxu1 %v4883_v39  ;;  %v2427_v23 = vadd.f32 %v2426_v16, %v2098_v19  ;;  %v5669_v16 = vld [vmem:[%s6470_s20 + $0x42c] sm:$0xf0]  ;;  %v4912_v19 = vld [vmem:[%s6470_s20 + $0x430] sm:$0xf0] }
 0x21d   : > { %4228 = vst.msk [vmem:[%s6591_s10 + $0x150] sm:$0xff] %vm4185_vm0, %v4099_v20  ;;  %v3334_v22 = vsub.f32 0.0, %v3082_v21  ;;  %2794 = vmatmul.bf16.gmra.mxu2 %v4887_v12  ;;  %v4918_v21 = vld [vmem:[%s6470_s20 + $0x428] sm:$0xf] }
 0x21e   : > { %3123 = vmatmul.bf16.gmra.mxu3 %v4891_v17  ;;  %v5667_v17 = vld [vmem:[%s6470_s20 + $0x424] sm:$0xf] }
 0x21f   : > { %v6007_v24 = vpop.eup %6006  ;;  %v3507_v25 = vmul.f32 1.442695, %v3334_v22  ;;  %v5670_v22 = vld [vmem:[%s6470_s20 + $0x434] sm:$0xf0] }
 0x220   : > { %v6009_v26 = vpop.eup %6008  ;;  %v3717_v27 = vadd.f32 1.0, %v6007_v24  ;;  %v2755_v28 = vpop.f32.mrf.mxu2  ;;  %v4920_v24 = vld [vmem:[%s6470_s20 + $0x438] sm:$0xf0] }
 0x221   : > { %v3084_v29 = vpop.f32.mrf.mxu3  ;;  %v3972_v30 = vmax.f32 %v6009_v26, 0.0  ;;  %6010 = vpow2.f32 %v3507_v25  ;;  %v2756_v31 = vadd.f32 %v2755_v28, %v2427_v23  ;;  %v2099_v32 = vpop.f32.mrf.mxu0  ;;  %v5668_v23 = vld [vmem:[%s6470_s20 + $0x42c] sm:$0xf] }
 0x222   : > { %v2428_v0 = vpop.f32.mrf.mxu1  ;;  %6012 = vrcp.f32 %v3717_v27  ;;  %v2100_v35 = vadd.f32 %v6853_v18, %v2099_v32  ;;  %v4911_v32 = vor.u32 %v5669_v16, %v4910_v15  ;;  %v4923_v38 = vor.u32 %v5668_v23, %v4920_v24 }
 0x223   : > { %v4100_v33 = vmin.f32 %v3972_v30, 1.0  ;;  %v3085_v34 = vadd.f32 %v3084_v29, %v2756_v31 }
 0x224   : > { %v2429_v48 = vadd.f32 %v2428_v0, %v2100_v35  ;;  %v4915_v0 = vor.u32 %v5667_v17, %v4912_v19 }
 0x225   : > { %4229 = vst.msk [vmem:[%s6591_s10 + $0x158] sm:$0xff] %vm4185_vm0, %v4100_v33  ;;  %v3335_v41 = vsub.f32 0.0, %v3085_v34  ;;  %v4919_v33 = vor.u32 %v5670_v22, %v4918_v21 }
 0x227   : > { %v6011_v46 = vpop.eup %6010  ;;  %v3509_v47 = vmul.f32 1.442695, %v3335_v41 }
 0x228   : > { %v6013_v49 = vpop.eup %6012  ;;  %v3718_v50 = vadd.f32 1.0, %v6011_v46  ;;  %v2757_v51 = vpop.f32.mrf.mxu2 }
 0x229   : > { %v3086_v52 = vpop.f32.mrf.mxu3  ;;  %v3973_v56 = vmax.f32 %v6013_v49, 0.0  ;;  %6014 = vpow2.f32 %v3509_v47  ;;  %v2758_v57 = vadd.f32 %v2757_v51, %v2429_v48  ;;  %v2102_v58 = vpop.f32.mrf.mxu0 }
 0x22a   : > { %v2431_v59 = vpop.f32.mrf.mxu1  ;;  %6016 = vrcp.f32 %v3718_v50  ;;  %v2103_v61 = vadd.f32 %v6853_v18, %v2102_v58  ;;  %v4926_v58 = vld [vmem:[%s6470_s20 + $0x440] sm:$0xf] }
 0x22b   : > { %v4101_v62 = vmin.f32 %v3973_v56, 1.0  ;;  %v3087_v63 = vadd.f32 %v3086_v52, %v2758_v57  ;;  %2141 = vmatmul.bf16.gmra.mxu0 %v4895_v53 }
 0x22c   : > { %2470 = vmatmul.bf16.gmra.mxu1 %v4899_v54  ;;  %v2432_v2 = vadd.f32 %v2431_v59, %v2103_v61  ;;  %v5673_v59 = vld [vmem:[%s6470_s20 + $0x44c] sm:$0xf0]  ;;  %v4928_v61 = vld [vmem:[%s6470_s20 + $0x450] sm:$0xf0] }
 0x22d   : > { %4230 = vst.msk [vmem:[%s6591_s10 + $0x160] sm:$0xff] %vm4185_vm0, %v4101_v62  ;;  %v3336_v1 = vsub.f32 0.0, %v3087_v63  ;;  %2799 = vmatmul.bf16.gmra.mxu2 %v4903_v55  ;;  %v4934_v63 = vld [vmem:[%s6470_s20 + $0x448] sm:$0xf] }
 0x22e   : > { %3128 = vmatmul.bf16.gmra.mxu3 %v4907_v60  ;;  %v5671_v60 = vld [vmem:[%s6470_s20 + $0x444] sm:$0xf] }
 0x22f   : > { %v6015_v3 = vpop.eup %6014  ;;  %v3511_v4 = vmul.f32 1.442695, %v3336_v1  ;;  %v5674_v1 = vld [vmem:[%s6470_s20 + $0x454] sm:$0xf0] }
 0x230   : > { %v6017_v5 = vpop.eup %6016  ;;  %v3719_v6 = vadd.f32 1.0, %v6015_v3  ;;  %v2760_v7 = vpop.f32.mrf.mxu2  ;;  %v4936_v3 = vld [vmem:[%s6470_s20 + $0x458] sm:$0xf0] }
 0x231   : > { %v3089_v8 = vpop.f32.mrf.mxu3  ;;  %v3974_v9 = vmax.f32 %v6017_v5, 0.0  ;;  %6018 = vpow2.f32 %v3511_v4  ;;  %v2761_v10 = vadd.f32 %v2760_v7, %v2432_v2  ;;  %v2104_v11 = vpop.f32.mrf.mxu0  ;;  %v5672_v2 = vld [vmem:[%s6470_s20 + $0x44c] sm:$0xf] }
 0x232   : > { %v2433_v39 = vpop.f32.mrf.mxu1  ;;  %6020 = vrcp.f32 %v3719_v6  ;;  %v2105_v14 = vadd.f32 %v6853_v18, %v2104_v11  ;;  %v4927_v11 = vor.u32 %v5673_v59, %v4926_v58  ;;  %v4939_v17 = vor.u32 %v5672_v2, %v4936_v3 }
 0x233   : > { %v4102_v12 = vmin.f32 %v3974_v9, 1.0  ;;  %v3090_v13 = vadd.f32 %v3089_v8, %v2761_v10 }
 0x234   : > { %v2434_v27 = vadd.f32 %v2433_v39, %v2105_v14  ;;  %v4931_v39 = vor.u32 %v5671_v60, %v4928_v61 }
 0x235   : > { %4231 = vst.msk [vmem:[%s6591_s10 + $0x168] sm:$0xff] %vm4185_vm0, %v4102_v12  ;;  %v3337_v20 = vsub.f32 0.0, %v3090_v13  ;;  %v4935_v12 = vor.u32 %v5674_v1, %v4934_v63 }
 0x237   : > { %v6019_v25 = vpop.eup %6018  ;;  %v3513_v26 = vmul.f32 1.442695, %v3337_v20 }
 0x238   : > { %v6021_v28 = vpop.eup %6020  ;;  %v3720_v29 = vadd.f32 1.0, %v6019_v25  ;;  %v2762_v30 = vpop.f32.mrf.mxu2 }
 0x239   : > { %v3091_v31 = vpop.f32.mrf.mxu3  ;;  %v3975_v34 = vmax.f32 %v6021_v28, 0.0  ;;  %6022 = vpow2.f32 %v3513_v26  ;;  %v2763_v35 = vadd.f32 %v2762_v30, %v2434_v27  ;;  %v2107_v36 = vpop.f32.mrf.mxu0 }
 0x23a   : > { %v2436_v37 = vpop.f32.mrf.mxu1  ;;  %6024 = vrcp.f32 %v3720_v29  ;;  %v2108_v40 = vadd.f32 %v6853_v18, %v2107_v36  ;;  %v4942_v36 = vld [vmem:[%s6470_s20 + $0x460] sm:$0xf] }
 0x23b   : > { %v4103_v41 = vmin.f32 %v3975_v34, 1.0  ;;  %v3092_v42 = vadd.f32 %v3091_v31, %v2763_v35  ;;  %2146 = vmatmul.bf16.gmra.mxu0 %v4911_v32 }
 0x23c   : > { %2475 = vmatmul.bf16.gmra.mxu1 %v4915_v0  ;;  %v2437_v44 = vadd.f32 %v2436_v37, %v2108_v40  ;;  %v5677_v37 = vld [vmem:[%s6470_s20 + $0x46c] sm:$0xf0]  ;;  %v4944_v40 = vld [vmem:[%s6470_s20 + $0x470] sm:$0xf0] }
 0x23d   : > { %4232 = vst.msk [vmem:[%s6591_s10 + $0x170] sm:$0xff] %vm4185_vm0, %v4103_v41  ;;  %v3338_v43 = vsub.f32 0.0, %v3092_v42  ;;  %2804 = vmatmul.bf16.gmra.mxu2 %v4919_v33  ;;  %v4950_v42 = vld [vmem:[%s6470_s20 + $0x468] sm:$0xf] }
 0x23e   : > { %3133 = vmatmul.bf16.gmra.mxu3 %v4923_v38  ;;  %v5675_v38 = vld [vmem:[%s6470_s20 + $0x464] sm:$0xf] }
 0x23f   : > { %v6023_v45 = vpop.eup %6022  ;;  %v3515_v46 = vmul.f32 1.442695, %v3338_v43  ;;  %v5678_v43 = vld [vmem:[%s6470_s20 + $0x474] sm:$0xf0] }
 0x240   : > { %v6025_v47 = vpop.eup %6024  ;;  %v3721_v48 = vadd.f32 1.0, %v6023_v45  ;;  %v2765_v49 = vpop.f32.mrf.mxu2  ;;  %v4952_v45 = vld [vmem:[%s6470_s20 + $0x478] sm:$0xf0] }
 0x241   : > { %v3094_v50 = vpop.f32.mrf.mxu3  ;;  %v3976_v51 = vmax.f32 %v6025_v47, 0.0  ;;  %6026 = vpow2.f32 %v3515_v46  ;;  %v2766_v52 = vadd.f32 %v2765_v49, %v2437_v44  ;;  %v2109_v53 = vpop.f32.mrf.mxu0  ;;  %v5676_v44 = vld [vmem:[%s6470_s20 + $0x46c] sm:$0xf] }
 0x242   : > { %v2438_v54 = vpop.f32.mrf.mxu1  ;;  %6028 = vrcp.f32 %v3721_v48  ;;  %v2110_v57 = vadd.f32 %v6853_v18, %v2109_v53  ;;  %v4943_v53 = vor.u32 %v5677_v37, %v4942_v36  ;;  %v4955_v60 = vor.u32 %v5676_v44, %v4952_v45 }
 0x243   : > { %v4104_v55 = vmin.f32 %v3976_v51, 1.0  ;;  %v3095_v56 = vadd.f32 %v3094_v50, %v2766_v52 }
 0x244   : > { %v2439_v6 = vadd.f32 %v2438_v54, %v2110_v57  ;;  %v4947_v54 = vor.u32 %v5675_v38, %v4944_v40 }
 0x245   : > { %4233 = vst.msk [vmem:[%s6591_s10 + $0x178] sm:$0xff] %vm4185_vm0, %v4104_v55  ;;  %v3339_v62 = vsub.f32 0.0, %v3095_v56  ;;  %v4951_v55 = vor.u32 %v5678_v43, %v4950_v42 }
 0x247   : > { %v6027_v4 = vpop.eup %6026  ;;  %v3517_v5 = vmul.f32 1.442695, %v3339_v62 }
 0x248   : > { %v6029_v7 = vpop.eup %6028  ;;  %v3722_v8 = vadd.f32 1.0, %v6027_v4  ;;  %v2767_v9 = vpop.f32.mrf.mxu2 }
 0x249   : > { %v3096_v10 = vpop.f32.mrf.mxu3  ;;  %v3977_v13 = vmax.f32 %v6029_v7, 0.0  ;;  %6030 = vpow2.f32 %v3517_v5  ;;  %v2768_v14 = vadd.f32 %v2767_v9, %v2439_v6  ;;  %v2112_v15 = vpop.f32.mrf.mxu0 }
 0x24a   : > { %v2441_v16 = vpop.f32.mrf.mxu1  ;;  %6032 = vrcp.f32 %v3722_v8  ;;  %v2113_v19 = vadd.f32 %v6853_v18, %v2112_v15  ;;  %v4958_v15 = vld [vmem:[%s6470_s20 + $0x480] sm:$0xf] }
 0x24b   : > { %v4105_v20 = vmin.f32 %v3977_v13, 1.0  ;;  %v3097_v21 = vadd.f32 %v3096_v10, %v2768_v14  ;;  %2151 = vmatmul.bf16.gmra.mxu0 %v4927_v11 }
 0x24c   : > { %2480 = vmatmul.bf16.gmra.mxu1 %v4931_v39  ;;  %v2442_v23 = vadd.f32 %v2441_v16, %v2113_v19  ;;  %v5681_v16 = vld [vmem:[%s6470_s20 + $0x48c] sm:$0xf0]  ;;  %v4960_v19 = vld [vmem:[%s6470_s20 + $0x490] sm:$0xf0] }
 0x24d   : > { %4234 = vst.msk [vmem:[%s6591_s10 + $0x180] sm:$0xff] %vm4185_vm0, %v4105_v20  ;;  %v3340_v22 = vsub.f32 0.0, %v3097_v21  ;;  %2809 = vmatmul.bf16.gmra.mxu2 %v4935_v12  ;;  %v4966_v21 = vld [vmem:[%s6470_s20 + $0x488] sm:$0xf] }
 0x24e   : > { %3138 = vmatmul.bf16.gmra.mxu3 %v4939_v17  ;;  %v5679_v17 = vld [vmem:[%s6470_s20 + $0x484] sm:$0xf] }
 0x24f   : > { %v6031_v24 = vpop.eup %6030  ;;  %v3519_v25 = vmul.f32 1.442695, %v3340_v22  ;;  %v5682_v22 = vld [vmem:[%s6470_s20 + $0x494] sm:$0xf0] }
 0x250   : > { %v6033_v26 = vpop.eup %6032  ;;  %v3723_v27 = vadd.f32 1.0, %v6031_v24  ;;  %v2770_v28 = vpop.f32.mrf.mxu2  ;;  %v4968_v24 = vld [vmem:[%s6470_s20 + $0x498] sm:$0xf0] }
 0x251   : > { %v3099_v29 = vpop.f32.mrf.mxu3  ;;  %v3978_v30 = vmax.f32 %v6033_v26, 0.0  ;;  %6034 = vpow2.f32 %v3519_v25  ;;  %v2771_v31 = vadd.f32 %v2770_v28, %v2442_v23  ;;  %v2114_v32 = vpop.f32.mrf.mxu0  ;;  %v5680_v23 = vld [vmem:[%s6470_s20 + $0x48c] sm:$0xf] }
 0x252   : > { %v2443_v0 = vpop.f32.mrf.mxu1  ;;  %6036 = vrcp.f32 %v3723_v27  ;;  %v2115_v35 = vadd.f32 %v6853_v18, %v2114_v32  ;;  %v4959_v32 = vor.u32 %v5681_v16, %v4958_v15  ;;  %v4971_v38 = vor.u32 %v5680_v23, %v4968_v24 }
 0x253   : > { %v4106_v33 = vmin.f32 %v3978_v30, 1.0  ;;  %v3100_v34 = vadd.f32 %v3099_v29, %v2771_v31 }
 0x254   : > { %v2444_v48 = vadd.f32 %v2443_v0, %v2115_v35  ;;  %v4963_v0 = vor.u32 %v5679_v17, %v4960_v19 }
 0x255   : > { %4235 = vst.msk [vmem:[%s6591_s10 + $0x188] sm:$0xff] %vm4185_vm0, %v4106_v33  ;;  %v3341_v41 = vsub.f32 0.0, %v3100_v34  ;;  %v4967_v33 = vor.u32 %v5682_v22, %v4966_v21 }
 0x257   : > { %v6035_v46 = vpop.eup %6034  ;;  %v3521_v47 = vmul.f32 1.442695, %v3341_v41 }
 0x258   : > { %v6037_v49 = vpop.eup %6036  ;;  %v3724_v50 = vadd.f32 1.0, %v6035_v46  ;;  %v2772_v51 = vpop.f32.mrf.mxu2 }
 0x259   : > { %v3101_v52 = vpop.f32.mrf.mxu3  ;;  %v3979_v56 = vmax.f32 %v6037_v49, 0.0  ;;  %6038 = vpow2.f32 %v3521_v47  ;;  %v2773_v57 = vadd.f32 %v2772_v51, %v2444_v48  ;;  %v2117_v58 = vpop.f32.mrf.mxu0 }
 0x25a   : > { %v2446_v59 = vpop.f32.mrf.mxu1  ;;  %6040 = vrcp.f32 %v3724_v50  ;;  %v2118_v61 = vadd.f32 %v6853_v18, %v2117_v58  ;;  %v4974_v58 = vld [vmem:[%s6470_s20 + $0x4a0] sm:$0xf] }
 0x25b   : > { %v4107_v62 = vmin.f32 %v3979_v56, 1.0  ;;  %v3102_v63 = vadd.f32 %v3101_v52, %v2773_v57  ;;  %2156 = vmatmul.bf16.gmra.mxu0 %v4943_v53 }
 0x25c   : > { %2485 = vmatmul.bf16.gmra.mxu1 %v4947_v54  ;;  %v2447_v2 = vadd.f32 %v2446_v59, %v2118_v61  ;;  %v5685_v59 = vld [vmem:[%s6470_s20 + $0x4ac] sm:$0xf0]  ;;  %v4976_v61 = vld [vmem:[%s6470_s20 + $0x4b0] sm:$0xf0] }
 0x25d   : > { %4236 = vst.msk [vmem:[%s6591_s10 + $0x190] sm:$0xff] %vm4185_vm0, %v4107_v62  ;;  %v3342_v1 = vsub.f32 0.0, %v3102_v63  ;;  %2814 = vmatmul.bf16.gmra.mxu2 %v4951_v55  ;;  %v4982_v63 = vld [vmem:[%s6470_s20 + $0x4a8] sm:$0xf] }
 0x25e   : > { %3143 = vmatmul.bf16.gmra.mxu3 %v4955_v60  ;;  %v5683_v60 = vld [vmem:[%s6470_s20 + $0x4a4] sm:$0xf] }
 0x25f   : > { %v6039_v3 = vpop.eup %6038  ;;  %v3523_v4 = vmul.f32 1.442695, %v3342_v1  ;;  %v5686_v1 = vld [vmem:[%s6470_s20 + $0x4b4] sm:$0xf0] }
 0x260   : > { %v6041_v5 = vpop.eup %6040  ;;  %v3725_v6 = vadd.f32 1.0, %v6039_v3  ;;  %v2775_v7 = vpop.f32.mrf.mxu2  ;;  %v4984_v3 = vld [vmem:[%s6470_s20 + $0x4b8] sm:$0xf0] }
 0x261   : > { %v3104_v8 = vpop.f32.mrf.mxu3  ;;  %v3980_v9 = vmax.f32 %v6041_v5, 0.0  ;;  %6042 = vpow2.f32 %v3523_v4  ;;  %v2776_v10 = vadd.f32 %v2775_v7, %v2447_v2  ;;  %v2119_v11 = vpop.f32.mrf.mxu0  ;;  %v5684_v2 = vld [vmem:[%s6470_s20 + $0x4ac] sm:$0xf] }
 0x262   : > { %v2448_v39 = vpop.f32.mrf.mxu1  ;;  %6044 = vrcp.f32 %v3725_v6  ;;  %v2120_v14 = vadd.f32 %v6853_v18, %v2119_v11  ;;  %v4975_v11 = vor.u32 %v5685_v59, %v4974_v58  ;;  %v4987_v17 = vor.u32 %v5684_v2, %v4984_v3 }
 0x263   : > { %v4108_v12 = vmin.f32 %v3980_v9, 1.0  ;;  %v3105_v13 = vadd.f32 %v3104_v8, %v2776_v10 }
 0x264   : > { %v2449_v27 = vadd.f32 %v2448_v39, %v2120_v14  ;;  %v4979_v39 = vor.u32 %v5683_v60, %v4976_v61  ;;  %v6998_v60 = vld [vmem:[%s7426_s2] ss:$0 sm:$0xff] }
 0x265   : > { %4237 = vst.msk [vmem:[%s6591_s10 + $0x198] sm:$0xff] %vm4185_vm0, %v4108_v12  ;;  %v3343_v20 = vsub.f32 0.0, %v3105_v13  ;;  %v4983_v12 = vor.u32 %v5686_v1, %v4982_v63 }
 0x267   : > { %v6043_v25 = vpop.eup %6042  ;;  %v3525_v26 = vmul.f32 1.442695, %v3343_v20 }
 0x268   : > { %v6045_v28 = vpop.eup %6044  ;;  %v3726_v29 = vadd.f32 1.0, %v6043_v25  ;;  %v2777_v30 = vpop.f32.mrf.mxu2 }
 0x269   : > { %v3106_v31 = vpop.f32.mrf.mxu3  ;;  %v3981_v34 = vmax.f32 %v6045_v28, 0.0  ;;  %6046 = vpow2.f32 %v3525_v26  ;;  %v2778_v35 = vadd.f32 %v2777_v30, %v2449_v27  ;;  %v2122_v36 = vpop.f32.mrf.mxu0 }
 0x26a   : > { %v2451_v37 = vpop.f32.mrf.mxu1  ;;  %6048 = vrcp.f32 %v3726_v29  ;;  %v2123_v40 = vadd.f32 %v6853_v18, %v2122_v36  ;;  %v4990_v36 = vld [vmem:[%s6470_s20 + $0x4c0] sm:$0xf] }
 0x26b   : > { %v4109_v41 = vmin.f32 %v3981_v34, 1.0  ;;  %v3107_v42 = vadd.f32 %v3106_v31, %v2778_v35  ;;  %2161 = vmatmul.bf16.gmra.mxu0 %v4959_v32 }
 0x26c   : > { %2490 = vmatmul.bf16.gmra.mxu1 %v4963_v0  ;;  %v2452_v44 = vadd.f32 %v2451_v37, %v2123_v40  ;;  %v5689_v37 = vld [vmem:[%s6470_s20 + $0x4cc] sm:$0xf0]  ;;  %v4992_v40 = vld [vmem:[%s6470_s20 + $0x4d0] sm:$0xf0] }
 0x26d   : > { %4238 = vst.msk [vmem:[%s6591_s10 + $0x1a0] sm:$0xff] %vm4185_vm0, %v4109_v41  ;;  %v3344_v43 = vsub.f32 0.0, %v3107_v42  ;;  %2819 = vmatmul.bf16.gmra.mxu2 %v4967_v33  ;;  %v4998_v42 = vld [vmem:[%s6470_s20 + $0x4c8] sm:$0xf] }
 0x26e   : > { %3148 = vmatmul.bf16.gmra.mxu3 %v4971_v38  ;;  %v5687_v38 = vld [vmem:[%s6470_s20 + $0x4c4] sm:$0xf] }
 0x26f   : > { %v6047_v45 = vpop.eup %6046  ;;  %v3527_v46 = vmul.f32 1.442695, %v3344_v43  ;;  %v5690_v43 = vld [vmem:[%s6470_s20 + $0x4d4] sm:$0xf0] }
 0x270   : > { %v6049_v47 = vpop.eup %6048  ;;  %v3727_v48 = vadd.f32 1.0, %v6047_v45  ;;  %v2780_v49 = vpop.f32.mrf.mxu2  ;;  %v5000_v45 = vld [vmem:[%s6470_s20 + $0x4d8] sm:$0xf0] }
 0x271   : > { %v3109_v50 = vpop.f32.mrf.mxu3  ;;  %v3982_v51 = vmax.f32 %v6049_v47, 0.0  ;;  %6050 = vpow2.f32 %v3527_v46  ;;  %v2781_v52 = vadd.f32 %v2780_v49, %v2452_v44  ;;  %v2124_v53 = vpop.f32.mrf.mxu0  ;;  %v5688_v44 = vld [vmem:[%s6470_s20 + $0x4cc] sm:$0xf] }
 0x272   : > { %v2453_v54 = vpop.f32.mrf.mxu1  ;;  %6052 = vrcp.f32 %v3727_v48  ;;  %v2125_v57 = vadd.f32 %v6853_v18, %v2124_v53  ;;  %v4991_v53 = vor.u32 %v5689_v37, %v4990_v36  ;;  %v5003_v59 = vor.u32 %v5688_v44, %v5000_v45 }
 0x273   : > { %v4110_v55 = vmin.f32 %v3982_v51, 1.0  ;;  %v3110_v56 = vadd.f32 %v3109_v50, %v2781_v52 }
 0x274   : > { %v2454_v6 = vadd.f32 %v2453_v54, %v2125_v57  ;;  %v4999_v54 = vor.u32 %v5690_v43, %v4998_v42 }
 0x275   : > { %4239 = vst.msk [vmem:[%s6591_s10 + $0x1a8] sm:$0xff] %vm4185_vm0, %v4110_v55  ;;  %v3345_v62 = vsub.f32 0.0, %v3110_v56 }
 0x277   : > { %v6051_v4 = vpop.eup %6050  ;;  %v3529_v5 = vmul.f32 1.442695, %v3345_v62 }
 0x278   : > { %v6053_v7 = vpop.eup %6052  ;;  %v3728_v8 = vadd.f32 1.0, %v6051_v4  ;;  %v2782_v9 = vpop.f32.mrf.mxu2 }
 0x279   : > { %v3111_v10 = vpop.f32.mrf.mxu3  ;;  %v3983_v13 = vmax.f32 %v6053_v7, 0.0  ;;  %6054 = vpow2.f32 %v3529_v5  ;;  %v2783_v14 = vadd.f32 %v2782_v9, %v2454_v6  ;;  %v2127_v15 = vpop.f32.mrf.mxu0 }
 0x27a   : > { %v2456_v16 = vpop.f32.mrf.mxu1  ;;  %6056 = vrcp.f32 %v3728_v8  ;;  %v2128_v19 = vadd.f32 %v6853_v18, %v2127_v15  ;;  %v5006_v15 = vld [vmem:[%s6470_s20 + $0x4e0] sm:$0xf] }
 0x27b   : > { %v4111_v20 = vmin.f32 %v3983_v13, 1.0  ;;  %v3112_v21 = vadd.f32 %v3111_v10, %v2783_v14  ;;  %2166 = vmatmul.bf16.gmra.mxu0 %v4975_v11 }
 0x27c   : > { %2495 = vmatmul.bf16.gmra.mxu1 %v4979_v39  ;;  %v2457_v23 = vadd.f32 %v2456_v16, %v2128_v19  ;;  %v5693_v16 = vld [vmem:[%s6470_s20 + $0x4ec] sm:$0xf0]  ;;  %v5008_v19 = vld [vmem:[%s6470_s20 + $0x4f0] sm:$0xf0] }
 0x27d   : > { %4240 = vst.msk [vmem:[%s6591_s10 + $0x1b0] sm:$0xff] %vm4185_vm0, %v4111_v20  ;;  %v3346_v22 = vsub.f32 0.0, %v3112_v21  ;;  %2824 = vmatmul.bf16.gmra.mxu2 %v4983_v12  ;;  %v5014_v21 = vld [vmem:[%s6470_s20 + $0x4e8] sm:$0xf] }
 0x27e   : > { %3153 = vmatmul.bf16.gmra.mxu3 %v4987_v17  ;;  %v5691_v17 = vld [vmem:[%s6470_s20 + $0x4e4] sm:$0xf] }
 0x27f   : > { %v6055_v24 = vpop.eup %6054  ;;  %v3531_v25 = vmul.f32 1.442695, %v3346_v22  ;;  %v5694_v22 = vld [vmem:[%s6470_s20 + $0x4f4] sm:$0xf0] }
 0x280   : > { %v6057_v26 = vpop.eup %6056  ;;  %v3729_v27 = vadd.f32 1.0, %v6055_v24  ;;  %v2785_v28 = vpop.f32.mrf.mxu2  ;;  %v5016_v24 = vld [vmem:[%s6470_s20 + $0x4f8] sm:$0xf0] }
 0x281   : > { %v3114_v29 = vpop.f32.mrf.mxu3  ;;  %v3984_v30 = vmax.f32 %v6057_v26, 0.0  ;;  %6058 = vpow2.f32 %v3531_v25  ;;  %v2786_v31 = vadd.f32 %v2785_v28, %v2457_v23  ;;  %v2129_v32 = vpop.f32.mrf.mxu0  ;;  %v5692_v23 = vld [vmem:[%s6470_s20 + $0x4ec] sm:$0xf] }
 0x282   : > { %v2458_v0 = vpop.f32.mrf.mxu1  ;;  %6060 = vrcp.f32 %v3729_v27  ;;  %v2130_v35 = vadd.f32 %v6853_v18, %v2129_v32  ;;  %v4995_v18 = vor.u32 %v5687_v38, %v4992_v40  ;;  %v5007_v32 = vor.u32 %v5693_v16, %v5006_v15 }
 0x283   : > { %v4112_v33 = vmin.f32 %v3984_v30, 1.0  ;;  %v3115_v34 = vadd.f32 %v3114_v29, %v2786_v31  ;;  %v5019_v38 = vor.u32 %v5692_v23, %v5016_v24 }
 0x284   : > { %v2459_v48 = vadd.f32 %v2458_v0, %v2130_v35  ;;  %v5011_v0 = vor.u32 %v5691_v17, %v5008_v19 }
 0x285   : > { %4241 = vst.msk [vmem:[%s6591_s10 + $0x1b8] sm:$0xff] %vm4185_vm0, %v4112_v33  ;;  %v3347_v41 = vsub.f32 0.0, %v3115_v34  ;;  %v5015_v33 = vor.u32 %v5694_v22, %v5014_v21 }
 0x287   : > { %v6059_v46 = vpop.eup %6058  ;;  %v3533_v47 = vmul.f32 1.442695, %v3347_v41 }
 0x288   : > { %v6061_v49 = vpop.eup %6060  ;;  %v3730_v50 = vadd.f32 1.0, %v6059_v46  ;;  %v2787_v51 = vpop.f32.mrf.mxu2 }
 0x289   : > { %v3116_v52 = vpop.f32.mrf.mxu3  ;;  %v3985_v55 = vmax.f32 %v6061_v49, 0.0  ;;  %6062 = vpow2.f32 %v3533_v47  ;;  %v2788_v56 = vadd.f32 %v2787_v51, %v2459_v48  ;;  %v2132_v57 = vpop.f32.mrf.mxu0 }
 0x28a   : > { %v2461_v58 = vpop.f32.mrf.mxu1  ;;  %6064 = vrcp.f32 %v3730_v50  ;;  %v2133_v61 = vadd.f32 %v6998_v60, %v2132_v57  ;;  %v5022_v57 = vld [vmem:[%s6470_s20 + $0x500] sm:$0xf] }
 0x28b   : > { %v4113_v62 = vmin.f32 %v3985_v55, 1.0  ;;  %v3117_v63 = vadd.f32 %v3116_v52, %v2788_v56  ;;  %2171 = vmatmul.bf16.gmra.mxu0 %v4991_v53 }
 0x28c   : > { %2500 = vmatmul.bf16.gmra.mxu1 %v4995_v18  ;;  %v2462_v2 = vadd.f32 %v2461_v58, %v2133_v61  ;;  %v5697_v58 = vld [vmem:[%s6470_s20 + $0x50c] sm:$0xf0]  ;;  %v5024_v61 = vld [vmem:[%s6470_s20 + $0x510] sm:$0xf0] }
 0x28d   : > { %4242 = vst.msk [vmem:[%s6591_s10 + $0x1c0] sm:$0xff] %vm4185_vm0, %v4113_v62  ;;  %v3348_v1 = vsub.f32 0.0, %v3117_v63  ;;  %2829 = vmatmul.bf16.gmra.mxu2 %v4999_v54  ;;  %v5030_v63 = vld [vmem:[%s6470_s20 + $0x508] sm:$0xf] }
 0x28e   : > { %3158 = vmatmul.bf16.gmra.mxu3 %v5003_v59  ;;  %v5695_v59 = vld [vmem:[%s6470_s20 + $0x504] sm:$0xf] }
 0x28f   : > { %v6063_v3 = vpop.eup %6062  ;;  %v3535_v4 = vmul.f32 1.442695, %v3348_v1  ;;  %v5698_v1 = vld [vmem:[%s6470_s20 + $0x514] sm:$0xf0] }
 0x290   : > { %v6065_v5 = vpop.eup %6064  ;;  %v3731_v6 = vadd.f32 1.0, %v6063_v3  ;;  %v2790_v7 = vpop.f32.mrf.mxu2  ;;  %v5032_v3 = vld [vmem:[%s6470_s20 + $0x518] sm:$0xf0] }
 0x291   : > { %v3119_v8 = vpop.f32.mrf.mxu3  ;;  %v3986_v9 = vmax.f32 %v6065_v5, 0.0  ;;  %6066 = vpow2.f32 %v3535_v4  ;;  %v2791_v10 = vadd.f32 %v2790_v7, %v2462_v2  ;;  %v2134_v11 = vpop.f32.mrf.mxu0  ;;  %v5696_v2 = vld [vmem:[%s6470_s20 + $0x50c] sm:$0xf] }
 0x292   : > { %v2463_v39 = vpop.f32.mrf.mxu1  ;;  %6068 = vrcp.f32 %v3731_v6  ;;  %v2135_v14 = vadd.f32 %v6998_v60, %v2134_v11  ;;  %v5023_v11 = vor.u32 %v5697_v58, %v5022_v57  ;;  %v5035_v17 = vor.u32 %v5696_v2, %v5032_v3 }
 0x293   : > { %v4114_v12 = vmin.f32 %v3986_v9, 1.0  ;;  %v3120_v13 = vadd.f32 %v3119_v8, %v2791_v10 }
 0x294   : > { %v2464_v27 = vadd.f32 %v2463_v39, %v2135_v14  ;;  %v5027_v39 = vor.u32 %v5695_v59, %v5024_v61 }
 0x295   : > { %4243 = vst.msk [vmem:[%s6591_s10 + $0x1c8] sm:$0xff] %vm4185_vm0, %v4114_v12  ;;  %v3349_v20 = vsub.f32 0.0, %v3120_v13  ;;  %v5031_v12 = vor.u32 %v5698_v1, %v5030_v63 }
 0x297   : > { %v6067_v25 = vpop.eup %6066  ;;  %v3537_v26 = vmul.f32 1.442695, %v3349_v20 }
 0x298   : > { %v6069_v28 = vpop.eup %6068  ;;  %v3732_v29 = vadd.f32 1.0, %v6067_v25  ;;  %v2792_v30 = vpop.f32.mrf.mxu2 }
 0x299   : > { %v3121_v31 = vpop.f32.mrf.mxu3  ;;  %v3987_v34 = vmax.f32 %v6069_v28, 0.0  ;;  %6070 = vpow2.f32 %v3537_v26  ;;  %v2793_v35 = vadd.f32 %v2792_v30, %v2464_v27  ;;  %v2137_v36 = vpop.f32.mrf.mxu0 }
 0x29a   : > { %v2466_v37 = vpop.f32.mrf.mxu1  ;;  %6072 = vrcp.f32 %v3732_v29  ;;  %v2138_v40 = vadd.f32 %v6998_v60, %v2137_v36  ;;  %v5038_v36 = vld [vmem:[%s6470_s20 + $0x520] sm:$0xf] }
 0x29b   : > { %v4115_v41 = vmin.f32 %v3987_v34, 1.0  ;;  %v3122_v42 = vadd.f32 %v3121_v31, %v2793_v35  ;;  %2176 = vmatmul.bf16.gmra.mxu0 %v5007_v32 }
 0x29c   : > { %2505 = vmatmul.bf16.gmra.mxu1 %v5011_v0  ;;  %v2467_v44 = vadd.f32 %v2466_v37, %v2138_v40  ;;  %v5701_v37 = vld [vmem:[%s6470_s20 + $0x52c] sm:$0xf0]  ;;  %v5040_v40 = vld [vmem:[%s6470_s20 + $0x530] sm:$0xf0] }
 0x29d   : > { %4244 = vst.msk [vmem:[%s6591_s10 + $0x1d0] sm:$0xff] %vm4185_vm0, %v4115_v41  ;;  %v3350_v43 = vsub.f32 0.0, %v3122_v42  ;;  %2834 = vmatmul.bf16.gmra.mxu2 %v5015_v33  ;;  %v5046_v42 = vld [vmem:[%s6470_s20 + $0x528] sm:$0xf] }
 0x29e   : > { %3163 = vmatmul.bf16.gmra.mxu3 %v5019_v38  ;;  %v5699_v38 = vld [vmem:[%s6470_s20 + $0x524] sm:$0xf] }
 0x29f   : > { %v6071_v45 = vpop.eup %6070  ;;  %v3539_v46 = vmul.f32 1.442695, %v3350_v43  ;;  %v5702_v43 = vld [vmem:[%s6470_s20 + $0x534] sm:$0xf0] }
 0x2a0   : > { %v6073_v47 = vpop.eup %6072  ;;  %v3733_v48 = vadd.f32 1.0, %v6071_v45  ;;  %v2795_v49 = vpop.f32.mrf.mxu2  ;;  %v5048_v45 = vld [vmem:[%s6470_s20 + $0x538] sm:$0xf0] }
 0x2a1   : > { %v3124_v50 = vpop.f32.mrf.mxu3  ;;  %v3988_v51 = vmax.f32 %v6073_v47, 0.0  ;;  %6074 = vpow2.f32 %v3539_v46  ;;  %v2796_v52 = vadd.f32 %v2795_v49, %v2467_v44  ;;  %v2139_v53 = vpop.f32.mrf.mxu0  ;;  %v5700_v44 = vld [vmem:[%s6470_s20 + $0x52c] sm:$0xf] }
 0x2a2   : > { %v2468_v18 = vpop.f32.mrf.mxu1  ;;  %6076 = vrcp.f32 %v3733_v48  ;;  %v2140_v56 = vadd.f32 %v6998_v60, %v2139_v53  ;;  %v5039_v53 = vor.u32 %v5701_v37, %v5038_v36  ;;  %v5051_v59 = vor.u32 %v5700_v44, %v5048_v45 }
 0x2a3   : > { %v4116_v54 = vmin.f32 %v3988_v51, 1.0  ;;  %v3125_v55 = vadd.f32 %v3124_v50, %v2796_v52 }
 0x2a4   : > { %v2469_v6 = vadd.f32 %v2468_v18, %v2140_v56  ;;  %v5043_v18 = vor.u32 %v5699_v38, %v5040_v40 }
 0x2a5   : > { %4245 = vst.msk [vmem:[%s6591_s10 + $0x1d8] sm:$0xff] %vm4185_vm0, %v4116_v54  ;;  %v3351_v62 = vsub.f32 0.0, %v3125_v55  ;;  %v5047_v54 = vor.u32 %v5702_v43, %v5046_v42 }
 0x2a7   : > { %v6075_v4 = vpop.eup %6074  ;;  %v3541_v5 = vmul.f32 1.442695, %v3351_v62 }
 0x2a8   : > { %v6077_v7 = vpop.eup %6076  ;;  %v3734_v8 = vadd.f32 1.0, %v6075_v4  ;;  %v2797_v9 = vpop.f32.mrf.mxu2 }
 0x2a9   : > { %v3126_v10 = vpop.f32.mrf.mxu3  ;;  %v3989_v13 = vmax.f32 %v6077_v7, 0.0  ;;  %6078 = vpow2.f32 %v3541_v5  ;;  %v2798_v14 = vadd.f32 %v2797_v9, %v2469_v6  ;;  %v2142_v15 = vpop.f32.mrf.mxu0 }
 0x2aa   : > { %v2471_v16 = vpop.f32.mrf.mxu1  ;;  %6080 = vrcp.f32 %v3734_v8  ;;  %v2143_v19 = vadd.f32 %v6998_v60, %v2142_v15  ;;  %v5054_v15 = vld [vmem:[%s6470_s20 + $0x540] sm:$0xf] }
 0x2ab   : > { %v4117_v20 = vmin.f32 %v3989_v13, 1.0  ;;  %v3127_v21 = vadd.f32 %v3126_v10, %v2798_v14  ;;  %2181 = vmatmul.bf16.gmra.mxu0 %v5023_v11 }
 0x2ac   : > { %2510 = vmatmul.bf16.gmra.mxu1 %v5027_v39  ;;  %v2472_v23 = vadd.f32 %v2471_v16, %v2143_v19  ;;  %v5705_v16 = vld [vmem:[%s6470_s20 + $0x54c] sm:$0xf0]  ;;  %v5056_v19 = vld [vmem:[%s6470_s20 + $0x550] sm:$0xf0] }
 0x2ad   : > { %4246 = vst.msk [vmem:[%s6591_s10 + $0x1e0] sm:$0xff] %vm4185_vm0, %v4117_v20  ;;  %v3352_v22 = vsub.f32 0.0, %v3127_v21  ;;  %2839 = vmatmul.bf16.gmra.mxu2 %v5031_v12  ;;  %v5062_v21 = vld [vmem:[%s6470_s20 + $0x548] sm:$0xf] }
 0x2ae   : > { %3168 = vmatmul.bf16.gmra.mxu3 %v5035_v17  ;;  %v5703_v17 = vld [vmem:[%s6470_s20 + $0x544] sm:$0xf] }
 0x2af   : > { %v6079_v24 = vpop.eup %6078  ;;  %v3543_v25 = vmul.f32 1.442695, %v3352_v22  ;;  %v5706_v22 = vld [vmem:[%s6470_s20 + $0x554] sm:$0xf0] }
 0x2b0   : > { %v6081_v26 = vpop.eup %6080  ;;  %v3735_v27 = vadd.f32 1.0, %v6079_v24  ;;  %v2800_v28 = vpop.f32.mrf.mxu2  ;;  %v5064_v24 = vld [vmem:[%s6470_s20 + $0x558] sm:$0xf0] }
 0x2b1   : > { %v3129_v29 = vpop.f32.mrf.mxu3  ;;  %v3990_v30 = vmax.f32 %v6081_v26, 0.0  ;;  %6082 = vpow2.f32 %v3543_v25  ;;  %v2801_v31 = vadd.f32 %v2800_v28, %v2472_v23  ;;  %v2144_v32 = vpop.f32.mrf.mxu0  ;;  %v5704_v23 = vld [vmem:[%s6470_s20 + $0x54c] sm:$0xf] }
 0x2b2   : > { %v2473_v0 = vpop.f32.mrf.mxu1  ;;  %6084 = vrcp.f32 %v3735_v27  ;;  %v2145_v35 = vadd.f32 %v6998_v60, %v2144_v32  ;;  %v5055_v32 = vor.u32 %v5705_v16, %v5054_v15  ;;  %v5067_v38 = vor.u32 %v5704_v23, %v5064_v24 }
 0x2b3   : > { %v4118_v33 = vmin.f32 %v3990_v30, 1.0  ;;  %v3130_v34 = vadd.f32 %v3129_v29, %v2801_v31 }
 0x2b4   : > { %v2474_v48 = vadd.f32 %v2473_v0, %v2145_v35  ;;  %v5059_v0 = vor.u32 %v5703_v17, %v5056_v19 }
 0x2b5   : > { %4247 = vst.msk [vmem:[%s6591_s10 + $0x1e8] sm:$0xff] %vm4185_vm0, %v4118_v33  ;;  %v3353_v41 = vsub.f32 0.0, %v3130_v34  ;;  %v5063_v33 = vor.u32 %v5706_v22, %v5062_v21 }
 0x2b7   : > { %v6083_v46 = vpop.eup %6082  ;;  %v3545_v47 = vmul.f32 1.442695, %v3353_v41 }
 0x2b8   : > { %v6085_v49 = vpop.eup %6084  ;;  %v3736_v50 = vadd.f32 1.0, %v6083_v46  ;;  %v2802_v51 = vpop.f32.mrf.mxu2 }
 0x2b9   : > { %v3131_v52 = vpop.f32.mrf.mxu3  ;;  %v3991_v55 = vmax.f32 %v6085_v49, 0.0  ;;  %6086 = vpow2.f32 %v3545_v47  ;;  %v2803_v56 = vadd.f32 %v2802_v51, %v2474_v48  ;;  %v2147_v57 = vpop.f32.mrf.mxu0 }
 0x2ba   : > { %v2476_v58 = vpop.f32.mrf.mxu1  ;;  %6088 = vrcp.f32 %v3736_v50  ;;  %v2148_v61 = vadd.f32 %v6998_v60, %v2147_v57  ;;  %v5070_v57 = vld [vmem:[%s6470_s20 + $0x560] sm:$0xf] }
 0x2bb   : > { %v4119_v62 = vmin.f32 %v3991_v55, 1.0  ;;  %v3132_v63 = vadd.f32 %v3131_v52, %v2803_v56  ;;  %2186 = vmatmul.bf16.gmra.mxu0 %v5039_v53 }
 0x2bc   : > { %2515 = vmatmul.bf16.gmra.mxu1 %v5043_v18  ;;  %v2477_v2 = vadd.f32 %v2476_v58, %v2148_v61  ;;  %v5709_v58 = vld [vmem:[%s6470_s20 + $0x56c] sm:$0xf0]  ;;  %v5072_v61 = vld [vmem:[%s6470_s20 + $0x570] sm:$0xf0] }
 0x2bd   : > { %4248 = vst.msk [vmem:[%s6591_s10 + $0x1f0] sm:$0xff] %vm4185_vm0, %v4119_v62  ;;  %v3354_v1 = vsub.f32 0.0, %v3132_v63  ;;  %2844 = vmatmul.bf16.gmra.mxu2 %v5047_v54  ;;  %v5078_v63 = vld [vmem:[%s6470_s20 + $0x568] sm:$0xf] }
 0x2be   : > { %3173 = vmatmul.bf16.gmra.mxu3 %v5051_v59  ;;  %v5707_v59 = vld [vmem:[%s6470_s20 + $0x564] sm:$0xf] }
 0x2bf   : > { %v6087_v3 = vpop.eup %6086  ;;  %v3547_v4 = vmul.f32 1.442695, %v3354_v1  ;;  %v5710_v1 = vld [vmem:[%s6470_s20 + $0x574] sm:$0xf0] }
 0x2c0   : > { %v6089_v5 = vpop.eup %6088  ;;  %v3737_v6 = vadd.f32 1.0, %v6087_v3  ;;  %v2805_v7 = vpop.f32.mrf.mxu2  ;;  %v5080_v3 = vld [vmem:[%s6470_s20 + $0x578] sm:$0xf0] }
 0x2c1   : > { %v3134_v8 = vpop.f32.mrf.mxu3  ;;  %v3992_v9 = vmax.f32 %v6089_v5, 0.0  ;;  %6090 = vpow2.f32 %v3547_v4  ;;  %v2806_v10 = vadd.f32 %v2805_v7, %v2477_v2  ;;  %v2149_v11 = vpop.f32.mrf.mxu0  ;;  %v5708_v2 = vld [vmem:[%s6470_s20 + $0x56c] sm:$0xf] }
 0x2c2   : > { %v2478_v39 = vpop.f32.mrf.mxu1  ;;  %6092 = vrcp.f32 %v3737_v6  ;;  %v2150_v14 = vadd.f32 %v6998_v60, %v2149_v11  ;;  %v5071_v11 = vor.u32 %v5709_v58, %v5070_v57  ;;  %v5083_v17 = vor.u32 %v5708_v2, %v5080_v3 }
 0x2c3   : > { %v4120_v12 = vmin.f32 %v3992_v9, 1.0  ;;  %v3135_v13 = vadd.f32 %v3134_v8, %v2806_v10 }
 0x2c4   : > { %v2479_v27 = vadd.f32 %v2478_v39, %v2150_v14  ;;  %v5075_v39 = vor.u32 %v5707_v59, %v5072_v61 }
 0x2c5   : > { %4249 = vst.msk [vmem:[%s6591_s10 + $0x1f8] sm:$0xff] %vm4185_vm0, %v4120_v12  ;;  %v3355_v20 = vsub.f32 0.0, %v3135_v13  ;;  %v5079_v12 = vor.u32 %v5710_v1, %v5078_v63 }
 0x2c7   : > { %v6091_v25 = vpop.eup %6090  ;;  %v3549_v26 = vmul.f32 1.442695, %v3355_v20 }
 0x2c8   : > { %v6093_v28 = vpop.eup %6092  ;;  %v3738_v29 = vadd.f32 1.0, %v6091_v25  ;;  %v2807_v30 = vpop.f32.mrf.mxu2 }
 0x2c9   : > { %v3136_v31 = vpop.f32.mrf.mxu3  ;;  %v3993_v34 = vmax.f32 %v6093_v28, 0.0  ;;  %6094 = vpow2.f32 %v3549_v26  ;;  %v2808_v35 = vadd.f32 %v2807_v30, %v2479_v27  ;;  %v2152_v36 = vpop.f32.mrf.mxu0 }
 0x2ca   : > { %v2481_v37 = vpop.f32.mrf.mxu1  ;;  %6096 = vrcp.f32 %v3738_v29  ;;  %v2153_v40 = vadd.f32 %v6998_v60, %v2152_v36  ;;  %v5086_v36 = vld [vmem:[%s6470_s20 + $0x580] sm:$0xf] }
 0x2cb   : > { %v4121_v41 = vmin.f32 %v3993_v34, 1.0  ;;  %v3137_v42 = vadd.f32 %v3136_v31, %v2808_v35  ;;  %2191 = vmatmul.bf16.gmra.mxu0 %v5055_v32 }
 0x2cc   : > { %2520 = vmatmul.bf16.gmra.mxu1 %v5059_v0  ;;  %v2482_v44 = vadd.f32 %v2481_v37, %v2153_v40  ;;  %v5713_v37 = vld [vmem:[%s6470_s20 + $0x58c] sm:$0xf0]  ;;  %v5088_v40 = vld [vmem:[%s6470_s20 + $0x590] sm:$0xf0] }
 0x2cd   : > { %4250 = vst.msk [vmem:[%s6591_s10 + $0x200] sm:$0xff] %vm4185_vm0, %v4121_v41  ;;  %v3356_v43 = vsub.f32 0.0, %v3137_v42  ;;  %2849 = vmatmul.bf16.gmra.mxu2 %v5063_v33  ;;  %v5094_v42 = vld [vmem:[%s6470_s20 + $0x588] sm:$0xf] }
 0x2ce   : > { %3178 = vmatmul.bf16.gmra.mxu3 %v5067_v38  ;;  %v5711_v38 = vld [vmem:[%s6470_s20 + $0x584] sm:$0xf] }
 0x2cf   : > { %v6095_v45 = vpop.eup %6094  ;;  %v3551_v46 = vmul.f32 1.442695, %v3356_v43  ;;  %v5714_v43 = vld [vmem:[%s6470_s20 + $0x594] sm:$0xf0] }
 0x2d0   : > { %v6097_v47 = vpop.eup %6096  ;;  %v3739_v48 = vadd.f32 1.0, %v6095_v45  ;;  %v2810_v49 = vpop.f32.mrf.mxu2  ;;  %v5096_v45 = vld [vmem:[%s6470_s20 + $0x598] sm:$0xf0] }
 0x2d1   : > { %v3139_v50 = vpop.f32.mrf.mxu3  ;;  %v3994_v51 = vmax.f32 %v6097_v47, 0.0  ;;  %6098 = vpow2.f32 %v3551_v46  ;;  %v2811_v52 = vadd.f32 %v2810_v49, %v2482_v44  ;;  %v2154_v53 = vpop.f32.mrf.mxu0  ;;  %v5712_v44 = vld [vmem:[%s6470_s20 + $0x58c] sm:$0xf] }
 0x2d2   : > { %v2483_v18 = vpop.f32.mrf.mxu1  ;;  %6100 = vrcp.f32 %v3739_v48  ;;  %v2155_v56 = vadd.f32 %v6998_v60, %v2154_v53  ;;  %v5087_v53 = vor.u32 %v5713_v37, %v5086_v36  ;;  %v5099_v59 = vor.u32 %v5712_v44, %v5096_v45 }
 0x2d3   : > { %v4122_v54 = vmin.f32 %v3994_v51, 1.0  ;;  %v3140_v55 = vadd.f32 %v3139_v50, %v2811_v52 }
 0x2d4   : > { %v2484_v6 = vadd.f32 %v2483_v18, %v2155_v56  ;;  %v5091_v18 = vor.u32 %v5711_v38, %v5088_v40 }
 0x2d5   : > { %4251 = vst.msk [vmem:[%s6591_s10 + $0x208] sm:$0xff] %vm4185_vm0, %v4122_v54  ;;  %v3357_v62 = vsub.f32 0.0, %v3140_v55  ;;  %v5095_v54 = vor.u32 %v5714_v43, %v5094_v42 }
 0x2d7   : > { %v6099_v4 = vpop.eup %6098  ;;  %v3553_v5 = vmul.f32 1.442695, %v3357_v62 }
 0x2d8   : > { %v6101_v7 = vpop.eup %6100  ;;  %v3740_v8 = vadd.f32 1.0, %v6099_v4  ;;  %v2812_v9 = vpop.f32.mrf.mxu2 }
 0x2d9   : > { %v3141_v10 = vpop.f32.mrf.mxu3  ;;  %v3995_v13 = vmax.f32 %v6101_v7, 0.0  ;;  %6102 = vpow2.f32 %v3553_v5  ;;  %v2813_v14 = vadd.f32 %v2812_v9, %v2484_v6  ;;  %v2157_v15 = vpop.f32.mrf.mxu0 }
 0x2da   : > { %v2486_v16 = vpop.f32.mrf.mxu1  ;;  %6104 = vrcp.f32 %v3740_v8  ;;  %v2158_v19 = vadd.f32 %v6998_v60, %v2157_v15  ;;  %v5102_v15 = vld [vmem:[%s6470_s20 + $0x5a0] sm:$0xf] }
 0x2db   : > { %v4123_v20 = vmin.f32 %v3995_v13, 1.0  ;;  %v3142_v21 = vadd.f32 %v3141_v10, %v2813_v14  ;;  %2196 = vmatmul.bf16.gmra.mxu0 %v5071_v11 }
 0x2dc   : > { %2525 = vmatmul.bf16.gmra.mxu1 %v5075_v39  ;;  %v2487_v23 = vadd.f32 %v2486_v16, %v2158_v19  ;;  %v5717_v16 = vld [vmem:[%s6470_s20 + $0x5ac] sm:$0xf0]  ;;  %v5104_v19 = vld [vmem:[%s6470_s20 + $0x5b0] sm:$0xf0] }
 0x2dd   : > { %4252 = vst.msk [vmem:[%s6591_s10 + $0x210] sm:$0xff] %vm4185_vm0, %v4123_v20  ;;  %v3358_v22 = vsub.f32 0.0, %v3142_v21  ;;  %2854 = vmatmul.bf16.gmra.mxu2 %v5079_v12  ;;  %v5110_v21 = vld [vmem:[%s6470_s20 + $0x5a8] sm:$0xf] }
 0x2de   : > { %3183 = vmatmul.bf16.gmra.mxu3 %v5083_v17  ;;  %v5715_v17 = vld [vmem:[%s6470_s20 + $0x5a4] sm:$0xf] }
 0x2df   : > { %v6103_v24 = vpop.eup %6102  ;;  %v3555_v25 = vmul.f32 1.442695, %v3358_v22  ;;  %v5718_v22 = vld [vmem:[%s6470_s20 + $0x5b4] sm:$0xf0] }
 0x2e0   : > { %v6105_v26 = vpop.eup %6104  ;;  %v3741_v27 = vadd.f32 1.0, %v6103_v24  ;;  %v2815_v28 = vpop.f32.mrf.mxu2  ;;  %v5112_v24 = vld [vmem:[%s6470_s20 + $0x5b8] sm:$0xf0] }
 0x2e1   : > { %v3144_v29 = vpop.f32.mrf.mxu3  ;;  %v3996_v30 = vmax.f32 %v6105_v26, 0.0  ;;  %6106 = vpow2.f32 %v3555_v25  ;;  %v2816_v31 = vadd.f32 %v2815_v28, %v2487_v23  ;;  %v2159_v32 = vpop.f32.mrf.mxu0  ;;  %v5716_v23 = vld [vmem:[%s6470_s20 + $0x5ac] sm:$0xf] }
 0x2e2   : > { %v2488_v0 = vpop.f32.mrf.mxu1  ;;  %6108 = vrcp.f32 %v3741_v27  ;;  %v2160_v35 = vadd.f32 %v6998_v60, %v2159_v32  ;;  %v5103_v32 = vor.u32 %v5717_v16, %v5102_v15  ;;  %v5115_v38 = vor.u32 %v5716_v23, %v5112_v24 }
 0x2e3   : > { %v4124_v33 = vmin.f32 %v3996_v30, 1.0  ;;  %v3145_v34 = vadd.f32 %v3144_v29, %v2816_v31 }
 0x2e4   : > { %v2489_v48 = vadd.f32 %v2488_v0, %v2160_v35  ;;  %v5107_v0 = vor.u32 %v5715_v17, %v5104_v19 }
 0x2e5   : > { %4253 = vst.msk [vmem:[%s6591_s10 + $0x218] sm:$0xff] %vm4185_vm0, %v4124_v33  ;;  %v3359_v41 = vsub.f32 0.0, %v3145_v34  ;;  %v5111_v33 = vor.u32 %v5718_v22, %v5110_v21 }
 0x2e7   : > { %v6107_v46 = vpop.eup %6106  ;;  %v3557_v47 = vmul.f32 1.442695, %v3359_v41 }
 0x2e8   : > { %v6109_v49 = vpop.eup %6108  ;;  %v3742_v50 = vadd.f32 1.0, %v6107_v46  ;;  %v2817_v51 = vpop.f32.mrf.mxu2 }
 0x2e9   : > { %v3146_v52 = vpop.f32.mrf.mxu3  ;;  %v3997_v55 = vmax.f32 %v6109_v49, 0.0  ;;  %6110 = vpow2.f32 %v3557_v47  ;;  %v2818_v56 = vadd.f32 %v2817_v51, %v2489_v48  ;;  %v2162_v57 = vpop.f32.mrf.mxu0 }
 0x2ea   : > { %v2491_v58 = vpop.f32.mrf.mxu1  ;;  %6112 = vrcp.f32 %v3742_v50  ;;  %v2163_v61 = vadd.f32 %v6998_v60, %v2162_v57  ;;  %v5118_v57 = vld [vmem:[%s6470_s20 + $0x5c0] sm:$0xf] }
 0x2eb   : > { %v4125_v62 = vmin.f32 %v3997_v55, 1.0  ;;  %v3147_v63 = vadd.f32 %v3146_v52, %v2818_v56  ;;  %2201 = vmatmul.bf16.gmra.mxu0 %v5087_v53 }
 0x2ec   : > { %2530 = vmatmul.bf16.gmra.mxu1 %v5091_v18  ;;  %v2492_v2 = vadd.f32 %v2491_v58, %v2163_v61  ;;  %v5721_v58 = vld [vmem:[%s6470_s20 + $0x5cc] sm:$0xf0]  ;;  %v5120_v61 = vld [vmem:[%s6470_s20 + $0x5d0] sm:$0xf0] }
 0x2ed   : > { %4254 = vst.msk [vmem:[%s6591_s10 + $0x220] sm:$0xff] %vm4185_vm0, %v4125_v62  ;;  %v3360_v1 = vsub.f32 0.0, %v3147_v63  ;;  %2859 = vmatmul.bf16.gmra.mxu2 %v5095_v54  ;;  %v5126_v63 = vld [vmem:[%s6470_s20 + $0x5c8] sm:$0xf] }
 0x2ee   : > { %3188 = vmatmul.bf16.gmra.mxu3 %v5099_v59  ;;  %v5719_v59 = vld [vmem:[%s6470_s20 + $0x5c4] sm:$0xf] }
 0x2ef   : > { %v6111_v3 = vpop.eup %6110  ;;  %v3559_v4 = vmul.f32 1.442695, %v3360_v1  ;;  %v5722_v1 = vld [vmem:[%s6470_s20 + $0x5d4] sm:$0xf0] }
 0x2f0   : > { %v6113_v5 = vpop.eup %6112  ;;  %v3743_v6 = vadd.f32 1.0, %v6111_v3  ;;  %v2820_v7 = vpop.f32.mrf.mxu2  ;;  %v5128_v3 = vld [vmem:[%s6470_s20 + $0x5d8] sm:$0xf0] }
 0x2f1   : > { %v3149_v8 = vpop.f32.mrf.mxu3  ;;  %v3998_v9 = vmax.f32 %v6113_v5, 0.0  ;;  %6114 = vpow2.f32 %v3559_v4  ;;  %v2821_v10 = vadd.f32 %v2820_v7, %v2492_v2  ;;  %v2164_v11 = vpop.f32.mrf.mxu0  ;;  %v5720_v2 = vld [vmem:[%s6470_s20 + $0x5cc] sm:$0xf] }
 0x2f2   : > { %v2493_v39 = vpop.f32.mrf.mxu1  ;;  %6116 = vrcp.f32 %v3743_v6  ;;  %v2165_v14 = vadd.f32 %v6998_v60, %v2164_v11  ;;  %v5119_v11 = vor.u32 %v5721_v58, %v5118_v57  ;;  %v5131_v17 = vor.u32 %v5720_v2, %v5128_v3 }
 0x2f3   : > { %v4126_v12 = vmin.f32 %v3998_v9, 1.0  ;;  %v3150_v13 = vadd.f32 %v3149_v8, %v2821_v10 }
 0x2f4   : > { %v2494_v27 = vadd.f32 %v2493_v39, %v2165_v14  ;;  %v5123_v39 = vor.u32 %v5719_v59, %v5120_v61 }
 0x2f5   : > { %4255 = vst.msk [vmem:[%s6591_s10 + $0x228] sm:$0xff] %vm4185_vm0, %v4126_v12  ;;  %v3361_v20 = vsub.f32 0.0, %v3150_v13  ;;  %v5127_v12 = vor.u32 %v5722_v1, %v5126_v63 }
 0x2f7   : > { %v6115_v25 = vpop.eup %6114  ;;  %v3561_v26 = vmul.f32 1.442695, %v3361_v20 }
 0x2f8   : > { %v6117_v28 = vpop.eup %6116  ;;  %v3744_v29 = vadd.f32 1.0, %v6115_v25  ;;  %v2822_v30 = vpop.f32.mrf.mxu2 }
 0x2f9   : > { %v3151_v31 = vpop.f32.mrf.mxu3  ;;  %v3999_v34 = vmax.f32 %v6117_v28, 0.0  ;;  %6118 = vpow2.f32 %v3561_v26  ;;  %v2823_v35 = vadd.f32 %v2822_v30, %v2494_v27  ;;  %v2167_v36 = vpop.f32.mrf.mxu0 }
 0x2fa   : > { %v2496_v37 = vpop.f32.mrf.mxu1  ;;  %6120 = vrcp.f32 %v3744_v29  ;;  %v2168_v40 = vadd.f32 %v6998_v60, %v2167_v36  ;;  %v5134_v36 = vld [vmem:[%s6470_s20 + $0x5e0] sm:$0xf] }
 0x2fb   : > { %v4127_v41 = vmin.f32 %v3999_v34, 1.0  ;;  %v3152_v42 = vadd.f32 %v3151_v31, %v2823_v35  ;;  %2206 = vmatmul.bf16.gmra.mxu0 %v5103_v32 }
 0x2fc   : > { %2535 = vmatmul.bf16.gmra.mxu1 %v5107_v0  ;;  %v2497_v44 = vadd.f32 %v2496_v37, %v2168_v40  ;;  %v5725_v37 = vld [vmem:[%s6470_s20 + $0x5ec] sm:$0xf0]  ;;  %v5136_v40 = vld [vmem:[%s6470_s20 + $0x5f0] sm:$0xf0] }
 0x2fd   : > { %4256 = vst.msk [vmem:[%s6591_s10 + $0x230] sm:$0xff] %vm4185_vm0, %v4127_v41  ;;  %v3362_v43 = vsub.f32 0.0, %v3152_v42  ;;  %2864 = vmatmul.bf16.gmra.mxu2 %v5111_v33  ;;  %v5142_v42 = vld [vmem:[%s6470_s20 + $0x5e8] sm:$0xf] }
 0x2fe   : > { %3193 = vmatmul.bf16.gmra.mxu3 %v5115_v38  ;;  %v5723_v38 = vld [vmem:[%s6470_s20 + $0x5e4] sm:$0xf] }
 0x2ff   : > { %v6119_v45 = vpop.eup %6118  ;;  %v3563_v46 = vmul.f32 1.442695, %v3362_v43  ;;  %v5726_v43 = vld [vmem:[%s6470_s20 + $0x5f4] sm:$0xf0] }
 0x300   : > { %v6121_v47 = vpop.eup %6120  ;;  %v3745_v48 = vadd.f32 1.0, %v6119_v45  ;;  %v2825_v49 = vpop.f32.mrf.mxu2  ;;  %v5144_v45 = vld [vmem:[%s6470_s20 + $0x5f8] sm:$0xf0] }
 0x301   : > { %v3154_v50 = vpop.f32.mrf.mxu3  ;;  %v4000_v51 = vmax.f32 %v6121_v47, 0.0  ;;  %6122 = vpow2.f32 %v3563_v46  ;;  %v2826_v52 = vadd.f32 %v2825_v49, %v2497_v44  ;;  %v2169_v53 = vpop.f32.mrf.mxu0  ;;  %v5724_v44 = vld [vmem:[%s6470_s20 + $0x5ec] sm:$0xf] }
 0x302   : > { %v2498_v18 = vpop.f32.mrf.mxu1  ;;  %6124 = vrcp.f32 %v3745_v48  ;;  %v2170_v56 = vadd.f32 %v6998_v60, %v2169_v53  ;;  %v5135_v53 = vor.u32 %v5725_v37, %v5134_v36  ;;  %v5147_v59 = vor.u32 %v5724_v44, %v5144_v45 }
 0x303   : > { %v4128_v54 = vmin.f32 %v4000_v51, 1.0  ;;  %v3155_v55 = vadd.f32 %v3154_v50, %v2826_v52 }
 0x304   : > { %v2499_v6 = vadd.f32 %v2498_v18, %v2170_v56  ;;  %v5139_v18 = vor.u32 %v5723_v38, %v5136_v40  ;;  %v7143_v38 = vld [vmem:[%s7426_s2] ss:$0 sm:$0xff] }
 0x305   : > { %4257 = vst.msk [vmem:[%s6591_s10 + $0x238] sm:$0xff] %vm4185_vm0, %v4128_v54  ;;  %v3363_v62 = vsub.f32 0.0, %v3155_v55  ;;  %v5143_v54 = vor.u32 %v5726_v43, %v5142_v42 }
 0x307   : > { %v6123_v4 = vpop.eup %6122  ;;  %v3565_v5 = vmul.f32 1.442695, %v3363_v62 }
 0x308   : > { %v6125_v7 = vpop.eup %6124  ;;  %v3746_v8 = vadd.f32 1.0, %v6123_v4  ;;  %v2827_v9 = vpop.f32.mrf.mxu2 }
 0x309   : > { %v3156_v10 = vpop.f32.mrf.mxu3  ;;  %v4001_v13 = vmax.f32 %v6125_v7, 0.0  ;;  %6126 = vpow2.f32 %v3565_v5  ;;  %v2828_v14 = vadd.f32 %v2827_v9, %v2499_v6  ;;  %v2172_v15 = vpop.f32.mrf.mxu0 }
 0x30a   : > { %v2501_v16 = vpop.f32.mrf.mxu1  ;;  %6128 = vrcp.f32 %v3746_v8  ;;  %v2173_v19 = vadd.f32 %v6998_v60, %v2172_v15  ;;  %v5150_v15 = vld [vmem:[%s6470_s20 + $0x600] sm:$0xf] }
 0x30b   : > { %v4129_v20 = vmin.f32 %v4001_v13, 1.0  ;;  %v3157_v21 = vadd.f32 %v3156_v10, %v2828_v14  ;;  %2211 = vmatmul.bf16.gmra.mxu0 %v5119_v11 }
 0x30c   : > { %2540 = vmatmul.bf16.gmra.mxu1 %v5123_v39  ;;  %v2502_v23 = vadd.f32 %v2501_v16, %v2173_v19  ;;  %v5729_v16 = vld [vmem:[%s6470_s20 + $0x60c] sm:$0xf0]  ;;  %v5152_v19 = vld [vmem:[%s6470_s20 + $0x610] sm:$0xf0] }
 0x30d   : > { %4258 = vst.msk [vmem:[%s6591_s10 + $0x240] sm:$0xff] %vm4185_vm0, %v4129_v20  ;;  %v3364_v22 = vsub.f32 0.0, %v3157_v21  ;;  %2869 = vmatmul.bf16.gmra.mxu2 %v5127_v12  ;;  %v5158_v21 = vld [vmem:[%s6470_s20 + $0x608] sm:$0xf] }
 0x30e   : > { %3198 = vmatmul.bf16.gmra.mxu3 %v5131_v17  ;;  %v5727_v17 = vld [vmem:[%s6470_s20 + $0x604] sm:$0xf] }
 0x30f   : > { %v6127_v24 = vpop.eup %6126  ;;  %v3567_v25 = vmul.f32 1.442695, %v3364_v22  ;;  %v5730_v22 = vld [vmem:[%s6470_s20 + $0x614] sm:$0xf0] }
 0x310   : > { %v6129_v26 = vpop.eup %6128  ;;  %v3747_v27 = vadd.f32 1.0, %v6127_v24  ;;  %v2830_v28 = vpop.f32.mrf.mxu2  ;;  %v5160_v24 = vld [vmem:[%s6470_s20 + $0x618] sm:$0xf0] }
 0x311   : > { %v3159_v29 = vpop.f32.mrf.mxu3  ;;  %v4002_v30 = vmax.f32 %v6129_v26, 0.0  ;;  %6130 = vpow2.f32 %v3567_v25  ;;  %v2831_v31 = vadd.f32 %v2830_v28, %v2502_v23  ;;  %v2174_v32 = vpop.f32.mrf.mxu0  ;;  %v5728_v23 = vld [vmem:[%s6470_s20 + $0x60c] sm:$0xf] }
 0x312   : > { %v2503_v0 = vpop.f32.mrf.mxu1  ;;  %6132 = vrcp.f32 %v3747_v27  ;;  %v2175_v35 = vadd.f32 %v6998_v60, %v2174_v32  ;;  %v5151_v32 = vor.u32 %v5729_v16, %v5150_v15  ;;  %v5163_v37 = vor.u32 %v5728_v23, %v5160_v24 }
 0x313   : > { %v4130_v33 = vmin.f32 %v4002_v30, 1.0  ;;  %v3160_v34 = vadd.f32 %v3159_v29, %v2831_v31 }
 0x314   : > { %v2504_v48 = vadd.f32 %v2503_v0, %v2175_v35  ;;  %v5159_v0 = vor.u32 %v5730_v22, %v5158_v21 }
 0x315   : > { %4259 = vst.msk [vmem:[%s6591_s10 + $0x248] sm:$0xff] %vm4185_vm0, %v4130_v33  ;;  %v3365_v41 = vsub.f32 0.0, %v3160_v34 }
 0x317   : > { %v6131_v46 = vpop.eup %6130  ;;  %v3569_v47 = vmul.f32 1.442695, %v3365_v41 }
 0x318   : > { %v6133_v49 = vpop.eup %6132  ;;  %v3748_v50 = vadd.f32 1.0, %v6131_v46  ;;  %v2832_v51 = vpop.f32.mrf.mxu2 }
 0x319   : > { %v3161_v52 = vpop.f32.mrf.mxu3  ;;  %v4003_v55 = vmax.f32 %v6133_v49, 0.0  ;;  %6134 = vpow2.f32 %v3569_v47  ;;  %v2833_v56 = vadd.f32 %v2832_v51, %v2504_v48  ;;  %v2177_v57 = vpop.f32.mrf.mxu0 }
 0x31a   : > { %v2506_v58 = vpop.f32.mrf.mxu1  ;;  %6136 = vrcp.f32 %v3748_v50  ;;  %v2178_v61 = vadd.f32 %v6998_v60, %v2177_v57  ;;  %v5166_v57 = vld [vmem:[%s6470_s20 + $0x620] sm:$0xf] }
 0x31b   : > { %v4131_v62 = vmin.f32 %v4003_v55, 1.0  ;;  %v3162_v63 = vadd.f32 %v3161_v52, %v2833_v56  ;;  %2216 = vmatmul.bf16.gmra.mxu0 %v5135_v53 }
 0x31c   : > { %2545 = vmatmul.bf16.gmra.mxu1 %v5139_v18  ;;  %v2507_v2 = vadd.f32 %v2506_v58, %v2178_v61  ;;  %v5733_v58 = vld [vmem:[%s6470_s20 + $0x62c] sm:$0xf0]  ;;  %v5168_v61 = vld [vmem:[%s6470_s20 + $0x630] sm:$0xf0] }
 0x31d   : > { %4260 = vst.msk [vmem:[%s6591_s10 + $0x250] sm:$0xff] %vm4185_vm0, %v4131_v62  ;;  %v3366_v1 = vsub.f32 0.0, %v3162_v63  ;;  %2874 = vmatmul.bf16.gmra.mxu2 %v5143_v54  ;;  %v5174_v63 = vld [vmem:[%s6470_s20 + $0x628] sm:$0xf] }
 0x31e   : > { %3203 = vmatmul.bf16.gmra.mxu3 %v5147_v59  ;;  %v5731_v59 = vld [vmem:[%s6470_s20 + $0x624] sm:$0xf] }
 0x31f   : > { %v6135_v3 = vpop.eup %6134  ;;  %v3571_v4 = vmul.f32 1.442695, %v3366_v1  ;;  %v5734_v1 = vld [vmem:[%s6470_s20 + $0x634] sm:$0xf0] }
 0x320   : > { %v6137_v5 = vpop.eup %6136  ;;  %v3749_v6 = vadd.f32 1.0, %v6135_v3  ;;  %v2835_v7 = vpop.f32.mrf.mxu2  ;;  %v5176_v3 = vld [vmem:[%s6470_s20 + $0x638] sm:$0xf0] }
 0x321   : > { %v3164_v8 = vpop.f32.mrf.mxu3  ;;  %v4004_v9 = vmax.f32 %v6137_v5, 0.0  ;;  %6138 = vpow2.f32 %v3571_v4  ;;  %v2836_v10 = vadd.f32 %v2835_v7, %v2507_v2  ;;  %v2179_v11 = vpop.f32.mrf.mxu0  ;;  %v5732_v2 = vld [vmem:[%s6470_s20 + $0x62c] sm:$0xf] }
 0x322   : > { %v2508_v39 = vpop.f32.mrf.mxu1  ;;  %6140 = vrcp.f32 %v3749_v6  ;;  %v2180_v14 = vadd.f32 %v6998_v60, %v2179_v11  ;;  %v5155_v60 = vor.u32 %v5727_v17, %v5152_v19  ;;  %v5167_v11 = vor.u32 %v5733_v58, %v5166_v57 }
 0x323   : > { %v4132_v12 = vmin.f32 %v4004_v9, 1.0  ;;  %v3165_v13 = vadd.f32 %v3164_v8, %v2836_v10  ;;  %v5179_v17 = vor.u32 %v5732_v2, %v5176_v3 }
 0x324   : > { %v2509_v27 = vadd.f32 %v2508_v39, %v2180_v14  ;;  %v5171_v39 = vor.u32 %v5731_v59, %v5168_v61 }
 0x325   : > { %4261 = vst.msk [vmem:[%s6591_s10 + $0x258] sm:$0xff] %vm4185_vm0, %v4132_v12  ;;  %v3367_v20 = vsub.f32 0.0, %v3165_v13  ;;  %v5175_v12 = vor.u32 %v5734_v1, %v5174_v63 }
 0x327   : > { %v6139_v25 = vpop.eup %6138  ;;  %v3573_v26 = vmul.f32 1.442695, %v3367_v20 }
 0x328   : > { %v6141_v28 = vpop.eup %6140  ;;  %v3750_v29 = vadd.f32 1.0, %v6139_v25  ;;  %v2837_v30 = vpop.f32.mrf.mxu2 }
 0x329   : > { %v3166_v31 = vpop.f32.mrf.mxu3  ;;  %v4005_v33 = vmax.f32 %v6141_v28, 0.0  ;;  %6142 = vpow2.f32 %v3573_v26  ;;  %v2838_v34 = vadd.f32 %v2837_v30, %v2509_v27  ;;  %v2182_v35 = vpop.f32.mrf.mxu0 }
 0x32a   : > { %v2511_v36 = vpop.f32.mrf.mxu1  ;;  %6144 = vrcp.f32 %v3750_v29  ;;  %v2183_v40 = vadd.f32 %v7143_v38, %v2182_v35  ;;  %v5182_v35 = vld [vmem:[%s6470_s20 + $0x640] sm:$0xf] }
 0x32b   : > { %v4133_v41 = vmin.f32 %v4005_v33, 1.0  ;;  %v3167_v42 = vadd.f32 %v3166_v31, %v2838_v34  ;;  %2221 = vmatmul.bf16.gmra.mxu0 %v5151_v32 }
 0x32c   : > { %2550 = vmatmul.bf16.gmra.mxu1 %v5155_v60  ;;  %v2512_v44 = vadd.f32 %v2511_v36, %v2183_v40  ;;  %v5737_v36 = vld [vmem:[%s6470_s20 + $0x64c] sm:$0xf0]  ;;  %v5184_v40 = vld [vmem:[%s6470_s20 + $0x650] sm:$0xf0] }
 0x32d   : > { %4262 = vst.msk [vmem:[%s6591_s10 + $0x260] sm:$0xff] %vm4185_vm0, %v4133_v41  ;;  %v3368_v43 = vsub.f32 0.0, %v3167_v42  ;;  %2879 = vmatmul.bf16.gmra.mxu2 %v5159_v0  ;;  %v5190_v42 = vld [vmem:[%s6470_s20 + $0x648] sm:$0xf] }
 0x32e   : > { %3208 = vmatmul.bf16.gmra.mxu3 %v5163_v37  ;;  %v5735_v37 = vld [vmem:[%s6470_s20 + $0x644] sm:$0xf] }
 0x32f   : > { %v6143_v45 = vpop.eup %6142  ;;  %v3575_v46 = vmul.f32 1.442695, %v3368_v43  ;;  %v5738_v43 = vld [vmem:[%s6470_s20 + $0x654] sm:$0xf0] }
 0x330   : > { %v6145_v47 = vpop.eup %6144  ;;  %v3751_v48 = vadd.f32 1.0, %v6143_v45  ;;  %v2840_v49 = vpop.f32.mrf.mxu2  ;;  %v5192_v45 = vld [vmem:[%s6470_s20 + $0x658] sm:$0xf0] }
 0x331   : > { %v3169_v50 = vpop.f32.mrf.mxu3  ;;  %v4006_v51 = vmax.f32 %v6145_v47, 0.0  ;;  %6146 = vpow2.f32 %v3575_v46  ;;  %v2841_v52 = vadd.f32 %v2840_v49, %v2512_v44  ;;  %v2184_v53 = vpop.f32.mrf.mxu0  ;;  %v5736_v44 = vld [vmem:[%s6470_s20 + $0x64c] sm:$0xf] }
 0x332   : > { %v2513_v18 = vpop.f32.mrf.mxu1  ;;  %6148 = vrcp.f32 %v3751_v48  ;;  %v2185_v56 = vadd.f32 %v7143_v38, %v2184_v53  ;;  %v5183_v53 = vor.u32 %v5737_v36, %v5182_v35  ;;  %v5195_v59 = vor.u32 %v5736_v44, %v5192_v45 }
 0x333   : > { %v4134_v54 = vmin.f32 %v4006_v51, 1.0  ;;  %v3170_v55 = vadd.f32 %v3169_v50, %v2841_v52 }
 0x334   : > { %v2514_v6 = vadd.f32 %v2513_v18, %v2185_v56  ;;  %v5187_v18 = vor.u32 %v5735_v37, %v5184_v40 }
 0x335   : > { %4263 = vst.msk [vmem:[%s6591_s10 + $0x268] sm:$0xff] %vm4185_vm0, %v4134_v54  ;;  %v3369_v62 = vsub.f32 0.0, %v3170_v55  ;;  %v5191_v54 = vor.u32 %v5738_v43, %v5190_v42 }
 0x337   : > { %v6147_v4 = vpop.eup %6146  ;;  %v3577_v5 = vmul.f32 1.442695, %v3369_v62 }
 0x338   : > { %v6149_v7 = vpop.eup %6148  ;;  %v3752_v8 = vadd.f32 1.0, %v6147_v4  ;;  %v2842_v9 = vpop.f32.mrf.mxu2 }
 0x339   : > { %v3171_v10 = vpop.f32.mrf.mxu3  ;;  %v4007_v13 = vmax.f32 %v6149_v7, 0.0  ;;  %6150 = vpow2.f32 %v3577_v5  ;;  %v2843_v14 = vadd.f32 %v2842_v9, %v2514_v6  ;;  %v2187_v15 = vpop.f32.mrf.mxu0 }
 0x33a   : > { %v2516_v16 = vpop.f32.mrf.mxu1  ;;  %6152 = vrcp.f32 %v3752_v8  ;;  %v2188_v19 = vadd.f32 %v7143_v38, %v2187_v15  ;;  %v5198_v15 = vld [vmem:[%s6470_s20 + $0x660] sm:$0xf] }
 0x33b   : > { %v4135_v20 = vmin.f32 %v4007_v13, 1.0  ;;  %v3172_v21 = vadd.f32 %v3171_v10, %v2843_v14  ;;  %2226 = vmatmul.bf16.gmra.mxu0 %v5167_v11 }
 0x33c   : > { %2555 = vmatmul.bf16.gmra.mxu1 %v5171_v39  ;;  %v2517_v23 = vadd.f32 %v2516_v16, %v2188_v19  ;;  %v5741_v16 = vld [vmem:[%s6470_s20 + $0x66c] sm:$0xf0]  ;;  %v5200_v19 = vld [vmem:[%s6470_s20 + $0x670] sm:$0xf0] }
 0x33d   : > { %4264 = vst.msk [vmem:[%s6591_s10 + $0x270] sm:$0xff] %vm4185_vm0, %v4135_v20  ;;  %v3370_v22 = vsub.f32 0.0, %v3172_v21  ;;  %2884 = vmatmul.bf16.gmra.mxu2 %v5175_v12  ;;  %v5206_v21 = vld [vmem:[%s6470_s20 + $0x668] sm:$0xf] }
 0x33e   : > { %3213 = vmatmul.bf16.gmra.mxu3 %v5179_v17  ;;  %v5739_v17 = vld [vmem:[%s6470_s20 + $0x664] sm:$0xf] }
 0x33f   : > { %v6151_v24 = vpop.eup %6150  ;;  %v3579_v25 = vmul.f32 1.442695, %v3370_v22  ;;  %v5742_v22 = vld [vmem:[%s6470_s20 + $0x674] sm:$0xf0] }
 0x340   : > { %v6153_v26 = vpop.eup %6152  ;;  %v3753_v27 = vadd.f32 1.0, %v6151_v24  ;;  %v2845_v28 = vpop.f32.mrf.mxu2  ;;  %v5208_v24 = vld [vmem:[%s6470_s20 + $0x678] sm:$0xf0] }
 0x341   : > { %v3174_v29 = vpop.f32.mrf.mxu3  ;;  %v4008_v30 = vmax.f32 %v6153_v26, 0.0  ;;  %6154 = vpow2.f32 %v3579_v25  ;;  %v2846_v31 = vadd.f32 %v2845_v28, %v2517_v23  ;;  %v2189_v32 = vpop.f32.mrf.mxu0  ;;  %v5740_v23 = vld [vmem:[%s6470_s20 + $0x66c] sm:$0xf] }
 0x342   : > { %v2518_v60 = vpop.f32.mrf.mxu1  ;;  %6156 = vrcp.f32 %v3753_v27  ;;  %v2190_v34 = vadd.f32 %v7143_v38, %v2189_v32  ;;  %v5199_v32 = vor.u32 %v5741_v16, %v5198_v15  ;;  %v5211_v37 = vor.u32 %v5740_v23, %v5208_v24 }
 0x343   : > { %v4136_v0 = vmin.f32 %v4008_v30, 1.0  ;;  %v3175_v33 = vadd.f32 %v3174_v29, %v2846_v31 }
 0x344   : > { %v2519_v48 = vadd.f32 %v2518_v60, %v2190_v34  ;;  %v5203_v60 = vor.u32 %v5739_v17, %v5200_v19 }
 0x345   : > { %4265 = vst.msk [vmem:[%s6591_s10 + $0x278] sm:$0xff] %vm4185_vm0, %v4136_v0  ;;  %v3371_v41 = vsub.f32 0.0, %v3175_v33  ;;  %v5207_v0 = vor.u32 %v5742_v22, %v5206_v21 }
 0x347   : > { %v6155_v46 = vpop.eup %6154  ;;  %v3581_v47 = vmul.f32 1.442695, %v3371_v41 }
 0x348   : > { %v6157_v49 = vpop.eup %6156  ;;  %v3754_v50 = vadd.f32 1.0, %v6155_v46  ;;  %v2847_v51 = vpop.f32.mrf.mxu2 }
 0x349   : > { %v3176_v52 = vpop.f32.mrf.mxu3  ;;  %v4009_v55 = vmax.f32 %v6157_v49, 0.0  ;;  %6158 = vpow2.f32 %v3581_v47  ;;  %v2848_v56 = vadd.f32 %v2847_v51, %v2519_v48  ;;  %v2192_v57 = vpop.f32.mrf.mxu0 }
 0x34a   : > { %v2521_v58 = vpop.f32.mrf.mxu1  ;;  %6160 = vrcp.f32 %v3754_v50  ;;  %v2193_v61 = vadd.f32 %v7143_v38, %v2192_v57  ;;  %v5214_v57 = vld [vmem:[%s6470_s20 + $0x680] sm:$0xf] }
 0x34b   : > { %v4137_v62 = vmin.f32 %v4009_v55, 1.0  ;;  %v3177_v63 = vadd.f32 %v3176_v52, %v2848_v56  ;;  %2231 = vmatmul.bf16.gmra.mxu0 %v5183_v53 }
 0x34c   : > { %2560 = vmatmul.bf16.gmra.mxu1 %v5187_v18  ;;  %v2522_v2 = vadd.f32 %v2521_v58, %v2193_v61  ;;  %v5745_v58 = vld [vmem:[%s6470_s20 + $0x68c] sm:$0xf0]  ;;  %v5216_v61 = vld [vmem:[%s6470_s20 + $0x690] sm:$0xf0] }
 0x34d   : > { %4266 = vst.msk [vmem:[%s6591_s10 + $0x280] sm:$0xff] %vm4185_vm0, %v4137_v62  ;;  %v3372_v1 = vsub.f32 0.0, %v3177_v63  ;;  %2889 = vmatmul.bf16.gmra.mxu2 %v5191_v54  ;;  %v5222_v63 = vld [vmem:[%s6470_s20 + $0x688] sm:$0xf] }
 0x34e   : > { %3218 = vmatmul.bf16.gmra.mxu3 %v5195_v59  ;;  %v5743_v59 = vld [vmem:[%s6470_s20 + $0x684] sm:$0xf] }
 0x34f   : > { %v6159_v3 = vpop.eup %6158  ;;  %v3583_v4 = vmul.f32 1.442695, %v3372_v1  ;;  %v5746_v1 = vld [vmem:[%s6470_s20 + $0x694] sm:$0xf0] }
 0x350   : > { %v6161_v5 = vpop.eup %6160  ;;  %v3755_v6 = vadd.f32 1.0, %v6159_v3  ;;  %v2850_v7 = vpop.f32.mrf.mxu2  ;;  %v5224_v3 = vld [vmem:[%s6470_s20 + $0x698] sm:$0xf0] }
 0x351   : > { %v3179_v8 = vpop.f32.mrf.mxu3  ;;  %v4010_v9 = vmax.f32 %v6161_v5, 0.0  ;;  %6162 = vpow2.f32 %v3583_v4  ;;  %v2851_v10 = vadd.f32 %v2850_v7, %v2522_v2  ;;  %v2194_v11 = vpop.f32.mrf.mxu0  ;;  %v5744_v2 = vld [vmem:[%s6470_s20 + $0x68c] sm:$0xf] }
 0x352   : > { %v2523_v39 = vpop.f32.mrf.mxu1  ;;  %6164 = vrcp.f32 %v3755_v6  ;;  %v2195_v14 = vadd.f32 %v7143_v38, %v2194_v11  ;;  %v5215_v11 = vor.u32 %v5745_v58, %v5214_v57  ;;  %v5227_v17 = vor.u32 %v5744_v2, %v5224_v3 }
 0x353   : > { %v4138_v12 = vmin.f32 %v4010_v9, 1.0  ;;  %v3180_v13 = vadd.f32 %v3179_v8, %v2851_v10 }
 0x354   : > { %v2524_v27 = vadd.f32 %v2523_v39, %v2195_v14  ;;  %v5219_v39 = vor.u32 %v5743_v59, %v5216_v61 }
 0x355   : > { %4267 = vst.msk [vmem:[%s6591_s10 + $0x288] sm:$0xff] %vm4185_vm0, %v4138_v12  ;;  %v3373_v20 = vsub.f32 0.0, %v3180_v13  ;;  %v5223_v12 = vor.u32 %v5746_v1, %v5222_v63 }
 0x357   : > { %v6163_v25 = vpop.eup %6162  ;;  %v3585_v26 = vmul.f32 1.442695, %v3373_v20 }
 0x358   : > { %v6165_v28 = vpop.eup %6164  ;;  %v3756_v29 = vadd.f32 1.0, %v6163_v25  ;;  %v2852_v30 = vpop.f32.mrf.mxu2 }
 0x359   : > { %v3181_v31 = vpop.f32.mrf.mxu3  ;;  %v4011_v33 = vmax.f32 %v6165_v28, 0.0  ;;  %6166 = vpow2.f32 %v3585_v26  ;;  %v2853_v34 = vadd.f32 %v2852_v30, %v2524_v27  ;;  %v2197_v35 = vpop.f32.mrf.mxu0 }
 0x35a   : > { %v2526_v36 = vpop.f32.mrf.mxu1  ;;  %6168 = vrcp.f32 %v3756_v29  ;;  %v2198_v40 = vadd.f32 %v7143_v38, %v2197_v35  ;;  %v5230_v35 = vld [vmem:[%s6470_s20 + $0x6a0] sm:$0xf] }
 0x35b   : > { %v4139_v41 = vmin.f32 %v4011_v33, 1.0  ;;  %v3182_v42 = vadd.f32 %v3181_v31, %v2853_v34  ;;  %2236 = vmatmul.bf16.gmra.mxu0 %v5199_v32 }
 0x35c   : > { %2565 = vmatmul.bf16.gmra.mxu1 %v5203_v60  ;;  %v2527_v44 = vadd.f32 %v2526_v36, %v2198_v40  ;;  %v5749_v36 = vld [vmem:[%s6470_s20 + $0x6ac] sm:$0xf0]  ;;  %v5232_v40 = vld [vmem:[%s6470_s20 + $0x6b0] sm:$0xf0] }
 0x35d   : > { %4268 = vst.msk [vmem:[%s6591_s10 + $0x290] sm:$0xff] %vm4185_vm0, %v4139_v41  ;;  %v3374_v43 = vsub.f32 0.0, %v3182_v42  ;;  %2894 = vmatmul.bf16.gmra.mxu2 %v5207_v0  ;;  %v5238_v42 = vld [vmem:[%s6470_s20 + $0x6a8] sm:$0xf] }
 0x35e   : > { %3223 = vmatmul.bf16.gmra.mxu3 %v5211_v37  ;;  %v5747_v37 = vld [vmem:[%s6470_s20 + $0x6a4] sm:$0xf] }
 0x35f   : > { %v6167_v45 = vpop.eup %6166  ;;  %v3587_v46 = vmul.f32 1.442695, %v3374_v43  ;;  %v5750_v43 = vld [vmem:[%s6470_s20 + $0x6b4] sm:$0xf0] }
 0x360   : > { %v6169_v47 = vpop.eup %6168  ;;  %v3757_v48 = vadd.f32 1.0, %v6167_v45  ;;  %v2855_v49 = vpop.f32.mrf.mxu2  ;;  %v5240_v45 = vld [vmem:[%s6470_s20 + $0x6b8] sm:$0xf0] }
 0x361   : > { %v3184_v50 = vpop.f32.mrf.mxu3  ;;  %v4012_v51 = vmax.f32 %v6169_v47, 0.0  ;;  %6170 = vpow2.f32 %v3587_v46  ;;  %v2856_v52 = vadd.f32 %v2855_v49, %v2527_v44  ;;  %v2199_v53 = vpop.f32.mrf.mxu0  ;;  %v5748_v44 = vld [vmem:[%s6470_s20 + $0x6ac] sm:$0xf] }
 0x362   : > { %v2528_v18 = vpop.f32.mrf.mxu1  ;;  %6172 = vrcp.f32 %v3757_v48  ;;  %v2200_v56 = vadd.f32 %v7143_v38, %v2199_v53  ;;  %v5231_v53 = vor.u32 %v5749_v36, %v5230_v35  ;;  %v5243_v59 = vor.u32 %v5748_v44, %v5240_v45 }
 0x363   : > { %v4140_v54 = vmin.f32 %v4012_v51, 1.0  ;;  %v3185_v55 = vadd.f32 %v3184_v50, %v2856_v52 }
 0x364   : > { %v2529_v6 = vadd.f32 %v2528_v18, %v2200_v56  ;;  %v5235_v18 = vor.u32 %v5747_v37, %v5232_v40 }
 0x365   : > { %4269 = vst.msk [vmem:[%s6591_s10 + $0x298] sm:$0xff] %vm4185_vm0, %v4140_v54  ;;  %v3375_v62 = vsub.f32 0.0, %v3185_v55  ;;  %v5239_v54 = vor.u32 %v5750_v43, %v5238_v42 }
 0x367   : > { %v6171_v4 = vpop.eup %6170  ;;  %v3589_v5 = vmul.f32 1.442695, %v3375_v62 }
 0x368   : > { %v6173_v7 = vpop.eup %6172  ;;  %v3758_v8 = vadd.f32 1.0, %v6171_v4  ;;  %v2857_v9 = vpop.f32.mrf.mxu2 }
 0x369   : > { %v3186_v10 = vpop.f32.mrf.mxu3  ;;  %v4013_v13 = vmax.f32 %v6173_v7, 0.0  ;;  %6174 = vpow2.f32 %v3589_v5  ;;  %v2858_v14 = vadd.f32 %v2857_v9, %v2529_v6  ;;  %v2202_v15 = vpop.f32.mrf.mxu0 }
 0x36a   : > { %v2531_v16 = vpop.f32.mrf.mxu1  ;;  %6176 = vrcp.f32 %v3758_v8  ;;  %v2203_v19 = vadd.f32 %v7143_v38, %v2202_v15  ;;  %v5246_v15 = vld [vmem:[%s6470_s20 + $0x6c0] sm:$0xf] }
 0x36b   : > { %v4141_v20 = vmin.f32 %v4013_v13, 1.0  ;;  %v3187_v21 = vadd.f32 %v3186_v10, %v2858_v14  ;;  %2241 = vmatmul.bf16.gmra.mxu0 %v5215_v11 }
 0x36c   : > { %2570 = vmatmul.bf16.gmra.mxu1 %v5219_v39  ;;  %v2532_v23 = vadd.f32 %v2531_v16, %v2203_v19  ;;  %v5753_v16 = vld [vmem:[%s6470_s20 + $0x6cc] sm:$0xf0]  ;;  %v5248_v19 = vld [vmem:[%s6470_s20 + $0x6d0] sm:$0xf0] }
 0x36d   : > { %4270 = vst.msk [vmem:[%s6591_s10 + $0x2a0] sm:$0xff] %vm4185_vm0, %v4141_v20  ;;  %v3376_v22 = vsub.f32 0.0, %v3187_v21  ;;  %2899 = vmatmul.bf16.gmra.mxu2 %v5223_v12  ;;  %v5254_v21 = vld [vmem:[%s6470_s20 + $0x6c8] sm:$0xf] }
 0x36e   : > { %3228 = vmatmul.bf16.gmra.mxu3 %v5227_v17  ;;  %v5751_v17 = vld [vmem:[%s6470_s20 + $0x6c4] sm:$0xf] }
 0x36f   : > { %v6175_v24 = vpop.eup %6174  ;;  %v3591_v25 = vmul.f32 1.442695, %v3376_v22  ;;  %v5754_v22 = vld [vmem:[%s6470_s20 + $0x6d4] sm:$0xf0] }
 0x370   : > { %v6177_v26 = vpop.eup %6176  ;;  %v3759_v27 = vadd.f32 1.0, %v6175_v24  ;;  %v2860_v28 = vpop.f32.mrf.mxu2  ;;  %v5256_v24 = vld [vmem:[%s6470_s20 + $0x6d8] sm:$0xf0] }
 0x371   : > { %v3189_v29 = vpop.f32.mrf.mxu3  ;;  %v4014_v30 = vmax.f32 %v6177_v26, 0.0  ;;  %6178 = vpow2.f32 %v3591_v25  ;;  %v2861_v31 = vadd.f32 %v2860_v28, %v2532_v23  ;;  %v2204_v32 = vpop.f32.mrf.mxu0  ;;  %v5752_v23 = vld [vmem:[%s6470_s20 + $0x6cc] sm:$0xf] }
 0x372   : > { %v2533_v60 = vpop.f32.mrf.mxu1  ;;  %6180 = vrcp.f32 %v3759_v27  ;;  %v2205_v34 = vadd.f32 %v7143_v38, %v2204_v32  ;;  %v5247_v32 = vor.u32 %v5753_v16, %v5246_v15  ;;  %v5259_v37 = vor.u32 %v5752_v23, %v5256_v24 }
 0x373   : > { %v4142_v0 = vmin.f32 %v4014_v30, 1.0  ;;  %v3190_v33 = vadd.f32 %v3189_v29, %v2861_v31 }
 0x374   : > { %v2534_v48 = vadd.f32 %v2533_v60, %v2205_v34  ;;  %v5251_v60 = vor.u32 %v5751_v17, %v5248_v19 }
 0x375   : > { %4271 = vst.msk [vmem:[%s6591_s10 + $0x2a8] sm:$0xff] %vm4185_vm0, %v4142_v0  ;;  %v3377_v41 = vsub.f32 0.0, %v3190_v33  ;;  %v5255_v0 = vor.u32 %v5754_v22, %v5254_v21 }
 0x377   : > { %v6179_v46 = vpop.eup %6178  ;;  %v3593_v47 = vmul.f32 1.442695, %v3377_v41 }
 0x378   : > { %v6181_v49 = vpop.eup %6180  ;;  %v3760_v50 = vadd.f32 1.0, %v6179_v46  ;;  %v2862_v51 = vpop.f32.mrf.mxu2 }
 0x379   : > { %v3191_v52 = vpop.f32.mrf.mxu3  ;;  %v4015_v55 = vmax.f32 %v6181_v49, 0.0  ;;  %6182 = vpow2.f32 %v3593_v47  ;;  %v2863_v56 = vadd.f32 %v2862_v51, %v2534_v48  ;;  %v2207_v57 = vpop.f32.mrf.mxu0 }
 0x37a   : > { %v2536_v58 = vpop.f32.mrf.mxu1  ;;  %6184 = vrcp.f32 %v3760_v50  ;;  %v2208_v61 = vadd.f32 %v7143_v38, %v2207_v57  ;;  %v5262_v57 = vld [vmem:[%s6470_s20 + $0x6e0] sm:$0xf] }
 0x37b   : > { %v4143_v62 = vmin.f32 %v4015_v55, 1.0  ;;  %v3192_v63 = vadd.f32 %v3191_v52, %v2863_v56  ;;  %2246 = vmatmul.bf16.gmra.mxu0 %v5231_v53 }
 0x37c   : > { %2575 = vmatmul.bf16.gmra.mxu1 %v5235_v18  ;;  %v2537_v2 = vadd.f32 %v2536_v58, %v2208_v61  ;;  %v5757_v58 = vld [vmem:[%s6470_s20 + $0x6ec] sm:$0xf0]  ;;  %v5264_v61 = vld [vmem:[%s6470_s20 + $0x6f0] sm:$0xf0] }
 0x37d   : > { %4272 = vst.msk [vmem:[%s6591_s10 + $0x2b0] sm:$0xff] %vm4185_vm0, %v4143_v62  ;;  %v3378_v1 = vsub.f32 0.0, %v3192_v63  ;;  %2904 = vmatmul.bf16.gmra.mxu2 %v5239_v54  ;;  %v5270_v63 = vld [vmem:[%s6470_s20 + $0x6e8] sm:$0xf] }
 0x37e   : > { %3233 = vmatmul.bf16.gmra.mxu3 %v5243_v59  ;;  %v5755_v59 = vld [vmem:[%s6470_s20 + $0x6e4] sm:$0xf] }
 0x37f   : > { %v6183_v3 = vpop.eup %6182  ;;  %v3595_v4 = vmul.f32 1.442695, %v3378_v1  ;;  %v5758_v1 = vld [vmem:[%s6470_s20 + $0x6f4] sm:$0xf0] }
 0x380   : > { %v6185_v5 = vpop.eup %6184  ;;  %v3761_v6 = vadd.f32 1.0, %v6183_v3  ;;  %v2865_v7 = vpop.f32.mrf.mxu2  ;;  %v5272_v3 = vld [vmem:[%s6470_s20 + $0x6f8] sm:$0xf0] }
 0x381   : > { %v3194_v8 = vpop.f32.mrf.mxu3  ;;  %v4016_v9 = vmax.f32 %v6185_v5, 0.0  ;;  %6186 = vpow2.f32 %v3595_v4  ;;  %v2866_v10 = vadd.f32 %v2865_v7, %v2537_v2  ;;  %v2209_v11 = vpop.f32.mrf.mxu0  ;;  %v5756_v2 = vld [vmem:[%s6470_s20 + $0x6ec] sm:$0xf] }
 0x382   : > { %v2538_v39 = vpop.f32.mrf.mxu1  ;;  %6188 = vrcp.f32 %v3761_v6  ;;  %v2210_v14 = vadd.f32 %v7143_v38, %v2209_v11  ;;  %v5263_v11 = vor.u32 %v5757_v58, %v5262_v57  ;;  %v5275_v17 = vor.u32 %v5756_v2, %v5272_v3 }
 0x383   : > { %v4144_v12 = vmin.f32 %v4016_v9, 1.0  ;;  %v3195_v13 = vadd.f32 %v3194_v8, %v2866_v10 }
 0x384   : > { %v2539_v27 = vadd.f32 %v2538_v39, %v2210_v14  ;;  %v5267_v39 = vor.u32 %v5755_v59, %v5264_v61 }
 0x385   : > { %4273 = vst.msk [vmem:[%s6591_s10 + $0x2b8] sm:$0xff] %vm4185_vm0, %v4144_v12  ;;  %v3379_v20 = vsub.f32 0.0, %v3195_v13  ;;  %v5271_v12 = vor.u32 %v5758_v1, %v5270_v63 }
 0x387   : > { %v6187_v25 = vpop.eup %6186  ;;  %v3597_v26 = vmul.f32 1.442695, %v3379_v20 }
 0x388   : > { %v6189_v28 = vpop.eup %6188  ;;  %v3762_v29 = vadd.f32 1.0, %v6187_v25  ;;  %v2867_v30 = vpop.f32.mrf.mxu2 }
 0x389   : > { %v3196_v31 = vpop.f32.mrf.mxu3  ;;  %v4017_v33 = vmax.f32 %v6189_v28, 0.0  ;;  %6190 = vpow2.f32 %v3597_v26  ;;  %v2868_v34 = vadd.f32 %v2867_v30, %v2539_v27  ;;  %v2212_v35 = vpop.f32.mrf.mxu0 }
 0x38a   : > { %v2541_v36 = vpop.f32.mrf.mxu1  ;;  %6192 = vrcp.f32 %v3762_v29  ;;  %v2213_v40 = vadd.f32 %v7143_v38, %v2212_v35  ;;  %v5278_v35 = vld [vmem:[%s6470_s20 + $0x700] sm:$0xf] }
 0x38b   : > { %v4145_v41 = vmin.f32 %v4017_v33, 1.0  ;;  %v3197_v42 = vadd.f32 %v3196_v31, %v2868_v34  ;;  %2251 = vmatmul.bf16.gmra.mxu0 %v5247_v32 }
 0x38c   : > { %2580 = vmatmul.bf16.gmra.mxu1 %v5251_v60  ;;  %v2542_v44 = vadd.f32 %v2541_v36, %v2213_v40  ;;  %v5761_v36 = vld [vmem:[%s6470_s20 + $0x70c] sm:$0xf0]  ;;  %v5280_v40 = vld [vmem:[%s6470_s20 + $0x710] sm:$0xf0] }
 0x38d   : > { %4274 = vst.msk [vmem:[%s6591_s10 + $0x2c0] sm:$0xff] %vm4185_vm0, %v4145_v41  ;;  %v3380_v43 = vsub.f32 0.0, %v3197_v42  ;;  %2909 = vmatmul.bf16.gmra.mxu2 %v5255_v0  ;;  %v5286_v42 = vld [vmem:[%s6470_s20 + $0x708] sm:$0xf] }
 0x38e   : > { %3238 = vmatmul.bf16.gmra.mxu3 %v5259_v37  ;;  %v5759_v37 = vld [vmem:[%s6470_s20 + $0x704] sm:$0xf] }
 0x38f   : > { %v6191_v45 = vpop.eup %6190  ;;  %v3599_v46 = vmul.f32 1.442695, %v3380_v43  ;;  %v5762_v43 = vld [vmem:[%s6470_s20 + $0x714] sm:$0xf0] }
 0x390   : > { %v6193_v47 = vpop.eup %6192  ;;  %v3763_v48 = vadd.f32 1.0, %v6191_v45  ;;  %v2870_v49 = vpop.f32.mrf.mxu2  ;;  %v5288_v45 = vld [vmem:[%s6470_s20 + $0x718] sm:$0xf0] }
 0x391   : > { %v3199_v50 = vpop.f32.mrf.mxu3  ;;  %v4018_v51 = vmax.f32 %v6193_v47, 0.0  ;;  %6194 = vpow2.f32 %v3599_v46  ;;  %v2871_v52 = vadd.f32 %v2870_v49, %v2542_v44  ;;  %v2214_v53 = vpop.f32.mrf.mxu0  ;;  %v5760_v44 = vld [vmem:[%s6470_s20 + $0x70c] sm:$0xf] }
 0x392   : > { %v2543_v18 = vpop.f32.mrf.mxu1  ;;  %6196 = vrcp.f32 %v3763_v48  ;;  %v2215_v56 = vadd.f32 %v7143_v38, %v2214_v53  ;;  %v5279_v53 = vor.u32 %v5761_v36, %v5278_v35  ;;  %v5291_v59 = vor.u32 %v5760_v44, %v5288_v45 }
 0x393   : > { %v4146_v54 = vmin.f32 %v4018_v51, 1.0  ;;  %v3200_v55 = vadd.f32 %v3199_v50, %v2871_v52 }
 0x394   : > { %v2544_v6 = vadd.f32 %v2543_v18, %v2215_v56  ;;  %v5283_v18 = vor.u32 %v5759_v37, %v5280_v40 }
 0x395   : > { %4275 = vst.msk [vmem:[%s6591_s10 + $0x2c8] sm:$0xff] %vm4185_vm0, %v4146_v54  ;;  %v3381_v62 = vsub.f32 0.0, %v3200_v55  ;;  %v5287_v54 = vor.u32 %v5762_v43, %v5286_v42 }
 0x397   : > { %v6195_v4 = vpop.eup %6194  ;;  %v3601_v5 = vmul.f32 1.442695, %v3381_v62 }
 0x398   : > { %v6197_v7 = vpop.eup %6196  ;;  %v3764_v8 = vadd.f32 1.0, %v6195_v4  ;;  %v2872_v9 = vpop.f32.mrf.mxu2 }
 0x399   : > { %v3201_v10 = vpop.f32.mrf.mxu3  ;;  %v4019_v13 = vmax.f32 %v6197_v7, 0.0  ;;  %6198 = vpow2.f32 %v3601_v5  ;;  %v2873_v14 = vadd.f32 %v2872_v9, %v2544_v6  ;;  %v2217_v15 = vpop.f32.mrf.mxu0 }
 0x39a   : > { %v2546_v16 = vpop.f32.mrf.mxu1  ;;  %6200 = vrcp.f32 %v3764_v8  ;;  %v2218_v19 = vadd.f32 %v7143_v38, %v2217_v15  ;;  %v5294_v15 = vld [vmem:[%s6470_s20 + $0x720] sm:$0xf] }
 0x39b   : > { %v4147_v20 = vmin.f32 %v4019_v13, 1.0  ;;  %v3202_v21 = vadd.f32 %v3201_v10, %v2873_v14  ;;  %2256 = vmatmul.bf16.gmra.mxu0 %v5263_v11 }
 0x39c   : > { %2585 = vmatmul.bf16.gmra.mxu1 %v5267_v39  ;;  %v2547_v23 = vadd.f32 %v2546_v16, %v2218_v19  ;;  %v5765_v16 = vld [vmem:[%s6470_s20 + $0x72c] sm:$0xf0]  ;;  %v5296_v19 = vld [vmem:[%s6470_s20 + $0x730] sm:$0xf0] }
 0x39d   : > { %4276 = vst.msk [vmem:[%s6591_s10 + $0x2d0] sm:$0xff] %vm4185_vm0, %v4147_v20  ;;  %v3382_v22 = vsub.f32 0.0, %v3202_v21  ;;  %2914 = vmatmul.bf16.gmra.mxu2 %v5271_v12  ;;  %v5302_v21 = vld [vmem:[%s6470_s20 + $0x728] sm:$0xf] }
 0x39e   : > { %3243 = vmatmul.bf16.gmra.mxu3 %v5275_v17  ;;  %v5763_v17 = vld [vmem:[%s6470_s20 + $0x724] sm:$0xf] }
 0x39f   : > { %v6199_v24 = vpop.eup %6198  ;;  %v3603_v25 = vmul.f32 1.442695, %v3382_v22  ;;  %v5766_v22 = vld [vmem:[%s6470_s20 + $0x734] sm:$0xf0] }
 0x3a0   : > { %v6201_v26 = vpop.eup %6200  ;;  %v3765_v27 = vadd.f32 1.0, %v6199_v24  ;;  %v2875_v28 = vpop.f32.mrf.mxu2  ;;  %v5304_v24 = vld [vmem:[%s6470_s20 + $0x738] sm:$0xf0] }
 0x3a1   : > { %v3204_v29 = vpop.f32.mrf.mxu3  ;;  %v4020_v30 = vmax.f32 %v6201_v26, 0.0  ;;  %6202 = vpow2.f32 %v3603_v25  ;;  %v2876_v31 = vadd.f32 %v2875_v28, %v2547_v23  ;;  %v2219_v32 = vpop.f32.mrf.mxu0  ;;  %v5764_v23 = vld [vmem:[%s6470_s20 + $0x72c] sm:$0xf] }
 0x3a2   : > { %v2548_v60 = vpop.f32.mrf.mxu1  ;;  %6204 = vrcp.f32 %v3765_v27  ;;  %v2220_v34 = vadd.f32 %v7143_v38, %v2219_v32  ;;  %v5295_v32 = vor.u32 %v5765_v16, %v5294_v15  ;;  %v5307_v37 = vor.u32 %v5764_v23, %v5304_v24 }
 0x3a3   : > { %v4148_v0 = vmin.f32 %v4020_v30, 1.0  ;;  %v3205_v33 = vadd.f32 %v3204_v29, %v2876_v31 }
 0x3a4   : > { %v2549_v48 = vadd.f32 %v2548_v60, %v2220_v34  ;;  %v5299_v60 = vor.u32 %v5763_v17, %v5296_v19  ;;  %v7288_v17 = vld [vmem:[%s7426_s2] ss:$0 sm:$0xff] }
 0x3a5   : > { %4277 = vst.msk [vmem:[%s6591_s10 + $0x2d8] sm:$0xff] %vm4185_vm0, %v4148_v0  ;;  %v3383_v41 = vsub.f32 0.0, %v3205_v33  ;;  %v5303_v0 = vor.u32 %v5766_v22, %v5302_v21 }
 0x3a7   : > { %v6203_v46 = vpop.eup %6202  ;;  %v3605_v47 = vmul.f32 1.442695, %v3383_v41 }
 0x3a8   : > { %v6205_v49 = vpop.eup %6204  ;;  %v3766_v50 = vadd.f32 1.0, %v6203_v46  ;;  %v2877_v51 = vpop.f32.mrf.mxu2 }
 0x3a9   : > { %v3206_v52 = vpop.f32.mrf.mxu3  ;;  %v4021_v55 = vmax.f32 %v6205_v49, 0.0  ;;  %6206 = vpow2.f32 %v3605_v47  ;;  %v2878_v56 = vadd.f32 %v2877_v51, %v2549_v48  ;;  %v2222_v57 = vpop.f32.mrf.mxu0 }
 0x3aa   : > { %v2551_v58 = vpop.f32.mrf.mxu1  ;;  %6208 = vrcp.f32 %v3766_v50  ;;  %v2223_v61 = vadd.f32 %v7143_v38, %v2222_v57  ;;  %v5310_v57 = vld [vmem:[%s6470_s20 + $0x740] sm:$0xf] }
 0x3ab   : > { %v4149_v62 = vmin.f32 %v4021_v55, 1.0  ;;  %v3207_v63 = vadd.f32 %v3206_v52, %v2878_v56  ;;  %2261 = vmatmul.bf16.gmra.mxu0 %v5279_v53 }
 0x3ac   : > { %2590 = vmatmul.bf16.gmra.mxu1 %v5283_v18  ;;  %v2552_v2 = vadd.f32 %v2551_v58, %v2223_v61  ;;  %v5769_v58 = vld [vmem:[%s6470_s20 + $0x74c] sm:$0xf0]  ;;  %v5312_v61 = vld [vmem:[%s6470_s20 + $0x750] sm:$0xf0] }
 0x3ad   : > { %4278 = vst.msk [vmem:[%s6591_s10 + $0x2e0] sm:$0xff] %vm4185_vm0, %v4149_v62  ;;  %v3384_v1 = vsub.f32 0.0, %v3207_v63  ;;  %2919 = vmatmul.bf16.gmra.mxu2 %v5287_v54  ;;  %v5318_v63 = vld [vmem:[%s6470_s20 + $0x748] sm:$0xf] }
 0x3ae   : > { %3248 = vmatmul.bf16.gmra.mxu3 %v5291_v59  ;;  %v5767_v59 = vld [vmem:[%s6470_s20 + $0x744] sm:$0xf] }
 0x3af   : > { %v6207_v3 = vpop.eup %6206  ;;  %v3607_v4 = vmul.f32 1.442695, %v3384_v1  ;;  %v5770_v1 = vld [vmem:[%s6470_s20 + $0x754] sm:$0xf0] }
 0x3b0   : > { %v6209_v5 = vpop.eup %6208  ;;  %v3767_v6 = vadd.f32 1.0, %v6207_v3  ;;  %v2880_v7 = vpop.f32.mrf.mxu2  ;;  %v5320_v3 = vld [vmem:[%s6470_s20 + $0x758] sm:$0xf0] }
 0x3b1   : > { %v3209_v8 = vpop.f32.mrf.mxu3  ;;  %v4022_v9 = vmax.f32 %v6209_v5, 0.0  ;;  %6210 = vpow2.f32 %v3607_v4  ;;  %v2881_v10 = vadd.f32 %v2880_v7, %v2552_v2  ;;  %v2224_v11 = vpop.f32.mrf.mxu0  ;;  %v5768_v2 = vld [vmem:[%s6470_s20 + $0x74c] sm:$0xf] }
 0x3b2   : > { %v2553_v39 = vpop.f32.mrf.mxu1  ;;  %6212 = vrcp.f32 %v3767_v6  ;;  %v2225_v14 = vadd.f32 %v7143_v38, %v2224_v11  ;;  %v5311_v11 = vor.u32 %v5769_v58, %v5310_v57  ;;  %v5323_v16 = vor.u32 %v5768_v2, %v5320_v3 }
 0x3b3   : > { %v4150_v12 = vmin.f32 %v4022_v9, 1.0  ;;  %v3210_v13 = vadd.f32 %v3209_v8, %v2881_v10 }
 0x3b4   : > { %v2554_v27 = vadd.f32 %v2553_v39, %v2225_v14  ;;  %v5319_v39 = vor.u32 %v5770_v1, %v5318_v63 }
 0x3b5   : > { %4279 = vst.msk [vmem:[%s6591_s10 + $0x2e8] sm:$0xff] %vm4185_vm0, %v4150_v12  ;;  %v3385_v20 = vsub.f32 0.0, %v3210_v13 }
 0x3b7   : > { %v6211_v25 = vpop.eup %6210  ;;  %v3609_v26 = vmul.f32 1.442695, %v3385_v20 }
 0x3b8   : > { %v6213_v28 = vpop.eup %6212  ;;  %v3768_v29 = vadd.f32 1.0, %v6211_v25  ;;  %v2882_v30 = vpop.f32.mrf.mxu2 }
 0x3b9   : > { %v3211_v31 = vpop.f32.mrf.mxu3  ;;  %v4023_v33 = vmax.f32 %v6213_v28, 0.0  ;;  %6214 = vpow2.f32 %v3609_v26  ;;  %v2883_v34 = vadd.f32 %v2882_v30, %v2554_v27  ;;  %v2227_v35 = vpop.f32.mrf.mxu0 }
 0x3ba   : > { %v2556_v36 = vpop.f32.mrf.mxu1  ;;  %6216 = vrcp.f32 %v3768_v29  ;;  %v2228_v40 = vadd.f32 %v7143_v38, %v2227_v35  ;;  %v5326_v35 = vld [vmem:[%s6470_s20 + $0x760] sm:$0xf] }
 0x3bb   : > { %v4151_v41 = vmin.f32 %v4023_v33, 1.0  ;;  %v3212_v42 = vadd.f32 %v3211_v31, %v2883_v34  ;;  %2266 = vmatmul.bf16.gmra.mxu0 %v5295_v32 }
 0x3bc   : > { %2595 = vmatmul.bf16.gmra.mxu1 %v5299_v60  ;;  %v2557_v44 = vadd.f32 %v2556_v36, %v2228_v40  ;;  %v5773_v36 = vld [vmem:[%s6470_s20 + $0x76c] sm:$0xf0]  ;;  %v5328_v40 = vld [vmem:[%s6470_s20 + $0x770] sm:$0xf0] }
 0x3bd   : > { %4280 = vst.msk [vmem:[%s6591_s10 + $0x2f0] sm:$0xff] %vm4185_vm0, %v4151_v41  ;;  %v3386_v43 = vsub.f32 0.0, %v3212_v42  ;;  %2924 = vmatmul.bf16.gmra.mxu2 %v5303_v0  ;;  %v5334_v42 = vld [vmem:[%s6470_s20 + $0x768] sm:$0xf] }
 0x3be   : > { %3253 = vmatmul.bf16.gmra.mxu3 %v5307_v37  ;;  %v5771_v37 = vld [vmem:[%s6470_s20 + $0x764] sm:$0xf] }
 0x3bf   : > { %v6215_v45 = vpop.eup %6214  ;;  %v3611_v46 = vmul.f32 1.442695, %v3386_v43  ;;  %v5774_v43 = vld [vmem:[%s6470_s20 + $0x774] sm:$0xf0] }
 0x3c0   : > { %v6217_v47 = vpop.eup %6216  ;;  %v3769_v48 = vadd.f32 1.0, %v6215_v45  ;;  %v2885_v49 = vpop.f32.mrf.mxu2  ;;  %v5336_v45 = vld [vmem:[%s6470_s20 + $0x778] sm:$0xf0] }
 0x3c1   : > { %v3214_v50 = vpop.f32.mrf.mxu3  ;;  %v4024_v51 = vmax.f32 %v6217_v47, 0.0  ;;  %6218 = vpow2.f32 %v3611_v46  ;;  %v2886_v52 = vadd.f32 %v2885_v49, %v2557_v44  ;;  %v2229_v53 = vpop.f32.mrf.mxu0  ;;  %v5772_v44 = vld [vmem:[%s6470_s20 + $0x76c] sm:$0xf] }
 0x3c2   : > { %v2558_v18 = vpop.f32.mrf.mxu1  ;;  %6220 = vrcp.f32 %v3769_v48  ;;  %v2230_v56 = vadd.f32 %v7143_v38, %v2229_v53  ;;  %v5315_v38 = vor.u32 %v5767_v59, %v5312_v61  ;;  %v5327_v53 = vor.u32 %v5773_v36, %v5326_v35 }
 0x3c3   : > { %v4152_v54 = vmin.f32 %v4024_v51, 1.0  ;;  %v3215_v55 = vadd.f32 %v3214_v50, %v2886_v52  ;;  %v5339_v59 = vor.u32 %v5772_v44, %v5336_v45 }
 0x3c4   : > { %v2559_v6 = vadd.f32 %v2558_v18, %v2230_v56  ;;  %v5331_v18 = vor.u32 %v5771_v37, %v5328_v40 }
 0x3c5   : > { %4281 = vst.msk [vmem:[%s6591_s10 + $0x2f8] sm:$0xff] %vm4185_vm0, %v4152_v54  ;;  %v3387_v62 = vsub.f32 0.0, %v3215_v55  ;;  %v5335_v54 = vor.u32 %v5774_v43, %v5334_v42 }
 0x3c7   : > { %v6219_v4 = vpop.eup %6218  ;;  %v3613_v5 = vmul.f32 1.442695, %v3387_v62 }
 0x3c8   : > { %v6221_v7 = vpop.eup %6220  ;;  %v3770_v8 = vadd.f32 1.0, %v6219_v4  ;;  %v2887_v9 = vpop.f32.mrf.mxu2 }
 0x3c9   : > { %v3216_v10 = vpop.f32.mrf.mxu3  ;;  %v4025_v12 = vmax.f32 %v6221_v7, 0.0  ;;  %6222 = vpow2.f32 %v3613_v5  ;;  %v2888_v13 = vadd.f32 %v2887_v9, %v2559_v6  ;;  %v2232_v14 = vpop.f32.mrf.mxu0 }
 0x3ca   : > { %v2561_v15 = vpop.f32.mrf.mxu1  ;;  %6224 = vrcp.f32 %v3770_v8  ;;  %v2233_v19 = vadd.f32 %v7288_v17, %v2232_v14  ;;  %v5342_v14 = vld [vmem:[%s6470_s20 + $0x780] sm:$0xf] }
 0x3cb   : > { %v4153_v20 = vmin.f32 %v4025_v12, 1.0  ;;  %v3217_v21 = vadd.f32 %v3216_v10, %v2888_v13  ;;  %2271 = vmatmul.bf16.gmra.mxu0 %v5311_v11 }
 0x3cc   : > { %2600 = vmatmul.bf16.gmra.mxu1 %v5315_v38  ;;  %v2562_v23 = vadd.f32 %v2561_v15, %v2233_v19  ;;  %v5777_v15 = vld [vmem:[%s6470_s20 + $0x78c] sm:$0xf0]  ;;  %v5344_v19 = vld [vmem:[%s6470_s20 + $0x790] sm:$0xf0] }
 0x3cd   : > { %4282 = vst.msk [vmem:[%s6591_s10 + $0x300] sm:$0xff] %vm4185_vm0, %v4153_v20  ;;  %v3388_v22 = vsub.f32 0.0, %v3217_v21  ;;  %2929 = vmatmul.bf16.gmra.mxu2 %v5319_v39  ;;  %v5350_v21 = vld [vmem:[%s6470_s20 + $0x788] sm:$0xf] }
 0x3ce   : > { %3258 = vmatmul.bf16.gmra.mxu3 %v5323_v16  ;;  %v5775_v16 = vld [vmem:[%s6470_s20 + $0x784] sm:$0xf] }
 0x3cf   : > { %v6223_v24 = vpop.eup %6222  ;;  %v3615_v25 = vmul.f32 1.442695, %v3388_v22  ;;  %v5778_v22 = vld [vmem:[%s6470_s20 + $0x794] sm:$0xf0] }
 0x3d0   : > { %v6225_v26 = vpop.eup %6224  ;;  %v3771_v27 = vadd.f32 1.0, %v6223_v24  ;;  %v2890_v28 = vpop.f32.mrf.mxu2  ;;  %v5352_v24 = vld [vmem:[%s6470_s20 + $0x798] sm:$0xf0] }
 0x3d1   : > { %v3219_v29 = vpop.f32.mrf.mxu3  ;;  %v4026_v30 = vmax.f32 %v6225_v26, 0.0  ;;  %6226 = vpow2.f32 %v3615_v25  ;;  %v2891_v31 = vadd.f32 %v2890_v28, %v2562_v23  ;;  %v2234_v32 = vpop.f32.mrf.mxu0  ;;  %v5776_v23 = vld [vmem:[%s6470_s20 + $0x78c] sm:$0xf] }
 0x3d2   : > { %v2563_v60 = vpop.f32.mrf.mxu1  ;;  %6228 = vrcp.f32 %v3771_v27  ;;  %v2235_v34 = vadd.f32 %v7288_v17, %v2234_v32  ;;  %v5343_v32 = vor.u32 %v5777_v15, %v5342_v14  ;;  %v5355_v37 = vor.u32 %v5776_v23, %v5352_v24 }
 0x3d3   : > { %v4154_v0 = vmin.f32 %v4026_v30, 1.0  ;;  %v3220_v33 = vadd.f32 %v3219_v29, %v2891_v31 }
 0x3d4   : > { %v2564_v48 = vadd.f32 %v2563_v60, %v2235_v34  ;;  %v5347_v60 = vor.u32 %v5775_v16, %v5344_v19 }
 0x3d5   : > { %4283 = vst.msk [vmem:[%s6591_s10 + $0x308] sm:$0xff] %vm4185_vm0, %v4154_v0  ;;  %v3389_v41 = vsub.f32 0.0, %v3220_v33  ;;  %v5351_v0 = vor.u32 %v5778_v22, %v5350_v21 }
 0x3d7   : > { %v6227_v46 = vpop.eup %6226  ;;  %v3617_v47 = vmul.f32 1.442695, %v3389_v41 }
 0x3d8   : > { %v6229_v49 = vpop.eup %6228  ;;  %v3772_v50 = vadd.f32 1.0, %v6227_v46  ;;  %v2892_v51 = vpop.f32.mrf.mxu2 }
 0x3d9   : > { %v3221_v52 = vpop.f32.mrf.mxu3  ;;  %v4027_v55 = vmax.f32 %v6229_v49, 0.0  ;;  %6230 = vpow2.f32 %v3617_v47  ;;  %v2893_v56 = vadd.f32 %v2892_v51, %v2564_v48  ;;  %v2237_v57 = vpop.f32.mrf.mxu0 }
 0x3da   : > { %v2566_v58 = vpop.f32.mrf.mxu1  ;;  %6232 = vrcp.f32 %v3772_v50  ;;  %v2238_v61 = vadd.f32 %v7288_v17, %v2237_v57  ;;  %v5358_v57 = vld [vmem:[%s6470_s20 + $0x7a0] sm:$0xf] }
 0x3db   : > { %v4155_v62 = vmin.f32 %v4027_v55, 1.0  ;;  %v3222_v63 = vadd.f32 %v3221_v52, %v2893_v56  ;;  %2276 = vmatmul.bf16.gmra.mxu0 %v5327_v53 }
 0x3dc   : > { %2605 = vmatmul.bf16.gmra.mxu1 %v5331_v18  ;;  %v2567_v2 = vadd.f32 %v2566_v58, %v2238_v61  ;;  %v5781_v58 = vld [vmem:[%s6470_s20 + $0x7ac] sm:$0xf0]  ;;  %v5360_v61 = vld [vmem:[%s6470_s20 + $0x7b0] sm:$0xf0] }
 0x3dd   : > { %4284 = vst.msk [vmem:[%s6591_s10 + $0x310] sm:$0xff] %vm4185_vm0, %v4155_v62  ;;  %v3390_v1 = vsub.f32 0.0, %v3222_v63  ;;  %2934 = vmatmul.bf16.gmra.mxu2 %v5335_v54  ;;  %v5366_v63 = vld [vmem:[%s6470_s20 + $0x7a8] sm:$0xf] }
 0x3de   : > { %3263 = vmatmul.bf16.gmra.mxu3 %v5339_v59  ;;  %v5779_v59 = vld [vmem:[%s6470_s20 + $0x7a4] sm:$0xf] }
 0x3df   : > { %v6231_v3 = vpop.eup %6230  ;;  %v3619_v4 = vmul.f32 1.442695, %v3390_v1  ;;  %v5782_v1 = vld [vmem:[%s6470_s20 + $0x7b4] sm:$0xf0] }
 0x3e0   : > { %v6233_v5 = vpop.eup %6232  ;;  %v3773_v6 = vadd.f32 1.0, %v6231_v3  ;;  %v2895_v7 = vpop.f32.mrf.mxu2  ;;  %v5368_v3 = vld [vmem:[%s6470_s20 + $0x7b8] sm:$0xf0] }
 0x3e1   : > { %v3224_v8 = vpop.f32.mrf.mxu3  ;;  %v4028_v9 = vmax.f32 %v6233_v5, 0.0  ;;  %6234 = vpow2.f32 %v3619_v4  ;;  %v2896_v10 = vadd.f32 %v2895_v7, %v2567_v2  ;;  %v2239_v11 = vpop.f32.mrf.mxu0  ;;  %v5780_v2 = vld [vmem:[%s6470_s20 + $0x7ac] sm:$0xf] }
 0x3e2   : > { %v2568_v38 = vpop.f32.mrf.mxu1  ;;  %6236 = vrcp.f32 %v3773_v6  ;;  %v2240_v13 = vadd.f32 %v7288_v17, %v2239_v11  ;;  %v5359_v11 = vor.u32 %v5781_v58, %v5358_v57  ;;  %v5371_v16 = vor.u32 %v5780_v2, %v5368_v3 }
 0x3e3   : > { %v4156_v39 = vmin.f32 %v4028_v9, 1.0  ;;  %v3225_v12 = vadd.f32 %v3224_v8, %v2896_v10 }
 0x3e4   : > { %v2569_v27 = vadd.f32 %v2568_v38, %v2240_v13  ;;  %v5363_v38 = vor.u32 %v5779_v59, %v5360_v61 }
 0x3e5   : > { %4285 = vst.msk [vmem:[%s6591_s10 + $0x318] sm:$0xff] %vm4185_vm0, %v4156_v39  ;;  %v3391_v20 = vsub.f32 0.0, %v3225_v12  ;;  %v5367_v39 = vor.u32 %v5782_v1, %v5366_v63 }
 0x3e7   : > { %v6235_v25 = vpop.eup %6234  ;;  %v3621_v26 = vmul.f32 1.442695, %v3391_v20 }
 0x3e8   : > { %v6237_v28 = vpop.eup %6236  ;;  %v3774_v29 = vadd.f32 1.0, %v6235_v25  ;;  %v2897_v30 = vpop.f32.mrf.mxu2 }
 0x3e9   : > { %v3226_v31 = vpop.f32.mrf.mxu3  ;;  %v4029_v33 = vmax.f32 %v6237_v28, 0.0  ;;  %6238 = vpow2.f32 %v3621_v26  ;;  %v2898_v34 = vadd.f32 %v2897_v30, %v2569_v27  ;;  %v2242_v35 = vpop.f32.mrf.mxu0 }
 0x3ea   : > { %v2571_v36 = vpop.f32.mrf.mxu1  ;;  %6240 = vrcp.f32 %v3774_v29  ;;  %v2243_v40 = vadd.f32 %v7288_v17, %v2242_v35  ;;  %v5374_v35 = vld [vmem:[%s6470_s20 + $0x7c0] sm:$0xf] }
 0x3eb   : > { %v4157_v41 = vmin.f32 %v4029_v33, 1.0  ;;  %v3227_v42 = vadd.f32 %v3226_v31, %v2898_v34  ;;  %2281 = vmatmul.bf16.gmra.mxu0 %v5343_v32 }
 0x3ec   : > { %2610 = vmatmul.bf16.gmra.mxu1 %v5347_v60  ;;  %v2572_v44 = vadd.f32 %v2571_v36, %v2243_v40  ;;  %v5785_v36 = vld [vmem:[%s6470_s20 + $0x7cc] sm:$0xf0]  ;;  %v5376_v40 = vld [vmem:[%s6470_s20 + $0x7d0] sm:$0xf0] }
 0x3ed   : > { %4286 = vst.msk [vmem:[%s6591_s10 + $0x320] sm:$0xff] %vm4185_vm0, %v4157_v41  ;;  %v3392_v43 = vsub.f32 0.0, %v3227_v42  ;;  %2939 = vmatmul.bf16.gmra.mxu2 %v5351_v0  ;;  %v5382_v42 = vld [vmem:[%s6470_s20 + $0x7c8] sm:$0xf] }
 0x3ee   : > { %3268 = vmatmul.bf16.gmra.mxu3 %v5355_v37  ;;  %v5783_v37 = vld [vmem:[%s6470_s20 + $0x7c4] sm:$0xf] }
 0x3ef   : > { %v6239_v45 = vpop.eup %6238  ;;  %v3623_v46 = vmul.f32 1.442695, %v3392_v43  ;;  %v5786_v43 = vld [vmem:[%s6470_s20 + $0x7d4] sm:$0xf0] }
 0x3f0   : > { %v6241_v47 = vpop.eup %6240  ;;  %v3775_v48 = vadd.f32 1.0, %v6239_v45  ;;  %v2900_v49 = vpop.f32.mrf.mxu2  ;;  %v5384_v45 = vld [vmem:[%s6470_s20 + $0x7d8] sm:$0xf0] }
 0x3f1   : > { %v3229_v50 = vpop.f32.mrf.mxu3  ;;  %v4030_v51 = vmax.f32 %v6241_v47, 0.0  ;;  %6242 = vpow2.f32 %v3623_v46  ;;  %v2901_v52 = vadd.f32 %v2900_v49, %v2572_v44  ;;  %v2244_v53 = vpop.f32.mrf.mxu0  ;;  %v5784_v44 = vld [vmem:[%s6470_s20 + $0x7cc] sm:$0xf] }
 0x3f2   : > { %v2573_v18 = vpop.f32.mrf.mxu1  ;;  %6244 = vrcp.f32 %v3775_v48  ;;  %v2245_v56 = vadd.f32 %v7288_v17, %v2244_v53  ;;  %v5375_v53 = vor.u32 %v5785_v36, %v5374_v35  ;;  %v5387_v59 = vor.u32 %v5784_v44, %v5384_v45 }
 0x3f3   : > { %v4158_v54 = vmin.f32 %v4030_v51, 1.0  ;;  %v3230_v55 = vadd.f32 %v3229_v50, %v2901_v52 }
 0x3f4   : > { %v2574_v6 = vadd.f32 %v2573_v18, %v2245_v56  ;;  %v5379_v18 = vor.u32 %v5783_v37, %v5376_v40 }
 0x3f5   : > { %4287 = vst.msk [vmem:[%s6591_s10 + $0x328] sm:$0xff] %vm4185_vm0, %v4158_v54  ;;  %v3393_v62 = vsub.f32 0.0, %v3230_v55  ;;  %v5383_v54 = vor.u32 %v5786_v43, %v5382_v42 }
 0x3f7   : > { %v6243_v4 = vpop.eup %6242  ;;  %v3625_v5 = vmul.f32 1.442695, %v3393_v62 }
 0x3f8   : > { %v6245_v7 = vpop.eup %6244  ;;  %v3776_v8 = vadd.f32 1.0, %v6243_v4  ;;  %v2902_v9 = vpop.f32.mrf.mxu2 }
 0x3f9   : > { %v3231_v10 = vpop.f32.mrf.mxu3  ;;  %v4031_v12 = vmax.f32 %v6245_v7, 0.0  ;;  %6246 = vpow2.f32 %v3625_v5  ;;  %v2903_v13 = vadd.f32 %v2902_v9, %v2574_v6  ;;  %v2247_v14 = vpop.f32.mrf.mxu0 }
 0x3fa   : > { %v2576_v15 = vpop.f32.mrf.mxu1  ;;  %6248 = vrcp.f32 %v3776_v8  ;;  %v2248_v19 = vadd.f32 %v7288_v17, %v2247_v14  ;;  %v5390_v14 = vld [vmem:[%s6470_s20 + $0x7e0] sm:$0xf] }
 0x3fb   : > { %v4159_v20 = vmin.f32 %v4031_v12, 1.0  ;;  %v3232_v21 = vadd.f32 %v3231_v10, %v2903_v13  ;;  %2286 = vmatmul.bf16.gmra.mxu0 %v5359_v11 }
 0x3fc   : > { %2615 = vmatmul.bf16.gmra.mxu1 %v5363_v38  ;;  %v2577_v23 = vadd.f32 %v2576_v15, %v2248_v19  ;;  %v5789_v15 = vld [vmem:[%s6470_s20 + $0x7ec] sm:$0xf0]  ;;  %v5392_v19 = vld [vmem:[%s6470_s20 + $0x7f0] sm:$0xf0] }
 0x3fd   : > { %4288 = vst.msk [vmem:[%s6591_s10 + $0x330] sm:$0xff] %vm4185_vm0, %v4159_v20  ;;  %v3394_v22 = vsub.f32 0.0, %v3232_v21  ;;  %2944 = vmatmul.bf16.gmra.mxu2 %v5367_v39  ;;  %v5398_v21 = vld [vmem:[%s6470_s20 + $0x7e8] sm:$0xf] }
 0x3fe   : > { %3273 = vmatmul.bf16.gmra.mxu3 %v5371_v16  ;;  %v5787_v16 = vld [vmem:[%s6470_s20 + $0x7e4] sm:$0xf] }
 0x3ff   : > { %v6247_v24 = vpop.eup %6246  ;;  %v3627_v25 = vmul.f32 1.442695, %v3394_v22  ;;  %v5790_v22 = vld [vmem:[%s6470_s20 + $0x7f4] sm:$0xf0] }
 0x400   : > { %v6249_v26 = vpop.eup %6248  ;;  %v3777_v27 = vadd.f32 1.0, %v6247_v24  ;;  %v2905_v28 = vpop.f32.mrf.mxu2  ;;  %v5400_v24 = vld [vmem:[%s6470_s20 + $0x7f8] sm:$0xf0] }
 0x401   : > { %v3234_v29 = vpop.f32.mrf.mxu3  ;;  %v4032_v30 = vmax.f32 %v6249_v26, 0.0  ;;  %6250 = vpow2.f32 %v3627_v25  ;;  %v2906_v31 = vadd.f32 %v2905_v28, %v2577_v23  ;;  %v2249_v32 = vpop.f32.mrf.mxu0  ;;  %v5788_v23 = vld [vmem:[%s6470_s20 + $0x7ec] sm:$0xf] }
 0x402   : > { %v2578_v60 = vpop.f32.mrf.mxu1  ;;  %6252 = vrcp.f32 %v3777_v27  ;;  %v2250_v34 = vadd.f32 %v7288_v17, %v2249_v32  ;;  %v5391_v32 = vor.u32 %v5789_v15, %v5390_v14  ;;  %v5403_v37 = vor.u32 %v5788_v23, %v5400_v24 }
 0x403   : > { %v4160_v0 = vmin.f32 %v4032_v30, 1.0  ;;  %v3235_v33 = vadd.f32 %v3234_v29, %v2906_v31 }
 0x404   : > { %v2579_v48 = vadd.f32 %v2578_v60, %v2250_v34  ;;  %v5395_v60 = vor.u32 %v5787_v16, %v5392_v19 }
 0x405   : > { %4289 = vst.msk [vmem:[%s6591_s10 + $0x338] sm:$0xff] %vm4185_vm0, %v4160_v0  ;;  %v3395_v41 = vsub.f32 0.0, %v3235_v33  ;;  %v5399_v0 = vor.u32 %v5790_v22, %v5398_v21 }
 0x407   : > { %v6251_v46 = vpop.eup %6250  ;;  %v3629_v47 = vmul.f32 1.442695, %v3395_v41 }
 0x408   : > { %v6253_v49 = vpop.eup %6252  ;;  %v3778_v50 = vadd.f32 1.0, %v6251_v46  ;;  %v2907_v51 = vpop.f32.mrf.mxu2 }
 0x409   : > { %v3236_v52 = vpop.f32.mrf.mxu3  ;;  %v4033_v55 = vmax.f32 %v6253_v49, 0.0  ;;  %6254 = vpow2.f32 %v3629_v47  ;;  %v2908_v56 = vadd.f32 %v2907_v51, %v2579_v48  ;;  %v2252_v57 = vpop.f32.mrf.mxu0 }
 0x40a   : > { %v2581_v58 = vpop.f32.mrf.mxu1  ;;  %6256 = vrcp.f32 %v3778_v50  ;;  %v2253_v61 = vadd.f32 %v7288_v17, %v2252_v57 }
 0x40b   : > { %v4161_v62 = vmin.f32 %v4033_v55, 1.0  ;;  %v3237_v63 = vadd.f32 %v3236_v52, %v2908_v56  ;;  %2291 = vmatmul.bf16.gmra.mxu0 %v5375_v53 }
 0x40c   : > { %2620 = vmatmul.bf16.gmra.mxu1 %v5379_v18  ;;  %v2582_v2 = vadd.f32 %v2581_v58, %v2253_v61 }
 0x40d   : > { %4290 = vst.msk [vmem:[%s6591_s10 + $0x340] sm:$0xff] %vm4185_vm0, %v4161_v62  ;;  %v3396_v1 = vsub.f32 0.0, %v3237_v63  ;;  %2949 = vmatmul.bf16.gmra.mxu2 %v5383_v54 }
 0x40e   : > { %3278 = vmatmul.bf16.gmra.mxu3 %v5387_v59 }
 0x40f   : > { %v6255_v3 = vpop.eup %6254  ;;  %v3631_v4 = vmul.f32 1.442695, %v3396_v1 }
 0x410   : > { %v6257_v5 = vpop.eup %6256  ;;  %v3779_v6 = vadd.f32 1.0, %v6255_v3  ;;  %v2910_v7 = vpop.f32.mrf.mxu2 }
 0x411   : > { %v3239_v8 = vpop.f32.mrf.mxu3  ;;  %v4034_v9 = vmax.f32 %v6257_v5, 0.0  ;;  %6258 = vpow2.f32 %v3631_v4  ;;  %v2911_v10 = vadd.f32 %v2910_v7, %v2582_v2  ;;  %v2254_v11 = vpop.f32.mrf.mxu0 }
 0x412   : > { %v2583_v38 = vpop.f32.mrf.mxu1  ;;  %6260 = vrcp.f32 %v3779_v6  ;;  %v2255_v13 = vadd.f32 %v7288_v17, %v2254_v11 }
 0x413   : > { %v4162_v39 = vmin.f32 %v4034_v9, 1.0  ;;  %v3240_v12 = vadd.f32 %v3239_v8, %v2911_v10 }
 0x414   : > { %v2584_v27 = vadd.f32 %v2583_v38, %v2255_v13 }
 0x415   : > { %4291 = vst.msk [vmem:[%s6591_s10 + $0x348] sm:$0xff] %vm4185_vm0, %v4162_v39  ;;  %v3397_v20 = vsub.f32 0.0, %v3240_v12 }
 0x417   : > { %v6259_v25 = vpop.eup %6258  ;;  %v3633_v26 = vmul.f32 1.442695, %v3397_v20 }
 0x418   : > { %v6261_v28 = vpop.eup %6260  ;;  %v3780_v29 = vadd.f32 1.0, %v6259_v25  ;;  %v2912_v30 = vpop.f32.mrf.mxu2 }
 0x419   : > { %v3241_v31 = vpop.f32.mrf.mxu3  ;;  %v4035_v33 = vmax.f32 %v6261_v28, 0.0  ;;  %6262 = vpow2.f32 %v3633_v26  ;;  %v2913_v34 = vadd.f32 %v2912_v30, %v2584_v27  ;;  %v2257_v35 = vpop.f32.mrf.mxu0 }
 0x41a   : > { %v2586_v36 = vpop.f32.mrf.mxu1  ;;  %6264 = vrcp.f32 %v3780_v29  ;;  %v2258_v40 = vadd.f32 %v7288_v17, %v2257_v35 }
 0x41b   : > { %v4163_v41 = vmin.f32 %v4035_v33, 1.0  ;;  %v3242_v42 = vadd.f32 %v3241_v31, %v2913_v34  ;;  %2296 = vmatmul.bf16.gmra.mxu0 %v5391_v32 }
 0x41c   : > { %2625 = vmatmul.bf16.gmra.mxu1 %v5395_v60  ;;  %v2587_v44 = vadd.f32 %v2586_v36, %v2258_v40 }
 0x41d   : > { %4292 = vst.msk [vmem:[%s6591_s10 + $0x350] sm:$0xff] %vm4185_vm0, %v4163_v41  ;;  %v3398_v43 = vsub.f32 0.0, %v3242_v42  ;;  %2954 = vmatmul.bf16.gmra.mxu2 %v5399_v0 }
 0x41e   : > { %3283 = vmatmul.bf16.gmra.mxu3 %v5403_v37 }
 0x41f   : > { %v6263_v45 = vpop.eup %6262  ;;  %v3635_v46 = vmul.f32 1.442695, %v3398_v43 }
 0x420   : > { %v6265_v47 = vpop.eup %6264  ;;  %v3781_v48 = vadd.f32 1.0, %v6263_v45  ;;  %v2915_v49 = vpop.f32.mrf.mxu2 }
 0x421   : > { %v3244_v50 = vpop.f32.mrf.mxu3  ;;  %v4036_v51 = vmax.f32 %v6265_v47, 0.0  ;;  %6266 = vpow2.f32 %v3635_v46  ;;  %v2916_v52 = vadd.f32 %v2915_v49, %v2587_v44  ;;  %v2259_v53 = vpop.f32.mrf.mxu0 }
 0x422   : > { %v2588_v18 = vpop.f32.mrf.mxu1  ;;  %6268 = vrcp.f32 %v3781_v48  ;;  %v2260_v56 = vadd.f32 %v7288_v17, %v2259_v53 }
 0x423   : > { %v4164_v54 = vmin.f32 %v4036_v51, 1.0  ;;  %v3245_v55 = vadd.f32 %v3244_v50, %v2916_v52 }
 0x424   : > { %v2589_v61 = vadd.f32 %v2588_v18, %v2260_v56 }
 0x425   : > { %4293 = vst.msk [vmem:[%s6591_s10 + $0x358] sm:$0xff] %vm4185_vm0, %v4164_v54  ;;  %v3399_v57 = vsub.f32 0.0, %v3245_v55 }
 0x427   : > { %v6267_v58 = vpop.eup %6266  ;;  %v3637_v59 = vmul.f32 1.442695, %v3399_v57 }
 0x428   : > { %v6269_v62 = vpop.eup %6268  ;;  %v3782_v63 = vadd.f32 1.0, %v6267_v58  ;;  %v2917_v1 = vpop.f32.mrf.mxu2 }
 0x429   : > { %v3246_v2 = vpop.f32.mrf.mxu3  ;;  %v4037_v3 = vmax.f32 %v6269_v62, 0.0  ;;  %6270 = vpow2.f32 %v3637_v59  ;;  %v2918_v4 = vadd.f32 %v2917_v1, %v2589_v61  ;;  %v2262_v5 = vpop.f32.mrf.mxu0 }
 0x42a   : > { %v2591_v6 = vpop.f32.mrf.mxu1  ;;  %6272 = vrcp.f32 %v3782_v63  ;;  %v2263_v7 = vadd.f32 %v7288_v17, %v2262_v5 }
 0x42b   : > { %v4165_v8 = vmin.f32 %v4037_v3, 1.0  ;;  %v3247_v9 = vadd.f32 %v3246_v2, %v2918_v4 }
 0x42c   : > { %v2592_v11 = vadd.f32 %v2591_v6, %v2263_v7 }
 0x42d   : > { %4294 = vst.msk [vmem:[%s6591_s10 + $0x360] sm:$0xff] %vm4185_vm0, %v4165_v8  ;;  %v3400_v10 = vsub.f32 0.0, %v3247_v9 }
 0x42f   : > { %v6271_v38 = vpop.eup %6270  ;;  %v3639_v39 = vmul.f32 1.442695, %v3400_v10 }
 0x430   : > { %v6273_v12 = vpop.eup %6272  ;;  %v3783_v13 = vadd.f32 1.0, %v6271_v38  ;;  %v2920_v14 = vpop.f32.mrf.mxu2 }
 0x431   : > { %v3249_v15 = vpop.f32.mrf.mxu3  ;;  %v4038_v16 = vmax.f32 %v6273_v12, 0.0  ;;  %6274 = vpow2.f32 %v3639_v39  ;;  %v2921_v19 = vadd.f32 %v2920_v14, %v2592_v11  ;;  %v2264_v20 = vpop.f32.mrf.mxu0 }
 0x432   : > { %v2593_v21 = vpop.f32.mrf.mxu1  ;;  %6276 = vrcp.f32 %v3783_v13  ;;  %v2265_v24 = vadd.f32 %v7288_v17, %v2264_v20 }
 0x433   : > { %v4166_v22 = vmin.f32 %v4038_v16, 1.0  ;;  %v3250_v23 = vadd.f32 %v3249_v15, %v2921_v19 }
 0x434   : > { %v2594_v28 = vadd.f32 %v2593_v21, %v2265_v24 }
 0x435   : > { %4295 = vst.msk [vmem:[%s6591_s10 + $0x368] sm:$0xff] %vm4185_vm0, %v4166_v22  ;;  %v3401_v25 = vsub.f32 0.0, %v3250_v23 }
 0x437   : > { %v6275_v26 = vpop.eup %6274  ;;  %v3641_v27 = vmul.f32 1.442695, %v3401_v25 }
 0x438   : > { %v6277_v29 = vpop.eup %6276  ;;  %v3784_v30 = vadd.f32 1.0, %v6275_v26  ;;  %v2922_v31 = vpop.f32.mrf.mxu2 }
 0x439   : > { %v3251_v32 = vpop.f32.mrf.mxu3  ;;  %v4039_v60 = vmax.f32 %v6277_v29, 0.0  ;;  %6278 = vpow2.f32 %v3641_v27  ;;  %v2923_v0 = vadd.f32 %v2922_v31, %v2594_v28  ;;  %v2267_v33 = vpop.f32.mrf.mxu0 }
 0x43a   : > { %v2596_v34 = vpop.f32.mrf.mxu1  ;;  %6280 = vrcp.f32 %v3784_v30  ;;  %v2268_v35 = vadd.f32 %v7288_v17, %v2267_v33 }
 0x43b   : > { %v4167_v36 = vmin.f32 %v4039_v60, 1.0  ;;  %v3252_v37 = vadd.f32 %v3251_v32, %v2923_v0 }
 0x43c   : > { %v2597_v41 = vadd.f32 %v2596_v34, %v2268_v35 }
 0x43d   : > { %4296 = vst.msk [vmem:[%s6591_s10 + $0x370] sm:$0xff] %vm4185_vm0, %v4167_v36  ;;  %v3402_v40 = vsub.f32 0.0, %v3252_v37 }
 0x43f   : > { %v6279_v42 = vpop.eup %6278  ;;  %v3643_v43 = vmul.f32 1.442695, %v3402_v40 }
 0x440   : > { %v6281_v44 = vpop.eup %6280  ;;  %v3785_v45 = vadd.f32 1.0, %v6279_v42  ;;  %v2925_v46 = vpop.f32.mrf.mxu2 }
 0x441   : > { %v3254_v47 = vpop.f32.mrf.mxu3  ;;  %v4040_v48 = vmax.f32 %v6281_v44, 0.0  ;;  %6282 = vpow2.f32 %v3643_v43  ;;  %v2926_v49 = vadd.f32 %v2925_v46, %v2597_v41  ;;  %v2269_v50 = vpop.f32.mrf.mxu0 }
 0x442   : > { %v2598_v51 = vpop.f32.mrf.mxu1  ;;  %6284 = vrcp.f32 %v3785_v45  ;;  %v2270_v18 = vadd.f32 %v7288_v17, %v2269_v50 }
 0x443   : > { %v4168_v52 = vmin.f32 %v4040_v48, 1.0  ;;  %v3255_v53 = vadd.f32 %v3254_v47, %v2926_v49 }
 0x444   : > { %v2599_v57 = vadd.f32 %v2598_v51, %v2270_v18 }
 0x445   : > { %4297 = vst.msk [vmem:[%s6591_s10 + $0x378] sm:$0xff] %vm4185_vm0, %v4168_v52  ;;  %v3403_v54 = vsub.f32 0.0, %v3255_v53 }
 0x447   : > { %v6283_v55 = vpop.eup %6282  ;;  %v3645_v56 = vmul.f32 1.442695, %v3403_v54 }
 0x448   : > { %v6285_v58 = vpop.eup %6284  ;;  %v3786_v59 = vadd.f32 1.0, %v6283_v55  ;;  %v2927_v61 = vpop.f32.mrf.mxu2 }
 0x449   : > { %v3256_v62 = vpop.f32.mrf.mxu3  ;;  %v4041_v63 = vmax.f32 %v6285_v58, 0.0  ;;  %6286 = vpow2.f32 %v3645_v56  ;;  %v2928_v1 = vadd.f32 %v2927_v61, %v2599_v57  ;;  %v2272_v2 = vpop.f32.mrf.mxu0 }
 0x44a   : > { %v2601_v3 = vpop.f32.mrf.mxu1  ;;  %6288 = vrcp.f32 %v3786_v59  ;;  %v2273_v4 = vadd.f32 %v7288_v17, %v2272_v2 }
 0x44b   : > { %v4169_v5 = vmin.f32 %v4041_v63, 1.0  ;;  %v3257_v6 = vadd.f32 %v3256_v62, %v2928_v1 }
 0x44c   : > { %v2602_v8 = vadd.f32 %v2601_v3, %v2273_v4 }
 0x44d   : > { %4298 = vst.msk [vmem:[%s6591_s10 + $0x380] sm:$0xff] %vm4185_vm0, %v4169_v5  ;;  %v3404_v7 = vsub.f32 0.0, %v3257_v6 }
 0x44f   : > { %v6287_v9 = vpop.eup %6286  ;;  %v3647_v10 = vmul.f32 1.442695, %v3404_v7 }
 0x450   : > { %v6289_v11 = vpop.eup %6288  ;;  %v3787_v38 = vadd.f32 1.0, %v6287_v9  ;;  %v2930_v39 = vpop.f32.mrf.mxu2 }
 0x451   : > { %v3259_v12 = vpop.f32.mrf.mxu3  ;;  %v4042_v13 = vmax.f32 %v6289_v11, 0.0  ;;  %6290 = vpow2.f32 %v3647_v10  ;;  %v2931_v14 = vadd.f32 %v2930_v39, %v2602_v8  ;;  %v2274_v15 = vpop.f32.mrf.mxu0 }
 0x452   : > { %v2603_v16 = vpop.f32.mrf.mxu1  ;;  %6292 = vrcp.f32 %v3787_v38  ;;  %v2275_v21 = vadd.f32 %v7288_v17, %v2274_v15 }
 0x453   : > { %v4170_v19 = vmin.f32 %v4042_v13, 1.0  ;;  %v3260_v20 = vadd.f32 %v3259_v12, %v2931_v14 }
 0x454   : > { %v2604_v25 = vadd.f32 %v2603_v16, %v2275_v21 }
 0x455   : > { %4299 = vst.msk [vmem:[%s6591_s10 + $0x388] sm:$0xff] %vm4185_vm0, %v4170_v19  ;;  %v3405_v22 = vsub.f32 0.0, %v3260_v20 }
 0x457   : > { %v6291_v23 = vpop.eup %6290  ;;  %v3649_v24 = vmul.f32 1.442695, %v3405_v22 }
 0x458   : > { %v6293_v26 = vpop.eup %6292  ;;  %v3788_v27 = vadd.f32 1.0, %v6291_v23  ;;  %v2932_v28 = vpop.f32.mrf.mxu2 }
 0x459   : > { %v3261_v29 = vpop.f32.mrf.mxu3  ;;  %v4043_v30 = vmax.f32 %v6293_v26, 0.0  ;;  %6294 = vpow2.f32 %v3649_v24  ;;  %v2933_v31 = vadd.f32 %v2932_v28, %v2604_v25  ;;  %v2277_v32 = vpop.f32.mrf.mxu0 }
 0x45a   : > { %v2606_v60 = vpop.f32.mrf.mxu1  ;;  %6296 = vrcp.f32 %v3788_v27  ;;  %v2278_v0 = vadd.f32 %v7288_v17, %v2277_v32 }
 0x45b   : > { %v4171_v33 = vmin.f32 %v4043_v30, 1.0  ;;  %v3262_v34 = vadd.f32 %v3261_v29, %v2933_v31 }
 0x45c   : > { %v2607_v36 = vadd.f32 %v2606_v60, %v2278_v0 }
 0x45d   : > { %4300 = vst.msk [vmem:[%s6591_s10 + $0x390] sm:$0xff] %vm4185_vm0, %v4171_v33  ;;  %v3406_v35 = vsub.f32 0.0, %v3262_v34 }
 0x45f   : > { %v6295_v37 = vpop.eup %6294  ;;  %v3651_v40 = vmul.f32 1.442695, %v3406_v35 }
 0x460   : > { %v6297_v41 = vpop.eup %6296  ;;  %v3789_v42 = vadd.f32 1.0, %v6295_v37  ;;  %v2935_v43 = vpop.f32.mrf.mxu2 }
 0x461   : > { %v3264_v44 = vpop.f32.mrf.mxu3  ;;  %v4044_v45 = vmax.f32 %v6297_v41, 0.0  ;;  %6298 = vpow2.f32 %v3651_v40  ;;  %v2936_v46 = vadd.f32 %v2935_v43, %v2607_v36  ;;  %v2279_v47 = vpop.f32.mrf.mxu0 }
 0x462   : > { %v2608_v48 = vpop.f32.mrf.mxu1  ;;  %6300 = vrcp.f32 %v3789_v42  ;;  %v2280_v51 = vadd.f32 %v7288_v17, %v2279_v47 }
 0x463   : > { %v4172_v49 = vmin.f32 %v4044_v45, 1.0  ;;  %v3265_v50 = vadd.f32 %v3264_v44, %v2936_v46 }
 0x464   : > { %v2609_v54 = vadd.f32 %v2608_v48, %v2280_v51 }
 0x465   : > { %4301 = vst.msk [vmem:[%s6591_s10 + $0x398] sm:$0xff] %vm4185_vm0, %v4172_v49  ;;  %v3407_v52 = vsub.f32 0.0, %v3265_v50 }
 0x467   : > { %v6299_v53 = vpop.eup %6298  ;;  %v3653_v18 = vmul.f32 1.442695, %v3407_v52 }
 0x468   : > { %v6301_v55 = vpop.eup %6300  ;;  %v3790_v56 = vadd.f32 1.0, %v6299_v53  ;;  %v2937_v57 = vpop.f32.mrf.mxu2 }
 0x469   : > { %v3266_v58 = vpop.f32.mrf.mxu3  ;;  %v4045_v59 = vmax.f32 %v6301_v55, 0.0  ;;  %6302 = vpow2.f32 %v3653_v18  ;;  %v2938_v61 = vadd.f32 %v2937_v57, %v2609_v54  ;;  %v2282_v62 = vpop.f32.mrf.mxu0 }
 0x46a   : > { %v2611_v63 = vpop.f32.mrf.mxu1  ;;  %6304 = vrcp.f32 %v3790_v56  ;;  %v2283_v1 = vadd.f32 %v7288_v17, %v2282_v62 }
 0x46b   : > { %v4173_v2 = vmin.f32 %v4045_v59, 1.0  ;;  %v3267_v3 = vadd.f32 %v3266_v58, %v2938_v61 }
 0x46c   : > { %v2612_v5 = vadd.f32 %v2611_v63, %v2283_v1 }
 0x46d   : > { %4302 = vst.msk [vmem:[%s6591_s10 + $0x3a0] sm:$0xff] %vm4185_vm0, %v4173_v2  ;;  %v3408_v4 = vsub.f32 0.0, %v3267_v3 }
 0x46f   : > { %v6303_v6 = vpop.eup %6302  ;;  %v3655_v7 = vmul.f32 1.442695, %v3408_v4 }
 0x470   : > { %v6305_v8 = vpop.eup %6304  ;;  %v3791_v9 = vadd.f32 1.0, %v6303_v6  ;;  %v2940_v10 = vpop.f32.mrf.mxu2 }
 0x471   : > { %v3269_v11 = vpop.f32.mrf.mxu3  ;;  %v4046_v38 = vmax.f32 %v6305_v8, 0.0  ;;  %6306 = vpow2.f32 %v3655_v7  ;;  %v2941_v39 = vadd.f32 %v2940_v10, %v2612_v5  ;;  %v2284_v12 = vpop.f32.mrf.mxu0 }
 0x472   : > { %v2613_v13 = vpop.f32.mrf.mxu1  ;;  %6308 = vrcp.f32 %v3791_v9  ;;  %v2285_v16 = vadd.f32 %v7288_v17, %v2284_v12 }
 0x473   : > { %v4174_v14 = vmin.f32 %v4046_v38, 1.0  ;;  %v3270_v15 = vadd.f32 %v3269_v11, %v2941_v39 }
 0x474   : > { %v2614_v22 = vadd.f32 %v2613_v13, %v2285_v16 }
 0x475   : > { %4303 = vst.msk [vmem:[%s6591_s10 + $0x3a8] sm:$0xff] %vm4185_vm0, %v4174_v14  ;;  %v3409_v19 = vsub.f32 0.0, %v3270_v15 }
 0x477   : > { %v6307_v20 = vpop.eup %6306  ;;  %v3657_v21 = vmul.f32 1.442695, %v3409_v19 }
 0x478   : > { %v6309_v23 = vpop.eup %6308  ;;  %v3792_v24 = vadd.f32 1.0, %v6307_v20  ;;  %v2942_v25 = vpop.f32.mrf.mxu2 }
 0x479   : > { %v3271_v26 = vpop.f32.mrf.mxu3  ;;  %v4047_v27 = vmax.f32 %v6309_v23, 0.0  ;;  %6310 = vpow2.f32 %v3657_v21  ;;  %v2943_v28 = vadd.f32 %v2942_v25, %v2614_v22  ;;  %v2287_v29 = vpop.f32.mrf.mxu0 }
 0x47a   : > { %v2616_v30 = vpop.f32.mrf.mxu1  ;;  %6312 = vrcp.f32 %v3792_v24  ;;  %v2288_v31 = vadd.f32 %v7288_v17, %v2287_v29 }
 0x47b   : > { %v4175_v32 = vmin.f32 %v4047_v27, 1.0  ;;  %v3272_v60 = vadd.f32 %v3271_v26, %v2943_v28 }
 0x47c   : > { %v2617_v33 = vadd.f32 %v2616_v30, %v2288_v31 }
 0x47d   : > { %4304 = vst.msk [vmem:[%s6591_s10 + $0x3b0] sm:$0xff] %vm4185_vm0, %v4175_v32  ;;  %v3410_v0 = vsub.f32 0.0, %v3272_v60 }
 0x47f   : > { %v6311_v34 = vpop.eup %6310  ;;  %v3659_v35 = vmul.f32 1.442695, %v3410_v0 }
 0x480   : > { %v6313_v36 = vpop.eup %6312  ;;  %v3793_v37 = vadd.f32 1.0, %v6311_v34  ;;  %v2945_v40 = vpop.f32.mrf.mxu2 }
 0x481   : > { %v3274_v41 = vpop.f32.mrf.mxu3  ;;  %v4048_v42 = vmax.f32 %v6313_v36, 0.0  ;;  %6314 = vpow2.f32 %v3659_v35  ;;  %v2946_v43 = vadd.f32 %v2945_v40, %v2617_v33  ;;  %v2289_v44 = vpop.f32.mrf.mxu0 }
 0x482   : > { %v2618_v45 = vpop.f32.mrf.mxu1  ;;  %6316 = vrcp.f32 %v3793_v37  ;;  %v2290_v48 = vadd.f32 %v7288_v17, %v2289_v44  ;;  %v6349_v17 = vld [vmem:[%s7426_s2] ss:$0 sm:$0xff] }
 0x483   : > { %v4176_v46 = vmin.f32 %v4048_v42, 1.0  ;;  %v3275_v47 = vadd.f32 %v3274_v41, %v2946_v43 }
 0x484   : > { %v2619_v52 = vadd.f32 %v2618_v45, %v2290_v48 }
 0x485   : > { %4305 = vst.msk [vmem:[%s6591_s10 + $0x3b8] sm:$0xff] %vm4185_vm0, %v4176_v46  ;;  %v3411_v49 = vsub.f32 0.0, %v3275_v47 }
 0x487   : > { %v6315_v50 = vpop.eup %6314  ;;  %v3661_v51 = vmul.f32 1.442695, %v3411_v49 }
 0x488   : > { %v6317_v53 = vpop.eup %6316  ;;  %v3794_v18 = vadd.f32 1.0, %v6315_v50  ;;  %v2947_v54 = vpop.f32.mrf.mxu2 }
 0x489   : > { %v3276_v55 = vpop.f32.mrf.mxu3  ;;  %v4049_v56 = vmax.f32 %v6317_v53, 0.0  ;;  %6318 = vpow2.f32 %v3661_v51  ;;  %v2948_v57 = vadd.f32 %v2947_v54, %v2619_v52  ;;  %v2292_v58 = vpop.f32.mrf.mxu0 }
 0x48a   : > { %v2621_v59 = vpop.f32.mrf.mxu1  ;;  %6320 = vrcp.f32 %v3794_v18  ;;  %v2293_v61 = vadd.f32 %v6349_v17, %v2292_v58 }
 0x48b   : > { %v4177_v62 = vmin.f32 %v4049_v56, 1.0  ;;  %v3277_v63 = vadd.f32 %v3276_v55, %v2948_v57 }
 0x48c   : > { %v2622_v2 = vadd.f32 %v2621_v59, %v2293_v61 }
 0x48d   : > { %4306 = vst.msk [vmem:[%s6591_s10 + $0x3c0] sm:$0xff] %vm4185_vm0, %v4177_v62  ;;  %v3412_v1 = vsub.f32 0.0, %v3277_v63 }
 0x48f   : > { %v6319_v3 = vpop.eup %6318  ;;  %v3663_v4 = vmul.f32 1.442695, %v3412_v1 }
 0x490   : > { %v6321_v5 = vpop.eup %6320  ;;  %v3795_v6 = vadd.f32 1.0, %v6319_v3  ;;  %v2950_v7 = vpop.f32.mrf.mxu2 }
 0x491   : > { %v3279_v8 = vpop.f32.mrf.mxu3  ;;  %v4050_v9 = vmax.f32 %v6321_v5, 0.0  ;;  %6322 = vpow2.f32 %v3663_v4  ;;  %v2951_v10 = vadd.f32 %v2950_v7, %v2622_v2  ;;  %v2294_v11 = vpop.f32.mrf.mxu0 }
 0x492   : > { %6324 = vrcp.f32 %v3795_v6  ;;  %v2623_v38 = vpop.f32.mrf.mxu1  ;;  %v2295_v13 = vadd.f32 %v6349_v17, %v2294_v11 }
 0x493   : > { %v4178_v39 = vmin.f32 %v4050_v9, 1.0  ;;  %v3280_v12 = vadd.f32 %v3279_v8, %v2951_v10 }
 0x494   : > { %v2624_v19 = vadd.f32 %v2623_v38, %v2295_v13 }
 0x495   : > { %4307 = vst.msk [vmem:[%s6591_s10 + $0x3c8] sm:$0xff] %vm4185_vm0, %v4178_v39  ;;  %v3413_v14 = vsub.f32 0.0, %v3280_v12 }
 0x497   : > { %v6323_v15 = vpop.eup %6322  ;;  %v3665_v16 = vmul.f32 1.442695, %v3413_v14 }
 0x498   : > { %v6325_v20 = vpop.eup %6324  ;;  %v3796_v21 = vadd.f32 1.0, %v6323_v15  ;;  %v2952_v22 = vpop.f32.mrf.mxu2 }
 0x499   : > { %v3281_v23 = vpop.f32.mrf.mxu3  ;;  %v4051_v24 = vmax.f32 %v6325_v20, 0.0  ;;  %6326 = vpow2.f32 %v3665_v16  ;;  %v2953_v25 = vadd.f32 %v2952_v22, %v2624_v19  ;;  %v2297_v26 = vpop.f32.mrf.mxu0 }
 0x49a   : > { %6328 = vrcp.f32 %v3796_v21  ;;  %v2298_v27 = vadd.f32 %v6349_v17, %v2297_v26  ;;  %v2626_v30 = vpop.f32.mrf.mxu1 }
 0x49b   : > { %v4179_v28 = vmin.f32 %v4051_v24, 1.0  ;;  %v3282_v29 = vadd.f32 %v3281_v23, %v2953_v25 }
 0x49c   : > { %v2627_v32 = vadd.f32 %v2626_v30, %v2298_v27 }
 0x49d   : > { %4308 = vst.msk [vmem:[%s6591_s10 + $0x3d0] sm:$0xff] %vm4185_vm0, %v4179_v28  ;;  %v3414_v31 = vsub.f32 0.0, %v3282_v29 }
 0x49f   : > { %v6327_v60 = vpop.eup %6326  ;;  %v3667_v0 = vmul.f32 1.442695, %v3414_v31 }
 0x4a0   : > { %v6329_v33 = vpop.eup %6328  ;;  %v3797_v34 = vadd.f32 1.0, %v6327_v60  ;;  %v2955_v35 = vpop.f32.mrf.mxu2 }
 0x4a1   : > { %v3284_v36 = vpop.f32.mrf.mxu3  ;;  %v4052_v37 = vmax.f32 %v6329_v33, 0.0  ;;  %6330 = vpow2.f32 %v3667_v0  ;;  %v2956_v40 = vadd.f32 %v2955_v35, %v2627_v32  ;;  %v2299_v41 = vpop.f32.mrf.mxu0 }
 0x4a2   : > { %6332 = vrcp.f32 %v3797_v34  ;;  %v2300_v44 = vadd.f32 %v6349_v17, %v2299_v41  ;;  %v2628_v46 = vpop.f32.mrf.mxu1 }
 0x4a3   : > { %v4180_v42 = vmin.f32 %v4052_v37, 1.0  ;;  %v3285_v43 = vadd.f32 %v3284_v36, %v2956_v40 }
 0x4a4   : > { %v2629_v49 = vadd.f32 %v2628_v46, %v2300_v44 }
 0x4a5   : > { %4309 = vst.msk [vmem:[%s6591_s10 + $0x3d8] sm:$0xff] %vm4185_vm0, %v4180_v42  ;;  %v3415_v45 = vsub.f32 0.0, %v3285_v43 }
 0x4a7   : > { %v6331_v47 = vpop.eup %6330  ;;  %v3669_v48 = vmul.f32 1.442695, %v3415_v45 }
 0x4a8   : > { %v6333_v50 = vpop.eup %6332  ;;  %v3798_v51 = vadd.f32 1.0, %v6331_v47  ;;  %v2957_v52 = vpop.f32.mrf.mxu2 }
 0x4a9   : > { %v4053_v53 = vmax.f32 %v6333_v50, 0.0  ;;  %6334 = vpow2.f32 %v3669_v48  ;;  %v2958_v18 = vadd.f32 %v2957_v52, %v2629_v49  ;;  %v3286_v54 = vpop.f32.mrf.mxu3 }
 0x4aa   : > { %6336 = vrcp.f32 %v3798_v51 }
 0x4ab   : > { %v4181_v55 = vmin.f32 %v4053_v53, 1.0  ;;  %v3287_v56 = vadd.f32 %v3286_v54, %v2958_v18 }
 0x4ad   : > { %4310 = vst.msk [vmem:[%s6591_s10 + $0x3e0] sm:$0xff] %vm4185_vm0, %v4181_v55  ;;  %v3416_v57 = vsub.f32 0.0, %v3287_v56 }
 0x4af   : > { %v6335_v58 = vpop.eup %6334  ;;  %v3671_v59 = vmul.f32 1.442695, %v3416_v57 }
 0x4b0   : > { %v6337_v17 = vpop.eup %6336  ;;  %v3799_v61 = vadd.f32 1.0, %v6335_v58 }
 0x4b1   : > { %v4054_v62 = vmax.f32 %v6337_v17, 0.0  ;;  %6338 = vpow2.f32 %v3671_v59 }
 0x4b2   : > { %6340 = vrcp.f32 %v3799_v61 }
 0x4b3   : > { %v4182_v63 = vmin.f32 %v4054_v62, 1.0 }
 0x4b5   : > { %4311 = vst.msk [vmem:[%s6591_s10 + $0x3e8] sm:$0xff] %vm4185_vm0, %v4182_v63 }
 0x4b7   : > { %v6339_v1 = vpop.eup %6338 }
 0x4b8   : > { %v6341_v2 = vpop.eup %6340  ;;  %v3800_v3 = vadd.f32 1.0, %v6339_v1 }
 0x4b9   : > { %v4055_v4 = vmax.f32 %v6341_v2, 0.0 }
 0x4ba   : > { %6342 = vrcp.f32 %v3800_v3 }
 0x4bb   : > { %v4183_v5 = vmin.f32 %v4055_v4, 1.0 }
 0x4bd   : > { %4312 = vst.msk [vmem:[%s6591_s10 + $0x3f0] sm:$0xff] %vm4185_vm0, %v4183_v5 }
 0x4c0   : > { %v6343_v6 = vpop.eup %6342 }
 0x4c1   : > { %v4056_v7 = vmax.f32 %v6343_v6, 0.0 }
 0x4c3   : > { %v4184_v8 = vmin.f32 %v4056_v7, 1.0 }
 0x4c5   : > { %4313 = vst.msk [vmem:[%s6591_s10 + $0x3f8] sm:$0xff] %vm4185_vm0, %v4184_v8 }
 0x4c6 PF: > { %s13_s12 = sadd.s32 1, %s6356_s12  }
 0x4c7   : > { %p10_p4 = scmp.ge.s32.totalorder %s13_s12, 4  }
 0x4c9   :  { %12 = sbr.rel (!%p10_p4) target bundleno = 1 (0x1), region = 62 }

</bundles_post_ra>
